<compile_context>
chip_gen: v6e
topology: v6e:2x2x1
jax: 0.10.0
libtpu: 0.0.40
codegen_flags: <defaults>
</compile_context>

<pallas_src>
import jax
import jax.numpy as jnp
from jax.experimental import pallas as pl
from jax.experimental.pallas import tpu as pltpu

# ---- hyperparameters mirroring the PyTorch module ----
CONTEXT_LENGTH = 20
EMB_DIM = 20
N_HEADS = 4
N_LAYER = 4
VOCAB_SIZE = 65            # stand-in for len(sorted(set(text_input)))
HEAD_SIZE = EMB_DIM // N_HEADS
FFN_DIM = 4 * EMB_DIM
LN_EPS = 1e-5
LANE = 128
VOCAB_PAD = ((VOCAB_SIZE + LANE - 1) // LANE) * LANE   # 128 (lane-dense output)


def _layer_norm(x, g, b):
    mean = jnp.mean(x, axis=-1, keepdims=True)
    var = jnp.mean((x - mean) ** 2, axis=-1, keepdims=True)
    return (x - mean) * jax.lax.rsqrt(var + LN_EPS) * g + b


def gpt_kernel(tok_ref, pos_ref, bias_ref,
               ln1g_ref, ln1b_ref, wqkv_ref, woh_ref, bo_ref,
               ln2g_ref, ln2b_ref, w1_ref, b1_ref, w2_ref, b2_ref,
               lnfg_ref, lnfb_ref, wlm_ref, blm_ref,
               out_ref):
    # One grid step == one batch tile, flattened to (N, E) with N = BT*C.
    h = tok_ref[...] + pos_ref[...]                          # (N, E)
    bias = bias_ref[...]                                     # (N, N) additive mask
    scale = 1.0 / (HEAD_SIZE ** 0.5)

    for l in range(N_LAYER):                                 # static unroll (4 layers)
        # ---- pre-norm multi-head causal self-attention (fused QKV) ----
        hn = _layer_norm(h, ln1g_ref[l], ln1b_ref[l])
        qkv = jnp.dot(hn, wqkv_ref[l], preferred_element_type=jnp.float32)   # (N, 3E)

        attn = None
        for hd in range(N_HEADS):                            # static unroll (4 heads)
            q0 = hd * HEAD_SIZE
            k0 = EMB_DIM + hd * HEAD_SIZE
            v0 = 2 * EMB_DIM + hd * HEAD_SIZE
            qh = qkv[:, q0:q0 + HEAD_SIZE]
            kh = qkv[:, k0:k0 + HEAD_SIZE]
            vh = qkv[:, v0:v0 + HEAD_SIZE]
            s = jnp.dot(qh, kh.T, preferred_element_type=jnp.float32) * scale + bias
            s = s - jnp.max(s, axis=-1, keepdims=True)
            p = jnp.exp(s)
            p = p * pl.reciprocal(jnp.sum(p, axis=-1, keepdims=True), approx=True)
            oh = jnp.dot(p, vh, preferred_element_type=jnp.float32)          # (N, D)
            # fold the head concat into the per-head slice of the out projection
            c = jnp.dot(oh, woh_ref[l, hd], preferred_element_type=jnp.float32)
            attn = c if attn is None else attn + c
        h = h + attn + bo_ref[l]

        # ---- pre-norm feed-forward: Linear -> ReLU -> Linear ----
        hn = _layer_norm(h, ln2g_ref[l], ln2b_ref[l])
        f = jnp.dot(hn, w1_ref[l], preferred_element_type=jnp.float32) + b1_ref[l]
        f = jnp.maximum(f, 0.0)
        h = h + jnp.dot(f, w2_ref[l], preferred_element_type=jnp.float32) + b2_ref[l]

    # ---- final layer norm + lane-padded lm head ----
    hf = _layer_norm(h, lnfg_ref[...], lnfb_ref[...])
    out_ref[...] = (jnp.dot(hf, wlm_ref[...], preferred_element_type=jnp.float32)
                    + blm_ref[...])                          # (N, 128)


def gpt_forward(params, x_ids, *, batch_tile=16):
    """Full GPTlanguageModel forward.  Embedding gather and weight repacking are
    JAX glue; all matmuls / attention / layernorm / MLP / lm_head run in the
    kernel, one batch tile per grid step."""
    B, C = x_ids.shape
    E, V = EMB_DIM, VOCAB_SIZE

    # ---- glue: embedding gathers ----
    tok = jnp.take(params["tok_emb"], x_ids, axis=0)         # (B, C, E)
    pos = params["pos_emb"][:C]                              # (C, E)

    # ---- batch tiling: many sequences per grid step, flattened to (BT*C, E) ----
    BT = min(B, batch_tile)
    while (BT * C) % 8 != 0 and BT < B:                      # keep sublane-friendly
        BT += 1
    n_tiles = -(-B // BT)
    B_pad = n_tiles * BT
    if B_pad != B:
        tok = jnp.concatenate(
            [tok, jnp.zeros((B_pad - B, C, E), tok.dtype)], axis=0)
    N = BT * C
    tok_flat = tok.reshape(B_pad * C, E)
    pos_flat = jnp.tile(pos, (BT, 1))                        # (N, E)

    # ---- block-diagonal causal additive bias, precomputed once ----
    r = jnp.arange(N)
    same_seq = (r[:, None] // C) == (r[None, :] // C)
    causal = r[:, None] >= r[None, :]
    attn_bias = jnp.where(same_seq & causal, 0.0, -1e30).astype(jnp.float32)

    # ---- weight repacking (layout only) ----
    wqkv = jnp.concatenate([params["wq"], params["wk"], params["wv"]], axis=-1)  # (L,E,3E)
    wo_heads = params["wo"].reshape(N_LAYER, N_HEADS, HEAD_SIZE, E)              # (L,H,D,E)
    wlm_p = jnp.pad(params["wlm"], ((0, 0), (0, VOCAB_PAD - V)))                 # (E,128)
    blm_p = jnp.pad(params["blm"], ((0, 0), (0, VOCAB_PAD - V)))                 # (1,128)

    weights = [params["ln1_g"], params["ln1_b"], wqkv, wo_heads, params["bo"],
               params["ln2_g"], params["ln2_b"], params["w1"], params["b1"],
               params["w2"], params["b2"], params["lnf_g"], params["lnf_b"],
               wlm_p, blm_p]

    def full_spec(a):
        # grid-invariant full-array block (weights / bias / tiled pos)
        return pl.BlockSpec(a.shape, lambda i, _n=a.ndim: (0,) * _n)

    in_specs = [pl.BlockSpec((N, E), lambda i: (i, 0)),      # token embeddings tile
                full_spec(pos_flat),
                full_spec(attn_bias)]
    in_specs += [full_spec(w) for w in weights]

    out_flat = pl.pallas_call(
        gpt_kernel,
        out_shape=jax.ShapeDtypeStruct((B_pad * C, VOCAB_PAD), jnp.float32),
        grid_spec=pltpu.PrefetchScalarGridSpec(
            num_scalar_prefetch=0,
            grid=(n_tiles,),
            in_specs=in_specs,
            out_specs=pl.BlockSpec((N, VOCAB_PAD), lambda i: (i, 0)),
        ),
        compiler_params=pltpu.CompilerParams(
            dimension_semantics=("parallel",)),               # shards tiles on v7x
    )(tok_flat, pos_flat, attn_bias, *weights)

    logits = out_flat.reshape(B_pad, C, VOCAB_PAD)[:B, :, :V]
    return logits  # loss is None when targets is None


# ---------------- pure-JAX reference (for correctness check) ----------------
def gpt_reference(params, x_ids):
    B, C = x_ids.shape
    h = jnp.take(params["tok_emb"], x_ids, axis=0) + params["pos_emb"][:C]
    row = jnp.arange(C)[:, None]
    col = jnp.arange(C)[None, :]
    causal = row >= col
    scale = 1.0 / (HEAD_SIZE ** 0.5)

    for l in range(N_LAYER):
        hn = _layer_norm(h, params["ln1_g"][l], params["ln1_b"][l])
        q = hn @ params["wq"][l]
        k = hn @ params["wk"][l]
        v = hn @ params["wv"][l]
        q = q.reshape(B, C, N_HEADS, HEAD_SIZE)
        k = k.reshape(B, C, N_HEADS, HEAD_SIZE)
        v = v.reshape(B, C, N_HEADS, HEAD_SIZE)
        s = jnp.einsum("bqhd,bkhd->bhqk", q, k) * scale
        s = jnp.where(causal[None, None], s, -jnp.inf)
        p = jax.nn.softmax(s, axis=-1)
        a = jnp.einsum("bhqk,bkhd->bqhd", p, v).reshape(B, C, EMB_DIM)
        h = h + (a @ params["wo"][l] + params["bo"][l])
        hn = _layer_norm(h, params["ln2_g"][l], params["ln2_b"][l])
        f = jnp.maximum(hn @ params["w1"][l] + params["b1"][l], 0.0)
        h = h + (f @ params["w2"][l] + params["b2"][l])
    h = _layer_norm(h, params["lnf_g"], params["lnf_b"])
    return h @ params["wlm"] + params["blm"]


def init_params(key):
    ks = jax.random.split(key, 9)
    nrm = lambda k, shape: 0.02 * jax.random.normal(k, shape, jnp.float32)
    L, E, F, V = N_LAYER, EMB_DIM, FFN_DIM, VOCAB_SIZE
    return dict(
        tok_emb=nrm(ks[0], (V, E)),
        pos_emb=nrm(ks[1], (CONTEXT_LENGTH, E)),
        ln1_g=jnp.ones((L, 1, E), jnp.float32), ln1_b=jnp.zeros((L, 1, E), jnp.float32),
        wq=nrm(ks[2], (L, E, E)), wk=nrm(ks[3], (L, E, E)), wv=nrm(ks[4], (L, E, E)),
        wo=nrm(ks[5], (L, E, E)), bo=jnp.zeros((L, 1, E), jnp.float32),
        ln2_g=jnp.ones((L, 1, E), jnp.float32), ln2_b=jnp.zeros((L, 1, E), jnp.float32),
        w1=nrm(ks[6], (L, E, F)), b1=jnp.zeros((L, 1, F), jnp.float32),
        w2=nrm(ks[7], (L, F, E)), b2=jnp.zeros((L, 1, E), jnp.float32),
        lnf_g=jnp.ones((1, E), jnp.float32), lnf_b=jnp.zeros((1, E), jnp.float32),
        wlm=nrm(ks[8], (E, V)), blm=jnp.zeros((1, V), jnp.float32),
    )


if __name__ == "__main__":
    key = jax.random.PRNGKey(0)
    pkey, xkey = jax.random.split(key)
    params = init_params(pkey)

    B, C = 2, CONTEXT_LENGTH
    x_ids = jax.random.randint(xkey, (B, C), 0, VOCAB_SIZE, dtype=jnp.int32)

    logits = gpt_forward(params, x_ids)
    logits = jax.block_until_ready(logits)

    ref = jax.block_until_ready(gpt_reference(params, x_ids))
    assert logits.shape == (B, C, VOCAB_SIZE)
    assert jnp.allclose(logits, ref, rtol=2e-3, atol=2e-3), "mismatch vs reference"

    print("KERNEL_OK")
</pallas_src>

<mosaic_0001>
module attributes {stable_mosaic.version = 11 : i64} {
  func.func @gpt_kernel(%arg0: i32, %arg1: memref<40x20xf32, #tpu.memory_space<vmem>>, %arg2: memref<40x20xf32, #tpu.memory_space<vmem>>, %arg3: memref<40x40xf32, #tpu.memory_space<vmem>>, %arg4: memref<4x1x20xf32, #tpu.memory_space<vmem>>, %arg5: memref<4x1x20xf32, #tpu.memory_space<vmem>>, %arg6: memref<4x20x60xf32, #tpu.memory_space<vmem>>, %arg7: memref<4x4x5x20xf32, #tpu.memory_space<vmem>>, %arg8: memref<4x1x20xf32, #tpu.memory_space<vmem>>, %arg9: memref<4x1x20xf32, #tpu.memory_space<vmem>>, %arg10: memref<4x1x20xf32, #tpu.memory_space<vmem>>, %arg11: memref<4x20x80xf32, #tpu.memory_space<vmem>>, %arg12: memref<4x1x80xf32, #tpu.memory_space<vmem>>, %arg13: memref<4x80x20xf32, #tpu.memory_space<vmem>>, %arg14: memref<4x1x20xf32, #tpu.memory_space<vmem>>, %arg15: memref<1x20xf32, #tpu.memory_space<vmem>>, %arg16: memref<1x20xf32, #tpu.memory_space<vmem>>, %arg17: memref<20x128xf32, #tpu.memory_space<vmem>>, %arg18: memref<1x128xf32, #tpu.memory_space<vmem>>, %arg19: memref<40x128xf32, #tpu.memory_space<vmem>>) attributes {dimension_semantics = [#tpu.dimension_semantics<parallel>], iteration_bounds = array<i64: 1>, scalar_prefetch = 0 : i64, scratch_operands = 0 : i64, tpu.core_type = #tpu.core_type<tc>, window_params = [{transform_indices = @transform_0, window_bounds = array<i64: 40, 20>}, {pipeline_mode = #tpu.pipeline_mode<synchronous>, transform_indices = @transform_1, window_bounds = array<i64: 40, 20>}, {pipeline_mode = #tpu.pipeline_mode<synchronous>, transform_indices = @transform_2, window_bounds = array<i64: 40, 40>}, {pipeline_mode = #tpu.pipeline_mode<synchronous>, transform_indices = @transform_3, window_bounds = array<i64: 4, 1, 20>}, {pipeline_mode = #tpu.pipeline_mode<synchronous>, transform_indices = @transform_4, window_bounds = array<i64: 4, 1, 20>}, {pipeline_mode = #tpu.pipeline_mode<synchronous>, transform_indices = @transform_5, window_bounds = array<i64: 4, 20, 60>}, {pipeline_mode = #tpu.pipeline_mode<synchronous>, transform_indices = @transform_6, window_bounds = array<i64: 4, 4, 5, 20>}, {pipeline_mode = #tpu.pipeline_mode<synchronous>, transform_indices = @transform_7, window_bounds = array<i64: 4, 1, 20>}, {pipeline_mode = #tpu.pipeline_mode<synchronous>, transform_indices = @transform_8, window_bounds = array<i64: 4, 1, 20>}, {pipeline_mode = #tpu.pipeline_mode<synchronous>, transform_indices = @transform_9, window_bounds = array<i64: 4, 1, 20>}, {pipeline_mode = #tpu.pipeline_mode<synchronous>, transform_indices = @transform_10, window_bounds = array<i64: 4, 20, 80>}, {pipeline_mode = #tpu.pipeline_mode<synchronous>, transform_indices = @transform_11, window_bounds = array<i64: 4, 1, 80>}, {pipeline_mode = #tpu.pipeline_mode<synchronous>, transform_indices = @transform_12, window_bounds = array<i64: 4, 80, 20>}, {pipeline_mode = #tpu.pipeline_mode<synchronous>, transform_indices = @transform_13, window_bounds = array<i64: 4, 1, 20>}, {pipeline_mode = #tpu.pipeline_mode<synchronous>, transform_indices = @transform_14, window_bounds = array<i64: 1, 20>}, {pipeline_mode = #tpu.pipeline_mode<synchronous>, transform_indices = @transform_15, window_bounds = array<i64: 1, 20>}, {pipeline_mode = #tpu.pipeline_mode<synchronous>, transform_indices = @transform_16, window_bounds = array<i64: 20, 128>}, {pipeline_mode = #tpu.pipeline_mode<synchronous>, transform_indices = @transform_17, window_bounds = array<i64: 1, 128>}, {transform_indices = @transform_18, window_bounds = array<i64: 40, 128>}]} {
    %c0 = arith.constant 0 : index
    %c0_0 = arith.constant 0 : index
    %0 = vector.load %arg1[%c0, %c0_0] : memref<40x20xf32, #tpu.memory_space<vmem>>, vector<40x20xf32>
    %c0_1 = arith.constant 0 : index
    %c0_2 = arith.constant 0 : index
    %1 = vector.load %arg2[%c0_1, %c0_2] : memref<40x20xf32, #tpu.memory_space<vmem>>, vector<40x20xf32>
    %2 = arith.addf %0, %1 : vector<40x20xf32>
    %c0_3 = arith.constant 0 : index
    %c0_4 = arith.constant 0 : index
    %3 = vector.load %arg3[%c0_3, %c0_4] : memref<40x40xf32, #tpu.memory_space<vmem>>, vector<40x40xf32>
    %c0_5 = arith.constant 0 : index
    %c0_6 = arith.constant 0 : index
    %c0_7 = arith.constant 0 : index
    %4 = vector.load %arg4[%c0_5, %c0_6, %c0_7] : memref<4x1x20xf32, #tpu.memory_space<vmem>>, vector<1x1x20xf32>
    %5 = vector.shape_cast %4 : vector<1x1x20xf32> to vector<1x20xf32>
    %c0_8 = arith.constant 0 : index
    %c0_9 = arith.constant 0 : index
    %c0_10 = arith.constant 0 : index
    %6 = vector.load %arg5[%c0_8, %c0_9, %c0_10] : memref<4x1x20xf32, #tpu.memory_space<vmem>>, vector<1x1x20xf32>
    %7 = vector.shape_cast %6 : vector<1x1x20xf32> to vector<1x20xf32>
    %cst = arith.constant dense<0.000000e+00> : vector<40xf32>
    %8 = vector.multi_reduction <add>, %2, %cst [1] : vector<40x20xf32> to vector<40xf32>
    %9 = vector.shape_cast %8 : vector<40xf32> to vector<40x1xf32>
    %cst_11 = arith.constant 2.000000e+01 : f32
    %10 = vector.broadcast %cst_11 : f32 to vector<40x1xf32>
    %11 = arith.divf %9, %10 : vector<40x1xf32>
    %12 = vector.broadcast %11 : vector<40x1xf32> to vector<40x20xf32>
    %13 = arith.subf %2, %12 : vector<40x20xf32>
    %14 = arith.mulf %13, %13 : vector<40x20xf32>
    %cst_12 = arith.constant dense<0.000000e+00> : vector<40xf32>
    %15 = vector.multi_reduction <add>, %14, %cst_12 [1] : vector<40x20xf32> to vector<40xf32>
    %16 = vector.shape_cast %15 : vector<40xf32> to vector<40x1xf32>
    %cst_13 = arith.constant 2.000000e+01 : f32
    %17 = vector.broadcast %cst_13 : f32 to vector<40x1xf32>
    %18 = arith.divf %16, %17 : vector<40x1xf32>
    %19 = vector.broadcast %11 : vector<40x1xf32> to vector<40x20xf32>
    %20 = arith.subf %2, %19 : vector<40x20xf32>
    %cst_14 = arith.constant 9.99999974E-6 : f32
    %21 = vector.broadcast %cst_14 : f32 to vector<40x1xf32>
    %22 = arith.addf %18, %21 : vector<40x1xf32>
    %23 = math.rsqrt %22 : vector<40x1xf32>
    %24 = vector.broadcast %23 : vector<40x1xf32> to vector<40x20xf32>
    %25 = arith.mulf %20, %24 : vector<40x20xf32>
    %26 = vector.broadcast %5 : vector<1x20xf32> to vector<40x20xf32>
    %27 = arith.mulf %25, %26 : vector<40x20xf32>
    %28 = vector.broadcast %7 : vector<1x20xf32> to vector<40x20xf32>
    %29 = arith.addf %27, %28 : vector<40x20xf32>
    %c0_15 = arith.constant 0 : index
    %c0_16 = arith.constant 0 : index
    %c0_17 = arith.constant 0 : index
    %30 = vector.load %arg6[%c0_15, %c0_16, %c0_17] : memref<4x20x60xf32, #tpu.memory_space<vmem>>, vector<1x20x60xf32>
    %31 = vector.shape_cast %30 : vector<1x20x60xf32> to vector<20x60xf32>
    %cst_18 = arith.constant dense<0.000000e+00> : vector<40x60xf32>
    %32 = tpu.matmul %29, %31, %cst_18 {dimension_numbers = #tpu.dot_dimension_numbers<[1], [0], [0], [1], [0, 0, 1, 1], [], []>} : vector<40x20xf32>, vector<20x60xf32>, vector<40x60xf32> -> vector<40x60xf32>
    %33 = vector.extract_strided_slice %32 {offsets = [0, 0], sizes = [40, 5], strides = [1, 1]} : vector<40x60xf32> to vector<40x5xf32>
    %34 = vector.extract_strided_slice %32 {offsets = [0, 20], sizes = [40, 5], strides = [1, 1]} : vector<40x60xf32> to vector<40x5xf32>
    %35 = vector.extract_strided_slice %32 {offsets = [0, 40], sizes = [40, 5], strides = [1, 1]} : vector<40x60xf32> to vector<40x5xf32>
    %36 = tpu.transpose %34, [1, 0] : vector<40x5xf32> -> vector<5x40xf32>
    %cst_19 = arith.constant dense<0.000000e+00> : vector<40x40xf32>
    %37 = tpu.matmul %33, %36, %cst_19 {dimension_numbers = #tpu.dot_dimension_numbers<[1], [0], [0], [1], [0, 0, 1, 1], [], []>} : vector<40x5xf32>, vector<5x40xf32>, vector<40x40xf32> -> vector<40x40xf32>
    %cst_20 = arith.constant 0.44721359 : f32
    %38 = vector.broadcast %cst_20 : f32 to vector<40x40xf32>
    %39 = arith.mulf %37, %38 : vector<40x40xf32>
    %40 = arith.addf %39, %3 : vector<40x40xf32>
    %cst_21 = arith.constant dense<0xFF800000> : vector<40xf32>
    %41 = vector.multi_reduction <maximumf>, %40, %cst_21 [1] : vector<40x40xf32> to vector<40xf32>
    %42 = vector.shape_cast %41 : vector<40xf32> to vector<40x1xf32>
    %43 = vector.broadcast %42 : vector<40x1xf32> to vector<40x40xf32>
    %44 = arith.subf %40, %43 : vector<40x40xf32>
    %45 = math.exp %44 : vector<40x40xf32>
    %cst_22 = arith.constant dense<0.000000e+00> : vector<40xf32>
    %46 = vector.multi_reduction <add>, %45, %cst_22 [1] : vector<40x40xf32> to vector<40xf32>
    %47 = vector.shape_cast %46 : vector<40xf32> to vector<40x1xf32>
    %48 = tpu.reciprocal %47 {approx = true} : vector<40x1xf32> -> vector<40x1xf32>
    %49 = vector.broadcast %48 : vector<40x1xf32> to vector<40x40xf32>
    %50 = arith.mulf %45, %49 : vector<40x40xf32>
    %cst_23 = arith.constant dense<0.000000e+00> : vector<40x5xf32>
    %51 = tpu.matmul %50, %35, %cst_23 {dimension_numbers = #tpu.dot_dimension_numbers<[1], [0], [0], [1], [0, 0, 1, 1], [], []>} : vector<40x40xf32>, vector<40x5xf32>, vector<40x5xf32> -> vector<40x5xf32>
    %c0_24 = arith.constant 0 : index
    %c0_25 = arith.constant 0 : index
    %c0_26 = arith.constant 0 : index
    %c0_27 = arith.constant 0 : index
    %52 = vector.load %arg7[%c0_24, %c0_25, %c0_26, %c0_27] : memref<4x4x5x20xf32, #tpu.memory_space<vmem>>, vector<1x1x5x20xf32>
    %53 = vector.shape_cast %52 : vector<1x1x5x20xf32> to vector<5x20xf32>
    %cst_28 = arith.constant dense<0.000000e+00> : vector<40x20xf32>
    %54 = tpu.matmul %51, %53, %cst_28 {dimension_numbers = #tpu.dot_dimension_numbers<[1], [0], [0], [1], [0, 0, 1, 1], [], []>} : vector<40x5xf32>, vector<5x20xf32>, vector<40x20xf32> -> vector<40x20xf32>
    %55 = vector.extract_strided_slice %32 {offsets = [0, 5], sizes = [40, 5], strides = [1, 1]} : vector<40x60xf32> to vector<40x5xf32>
    %56 = vector.extract_strided_slice %32 {offsets = [0, 25], sizes = [40, 5], strides = [1, 1]} : vector<40x60xf32> to vector<40x5xf32>
    %57 = vector.extract_strided_slice %32 {offsets = [0, 45], sizes = [40, 5], strides = [1, 1]} : vector<40x60xf32> to vector<40x5xf32>
    %58 = tpu.transpose %56, [1, 0] : vector<40x5xf32> -> vector<5x40xf32>
    %cst_29 = arith.constant dense<0.000000e+00> : vector<40x40xf32>
    %59 = tpu.matmul %55, %58, %cst_29 {dimension_numbers = #tpu.dot_dimension_numbers<[1], [0], [0], [1], [0, 0, 1, 1], [], []>} : vector<40x5xf32>, vector<5x40xf32>, vector<40x40xf32> -> vector<40x40xf32>
    %cst_30 = arith.constant 0.44721359 : f32
    %60 = vector.broadcast %cst_30 : f32 to vector<40x40xf32>
    %61 = arith.mulf %59, %60 : vector<40x40xf32>
    %62 = arith.addf %61, %3 : vector<40x40xf32>
    %cst_31 = arith.constant dense<0xFF800000> : vector<40xf32>
    %63 = vector.multi_reduction <maximumf>, %62, %cst_31 [1] : vector<40x40xf32> to vector<40xf32>
    %64 = vector.shape_cast %63 : vector<40xf32> to vector<40x1xf32>
    %65 = vector.broadcast %64 : vector<40x1xf32> to vector<40x40xf32>
    %66 = arith.subf %62, %65 : vector<40x40xf32>
    %67 = math.exp %66 : vector<40x40xf32>
    %cst_32 = arith.constant dense<0.000000e+00> : vector<40xf32>
    %68 = vector.multi_reduction <add>, %67, %cst_32 [1] : vector<40x40xf32> to vector<40xf32>
    %69 = vector.shape_cast %68 : vector<40xf32> to vector<40x1xf32>
    %70 = tpu.reciprocal %69 {approx = true} : vector<40x1xf32> -> vector<40x1xf32>
    %71 = vector.broadcast %70 : vector<40x1xf32> to vector<40x40xf32>
    %72 = arith.mulf %67, %71 : vector<40x40xf32>
    %cst_33 = arith.constant dense<0.000000e+00> : vector<40x5xf32>
    %73 = tpu.matmul %72, %57, %cst_33 {dimension_numbers = #tpu.dot_dimension_numbers<[1], [0], [0], [1], [0, 0, 1, 1], [], []>} : vector<40x40xf32>, vector<40x5xf32>, vector<40x5xf32> -> vector<40x5xf32>
    %c0_34 = arith.constant 0 : index
    %c1 = arith.constant 1 : index
    %c0_35 = arith.constant 0 : index
    %c0_36 = arith.constant 0 : index
    %74 = vector.load %arg7[%c0_34, %c1, %c0_35, %c0_36] : memref<4x4x5x20xf32, #tpu.memory_space<vmem>>, vector<1x1x5x20xf32>
    %75 = vector.shape_cast %74 : vector<1x1x5x20xf32> to vector<5x20xf32>
    %cst_37 = arith.constant dense<0.000000e+00> : vector<40x20xf32>
    %76 = tpu.matmul %73, %75, %cst_37 {dimension_numbers = #tpu.dot_dimension_numbers<[1], [0], [0], [1], [0, 0, 1, 1], [], []>} : vector<40x5xf32>, vector<5x20xf32>, vector<40x20xf32> -> vector<40x20xf32>
    %77 = arith.addf %54, %76 : vector<40x20xf32>
    %78 = vector.extract_strided_slice %32 {offsets = [0, 10], sizes = [40, 5], strides = [1, 1]} : vector<40x60xf32> to vector<40x5xf32>
    %79 = vector.extract_strided_slice %32 {offsets = [0, 30], sizes = [40, 5], strides = [1, 1]} : vector<40x60xf32> to vector<40x5xf32>
    %80 = vector.extract_strided_slice %32 {offsets = [0, 50], sizes = [40, 5], strides = [1, 1]} : vector<40x60xf32> to vector<40x5xf32>
    %81 = tpu.transpose %79, [1, 0] : vector<40x5xf32> -> vector<5x40xf32>
    %cst_38 = arith.constant dense<0.000000e+00> : vector<40x40xf32>
    %82 = tpu.matmul %78, %81, %cst_38 {dimension_numbers = #tpu.dot_dimension_numbers<[1], [0], [0], [1], [0, 0, 1, 1], [], []>} : vector<40x5xf32>, vector<5x40xf32>, vector<40x40xf32> -> vector<40x40xf32>
    %cst_39 = arith.constant 0.44721359 : f32
    %83 = vector.broadcast %cst_39 : f32 to vector<40x40xf32>
    %84 = arith.mulf %82, %83 : vector<40x40xf32>
    %85 = arith.addf %84, %3 : vector<40x40xf32>
    %cst_40 = arith.constant dense<0xFF800000> : vector<40xf32>
    %86 = vector.multi_reduction <maximumf>, %85, %cst_40 [1] : vector<40x40xf32> to vector<40xf32>
    %87 = vector.shape_cast %86 : vector<40xf32> to vector<40x1xf32>
    %88 = vector.broadcast %87 : vector<40x1xf32> to vector<40x40xf32>
    %89 = arith.subf %85, %88 : vector<40x40xf32>
    %90 = math.exp %89 : vector<40x40xf32>
    %cst_41 = arith.constant dense<0.000000e+00> : vector<40xf32>
    %91 = vector.multi_reduction <add>, %90, %cst_41 [1] : vector<40x40xf32> to vector<40xf32>
    %92 = vector.shape_cast %91 : vector<40xf32> to vector<40x1xf32>
    %93 = tpu.reciprocal %92 {approx = true} : vector<40x1xf32> -> vector<40x1xf32>
    %94 = vector.broadcast %93 : vector<40x1xf32> to vector<40x40xf32>
    %95 = arith.mulf %90, %94 : vector<40x40xf32>
    %cst_42 = arith.constant dense<0.000000e+00> : vector<40x5xf32>
    %96 = tpu.matmul %95, %80, %cst_42 {dimension_numbers = #tpu.dot_dimension_numbers<[1], [0], [0], [1], [0, 0, 1, 1], [], []>} : vector<40x40xf32>, vector<40x5xf32>, vector<40x5xf32> -> vector<40x5xf32>
    %c0_43 = arith.constant 0 : index
    %c2 = arith.constant 2 : index
    %c0_44 = arith.constant 0 : index
    %c0_45 = arith.constant 0 : index
    %97 = vector.load %arg7[%c0_43, %c2, %c0_44, %c0_45] : memref<4x4x5x20xf32, #tpu.memory_space<vmem>>, vector<1x1x5x20xf32>
    %98 = vector.shape_cast %97 : vector<1x1x5x20xf32> to vector<5x20xf32>
    %cst_46 = arith.constant dense<0.000000e+00> : vector<40x20xf32>
    %99 = tpu.matmul %96, %98, %cst_46 {dimension_numbers = #tpu.dot_dimension_numbers<[1], [0], [0], [1], [0, 0, 1, 1], [], []>} : vector<40x5xf32>, vector<5x20xf32>, vector<40x20xf32> -> vector<40x20xf32>
    %100 = arith.addf %77, %99 : vector<40x20xf32>
    %101 = vector.extract_strided_slice %32 {offsets = [0, 15], sizes = [40, 5], strides = [1, 1]} : vector<40x60xf32> to vector<40x5xf32>
    %102 = vector.extract_strided_slice %32 {offsets = [0, 35], sizes = [40, 5], strides = [1, 1]} : vector<40x60xf32> to vector<40x5xf32>
    %103 = vector.extract_strided_slice %32 {offsets = [0, 55], sizes = [40, 5], strides = [1, 1]} : vector<40x60xf32> to vector<40x5xf32>
    %104 = tpu.transpose %102, [1, 0] : vector<40x5xf32> -> vector<5x40xf32>
    %cst_47 = arith.constant dense<0.000000e+00> : vector<40x40xf32>
    %105 = tpu.matmul %101, %104, %cst_47 {dimension_numbers = #tpu.dot_dimension_numbers<[1], [0], [0], [1], [0, 0, 1, 1], [], []>} : vector<40x5xf32>, vector<5x40xf32>, vector<40x40xf32> -> vector<40x40xf32>
    %cst_48 = arith.constant 0.44721359 : f32
    %106 = vector.broadcast %cst_48 : f32 to vector<40x40xf32>
    %107 = arith.mulf %105, %106 : vector<40x40xf32>
    %108 = arith.addf %107, %3 : vector<40x40xf32>
    %cst_49 = arith.constant dense<0xFF800000> : vector<40xf32>
    %109 = vector.multi_reduction <maximumf>, %108, %cst_49 [1] : vector<40x40xf32> to vector<40xf32>
    %110 = vector.shape_cast %109 : vector<40xf32> to vector<40x1xf32>
    %111 = vector.broadcast %110 : vector<40x1xf32> to vector<40x40xf32>
    %112 = arith.subf %108, %111 : vector<40x40xf32>
    %113 = math.exp %112 : vector<40x40xf32>
    %cst_50 = arith.constant dense<0.000000e+00> : vector<40xf32>
    %114 = vector.multi_reduction <add>, %113, %cst_50 [1] : vector<40x40xf32> to vector<40xf32>
    %115 = vector.shape_cast %114 : vector<40xf32> to vector<40x1xf32>
    %116 = tpu.reciprocal %115 {approx = true} : vector<40x1xf32> -> vector<40x1xf32>
    %117 = vector.broadcast %116 : vector<40x1xf32> to vector<40x40xf32>
    %118 = arith.mulf %113, %117 : vector<40x40xf32>
    %cst_51 = arith.constant dense<0.000000e+00> : vector<40x5xf32>
    %119 = tpu.matmul %118, %103, %cst_51 {dimension_numbers = #tpu.dot_dimension_numbers<[1], [0], [0], [1], [0, 0, 1, 1], [], []>} : vector<40x40xf32>, vector<40x5xf32>, vector<40x5xf32> -> vector<40x5xf32>
    %c0_52 = arith.constant 0 : index
    %c3 = arith.constant 3 : index
    %c0_53 = arith.constant 0 : index
    %c0_54 = arith.constant 0 : index
    %120 = vector.load %arg7[%c0_52, %c3, %c0_53, %c0_54] : memref<4x4x5x20xf32, #tpu.memory_space<vmem>>, vector<1x1x5x20xf32>
    %121 = vector.shape_cast %120 : vector<1x1x5x20xf32> to vector<5x20xf32>
    %cst_55 = arith.constant dense<0.000000e+00> : vector<40x20xf32>
    %122 = tpu.matmul %119, %121, %cst_55 {dimension_numbers = #tpu.dot_dimension_numbers<[1], [0], [0], [1], [0, 0, 1, 1], [], []>} : vector<40x5xf32>, vector<5x20xf32>, vector<40x20xf32> -> vector<40x20xf32>
    %123 = arith.addf %100, %122 : vector<40x20xf32>
    %124 = arith.addf %2, %123 : vector<40x20xf32>
    %c0_56 = arith.constant 0 : index
    %c0_57 = arith.constant 0 : index
    %c0_58 = arith.constant 0 : index
    %125 = vector.load %arg8[%c0_56, %c0_57, %c0_58] : memref<4x1x20xf32, #tpu.memory_space<vmem>>, vector<1x1x20xf32>
    %126 = vector.shape_cast %125 : vector<1x1x20xf32> to vector<1x20xf32>
    %127 = vector.broadcast %126 : vector<1x20xf32> to vector<40x20xf32>
    %128 = arith.addf %124, %127 : vector<40x20xf32>
    %c0_59 = arith.constant 0 : index
    %c0_60 = arith.constant 0 : index
    %c0_61 = arith.constant 0 : index
    %129 = vector.load %arg9[%c0_59, %c0_60, %c0_61] : memref<4x1x20xf32, #tpu.memory_space<vmem>>, vector<1x1x20xf32>
    %130 = vector.shape_cast %129 : vector<1x1x20xf32> to vector<1x20xf32>
    %c0_62 = arith.constant 0 : index
    %c0_63 = arith.constant 0 : index
    %c0_64 = arith.constant 0 : index
    %131 = vector.load %arg10[%c0_62, %c0_63, %c0_64] : memref<4x1x20xf32, #tpu.memory_space<vmem>>, vector<1x1x20xf32>
    %132 = vector.shape_cast %131 : vector<1x1x20xf32> to vector<1x20xf32>
    %cst_65 = arith.constant dense<0.000000e+00> : vector<40xf32>
    %133 = vector.multi_reduction <add>, %128, %cst_65 [1] : vector<40x20xf32> to vector<40xf32>
    %134 = vector.shape_cast %133 : vector<40xf32> to vector<40x1xf32>
    %cst_66 = arith.constant 2.000000e+01 : f32
    %135 = vector.broadcast %cst_66 : f32 to vector<40x1xf32>
    %136 = arith.divf %134, %135 : vector<40x1xf32>
    %137 = vector.broadcast %136 : vector<40x1xf32> to vector<40x20xf32>
    %138 = arith.subf %128, %137 : vector<40x20xf32>
    %139 = arith.mulf %138, %138 : vector<40x20xf32>
    %cst_67 = arith.constant dense<0.000000e+00> : vector<40xf32>
    %140 = vector.multi_reduction <add>, %139, %cst_67 [1] : vector<40x20xf32> to vector<40xf32>
    %141 = vector.shape_cast %140 : vector<40xf32> to vector<40x1xf32>
    %cst_68 = arith.constant 2.000000e+01 : f32
    %142 = vector.broadcast %cst_68 : f32 to vector<40x1xf32>
    %143 = arith.divf %141, %142 : vector<40x1xf32>
    %144 = vector.broadcast %136 : vector<40x1xf32> to vector<40x20xf32>
    %145 = arith.subf %128, %144 : vector<40x20xf32>
    %cst_69 = arith.constant 9.99999974E-6 : f32
    %146 = vector.broadcast %cst_69 : f32 to vector<40x1xf32>
    %147 = arith.addf %143, %146 : vector<40x1xf32>
    %148 = math.rsqrt %147 : vector<40x1xf32>
    %149 = vector.broadcast %148 : vector<40x1xf32> to vector<40x20xf32>
    %150 = arith.mulf %145, %149 : vector<40x20xf32>
    %151 = vector.broadcast %130 : vector<1x20xf32> to vector<40x20xf32>
    %152 = arith.mulf %150, %151 : vector<40x20xf32>
    %153 = vector.broadcast %132 : vector<1x20xf32> to vector<40x20xf32>
    %154 = arith.addf %152, %153 : vector<40x20xf32>
    %c0_70 = arith.constant 0 : index
    %c0_71 = arith.constant 0 : index
    %c0_72 = arith.constant 0 : index
    %155 = vector.load %arg11[%c0_70, %c0_71, %c0_72] : memref<4x20x80xf32, #tpu.memory_space<vmem>>, vector<1x20x80xf32>
    %156 = vector.shape_cast %155 : vector<1x20x80xf32> to vector<20x80xf32>
    %cst_73 = arith.constant dense<0.000000e+00> : vector<40x80xf32>
    %157 = tpu.matmul %154, %156, %cst_73 {dimension_numbers = #tpu.dot_dimension_numbers<[1], [0], [0], [1], [0, 0, 1, 1], [], []>} : vector<40x20xf32>, vector<20x80xf32>, vector<40x80xf32> -> vector<40x80xf32>
    %c0_74 = arith.constant 0 : index
    %c0_75 = arith.constant 0 : index
    %c0_76 = arith.constant 0 : index
    %158 = vector.load %arg12[%c0_74, %c0_75, %c0_76] : memref<4x1x80xf32, #tpu.memory_space<vmem>>, vector<1x1x80xf32>
    %159 = vector.shape_cast %158 : vector<1x1x80xf32> to vector<1x80xf32>
    %160 = vector.broadcast %159 : vector<1x80xf32> to vector<40x80xf32>
    %161 = arith.addf %157, %160 : vector<40x80xf32>
    %cst_77 = arith.constant 0.000000e+00 : f32
    %162 = vector.broadcast %cst_77 : f32 to vector<40x80xf32>
    %163 = arith.maximumf %161, %162 : vector<40x80xf32>
    %c0_78 = arith.constant 0 : index
    %c0_79 = arith.constant 0 : index
    %c0_80 = arith.constant 0 : index
    %164 = vector.load %arg13[%c0_78, %c0_79, %c0_80] : memref<4x80x20xf32, #tpu.memory_space<vmem>>, vector<1x80x20xf32>
    %165 = vector.shape_cast %164 : vector<1x80x20xf32> to vector<80x20xf32>
    %cst_81 = arith.constant dense<0.000000e+00> : vector<40x20xf32>
    %166 = tpu.matmul %163, %165, %cst_81 {dimension_numbers = #tpu.dot_dimension_numbers<[1], [0], [0], [1], [0, 0, 1, 1], [], []>} : vector<40x80xf32>, vector<80x20xf32>, vector<40x20xf32> -> vector<40x20xf32>
    %167 = arith.addf %128, %166 : vector<40x20xf32>
    %c0_82 = arith.constant 0 : index
    %c0_83 = arith.constant 0 : index
    %c0_84 = arith.constant 0 : index
    %168 = vector.load %arg14[%c0_82, %c0_83, %c0_84] : memref<4x1x20xf32, #tpu.memory_space<vmem>>, vector<1x1x20xf32>
    %169 = vector.shape_cast %168 : vector<1x1x20xf32> to vector<1x20xf32>
    %170 = vector.broadcast %169 : vector<1x20xf32> to vector<40x20xf32>
    %171 = arith.addf %167, %170 : vector<40x20xf32>
    %c1_85 = arith.constant 1 : index
    %c0_86 = arith.constant 0 : index
    %c0_87 = arith.constant 0 : index
    %172 = vector.load %arg4[%c1_85, %c0_86, %c0_87] : memref<4x1x20xf32, #tpu.memory_space<vmem>>, vector<1x1x20xf32>
    %173 = vector.shape_cast %172 : vector<1x1x20xf32> to vector<1x20xf32>
    %c1_88 = arith.constant 1 : index
    %c0_89 = arith.constant 0 : index
    %c0_90 = arith.constant 0 : index
    %174 = vector.load %arg5[%c1_88, %c0_89, %c0_90] : memref<4x1x20xf32, #tpu.memory_space<vmem>>, vector<1x1x20xf32>
    %175 = vector.shape_cast %174 : vector<1x1x20xf32> to vector<1x20xf32>
    %cst_91 = arith.constant dense<0.000000e+00> : vector<40xf32>
    %176 = vector.multi_reduction <add>, %171, %cst_91 [1] : vector<40x20xf32> to vector<40xf32>
    %177 = vector.shape_cast %176 : vector<40xf32> to vector<40x1xf32>
    %cst_92 = arith.constant 2.000000e+01 : f32
    %178 = vector.broadcast %cst_92 : f32 to vector<40x1xf32>
    %179 = arith.divf %177, %178 : vector<40x1xf32>
    %180 = vector.broadcast %179 : vector<40x1xf32> to vector<40x20xf32>
    %181 = arith.subf %171, %180 : vector<40x20xf32>
    %182 = arith.mulf %181, %181 : vector<40x20xf32>
    %cst_93 = arith.constant dense<0.000000e+00> : vector<40xf32>
    %183 = vector.multi_reduction <add>, %182, %cst_93 [1] : vector<40x20xf32> to vector<40xf32>
    %184 = vector.shape_cast %183 : vector<40xf32> to vector<40x1xf32>
    %cst_94 = arith.constant 2.000000e+01 : f32
    %185 = vector.broadcast %cst_94 : f32 to vector<40x1xf32>
    %186 = arith.divf %184, %185 : vector<40x1xf32>
    %187 = vector.broadcast %179 : vector<40x1xf32> to vector<40x20xf32>
    %188 = arith.subf %171, %187 : vector<40x20xf32>
    %cst_95 = arith.constant 9.99999974E-6 : f32
    %189 = vector.broadcast %cst_95 : f32 to vector<40x1xf32>
    %190 = arith.addf %186, %189 : vector<40x1xf32>
    %191 = math.rsqrt %190 : vector<40x1xf32>
    %192 = vector.broadcast %191 : vector<40x1xf32> to vector<40x20xf32>
    %193 = arith.mulf %188, %192 : vector<40x20xf32>
    %194 = vector.broadcast %173 : vector<1x20xf32> to vector<40x20xf32>
    %195 = arith.mulf %193, %194 : vector<40x20xf32>
    %196 = vector.broadcast %175 : vector<1x20xf32> to vector<40x20xf32>
    %197 = arith.addf %195, %196 : vector<40x20xf32>
    %c1_96 = arith.constant 1 : index
    %c0_97 = arith.constant 0 : index
    %c0_98 = arith.constant 0 : index
    %198 = vector.load %arg6[%c1_96, %c0_97, %c0_98] : memref<4x20x60xf32, #tpu.memory_space<vmem>>, vector<1x20x60xf32>
    %199 = vector.shape_cast %198 : vector<1x20x60xf32> to vector<20x60xf32>
    %cst_99 = arith.constant dense<0.000000e+00> : vector<40x60xf32>
    %200 = tpu.matmul %197, %199, %cst_99 {dimension_numbers = #tpu.dot_dimension_numbers<[1], [0], [0], [1], [0, 0, 1, 1], [], []>} : vector<40x20xf32>, vector<20x60xf32>, vector<40x60xf32> -> vector<40x60xf32>
    %201 = vector.extract_strided_slice %200 {offsets = [0, 0], sizes = [40, 5], strides = [1, 1]} : vector<40x60xf32> to vector<40x5xf32>
    %202 = vector.extract_strided_slice %200 {offsets = [0, 20], sizes = [40, 5], strides = [1, 1]} : vector<40x60xf32> to vector<40x5xf32>
    %203 = vector.extract_strided_slice %200 {offsets = [0, 40], sizes = [40, 5], strides = [1, 1]} : vector<40x60xf32> to vector<40x5xf32>
    %204 = tpu.transpose %202, [1, 0] : vector<40x5xf32> -> vector<5x40xf32>
    %cst_100 = arith.constant dense<0.000000e+00> : vector<40x40xf32>
    %205 = tpu.matmul %201, %204, %cst_100 {dimension_numbers = #tpu.dot_dimension_numbers<[1], [0], [0], [1], [0, 0, 1, 1], [], []>} : vector<40x5xf32>, vector<5x40xf32>, vector<40x40xf32> -> vector<40x40xf32>
    %cst_101 = arith.constant 0.44721359 : f32
    %206 = vector.broadcast %cst_101 : f32 to vector<40x40xf32>
    %207 = arith.mulf %205, %206 : vector<40x40xf32>
    %208 = arith.addf %207, %3 : vector<40x40xf32>
    %cst_102 = arith.constant dense<0xFF800000> : vector<40xf32>
    %209 = vector.multi_reduction <maximumf>, %208, %cst_102 [1] : vector<40x40xf32> to vector<40xf32>
    %210 = vector.shape_cast %209 : vector<40xf32> to vector<40x1xf32>
    %211 = vector.broadcast %210 : vector<40x1xf32> to vector<40x40xf32>
    %212 = arith.subf %208, %211 : vector<40x40xf32>
    %213 = math.exp %212 : vector<40x40xf32>
    %cst_103 = arith.constant dense<0.000000e+00> : vector<40xf32>
    %214 = vector.multi_reduction <add>, %213, %cst_103 [1] : vector<40x40xf32> to vector<40xf32>
    %215 = vector.shape_cast %214 : vector<40xf32> to vector<40x1xf32>
    %216 = tpu.reciprocal %215 {approx = true} : vector<40x1xf32> -> vector<40x1xf32>
    %217 = vector.broadcast %216 : vector<40x1xf32> to vector<40x40xf32>
    %218 = arith.mulf %213, %217 : vector<40x40xf32>
    %cst_104 = arith.constant dense<0.000000e+00> : vector<40x5xf32>
    %219 = tpu.matmul %218, %203, %cst_104 {dimension_numbers = #tpu.dot_dimension_numbers<[1], [0], [0], [1], [0, 0, 1, 1], [], []>} : vector<40x40xf32>, vector<40x5xf32>, vector<40x5xf32> -> vector<40x5xf32>
    %c1_105 = arith.constant 1 : index
    %c0_106 = arith.constant 0 : index
    %c0_107 = arith.constant 0 : index
    %c0_108 = arith.constant 0 : index
    %220 = vector.load %arg7[%c1_105, %c0_106, %c0_107, %c0_108] : memref<4x4x5x20xf32, #tpu.memory_space<vmem>>, vector<1x1x5x20xf32>
    %221 = vector.shape_cast %220 : vector<1x1x5x20xf32> to vector<5x20xf32>
    %cst_109 = arith.constant dense<0.000000e+00> : vector<40x20xf32>
    %222 = tpu.matmul %219, %221, %cst_109 {dimension_numbers = #tpu.dot_dimension_numbers<[1], [0], [0], [1], [0, 0, 1, 1], [], []>} : vector<40x5xf32>, vector<5x20xf32>, vector<40x20xf32> -> vector<40x20xf32>
    %223 = vector.extract_strided_slice %200 {offsets = [0, 5], sizes = [40, 5], strides = [1, 1]} : vector<40x60xf32> to vector<40x5xf32>
    %224 = vector.extract_strided_slice %200 {offsets = [0, 25], sizes = [40, 5], strides = [1, 1]} : vector<40x60xf32> to vector<40x5xf32>
    %225 = vector.extract_strided_slice %200 {offsets = [0, 45], sizes = [40, 5], strides = [1, 1]} : vector<40x60xf32> to vector<40x5xf32>
    %226 = tpu.transpose %224, [1, 0] : vector<40x5xf32> -> vector<5x40xf32>
    %cst_110 = arith.constant dense<0.000000e+00> : vector<40x40xf32>
    %227 = tpu.matmul %223, %226, %cst_110 {dimension_numbers = #tpu.dot_dimension_numbers<[1], [0], [0], [1], [0, 0, 1, 1], [], []>} : vector<40x5xf32>, vector<5x40xf32>, vector<40x40xf32> -> vector<40x40xf32>
    %cst_111 = arith.constant 0.44721359 : f32
    %228 = vector.broadcast %cst_111 : f32 to vector<40x40xf32>
    %229 = arith.mulf %227, %228 : vector<40x40xf32>
    %230 = arith.addf %229, %3 : vector<40x40xf32>
    %cst_112 = arith.constant dense<0xFF800000> : vector<40xf32>
    %231 = vector.multi_reduction <maximumf>, %230, %cst_112 [1] : vector<40x40xf32> to vector<40xf32>
    %232 = vector.shape_cast %231 : vector<40xf32> to vector<40x1xf32>
    %233 = vector.broadcast %232 : vector<40x1xf32> to vector<40x40xf32>
    %234 = arith.subf %230, %233 : vector<40x40xf32>
    %235 = math.exp %234 : vector<40x40xf32>
    %cst_113 = arith.constant dense<0.000000e+00> : vector<40xf32>
    %236 = vector.multi_reduction <add>, %235, %cst_113 [1] : vector<40x40xf32> to vector<40xf32>
    %237 = vector.shape_cast %236 : vector<40xf32> to vector<40x1xf32>
    %238 = tpu.reciprocal %237 {approx = true} : vector<40x1xf32> -> vector<40x1xf32>
    %239 = vector.broadcast %238 : vector<40x1xf32> to vector<40x40xf32>
    %240 = arith.mulf %235, %239 : vector<40x40xf32>
    %cst_114 = arith.constant dense<0.000000e+00> : vector<40x5xf32>
    %241 = tpu.matmul %240, %225, %cst_114 {dimension_numbers = #tpu.dot_dimension_numbers<[1], [0], [0], [1], [0, 0, 1, 1], [], []>} : vector<40x40xf32>, vector<40x5xf32>, vector<40x5xf32> -> vector<40x5xf32>
    %c1_115 = arith.constant 1 : index
    %c1_116 = arith.constant 1 : index
    %c0_117 = arith.constant 0 : index
    %c0_118 = arith.constant 0 : index
    %242 = vector.load %arg7[%c1_115, %c1_116, %c0_117, %c0_118] : memref<4x4x5x20xf32, #tpu.memory_space<vmem>>, vector<1x1x5x20xf32>
    %243 = vector.shape_cast %242 : vector<1x1x5x20xf32> to vector<5x20xf32>
    %cst_119 = arith.constant dense<0.000000e+00> : vector<40x20xf32>
    %244 = tpu.matmul %241, %243, %cst_119 {dimension_numbers = #tpu.dot_dimension_numbers<[1], [0], [0], [1], [0, 0, 1, 1], [], []>} : vector<40x5xf32>, vector<5x20xf32>, vector<40x20xf32> -> vector<40x20xf32>
    %245 = arith.addf %222, %244 : vector<40x20xf32>
    %246 = vector.extract_strided_slice %200 {offsets = [0, 10], sizes = [40, 5], strides = [1, 1]} : vector<40x60xf32> to vector<40x5xf32>
    %247 = vector.extract_strided_slice %200 {offsets = [0, 30], sizes = [40, 5], strides = [1, 1]} : vector<40x60xf32> to vector<40x5xf32>
    %248 = vector.extract_strided_slice %200 {offsets = [0, 50], sizes = [40, 5], strides = [1, 1]} : vector<40x60xf32> to vector<40x5xf32>
    %249 = tpu.transpose %247, [1, 0] : vector<40x5xf32> -> vector<5x40xf32>
    %cst_120 = arith.constant dense<0.000000e+00> : vector<40x40xf32>
    %250 = tpu.matmul %246, %249, %cst_120 {dimension_numbers = #tpu.dot_dimension_numbers<[1], [0], [0], [1], [0, 0, 1, 1], [], []>} : vector<40x5xf32>, vector<5x40xf32>, vector<40x40xf32> -> vector<40x40xf32>
    %cst_121 = arith.constant 0.44721359 : f32
    %251 = vector.broadcast %cst_121 : f32 to vector<40x40xf32>
    %252 = arith.mulf %250, %251 : vector<40x40xf32>
    %253 = arith.addf %252, %3 : vector<40x40xf32>
    %cst_122 = arith.constant dense<0xFF800000> : vector<40xf32>
    %254 = vector.multi_reduction <maximumf>, %253, %cst_122 [1] : vector<40x40xf32> to vector<40xf32>
    %255 = vector.shape_cast %254 : vector<40xf32> to vector<40x1xf32>
    %256 = vector.broadcast %255 : vector<40x1xf32> to vector<40x40xf32>
    %257 = arith.subf %253, %256 : vector<40x40xf32>
    %258 = math.exp %257 : vector<40x40xf32>
    %cst_123 = arith.constant dense<0.000000e+00> : vector<40xf32>
    %259 = vector.multi_reduction <add>, %258, %cst_123 [1] : vector<40x40xf32> to vector<40xf32>
    %260 = vector.shape_cast %259 : vector<40xf32> to vector<40x1xf32>
    %261 = tpu.reciprocal %260 {approx = true} : vector<40x1xf32> -> vector<40x1xf32>
    %262 = vector.broadcast %261 : vector<40x1xf32> to vector<40x40xf32>
    %263 = arith.mulf %258, %262 : vector<40x40xf32>
    %cst_124 = arith.constant dense<0.000000e+00> : vector<40x5xf32>
    %264 = tpu.matmul %263, %248, %cst_124 {dimension_numbers = #tpu.dot_dimension_numbers<[1], [0], [0], [1], [0, 0, 1, 1], [], []>} : vector<40x40xf32>, vector<40x5xf32>, vector<40x5xf32> -> vector<40x5xf32>
    %c1_125 = arith.constant 1 : index
    %c2_126 = arith.constant 2 : index
    %c0_127 = arith.constant 0 : index
    %c0_128 = arith.constant 0 : index
    %265 = vector.load %arg7[%c1_125, %c2_126, %c0_127, %c0_128] : memref<4x4x5x20xf32, #tpu.memory_space<vmem>>, vector<1x1x5x20xf32>
    %266 = vector.shape_cast %265 : vector<1x1x5x20xf32> to vector<5x20xf32>
    %cst_129 = arith.constant dense<0.000000e+00> : vector<40x20xf32>
    %267 = tpu.matmul %264, %266, %cst_129 {dimension_numbers = #tpu.dot_dimension_numbers<[1], [0], [0], [1], [0, 0, 1, 1], [], []>} : vector<40x5xf32>, vector<5x20xf32>, vector<40x20xf32> -> vector<40x20xf32>
    %268 = arith.addf %245, %267 : vector<40x20xf32>
    %269 = vector.extract_strided_slice %200 {offsets = [0, 15], sizes = [40, 5], strides = [1, 1]} : vector<40x60xf32> to vector<40x5xf32>
    %270 = vector.extract_strided_slice %200 {offsets = [0, 35], sizes = [40, 5], strides = [1, 1]} : vector<40x60xf32> to vector<40x5xf32>
    %271 = vector.extract_strided_slice %200 {offsets = [0, 55], sizes = [40, 5], strides = [1, 1]} : vector<40x60xf32> to vector<40x5xf32>
    %272 = tpu.transpose %270, [1, 0] : vector<40x5xf32> -> vector<5x40xf32>
    %cst_130 = arith.constant dense<0.000000e+00> : vector<40x40xf32>
    %273 = tpu.matmul %269, %272, %cst_130 {dimension_numbers = #tpu.dot_dimension_numbers<[1], [0], [0], [1], [0, 0, 1, 1], [], []>} : vector<40x5xf32>, vector<5x40xf32>, vector<40x40xf32> -> vector<40x40xf32>
    %cst_131 = arith.constant 0.44721359 : f32
    %274 = vector.broadcast %cst_131 : f32 to vector<40x40xf32>
    %275 = arith.mulf %273, %274 : vector<40x40xf32>
    %276 = arith.addf %275, %3 : vector<40x40xf32>
    %cst_132 = arith.constant dense<0xFF800000> : vector<40xf32>
    %277 = vector.multi_reduction <maximumf>, %276, %cst_132 [1] : vector<40x40xf32> to vector<40xf32>
    %278 = vector.shape_cast %277 : vector<40xf32> to vector<40x1xf32>
    %279 = vector.broadcast %278 : vector<40x1xf32> to vector<40x40xf32>
    %280 = arith.subf %276, %279 : vector<40x40xf32>
    %281 = math.exp %280 : vector<40x40xf32>
    %cst_133 = arith.constant dense<0.000000e+00> : vector<40xf32>
    %282 = vector.multi_reduction <add>, %281, %cst_133 [1] : vector<40x40xf32> to vector<40xf32>
    %283 = vector.shape_cast %282 : vector<40xf32> to vector<40x1xf32>
    %284 = tpu.reciprocal %283 {approx = true} : vector<40x1xf32> -> vector<40x1xf32>
    %285 = vector.broadcast %284 : vector<40x1xf32> to vector<40x40xf32>
    %286 = arith.mulf %281, %285 : vector<40x40xf32>
    %cst_134 = arith.constant dense<0.000000e+00> : vector<40x5xf32>
    %287 = tpu.matmul %286, %271, %cst_134 {dimension_numbers = #tpu.dot_dimension_numbers<[1], [0], [0], [1], [0, 0, 1, 1], [], []>} : vector<40x40xf32>, vector<40x5xf32>, vector<40x5xf32> -> vector<40x5xf32>
    %c1_135 = arith.constant 1 : index
    %c3_136 = arith.constant 3 : index
    %c0_137 = arith.constant 0 : index
    %c0_138 = arith.constant 0 : index
    %288 = vector.load %arg7[%c1_135, %c3_136, %c0_137, %c0_138] : memref<4x4x5x20xf32, #tpu.memory_space<vmem>>, vector<1x1x5x20xf32>
    %289 = vector.shape_cast %288 : vector<1x1x5x20xf32> to vector<5x20xf32>
    %cst_139 = arith.constant dense<0.000000e+00> : vector<40x20xf32>
    %290 = tpu.matmul %287, %289, %cst_139 {dimension_numbers = #tpu.dot_dimension_numbers<[1], [0], [0], [1], [0, 0, 1, 1], [], []>} : vector<40x5xf32>, vector<5x20xf32>, vector<40x20xf32> -> vector<40x20xf32>
    %291 = arith.addf %268, %290 : vector<40x20xf32>
    %292 = arith.addf %171, %291 : vector<40x20xf32>
    %c1_140 = arith.constant 1 : index
    %c0_141 = arith.constant 0 : index
    %c0_142 = arith.constant 0 : index
    %293 = vector.load %arg8[%c1_140, %c0_141, %c0_142] : memref<4x1x20xf32, #tpu.memory_space<vmem>>, vector<1x1x20xf32>
    %294 = vector.shape_cast %293 : vector<1x1x20xf32> to vector<1x20xf32>
    %295 = vector.broadcast %294 : vector<1x20xf32> to vector<40x20xf32>
    %296 = arith.addf %292, %295 : vector<40x20xf32>
    %c1_143 = arith.constant 1 : index
    %c0_144 = arith.constant 0 : index
    %c0_145 = arith.constant 0 : index
    %297 = vector.load %arg9[%c1_143, %c0_144, %c0_145] : memref<4x1x20xf32, #tpu.memory_space<vmem>>, vector<1x1x20xf32>
    %298 = vector.shape_cast %297 : vector<1x1x20xf32> to vector<1x20xf32>
    %c1_146 = arith.constant 1 : index
    %c0_147 = arith.constant 0 : index
    %c0_148 = arith.constant 0 : index
    %299 = vector.load %arg10[%c1_146, %c0_147, %c0_148] : memref<4x1x20xf32, #tpu.memory_space<vmem>>, vector<1x1x20xf32>
    %300 = vector.shape_cast %299 : vector<1x1x20xf32> to vector<1x20xf32>
    %cst_149 = arith.constant dense<0.000000e+00> : vector<40xf32>
    %301 = vector.multi_reduction <add>, %296, %cst_149 [1] : vector<40x20xf32> to vector<40xf32>
    %302 = vector.shape_cast %301 : vector<40xf32> to vector<40x1xf32>
    %cst_150 = arith.constant 2.000000e+01 : f32
    %303 = vector.broadcast %cst_150 : f32 to vector<40x1xf32>
    %304 = arith.divf %302, %303 : vector<40x1xf32>
    %305 = vector.broadcast %304 : vector<40x1xf32> to vector<40x20xf32>
    %306 = arith.subf %296, %305 : vector<40x20xf32>
    %307 = arith.mulf %306, %306 : vector<40x20xf32>
    %cst_151 = arith.constant dense<0.000000e+00> : vector<40xf32>
    %308 = vector.multi_reduction <add>, %307, %cst_151 [1] : vector<40x20xf32> to vector<40xf32>
    %309 = vector.shape_cast %308 : vector<40xf32> to vector<40x1xf32>
    %cst_152 = arith.constant 2.000000e+01 : f32
    %310 = vector.broadcast %cst_152 : f32 to vector<40x1xf32>
    %311 = arith.divf %309, %310 : vector<40x1xf32>
    %312 = vector.broadcast %304 : vector<40x1xf32> to vector<40x20xf32>
    %313 = arith.subf %296, %312 : vector<40x20xf32>
    %cst_153 = arith.constant 9.99999974E-6 : f32
    %314 = vector.broadcast %cst_153 : f32 to vector<40x1xf32>
    %315 = arith.addf %311, %314 : vector<40x1xf32>
    %316 = math.rsqrt %315 : vector<40x1xf32>
    %317 = vector.broadcast %316 : vector<40x1xf32> to vector<40x20xf32>
    %318 = arith.mulf %313, %317 : vector<40x20xf32>
    %319 = vector.broadcast %298 : vector<1x20xf32> to vector<40x20xf32>
    %320 = arith.mulf %318, %319 : vector<40x20xf32>
    %321 = vector.broadcast %300 : vector<1x20xf32> to vector<40x20xf32>
    %322 = arith.addf %320, %321 : vector<40x20xf32>
    %c1_154 = arith.constant 1 : index
    %c0_155 = arith.constant 0 : index
    %c0_156 = arith.constant 0 : index
    %323 = vector.load %arg11[%c1_154, %c0_155, %c0_156] : memref<4x20x80xf32, #tpu.memory_space<vmem>>, vector<1x20x80xf32>
    %324 = vector.shape_cast %323 : vector<1x20x80xf32> to vector<20x80xf32>
    %cst_157 = arith.constant dense<0.000000e+00> : vector<40x80xf32>
    %325 = tpu.matmul %322, %324, %cst_157 {dimension_numbers = #tpu.dot_dimension_numbers<[1], [0], [0], [1], [0, 0, 1, 1], [], []>} : vector<40x20xf32>, vector<20x80xf32>, vector<40x80xf32> -> vector<40x80xf32>
    %c1_158 = arith.constant 1 : index
    %c0_159 = arith.constant 0 : index
    %c0_160 = arith.constant 0 : index
    %326 = vector.load %arg12[%c1_158, %c0_159, %c0_160] : memref<4x1x80xf32, #tpu.memory_space<vmem>>, vector<1x1x80xf32>
    %327 = vector.shape_cast %326 : vector<1x1x80xf32> to vector<1x80xf32>
    %328 = vector.broadcast %327 : vector<1x80xf32> to vector<40x80xf32>
    %329 = arith.addf %325, %328 : vector<40x80xf32>
    %cst_161 = arith.constant 0.000000e+00 : f32
    %330 = vector.broadcast %cst_161 : f32 to vector<40x80xf32>
    %331 = arith.maximumf %329, %330 : vector<40x80xf32>
    %c1_162 = arith.constant 1 : index
    %c0_163 = arith.constant 0 : index
    %c0_164 = arith.constant 0 : index
    %332 = vector.load %arg13[%c1_162, %c0_163, %c0_164] : memref<4x80x20xf32, #tpu.memory_space<vmem>>, vector<1x80x20xf32>
    %333 = vector.shape_cast %332 : vector<1x80x20xf32> to vector<80x20xf32>
    %cst_165 = arith.constant dense<0.000000e+00> : vector<40x20xf32>
    %334 = tpu.matmul %331, %333, %cst_165 {dimension_numbers = #tpu.dot_dimension_numbers<[1], [0], [0], [1], [0, 0, 1, 1], [], []>} : vector<40x80xf32>, vector<80x20xf32>, vector<40x20xf32> -> vector<40x20xf32>
    %335 = arith.addf %296, %334 : vector<40x20xf32>
    %c1_166 = arith.constant 1 : index
    %c0_167 = arith.constant 0 : index
    %c0_168 = arith.constant 0 : index
    %336 = vector.load %arg14[%c1_166, %c0_167, %c0_168] : memref<4x1x20xf32, #tpu.memory_space<vmem>>, vector<1x1x20xf32>
    %337 = vector.shape_cast %336 : vector<1x1x20xf32> to vector<1x20xf32>
    %338 = vector.broadcast %337 : vector<1x20xf32> to vector<40x20xf32>
    %339 = arith.addf %335, %338 : vector<40x20xf32>
    %c2_169 = arith.constant 2 : index
    %c0_170 = arith.constant 0 : index
    %c0_171 = arith.constant 0 : index
    %340 = vector.load %arg4[%c2_169, %c0_170, %c0_171] : memref<4x1x20xf32, #tpu.memory_space<vmem>>, vector<1x1x20xf32>
    %341 = vector.shape_cast %340 : vector<1x1x20xf32> to vector<1x20xf32>
    %c2_172 = arith.constant 2 : index
    %c0_173 = arith.constant 0 : index
    %c0_174 = arith.constant 0 : index
    %342 = vector.load %arg5[%c2_172, %c0_173, %c0_174] : memref<4x1x20xf32, #tpu.memory_space<vmem>>, vector<1x1x20xf32>
    %343 = vector.shape_cast %342 : vector<1x1x20xf32> to vector<1x20xf32>
    %cst_175 = arith.constant dense<0.000000e+00> : vector<40xf32>
    %344 = vector.multi_reduction <add>, %339, %cst_175 [1] : vector<40x20xf32> to vector<40xf32>
    %345 = vector.shape_cast %344 : vector<40xf32> to vector<40x1xf32>
    %cst_176 = arith.constant 2.000000e+01 : f32
    %346 = vector.broadcast %cst_176 : f32 to vector<40x1xf32>
    %347 = arith.divf %345, %346 : vector<40x1xf32>
    %348 = vector.broadcast %347 : vector<40x1xf32> to vector<40x20xf32>
    %349 = arith.subf %339, %348 : vector<40x20xf32>
    %350 = arith.mulf %349, %349 : vector<40x20xf32>
    %cst_177 = arith.constant dense<0.000000e+00> : vector<40xf32>
    %351 = vector.multi_reduction <add>, %350, %cst_177 [1] : vector<40x20xf32> to vector<40xf32>
    %352 = vector.shape_cast %351 : vector<40xf32> to vector<40x1xf32>
    %cst_178 = arith.constant 2.000000e+01 : f32
    %353 = vector.broadcast %cst_178 : f32 to vector<40x1xf32>
    %354 = arith.divf %352, %353 : vector<40x1xf32>
    %355 = vector.broadcast %347 : vector<40x1xf32> to vector<40x20xf32>
    %356 = arith.subf %339, %355 : vector<40x20xf32>
    %cst_179 = arith.constant 9.99999974E-6 : f32
    %357 = vector.broadcast %cst_179 : f32 to vector<40x1xf32>
    %358 = arith.addf %354, %357 : vector<40x1xf32>
    %359 = math.rsqrt %358 : vector<40x1xf32>
    %360 = vector.broadcast %359 : vector<40x1xf32> to vector<40x20xf32>
    %361 = arith.mulf %356, %360 : vector<40x20xf32>
    %362 = vector.broadcast %341 : vector<1x20xf32> to vector<40x20xf32>
    %363 = arith.mulf %361, %362 : vector<40x20xf32>
    %364 = vector.broadcast %343 : vector<1x20xf32> to vector<40x20xf32>
    %365 = arith.addf %363, %364 : vector<40x20xf32>
    %c2_180 = arith.constant 2 : index
    %c0_181 = arith.constant 0 : index
    %c0_182 = arith.constant 0 : index
    %366 = vector.load %arg6[%c2_180, %c0_181, %c0_182] : memref<4x20x60xf32, #tpu.memory_space<vmem>>, vector<1x20x60xf32>
    %367 = vector.shape_cast %366 : vector<1x20x60xf32> to vector<20x60xf32>
    %cst_183 = arith.constant dense<0.000000e+00> : vector<40x60xf32>
    %368 = tpu.matmul %365, %367, %cst_183 {dimension_numbers = #tpu.dot_dimension_numbers<[1], [0], [0], [1], [0, 0, 1, 1], [], []>} : vector<40x20xf32>, vector<20x60xf32>, vector<40x60xf32> -> vector<40x60xf32>
    %369 = vector.extract_strided_slice %368 {offsets = [0, 0], sizes = [40, 5], strides = [1, 1]} : vector<40x60xf32> to vector<40x5xf32>
    %370 = vector.extract_strided_slice %368 {offsets = [0, 20], sizes = [40, 5], strides = [1, 1]} : vector<40x60xf32> to vector<40x5xf32>
    %371 = vector.extract_strided_slice %368 {offsets = [0, 40], sizes = [40, 5], strides = [1, 1]} : vector<40x60xf32> to vector<40x5xf32>
    %372 = tpu.transpose %370, [1, 0] : vector<40x5xf32> -> vector<5x40xf32>
    %cst_184 = arith.constant dense<0.000000e+00> : vector<40x40xf32>
    %373 = tpu.matmul %369, %372, %cst_184 {dimension_numbers = #tpu.dot_dimension_numbers<[1], [0], [0], [1], [0, 0, 1, 1], [], []>} : vector<40x5xf32>, vector<5x40xf32>, vector<40x40xf32> -> vector<40x40xf32>
    %cst_185 = arith.constant 0.44721359 : f32
    %374 = vector.broadcast %cst_185 : f32 to vector<40x40xf32>
    %375 = arith.mulf %373, %374 : vector<40x40xf32>
    %376 = arith.addf %375, %3 : vector<40x40xf32>
    %cst_186 = arith.constant dense<0xFF800000> : vector<40xf32>
    %377 = vector.multi_reduction <maximumf>, %376, %cst_186 [1] : vector<40x40xf32> to vector<40xf32>
    %378 = vector.shape_cast %377 : vector<40xf32> to vector<40x1xf32>
    %379 = vector.broadcast %378 : vector<40x1xf32> to vector<40x40xf32>
    %380 = arith.subf %376, %379 : vector<40x40xf32>
    %381 = math.exp %380 : vector<40x40xf32>
    %cst_187 = arith.constant dense<0.000000e+00> : vector<40xf32>
    %382 = vector.multi_reduction <add>, %381, %cst_187 [1] : vector<40x40xf32> to vector<40xf32>
    %383 = vector.shape_cast %382 : vector<40xf32> to vector<40x1xf32>
    %384 = tpu.reciprocal %383 {approx = true} : vector<40x1xf32> -> vector<40x1xf32>
    %385 = vector.broadcast %384 : vector<40x1xf32> to vector<40x40xf32>
    %386 = arith.mulf %381, %385 : vector<40x40xf32>
    %cst_188 = arith.constant dense<0.000000e+00> : vector<40x5xf32>
    %387 = tpu.matmul %386, %371, %cst_188 {dimension_numbers = #tpu.dot_dimension_numbers<[1], [0], [0], [1], [0, 0, 1, 1], [], []>} : vector<40x40xf32>, vector<40x5xf32>, vector<40x5xf32> -> vector<40x5xf32>
    %c2_189 = arith.constant 2 : index
    %c0_190 = arith.constant 0 : index
    %c0_191 = arith.constant 0 : index
    %c0_192 = arith.constant 0 : index
    %388 = vector.load %arg7[%c2_189, %c0_190, %c0_191, %c0_192] : memref<4x4x5x20xf32, #tpu.memory_space<vmem>>, vector<1x1x5x20xf32>
    %389 = vector.shape_cast %388 : vector<1x1x5x20xf32> to vector<5x20xf32>
    %cst_193 = arith.constant dense<0.000000e+00> : vector<40x20xf32>
    %390 = tpu.matmul %387, %389, %cst_193 {dimension_numbers = #tpu.dot_dimension_numbers<[1], [0], [0], [1], [0, 0, 1, 1], [], []>} : vector<40x5xf32>, vector<5x20xf32>, vector<40x20xf32> -> vector<40x20xf32>
    %391 = vector.extract_strided_slice %368 {offsets = [0, 5], sizes = [40, 5], strides = [1, 1]} : vector<40x60xf32> to vector<40x5xf32>
    %392 = vector.extract_strided_slice %368 {offsets = [0, 25], sizes = [40, 5], strides = [1, 1]} : vector<40x60xf32> to vector<40x5xf32>
    %393 = vector.extract_strided_slice %368 {offsets = [0, 45], sizes = [40, 5], strides = [1, 1]} : vector<40x60xf32> to vector<40x5xf32>
    %394 = tpu.transpose %392, [1, 0] : vector<40x5xf32> -> vector<5x40xf32>
    %cst_194 = arith.constant dense<0.000000e+00> : vector<40x40xf32>
    %395 = tpu.matmul %391, %394, %cst_194 {dimension_numbers = #tpu.dot_dimension_numbers<[1], [0], [0], [1], [0, 0, 1, 1], [], []>} : vector<40x5xf32>, vector<5x40xf32>, vector<40x40xf32> -> vector<40x40xf32>
    %cst_195 = arith.constant 0.44721359 : f32
    %396 = vector.broadcast %cst_195 : f32 to vector<40x40xf32>
    %397 = arith.mulf %395, %396 : vector<40x40xf32>
    %398 = arith.addf %397, %3 : vector<40x40xf32>
    %cst_196 = arith.constant dense<0xFF800000> : vector<40xf32>
    %399 = vector.multi_reduction <maximumf>, %398, %cst_196 [1] : vector<40x40xf32> to vector<40xf32>
    %400 = vector.shape_cast %399 : vector<40xf32> to vector<40x1xf32>
    %401 = vector.broadcast %400 : vector<40x1xf32> to vector<40x40xf32>
    %402 = arith.subf %398, %401 : vector<40x40xf32>
    %403 = math.exp %402 : vector<40x40xf32>
    %cst_197 = arith.constant dense<0.000000e+00> : vector<40xf32>
    %404 = vector.multi_reduction <add>, %403, %cst_197 [1] : vector<40x40xf32> to vector<40xf32>
    %405 = vector.shape_cast %404 : vector<40xf32> to vector<40x1xf32>
    %406 = tpu.reciprocal %405 {approx = true} : vector<40x1xf32> -> vector<40x1xf32>
    %407 = vector.broadcast %406 : vector<40x1xf32> to vector<40x40xf32>
    %408 = arith.mulf %403, %407 : vector<40x40xf32>
    %cst_198 = arith.constant dense<0.000000e+00> : vector<40x5xf32>
    %409 = tpu.matmul %408, %393, %cst_198 {dimension_numbers = #tpu.dot_dimension_numbers<[1], [0], [0], [1], [0, 0, 1, 1], [], []>} : vector<40x40xf32>, vector<40x5xf32>, vector<40x5xf32> -> vector<40x5xf32>
    %c2_199 = arith.constant 2 : index
    %c1_200 = arith.constant 1 : index
    %c0_201 = arith.constant 0 : index
    %c0_202 = arith.constant 0 : index
    %410 = vector.load %arg7[%c2_199, %c1_200, %c0_201, %c0_202] : memref<4x4x5x20xf32, #tpu.memory_space<vmem>>, vector<1x1x5x20xf32>
    %411 = vector.shape_cast %410 : vector<1x1x5x20xf32> to vector<5x20xf32>
    %cst_203 = arith.constant dense<0.000000e+00> : vector<40x20xf32>
    %412 = tpu.matmul %409, %411, %cst_203 {dimension_numbers = #tpu.dot_dimension_numbers<[1], [0], [0], [1], [0, 0, 1, 1], [], []>} : vector<40x5xf32>, vector<5x20xf32>, vector<40x20xf32> -> vector<40x20xf32>
    %413 = arith.addf %390, %412 : vector<40x20xf32>
    %414 = vector.extract_strided_slice %368 {offsets = [0, 10], sizes = [40, 5], strides = [1, 1]} : vector<40x60xf32> to vector<40x5xf32>
    %415 = vector.extract_strided_slice %368 {offsets = [0, 30], sizes = [40, 5], strides = [1, 1]} : vector<40x60xf32> to vector<40x5xf32>
    %416 = vector.extract_strided_slice %368 {offsets = [0, 50], sizes = [40, 5], strides = [1, 1]} : vector<40x60xf32> to vector<40x5xf32>
    %417 = tpu.transpose %415, [1, 0] : vector<40x5xf32> -> vector<5x40xf32>
    %cst_204 = arith.constant dense<0.000000e+00> : vector<40x40xf32>
    %418 = tpu.matmul %414, %417, %cst_204 {dimension_numbers = #tpu.dot_dimension_numbers<[1], [0], [0], [1], [0, 0, 1, 1], [], []>} : vector<40x5xf32>, vector<5x40xf32>, vector<40x40xf32> -> vector<40x40xf32>
    %cst_205 = arith.constant 0.44721359 : f32
    %419 = vector.broadcast %cst_205 : f32 to vector<40x40xf32>
    %420 = arith.mulf %418, %419 : vector<40x40xf32>
    %421 = arith.addf %420, %3 : vector<40x40xf32>
    %cst_206 = arith.constant dense<0xFF800000> : vector<40xf32>
    %422 = vector.multi_reduction <maximumf>, %421, %cst_206 [1] : vector<40x40xf32> to vector<40xf32>
    %423 = vector.shape_cast %422 : vector<40xf32> to vector<40x1xf32>
    %424 = vector.broadcast %423 : vector<40x1xf32> to vector<40x40xf32>
    %425 = arith.subf %421, %424 : vector<40x40xf32>
    %426 = math.exp %425 : vector<40x40xf32>
    %cst_207 = arith.constant dense<0.000000e+00> : vector<40xf32>
    %427 = vector.multi_reduction <add>, %426, %cst_207 [1] : vector<40x40xf32> to vector<40xf32>
    %428 = vector.shape_cast %427 : vector<40xf32> to vector<40x1xf32>
    %429 = tpu.reciprocal %428 {approx = true} : vector<40x1xf32> -> vector<40x1xf32>
    %430 = vector.broadcast %429 : vector<40x1xf32> to vector<40x40xf32>
    %431 = arith.mulf %426, %430 : vector<40x40xf32>
    %cst_208 = arith.constant dense<0.000000e+00> : vector<40x5xf32>
    %432 = tpu.matmul %431, %416, %cst_208 {dimension_numbers = #tpu.dot_dimension_numbers<[1], [0], [0], [1], [0, 0, 1, 1], [], []>} : vector<40x40xf32>, vector<40x5xf32>, vector<40x5xf32> -> vector<40x5xf32>
    %c2_209 = arith.constant 2 : index
    %c2_210 = arith.constant 2 : index
    %c0_211 = arith.constant 0 : index
    %c0_212 = arith.constant 0 : index
    %433 = vector.load %arg7[%c2_209, %c2_210, %c0_211, %c0_212] : memref<4x4x5x20xf32, #tpu.memory_space<vmem>>, vector<1x1x5x20xf32>
    %434 = vector.shape_cast %433 : vector<1x1x5x20xf32> to vector<5x20xf32>
    %cst_213 = arith.constant dense<0.000000e+00> : vector<40x20xf32>
    %435 = tpu.matmul %432, %434, %cst_213 {dimension_numbers = #tpu.dot_dimension_numbers<[1], [0], [0], [1], [0, 0, 1, 1], [], []>} : vector<40x5xf32>, vector<5x20xf32>, vector<40x20xf32> -> vector<40x20xf32>
    %436 = arith.addf %413, %435 : vector<40x20xf32>
    %437 = vector.extract_strided_slice %368 {offsets = [0, 15], sizes = [40, 5], strides = [1, 1]} : vector<40x60xf32> to vector<40x5xf32>
    %438 = vector.extract_strided_slice %368 {offsets = [0, 35], sizes = [40, 5], strides = [1, 1]} : vector<40x60xf32> to vector<40x5xf32>
    %439 = vector.extract_strided_slice %368 {offsets = [0, 55], sizes = [40, 5], strides = [1, 1]} : vector<40x60xf32> to vector<40x5xf32>
    %440 = tpu.transpose %438, [1, 0] : vector<40x5xf32> -> vector<5x40xf32>
    %cst_214 = arith.constant dense<0.000000e+00> : vector<40x40xf32>
    %441 = tpu.matmul %437, %440, %cst_214 {dimension_numbers = #tpu.dot_dimension_numbers<[1], [0], [0], [1], [0, 0, 1, 1], [], []>} : vector<40x5xf32>, vector<5x40xf32>, vector<40x40xf32> -> vector<40x40xf32>
    %cst_215 = arith.constant 0.44721359 : f32
    %442 = vector.broadcast %cst_215 : f32 to vector<40x40xf32>
    %443 = arith.mulf %441, %442 : vector<40x40xf32>
    %444 = arith.addf %443, %3 : vector<40x40xf32>
    %cst_216 = arith.constant dense<0xFF800000> : vector<40xf32>
    %445 = vector.multi_reduction <maximumf>, %444, %cst_216 [1] : vector<40x40xf32> to vector<40xf32>
    %446 = vector.shape_cast %445 : vector<40xf32> to vector<40x1xf32>
    %447 = vector.broadcast %446 : vector<40x1xf32> to vector<40x40xf32>
    %448 = arith.subf %444, %447 : vector<40x40xf32>
    %449 = math.exp %448 : vector<40x40xf32>
    %cst_217 = arith.constant dense<0.000000e+00> : vector<40xf32>
    %450 = vector.multi_reduction <add>, %449, %cst_217 [1] : vector<40x40xf32> to vector<40xf32>
    %451 = vector.shape_cast %450 : vector<40xf32> to vector<40x1xf32>
    %452 = tpu.reciprocal %451 {approx = true} : vector<40x1xf32> -> vector<40x1xf32>
    %453 = vector.broadcast %452 : vector<40x1xf32> to vector<40x40xf32>
    %454 = arith.mulf %449, %453 : vector<40x40xf32>
    %cst_218 = arith.constant dense<0.000000e+00> : vector<40x5xf32>
    %455 = tpu.matmul %454, %439, %cst_218 {dimension_numbers = #tpu.dot_dimension_numbers<[1], [0], [0], [1], [0, 0, 1, 1], [], []>} : vector<40x40xf32>, vector<40x5xf32>, vector<40x5xf32> -> vector<40x5xf32>
    %c2_219 = arith.constant 2 : index
    %c3_220 = arith.constant 3 : index
    %c0_221 = arith.constant 0 : index
    %c0_222 = arith.constant 0 : index
    %456 = vector.load %arg7[%c2_219, %c3_220, %c0_221, %c0_222] : memref<4x4x5x20xf32, #tpu.memory_space<vmem>>, vector<1x1x5x20xf32>
    %457 = vector.shape_cast %456 : vector<1x1x5x20xf32> to vector<5x20xf32>
    %cst_223 = arith.constant dense<0.000000e+00> : vector<40x20xf32>
    %458 = tpu.matmul %455, %457, %cst_223 {dimension_numbers = #tpu.dot_dimension_numbers<[1], [0], [0], [1], [0, 0, 1, 1], [], []>} : vector<40x5xf32>, vector<5x20xf32>, vector<40x20xf32> -> vector<40x20xf32>
    %459 = arith.addf %436, %458 : vector<40x20xf32>
    %460 = arith.addf %339, %459 : vector<40x20xf32>
    %c2_224 = arith.constant 2 : index
    %c0_225 = arith.constant 0 : index
    %c0_226 = arith.constant 0 : index
    %461 = vector.load %arg8[%c2_224, %c0_225, %c0_226] : memref<4x1x20xf32, #tpu.memory_space<vmem>>, vector<1x1x20xf32>
    %462 = vector.shape_cast %461 : vector<1x1x20xf32> to vector<1x20xf32>
    %463 = vector.broadcast %462 : vector<1x20xf32> to vector<40x20xf32>
    %464 = arith.addf %460, %463 : vector<40x20xf32>
    %c2_227 = arith.constant 2 : index
    %c0_228 = arith.constant 0 : index
    %c0_229 = arith.constant 0 : index
    %465 = vector.load %arg9[%c2_227, %c0_228, %c0_229] : memref<4x1x20xf32, #tpu.memory_space<vmem>>, vector<1x1x20xf32>
    %466 = vector.shape_cast %465 : vector<1x1x20xf32> to vector<1x20xf32>
    %c2_230 = arith.constant 2 : index
    %c0_231 = arith.constant 0 : index
    %c0_232 = arith.constant 0 : index
    %467 = vector.load %arg10[%c2_230, %c0_231, %c0_232] : memref<4x1x20xf32, #tpu.memory_space<vmem>>, vector<1x1x20xf32>
    %468 = vector.shape_cast %467 : vector<1x1x20xf32> to vector<1x20xf32>
    %cst_233 = arith.constant dense<0.000000e+00> : vector<40xf32>
    %469 = vector.multi_reduction <add>, %464, %cst_233 [1] : vector<40x20xf32> to vector<40xf32>
    %470 = vector.shape_cast %469 : vector<40xf32> to vector<40x1xf32>
    %cst_234 = arith.constant 2.000000e+01 : f32
    %471 = vector.broadcast %cst_234 : f32 to vector<40x1xf32>
    %472 = arith.divf %470, %471 : vector<40x1xf32>
    %473 = vector.broadcast %472 : vector<40x1xf32> to vector<40x20xf32>
    %474 = arith.subf %464, %473 : vector<40x20xf32>
    %475 = arith.mulf %474, %474 : vector<40x20xf32>
    %cst_235 = arith.constant dense<0.000000e+00> : vector<40xf32>
    %476 = vector.multi_reduction <add>, %475, %cst_235 [1] : vector<40x20xf32> to vector<40xf32>
    %477 = vector.shape_cast %476 : vector<40xf32> to vector<40x1xf32>
    %cst_236 = arith.constant 2.000000e+01 : f32
    %478 = vector.broadcast %cst_236 : f32 to vector<40x1xf32>
    %479 = arith.divf %477, %478 : vector<40x1xf32>
    %480 = vector.broadcast %472 : vector<40x1xf32> to vector<40x20xf32>
    %481 = arith.subf %464, %480 : vector<40x20xf32>
    %cst_237 = arith.constant 9.99999974E-6 : f32
    %482 = vector.broadcast %cst_237 : f32 to vector<40x1xf32>
    %483 = arith.addf %479, %482 : vector<40x1xf32>
    %484 = math.rsqrt %483 : vector<40x1xf32>
    %485 = vector.broadcast %484 : vector<40x1xf32> to vector<40x20xf32>
    %486 = arith.mulf %481, %485 : vector<40x20xf32>
    %487 = vector.broadcast %466 : vector<1x20xf32> to vector<40x20xf32>
    %488 = arith.mulf %486, %487 : vector<40x20xf32>
    %489 = vector.broadcast %468 : vector<1x20xf32> to vector<40x20xf32>
    %490 = arith.addf %488, %489 : vector<40x20xf32>
    %c2_238 = arith.constant 2 : index
    %c0_239 = arith.constant 0 : index
    %c0_240 = arith.constant 0 : index
    %491 = vector.load %arg11[%c2_238, %c0_239, %c0_240] : memref<4x20x80xf32, #tpu.memory_space<vmem>>, vector<1x20x80xf32>
    %492 = vector.shape_cast %491 : vector<1x20x80xf32> to vector<20x80xf32>
    %cst_241 = arith.constant dense<0.000000e+00> : vector<40x80xf32>
    %493 = tpu.matmul %490, %492, %cst_241 {dimension_numbers = #tpu.dot_dimension_numbers<[1], [0], [0], [1], [0, 0, 1, 1], [], []>} : vector<40x20xf32>, vector<20x80xf32>, vector<40x80xf32> -> vector<40x80xf32>
    %c2_242 = arith.constant 2 : index
    %c0_243 = arith.constant 0 : index
    %c0_244 = arith.constant 0 : index
    %494 = vector.load %arg12[%c2_242, %c0_243, %c0_244] : memref<4x1x80xf32, #tpu.memory_space<vmem>>, vector<1x1x80xf32>
    %495 = vector.shape_cast %494 : vector<1x1x80xf32> to vector<1x80xf32>
    %496 = vector.broadcast %495 : vector<1x80xf32> to vector<40x80xf32>
    %497 = arith.addf %493, %496 : vector<40x80xf32>
    %cst_245 = arith.constant 0.000000e+00 : f32
    %498 = vector.broadcast %cst_245 : f32 to vector<40x80xf32>
    %499 = arith.maximumf %497, %498 : vector<40x80xf32>
    %c2_246 = arith.constant 2 : index
    %c0_247 = arith.constant 0 : index
    %c0_248 = arith.constant 0 : index
    %500 = vector.load %arg13[%c2_246, %c0_247, %c0_248] : memref<4x80x20xf32, #tpu.memory_space<vmem>>, vector<1x80x20xf32>
    %501 = vector.shape_cast %500 : vector<1x80x20xf32> to vector<80x20xf32>
    %cst_249 = arith.constant dense<0.000000e+00> : vector<40x20xf32>
    %502 = tpu.matmul %499, %501, %cst_249 {dimension_numbers = #tpu.dot_dimension_numbers<[1], [0], [0], [1], [0, 0, 1, 1], [], []>} : vector<40x80xf32>, vector<80x20xf32>, vector<40x20xf32> -> vector<40x20xf32>
    %503 = arith.addf %464, %502 : vector<40x20xf32>
    %c2_250 = arith.constant 2 : index
    %c0_251 = arith.constant 0 : index
    %c0_252 = arith.constant 0 : index
    %504 = vector.load %arg14[%c2_250, %c0_251, %c0_252] : memref<4x1x20xf32, #tpu.memory_space<vmem>>, vector<1x1x20xf32>
    %505 = vector.shape_cast %504 : vector<1x1x20xf32> to vector<1x20xf32>
    %506 = vector.broadcast %505 : vector<1x20xf32> to vector<40x20xf32>
    %507 = arith.addf %503, %506 : vector<40x20xf32>
    %c3_253 = arith.constant 3 : index
    %c0_254 = arith.constant 0 : index
    %c0_255 = arith.constant 0 : index
    %508 = vector.load %arg4[%c3_253, %c0_254, %c0_255] : memref<4x1x20xf32, #tpu.memory_space<vmem>>, vector<1x1x20xf32>
    %509 = vector.shape_cast %508 : vector<1x1x20xf32> to vector<1x20xf32>
    %c3_256 = arith.constant 3 : index
    %c0_257 = arith.constant 0 : index
    %c0_258 = arith.constant 0 : index
    %510 = vector.load %arg5[%c3_256, %c0_257, %c0_258] : memref<4x1x20xf32, #tpu.memory_space<vmem>>, vector<1x1x20xf32>
    %511 = vector.shape_cast %510 : vector<1x1x20xf32> to vector<1x20xf32>
    %cst_259 = arith.constant dense<0.000000e+00> : vector<40xf32>
    %512 = vector.multi_reduction <add>, %507, %cst_259 [1] : vector<40x20xf32> to vector<40xf32>
    %513 = vector.shape_cast %512 : vector<40xf32> to vector<40x1xf32>
    %cst_260 = arith.constant 2.000000e+01 : f32
    %514 = vector.broadcast %cst_260 : f32 to vector<40x1xf32>
    %515 = arith.divf %513, %514 : vector<40x1xf32>
    %516 = vector.broadcast %515 : vector<40x1xf32> to vector<40x20xf32>
    %517 = arith.subf %507, %516 : vector<40x20xf32>
    %518 = arith.mulf %517, %517 : vector<40x20xf32>
    %cst_261 = arith.constant dense<0.000000e+00> : vector<40xf32>
    %519 = vector.multi_reduction <add>, %518, %cst_261 [1] : vector<40x20xf32> to vector<40xf32>
    %520 = vector.shape_cast %519 : vector<40xf32> to vector<40x1xf32>
    %cst_262 = arith.constant 2.000000e+01 : f32
    %521 = vector.broadcast %cst_262 : f32 to vector<40x1xf32>
    %522 = arith.divf %520, %521 : vector<40x1xf32>
    %523 = vector.broadcast %515 : vector<40x1xf32> to vector<40x20xf32>
    %524 = arith.subf %507, %523 : vector<40x20xf32>
    %cst_263 = arith.constant 9.99999974E-6 : f32
    %525 = vector.broadcast %cst_263 : f32 to vector<40x1xf32>
    %526 = arith.addf %522, %525 : vector<40x1xf32>
    %527 = math.rsqrt %526 : vector<40x1xf32>
    %528 = vector.broadcast %527 : vector<40x1xf32> to vector<40x20xf32>
    %529 = arith.mulf %524, %528 : vector<40x20xf32>
    %530 = vector.broadcast %509 : vector<1x20xf32> to vector<40x20xf32>
    %531 = arith.mulf %529, %530 : vector<40x20xf32>
    %532 = vector.broadcast %511 : vector<1x20xf32> to vector<40x20xf32>
    %533 = arith.addf %531, %532 : vector<40x20xf32>
    %c3_264 = arith.constant 3 : index
    %c0_265 = arith.constant 0 : index
    %c0_266 = arith.constant 0 : index
    %534 = vector.load %arg6[%c3_264, %c0_265, %c0_266] : memref<4x20x60xf32, #tpu.memory_space<vmem>>, vector<1x20x60xf32>
    %535 = vector.shape_cast %534 : vector<1x20x60xf32> to vector<20x60xf32>
    %cst_267 = arith.constant dense<0.000000e+00> : vector<40x60xf32>
    %536 = tpu.matmul %533, %535, %cst_267 {dimension_numbers = #tpu.dot_dimension_numbers<[1], [0], [0], [1], [0, 0, 1, 1], [], []>} : vector<40x20xf32>, vector<20x60xf32>, vector<40x60xf32> -> vector<40x60xf32>
    %537 = vector.extract_strided_slice %536 {offsets = [0, 0], sizes = [40, 5], strides = [1, 1]} : vector<40x60xf32> to vector<40x5xf32>
    %538 = vector.extract_strided_slice %536 {offsets = [0, 20], sizes = [40, 5], strides = [1, 1]} : vector<40x60xf32> to vector<40x5xf32>
    %539 = vector.extract_strided_slice %536 {offsets = [0, 40], sizes = [40, 5], strides = [1, 1]} : vector<40x60xf32> to vector<40x5xf32>
    %540 = tpu.transpose %538, [1, 0] : vector<40x5xf32> -> vector<5x40xf32>
    %cst_268 = arith.constant dense<0.000000e+00> : vector<40x40xf32>
    %541 = tpu.matmul %537, %540, %cst_268 {dimension_numbers = #tpu.dot_dimension_numbers<[1], [0], [0], [1], [0, 0, 1, 1], [], []>} : vector<40x5xf32>, vector<5x40xf32>, vector<40x40xf32> -> vector<40x40xf32>
    %cst_269 = arith.constant 0.44721359 : f32
    %542 = vector.broadcast %cst_269 : f32 to vector<40x40xf32>
    %543 = arith.mulf %541, %542 : vector<40x40xf32>
    %544 = arith.addf %543, %3 : vector<40x40xf32>
    %cst_270 = arith.constant dense<0xFF800000> : vector<40xf32>
    %545 = vector.multi_reduction <maximumf>, %544, %cst_270 [1] : vector<40x40xf32> to vector<40xf32>
    %546 = vector.shape_cast %545 : vector<40xf32> to vector<40x1xf32>
    %547 = vector.broadcast %546 : vector<40x1xf32> to vector<40x40xf32>
    %548 = arith.subf %544, %547 : vector<40x40xf32>
    %549 = math.exp %548 : vector<40x40xf32>
    %cst_271 = arith.constant dense<0.000000e+00> : vector<40xf32>
    %550 = vector.multi_reduction <add>, %549, %cst_271 [1] : vector<40x40xf32> to vector<40xf32>
    %551 = vector.shape_cast %550 : vector<40xf32> to vector<40x1xf32>
    %552 = tpu.reciprocal %551 {approx = true} : vector<40x1xf32> -> vector<40x1xf32>
    %553 = vector.broadcast %552 : vector<40x1xf32> to vector<40x40xf32>
    %554 = arith.mulf %549, %553 : vector<40x40xf32>
    %cst_272 = arith.constant dense<0.000000e+00> : vector<40x5xf32>
    %555 = tpu.matmul %554, %539, %cst_272 {dimension_numbers = #tpu.dot_dimension_numbers<[1], [0], [0], [1], [0, 0, 1, 1], [], []>} : vector<40x40xf32>, vector<40x5xf32>, vector<40x5xf32> -> vector<40x5xf32>
    %c3_273 = arith.constant 3 : index
    %c0_274 = arith.constant 0 : index
    %c0_275 = arith.constant 0 : index
    %c0_276 = arith.constant 0 : index
    %556 = vector.load %arg7[%c3_273, %c0_274, %c0_275, %c0_276] : memref<4x4x5x20xf32, #tpu.memory_space<vmem>>, vector<1x1x5x20xf32>
    %557 = vector.shape_cast %556 : vector<1x1x5x20xf32> to vector<5x20xf32>
    %cst_277 = arith.constant dense<0.000000e+00> : vector<40x20xf32>
    %558 = tpu.matmul %555, %557, %cst_277 {dimension_numbers = #tpu.dot_dimension_numbers<[1], [0], [0], [1], [0, 0, 1, 1], [], []>} : vector<40x5xf32>, vector<5x20xf32>, vector<40x20xf32> -> vector<40x20xf32>
    %559 = vector.extract_strided_slice %536 {offsets = [0, 5], sizes = [40, 5], strides = [1, 1]} : vector<40x60xf32> to vector<40x5xf32>
    %560 = vector.extract_strided_slice %536 {offsets = [0, 25], sizes = [40, 5], strides = [1, 1]} : vector<40x60xf32> to vector<40x5xf32>
    %561 = vector.extract_strided_slice %536 {offsets = [0, 45], sizes = [40, 5], strides = [1, 1]} : vector<40x60xf32> to vector<40x5xf32>
    %562 = tpu.transpose %560, [1, 0] : vector<40x5xf32> -> vector<5x40xf32>
    %cst_278 = arith.constant dense<0.000000e+00> : vector<40x40xf32>
    %563 = tpu.matmul %559, %562, %cst_278 {dimension_numbers = #tpu.dot_dimension_numbers<[1], [0], [0], [1], [0, 0, 1, 1], [], []>} : vector<40x5xf32>, vector<5x40xf32>, vector<40x40xf32> -> vector<40x40xf32>
    %cst_279 = arith.constant 0.44721359 : f32
    %564 = vector.broadcast %cst_279 : f32 to vector<40x40xf32>
    %565 = arith.mulf %563, %564 : vector<40x40xf32>
    %566 = arith.addf %565, %3 : vector<40x40xf32>
    %cst_280 = arith.constant dense<0xFF800000> : vector<40xf32>
    %567 = vector.multi_reduction <maximumf>, %566, %cst_280 [1] : vector<40x40xf32> to vector<40xf32>
    %568 = vector.shape_cast %567 : vector<40xf32> to vector<40x1xf32>
    %569 = vector.broadcast %568 : vector<40x1xf32> to vector<40x40xf32>
    %570 = arith.subf %566, %569 : vector<40x40xf32>
    %571 = math.exp %570 : vector<40x40xf32>
    %cst_281 = arith.constant dense<0.000000e+00> : vector<40xf32>
    %572 = vector.multi_reduction <add>, %571, %cst_281 [1] : vector<40x40xf32> to vector<40xf32>
    %573 = vector.shape_cast %572 : vector<40xf32> to vector<40x1xf32>
    %574 = tpu.reciprocal %573 {approx = true} : vector<40x1xf32> -> vector<40x1xf32>
    %575 = vector.broadcast %574 : vector<40x1xf32> to vector<40x40xf32>
    %576 = arith.mulf %571, %575 : vector<40x40xf32>
    %cst_282 = arith.constant dense<0.000000e+00> : vector<40x5xf32>
    %577 = tpu.matmul %576, %561, %cst_282 {dimension_numbers = #tpu.dot_dimension_numbers<[1], [0], [0], [1], [0, 0, 1, 1], [], []>} : vector<40x40xf32>, vector<40x5xf32>, vector<40x5xf32> -> vector<40x5xf32>
    %c3_283 = arith.constant 3 : index
    %c1_284 = arith.constant 1 : index
    %c0_285 = arith.constant 0 : index
    %c0_286 = arith.constant 0 : index
    %578 = vector.load %arg7[%c3_283, %c1_284, %c0_285, %c0_286] : memref<4x4x5x20xf32, #tpu.memory_space<vmem>>, vector<1x1x5x20xf32>
    %579 = vector.shape_cast %578 : vector<1x1x5x20xf32> to vector<5x20xf32>
    %cst_287 = arith.constant dense<0.000000e+00> : vector<40x20xf32>
    %580 = tpu.matmul %577, %579, %cst_287 {dimension_numbers = #tpu.dot_dimension_numbers<[1], [0], [0], [1], [0, 0, 1, 1], [], []>} : vector<40x5xf32>, vector<5x20xf32>, vector<40x20xf32> -> vector<40x20xf32>
    %581 = arith.addf %558, %580 : vector<40x20xf32>
    %582 = vector.extract_strided_slice %536 {offsets = [0, 10], sizes = [40, 5], strides = [1, 1]} : vector<40x60xf32> to vector<40x5xf32>
    %583 = vector.extract_strided_slice %536 {offsets = [0, 30], sizes = [40, 5], strides = [1, 1]} : vector<40x60xf32> to vector<40x5xf32>
    %584 = vector.extract_strided_slice %536 {offsets = [0, 50], sizes = [40, 5], strides = [1, 1]} : vector<40x60xf32> to vector<40x5xf32>
    %585 = tpu.transpose %583, [1, 0] : vector<40x5xf32> -> vector<5x40xf32>
    %cst_288 = arith.constant dense<0.000000e+00> : vector<40x40xf32>
    %586 = tpu.matmul %582, %585, %cst_288 {dimension_numbers = #tpu.dot_dimension_numbers<[1], [0], [0], [1], [0, 0, 1, 1], [], []>} : vector<40x5xf32>, vector<5x40xf32>, vector<40x40xf32> -> vector<40x40xf32>
    %cst_289 = arith.constant 0.44721359 : f32
    %587 = vector.broadcast %cst_289 : f32 to vector<40x40xf32>
    %588 = arith.mulf %586, %587 : vector<40x40xf32>
    %589 = arith.addf %588, %3 : vector<40x40xf32>
    %cst_290 = arith.constant dense<0xFF800000> : vector<40xf32>
    %590 = vector.multi_reduction <maximumf>, %589, %cst_290 [1] : vector<40x40xf32> to vector<40xf32>
    %591 = vector.shape_cast %590 : vector<40xf32> to vector<40x1xf32>
    %592 = vector.broadcast %591 : vector<40x1xf32> to vector<40x40xf32>
    %593 = arith.subf %589, %592 : vector<40x40xf32>
    %594 = math.exp %593 : vector<40x40xf32>
    %cst_291 = arith.constant dense<0.000000e+00> : vector<40xf32>
    %595 = vector.multi_reduction <add>, %594, %cst_291 [1] : vector<40x40xf32> to vector<40xf32>
    %596 = vector.shape_cast %595 : vector<40xf32> to vector<40x1xf32>
    %597 = tpu.reciprocal %596 {approx = true} : vector<40x1xf32> -> vector<40x1xf32>
    %598 = vector.broadcast %597 : vector<40x1xf32> to vector<40x40xf32>
    %599 = arith.mulf %594, %598 : vector<40x40xf32>
    %cst_292 = arith.constant dense<0.000000e+00> : vector<40x5xf32>
    %600 = tpu.matmul %599, %584, %cst_292 {dimension_numbers = #tpu.dot_dimension_numbers<[1], [0], [0], [1], [0, 0, 1, 1], [], []>} : vector<40x40xf32>, vector<40x5xf32>, vector<40x5xf32> -> vector<40x5xf32>
    %c3_293 = arith.constant 3 : index
    %c2_294 = arith.constant 2 : index
    %c0_295 = arith.constant 0 : index
    %c0_296 = arith.constant 0 : index
    %601 = vector.load %arg7[%c3_293, %c2_294, %c0_295, %c0_296] : memref<4x4x5x20xf32, #tpu.memory_space<vmem>>, vector<1x1x5x20xf32>
    %602 = vector.shape_cast %601 : vector<1x1x5x20xf32> to vector<5x20xf32>
    %cst_297 = arith.constant dense<0.000000e+00> : vector<40x20xf32>
    %603 = tpu.matmul %600, %602, %cst_297 {dimension_numbers = #tpu.dot_dimension_numbers<[1], [0], [0], [1], [0, 0, 1, 1], [], []>} : vector<40x5xf32>, vector<5x20xf32>, vector<40x20xf32> -> vector<40x20xf32>
    %604 = arith.addf %581, %603 : vector<40x20xf32>
    %605 = vector.extract_strided_slice %536 {offsets = [0, 15], sizes = [40, 5], strides = [1, 1]} : vector<40x60xf32> to vector<40x5xf32>
    %606 = vector.extract_strided_slice %536 {offsets = [0, 35], sizes = [40, 5], strides = [1, 1]} : vector<40x60xf32> to vector<40x5xf32>
    %607 = vector.extract_strided_slice %536 {offsets = [0, 55], sizes = [40, 5], strides = [1, 1]} : vector<40x60xf32> to vector<40x5xf32>
    %608 = tpu.transpose %606, [1, 0] : vector<40x5xf32> -> vector<5x40xf32>
    %cst_298 = arith.constant dense<0.000000e+00> : vector<40x40xf32>
    %609 = tpu.matmul %605, %608, %cst_298 {dimension_numbers = #tpu.dot_dimension_numbers<[1], [0], [0], [1], [0, 0, 1, 1], [], []>} : vector<40x5xf32>, vector<5x40xf32>, vector<40x40xf32> -> vector<40x40xf32>
    %cst_299 = arith.constant 0.44721359 : f32
    %610 = vector.broadcast %cst_299 : f32 to vector<40x40xf32>
    %611 = arith.mulf %609, %610 : vector<40x40xf32>
    %612 = arith.addf %611, %3 : vector<40x40xf32>
    %cst_300 = arith.constant dense<0xFF800000> : vector<40xf32>
    %613 = vector.multi_reduction <maximumf>, %612, %cst_300 [1] : vector<40x40xf32> to vector<40xf32>
    %614 = vector.shape_cast %613 : vector<40xf32> to vector<40x1xf32>
    %615 = vector.broadcast %614 : vector<40x1xf32> to vector<40x40xf32>
    %616 = arith.subf %612, %615 : vector<40x40xf32>
    %617 = math.exp %616 : vector<40x40xf32>
    %cst_301 = arith.constant dense<0.000000e+00> : vector<40xf32>
    %618 = vector.multi_reduction <add>, %617, %cst_301 [1] : vector<40x40xf32> to vector<40xf32>
    %619 = vector.shape_cast %618 : vector<40xf32> to vector<40x1xf32>
    %620 = tpu.reciprocal %619 {approx = true} : vector<40x1xf32> -> vector<40x1xf32>
    %621 = vector.broadcast %620 : vector<40x1xf32> to vector<40x40xf32>
    %622 = arith.mulf %617, %621 : vector<40x40xf32>
    %cst_302 = arith.constant dense<0.000000e+00> : vector<40x5xf32>
    %623 = tpu.matmul %622, %607, %cst_302 {dimension_numbers = #tpu.dot_dimension_numbers<[1], [0], [0], [1], [0, 0, 1, 1], [], []>} : vector<40x40xf32>, vector<40x5xf32>, vector<40x5xf32> -> vector<40x5xf32>
    %c3_303 = arith.constant 3 : index
    %c3_304 = arith.constant 3 : index
    %c0_305 = arith.constant 0 : index
    %c0_306 = arith.constant 0 : index
    %624 = vector.load %arg7[%c3_303, %c3_304, %c0_305, %c0_306] : memref<4x4x5x20xf32, #tpu.memory_space<vmem>>, vector<1x1x5x20xf32>
    %625 = vector.shape_cast %624 : vector<1x1x5x20xf32> to vector<5x20xf32>
    %cst_307 = arith.constant dense<0.000000e+00> : vector<40x20xf32>
    %626 = tpu.matmul %623, %625, %cst_307 {dimension_numbers = #tpu.dot_dimension_numbers<[1], [0], [0], [1], [0, 0, 1, 1], [], []>} : vector<40x5xf32>, vector<5x20xf32>, vector<40x20xf32> -> vector<40x20xf32>
    %627 = arith.addf %604, %626 : vector<40x20xf32>
    %628 = arith.addf %507, %627 : vector<40x20xf32>
    %c3_308 = arith.constant 3 : index
    %c0_309 = arith.constant 0 : index
    %c0_310 = arith.constant 0 : index
    %629 = vector.load %arg8[%c3_308, %c0_309, %c0_310] : memref<4x1x20xf32, #tpu.memory_space<vmem>>, vector<1x1x20xf32>
    %630 = vector.shape_cast %629 : vector<1x1x20xf32> to vector<1x20xf32>
    %631 = vector.broadcast %630 : vector<1x20xf32> to vector<40x20xf32>
    %632 = arith.addf %628, %631 : vector<40x20xf32>
    %c3_311 = arith.constant 3 : index
    %c0_312 = arith.constant 0 : index
    %c0_313 = arith.constant 0 : index
    %633 = vector.load %arg9[%c3_311, %c0_312, %c0_313] : memref<4x1x20xf32, #tpu.memory_space<vmem>>, vector<1x1x20xf32>
    %634 = vector.shape_cast %633 : vector<1x1x20xf32> to vector<1x20xf32>
    %c3_314 = arith.constant 3 : index
    %c0_315 = arith.constant 0 : index
    %c0_316 = arith.constant 0 : index
    %635 = vector.load %arg10[%c3_314, %c0_315, %c0_316] : memref<4x1x20xf32, #tpu.memory_space<vmem>>, vector<1x1x20xf32>
    %636 = vector.shape_cast %635 : vector<1x1x20xf32> to vector<1x20xf32>
    %cst_317 = arith.constant dense<0.000000e+00> : vector<40xf32>
    %637 = vector.multi_reduction <add>, %632, %cst_317 [1] : vector<40x20xf32> to vector<40xf32>
    %638 = vector.shape_cast %637 : vector<40xf32> to vector<40x1xf32>
    %cst_318 = arith.constant 2.000000e+01 : f32
    %639 = vector.broadcast %cst_318 : f32 to vector<40x1xf32>
    %640 = arith.divf %638, %639 : vector<40x1xf32>
    %641 = vector.broadcast %640 : vector<40x1xf32> to vector<40x20xf32>
    %642 = arith.subf %632, %641 : vector<40x20xf32>
    %643 = arith.mulf %642, %642 : vector<40x20xf32>
    %cst_319 = arith.constant dense<0.000000e+00> : vector<40xf32>
    %644 = vector.multi_reduction <add>, %643, %cst_319 [1] : vector<40x20xf32> to vector<40xf32>
    %645 = vector.shape_cast %644 : vector<40xf32> to vector<40x1xf32>
    %cst_320 = arith.constant 2.000000e+01 : f32
    %646 = vector.broadcast %cst_320 : f32 to vector<40x1xf32>
    %647 = arith.divf %645, %646 : vector<40x1xf32>
    %648 = vector.broadcast %640 : vector<40x1xf32> to vector<40x20xf32>
    %649 = arith.subf %632, %648 : vector<40x20xf32>
    %cst_321 = arith.constant 9.99999974E-6 : f32
    %650 = vector.broadcast %cst_321 : f32 to vector<40x1xf32>
    %651 = arith.addf %647, %650 : vector<40x1xf32>
    %652 = math.rsqrt %651 : vector<40x1xf32>
    %653 = vector.broadcast %652 : vector<40x1xf32> to vector<40x20xf32>
    %654 = arith.mulf %649, %653 : vector<40x20xf32>
    %655 = vector.broadcast %634 : vector<1x20xf32> to vector<40x20xf32>
    %656 = arith.mulf %654, %655 : vector<40x20xf32>
    %657 = vector.broadcast %636 : vector<1x20xf32> to vector<40x20xf32>
    %658 = arith.addf %656, %657 : vector<40x20xf32>
    %c3_322 = arith.constant 3 : index
    %c0_323 = arith.constant 0 : index
    %c0_324 = arith.constant 0 : index
    %659 = vector.load %arg11[%c3_322, %c0_323, %c0_324] : memref<4x20x80xf32, #tpu.memory_space<vmem>>, vector<1x20x80xf32>
    %660 = vector.shape_cast %659 : vector<1x20x80xf32> to vector<20x80xf32>
    %cst_325 = arith.constant dense<0.000000e+00> : vector<40x80xf32>
    %661 = tpu.matmul %658, %660, %cst_325 {dimension_numbers = #tpu.dot_dimension_numbers<[1], [0], [0], [1], [0, 0, 1, 1], [], []>} : vector<40x20xf32>, vector<20x80xf32>, vector<40x80xf32> -> vector<40x80xf32>
    %c3_326 = arith.constant 3 : index
    %c0_327 = arith.constant 0 : index
    %c0_328 = arith.constant 0 : index
    %662 = vector.load %arg12[%c3_326, %c0_327, %c0_328] : memref<4x1x80xf32, #tpu.memory_space<vmem>>, vector<1x1x80xf32>
    %663 = vector.shape_cast %662 : vector<1x1x80xf32> to vector<1x80xf32>
    %664 = vector.broadcast %663 : vector<1x80xf32> to vector<40x80xf32>
    %665 = arith.addf %661, %664 : vector<40x80xf32>
    %cst_329 = arith.constant 0.000000e+00 : f32
    %666 = vector.broadcast %cst_329 : f32 to vector<40x80xf32>
    %667 = arith.maximumf %665, %666 : vector<40x80xf32>
    %c3_330 = arith.constant 3 : index
    %c0_331 = arith.constant 0 : index
    %c0_332 = arith.constant 0 : index
    %668 = vector.load %arg13[%c3_330, %c0_331, %c0_332] : memref<4x80x20xf32, #tpu.memory_space<vmem>>, vector<1x80x20xf32>
    %669 = vector.shape_cast %668 : vector<1x80x20xf32> to vector<80x20xf32>
    %cst_333 = arith.constant dense<0.000000e+00> : vector<40x20xf32>
    %670 = tpu.matmul %667, %669, %cst_333 {dimension_numbers = #tpu.dot_dimension_numbers<[1], [0], [0], [1], [0, 0, 1, 1], [], []>} : vector<40x80xf32>, vector<80x20xf32>, vector<40x20xf32> -> vector<40x20xf32>
    %671 = arith.addf %632, %670 : vector<40x20xf32>
    %c3_334 = arith.constant 3 : index
    %c0_335 = arith.constant 0 : index
    %c0_336 = arith.constant 0 : index
    %672 = vector.load %arg14[%c3_334, %c0_335, %c0_336] : memref<4x1x20xf32, #tpu.memory_space<vmem>>, vector<1x1x20xf32>
    %673 = vector.shape_cast %672 : vector<1x1x20xf32> to vector<1x20xf32>
    %674 = vector.broadcast %673 : vector<1x20xf32> to vector<40x20xf32>
    %675 = arith.addf %671, %674 : vector<40x20xf32>
    %c0_337 = arith.constant 0 : index
    %c0_338 = arith.constant 0 : index
    %676 = vector.load %arg15[%c0_337, %c0_338] : memref<1x20xf32, #tpu.memory_space<vmem>>, vector<1x20xf32>
    %c0_339 = arith.constant 0 : index
    %c0_340 = arith.constant 0 : index
    %677 = vector.load %arg16[%c0_339, %c0_340] : memref<1x20xf32, #tpu.memory_space<vmem>>, vector<1x20xf32>
    %cst_341 = arith.constant dense<0.000000e+00> : vector<40xf32>
    %678 = vector.multi_reduction <add>, %675, %cst_341 [1] : vector<40x20xf32> to vector<40xf32>
    %679 = vector.shape_cast %678 : vector<40xf32> to vector<40x1xf32>
    %cst_342 = arith.constant 2.000000e+01 : f32
    %680 = vector.broadcast %cst_342 : f32 to vector<40x1xf32>
    %681 = arith.divf %679, %680 : vector<40x1xf32>
    %682 = vector.broadcast %681 : vector<40x1xf32> to vector<40x20xf32>
    %683 = arith.subf %675, %682 : vector<40x20xf32>
    %684 = arith.mulf %683, %683 : vector<40x20xf32>
    %cst_343 = arith.constant dense<0.000000e+00> : vector<40xf32>
    %685 = vector.multi_reduction <add>, %684, %cst_343 [1] : vector<40x20xf32> to vector<40xf32>
    %686 = vector.shape_cast %685 : vector<40xf32> to vector<40x1xf32>
    %cst_344 = arith.constant 2.000000e+01 : f32
    %687 = vector.broadcast %cst_344 : f32 to vector<40x1xf32>
    %688 = arith.divf %686, %687 : vector<40x1xf32>
    %689 = vector.broadcast %681 : vector<40x1xf32> to vector<40x20xf32>
    %690 = arith.subf %675, %689 : vector<40x20xf32>
    %cst_345 = arith.constant 9.99999974E-6 : f32
    %691 = vector.broadcast %cst_345 : f32 to vector<40x1xf32>
    %692 = arith.addf %688, %691 : vector<40x1xf32>
    %693 = math.rsqrt %692 : vector<40x1xf32>
    %694 = vector.broadcast %693 : vector<40x1xf32> to vector<40x20xf32>
    %695 = arith.mulf %690, %694 : vector<40x20xf32>
    %696 = vector.broadcast %676 : vector<1x20xf32> to vector<40x20xf32>
    %697 = arith.mulf %695, %696 : vector<40x20xf32>
    %698 = vector.broadcast %677 : vector<1x20xf32> to vector<40x20xf32>
    %699 = arith.addf %697, %698 : vector<40x20xf32>
    %c0_346 = arith.constant 0 : index
    %c0_347 = arith.constant 0 : index
    %700 = vector.load %arg17[%c0_346, %c0_347] : memref<20x128xf32, #tpu.memory_space<vmem>>, vector<20x128xf32>
    %cst_348 = arith.constant dense<0.000000e+00> : vector<40x128xf32>
    %701 = tpu.matmul %699, %700, %cst_348 {dimension_numbers = #tpu.dot_dimension_numbers<[1], [0], [0], [1], [0, 0, 1, 1], [], []>} : vector<40x20xf32>, vector<20x128xf32>, vector<40x128xf32> -> vector<40x128xf32>
    %c0_349 = arith.constant 0 : index
    %c0_350 = arith.constant 0 : index
    %702 = vector.load %arg18[%c0_349, %c0_350] : memref<1x128xf32, #tpu.memory_space<vmem>>, vector<1x128xf32>
    %703 = vector.broadcast %702 : vector<1x128xf32> to vector<40x128xf32>
    %704 = arith.addf %701, %703 : vector<40x128xf32>
    %c0_351 = arith.constant 0 : index
    %c0_352 = arith.constant 0 : index
    %705 = vector.load %arg19[%c0_351, %c0_352] : memref<40x128xf32, #tpu.memory_space<vmem>>, vector<40x128xf32>
    tpu.vector_store %arg19[%c0_351, %c0_352], %704 {strides = array<i32>} : memref<40x128xf32, #tpu.memory_space<vmem>>, vector<40x128xf32>,
    return
  }
  func.func @transform_0(%arg0: i32) -> (i32, i32) {
    %c0_i32 = arith.constant 0 : i32
    %c0_i32_0 = arith.constant 0 : i32
    return %arg0, %c0_i32 : i32, i32
  }
  func.func @transform_1(%arg0: i32) -> (i32, i32) {
    %c0_i32 = arith.constant 0 : i32
    %c0_i32_0 = arith.constant 0 : i32
    %c0_i32_1 = arith.constant 0 : i32
    return %c0_i32, %c0_i32_0 : i32, i32
  }
  func.func @transform_2(%arg0: i32) -> (i32, i32) {
    %c0_i32 = arith.constant 0 : i32
    %c0_i32_0 = arith.constant 0 : i32
    %c0_i32_1 = arith.constant 0 : i32
    return %c0_i32, %c0_i32_0 : i32, i32
  }
  func.func @transform_3(%arg0: i32) -> (i32, i32, i32) {
    %c0_i32 = arith.constant 0 : i32
    %c0_i32_0 = arith.constant 0 : i32
    %c0_i32_1 = arith.constant 0 : i32
    %c0_i32_2 = arith.constant 0 : i32
    return %c0_i32, %c0_i32_0, %c0_i32_1 : i32, i32, i32
  }
  func.func @transform_4(%arg0: i32) -> (i32, i32, i32) {
    %c0_i32 = arith.constant 0 : i32
    %c0_i32_0 = arith.constant 0 : i32
    %c0_i32_1 = arith.constant 0 : i32
    %c0_i32_2 = arith.constant 0 : i32
    return %c0_i32, %c0_i32_0, %c0_i32_1 : i32, i32, i32
  }
  func.func @transform_5(%arg0: i32) -> (i32, i32, i32) {
    %c0_i32 = arith.constant 0 : i32
    %c0_i32_0 = arith.constant 0 : i32
    %c0_i32_1 = arith.constant 0 : i32
    %c0_i32_2 = arith.constant 0 : i32
    return %c0_i32, %c0_i32_0, %c0_i32_1 : i32, i32, i32
  }
  func.func @transform_6(%arg0: i32) -> (i32, i32, i32, i32) {
    %c0_i32 = arith.constant 0 : i32
    %c0_i32_0 = arith.constant 0 : i32
    %c0_i32_1 = arith.constant 0 : i32
    %c0_i32_2 = arith.constant 0 : i32
    %c0_i32_3 = arith.constant 0 : i32
    return %c0_i32, %c0_i32_0, %c0_i32_1, %c0_i32_2 : i32, i32, i32, i32
  }
  func.func @transform_7(%arg0: i32) -> (i32, i32, i32) {
    %c0_i32 = arith.constant 0 : i32
    %c0_i32_0 = arith.constant 0 : i32
    %c0_i32_1 = arith.constant 0 : i32
    %c0_i32_2 = arith.constant 0 : i32
    return %c0_i32, %c0_i32_0, %c0_i32_1 : i32, i32, i32
  }
  func.func @transform_8(%arg0: i32) -> (i32, i32, i32) {
    %c0_i32 = arith.constant 0 : i32
    %c0_i32_0 = arith.constant 0 : i32
    %c0_i32_1 = arith.constant 0 : i32
    %c0_i32_2 = arith.constant 0 : i32
    return %c0_i32, %c0_i32_0, %c0_i32_1 : i32, i32, i32
  }
  func.func @transform_9(%arg0: i32) -> (i32, i32, i32) {
    %c0_i32 = arith.constant 0 : i32
    %c0_i32_0 = arith.constant 0 : i32
    %c0_i32_1 = arith.constant 0 : i32
    %c0_i32_2 = arith.constant 0 : i32
    return %c0_i32, %c0_i32_0, %c0_i32_1 : i32, i32, i32
  }
  func.func @transform_10(%arg0: i32) -> (i32, i32, i32) {
    %c0_i32 = arith.constant 0 : i32
    %c0_i32_0 = arith.constant 0 : i32
    %c0_i32_1 = arith.constant 0 : i32
    %c0_i32_2 = arith.constant 0 : i32
    return %c0_i32, %c0_i32_0, %c0_i32_1 : i32, i32, i32
  }
  func.func @transform_11(%arg0: i32) -> (i32, i32, i32) {
    %c0_i32 = arith.constant 0 : i32
    %c0_i32_0 = arith.constant 0 : i32
    %c0_i32_1 = arith.constant 0 : i32
    %c0_i32_2 = arith.constant 0 : i32
    return %c0_i32, %c0_i32_0, %c0_i32_1 : i32, i32, i32
  }
  func.func @transform_12(%arg0: i32) -> (i32, i32, i32) {
    %c0_i32 = arith.constant 0 : i32
    %c0_i32_0 = arith.constant 0 : i32
    %c0_i32_1 = arith.constant 0 : i32
    %c0_i32_2 = arith.constant 0 : i32
    return %c0_i32, %c0_i32_0, %c0_i32_1 : i32, i32, i32
  }
  func.func @transform_13(%arg0: i32) -> (i32, i32, i32) {
    %c0_i32 = arith.constant 0 : i32
    %c0_i32_0 = arith.constant 0 : i32
    %c0_i32_1 = arith.constant 0 : i32
    %c0_i32_2 = arith.constant 0 : i32
    return %c0_i32, %c0_i32_0, %c0_i32_1 : i32, i32, i32
  }
  func.func @transform_14(%arg0: i32) -> (i32, i32) {
    %c0_i32 = arith.constant 0 : i32
    %c0_i32_0 = arith.constant 0 : i32
    %c0_i32_1 = arith.constant 0 : i32
    return %c0_i32, %c0_i32_0 : i32, i32
  }
  func.func @transform_15(%arg0: i32) -> (i32, i32) {
    %c0_i32 = arith.constant 0 : i32
    %c0_i32_0 = arith.constant 0 : i32
    %c0_i32_1 = arith.constant 0 : i32
    return %c0_i32, %c0_i32_0 : i32, i32
  }
  func.func @transform_16(%arg0: i32) -> (i32, i32) {
    %c0_i32 = arith.constant 0 : i32
    %c0_i32_0 = arith.constant 0 : i32
    %c0_i32_1 = arith.constant 0 : i32
    return %c0_i32, %c0_i32_0 : i32, i32
  }
  func.func @transform_17(%arg0: i32) -> (i32, i32) {
    %c0_i32 = arith.constant 0 : i32
    %c0_i32_0 = arith.constant 0 : i32
    %c0_i32_1 = arith.constant 0 : i32
    return %c0_i32, %c0_i32_0 : i32, i32
  }
  func.func @transform_18(%arg0: i32) -> (i32, i32) {
    %c0_i32 = arith.constant 0 : i32
    %c0_i32_0 = arith.constant 0 : i32
    return %arg0, %c0_i32 : i32, i32
  }
}

</mosaic_0001>

<bundles_post_ra>
// kernel: tpu_custom_call.1
= control target key start
LH: loop header
LB: loop body
LE: loop exit
PB: predicated region body
PF: predicated region fallthrough
CT: control target
= control target key end

     0   :  { %s15833_s0 = inlined_call_operand.vmem [shape: f32[40,20], index: 0, kind: input, shape index: {}]   ;;  %s15834_s1 = inlined_call_operand.vmem [shape: f32[40,20], index: 1, kind: input, shape index: {}]   ;;  %s15835_s2 = inlined_call_operand.vmem [shape: f32[40,40], index: 2, kind: input, shape index: {}]   ;;  %s15836_s3 = inlined_call_operand.vmem [shape: f32[4,1,20], index: 3, kind: input, shape index: {}]   ;;  %s15837_s4 = inlined_call_operand.vmem [shape: f32[4,1,20], index: 4, kind: input, shape index: {}]   ;;  %s15838_s5 = inlined_call_operand.vmem [shape: f32[4,20,60], index: 5, kind: input, shape index: {}]   ;;  %s15839_s6 = inlined_call_operand.vmem [shape: f32[4,4,5,20], index: 6, kind: input, shape index: {}]   ;;  %s15840_s7 = inlined_call_operand.vmem [shape: f32[4,1,20], index: 7, kind: input, shape index: {}]   ;;  %s15841_s8 = inlined_call_operand.vmem [shape: f32[4,1,20], index: 8, kind: input, shape index: {}]   ;;  %s15842_s9 = inlined_call_operand.vmem [shape: f32[4,1,20], index: 9, kind: input, shape index: {}]   ;;  %s15843_s10 = inlined_call_operand.vmem [shape: f32[4,20,80], index: 10, kind: input, shape index: {}]   ;;  %s15844_s11 = inlined_call_operand.vmem [shape: f32[4,1,80], index: 11, kind: input, shape index: {}]   ;;  %s15845_s12 = inlined_call_operand.vmem [shape: f32[4,80,20], index: 12, kind: input, shape index: {}]   ;;  %s15846_s13 = inlined_call_operand.vmem [shape: f32[4,1,20], index: 13, kind: input, shape index: {}]   ;;  %s15847_s14 = inlined_call_operand.vmem [shape: f32[1,20], index: 14, kind: input, shape index: {}]   ;;  %s15848_s15 = inlined_call_operand.vmem [shape: f32[1,20], index: 15, kind: input, shape index: {}]   ;;  %s15849_s16 = inlined_call_operand.vmem [shape: f32[20,128], index: 16, kind: input, shape index: {}]   ;;  %s15850_s17 = inlined_call_operand.vmem [shape: f32[1,128], index: 17, kind: input, shape index: {}]   ;;  %s15851_s18 = inlined_call_operand.hbm [shape: f32[40,128], index: 18, kind: output, shape index: {}]  }
   0x1   :  { %15878 = sst [smem:[#allocation5_spill]] %s15833_s0 }
   0x2   :  { %15879 = sst [smem:[#allocation6_spill]] %s15834_s1 }
   0x3   :  { %15880 = sst [smem:[#allocation7_spill]] %s15835_s2 }
   0x4   :  { %15881 = sst [smem:[#allocation8_spill]] %s15846_s13 }
   0x5   :  { %15882 = sst [smem:[#allocation9_spill]] %s15848_s15 }
   0x6   :  { %15883 = sst [smem:[#allocation10_spill]] %s15850_s17 }
   0x7   :  { %15884 = sst [smem:[#allocation11_spill]] %s15851_s18 }
   0x8   :  { %s15885_s29 = sld [smem:[#allocation5_spill]]  ;;  %vm82_vm0 = vcmask 162816  }
   0x9   :  { %s15886_s13 = sld [smem:[#allocation6_spill]] }
   0xe   :  { %v60_v0 = vld [vmem:[%s15885_s29] sm:$0xff]  ;;  %v62_v2 = vld [vmem:[%s15885_s29 + $0x10] sm:$0xff]  ;;  %v61_v5 = vld [vmem:[%s15885_s29 + $0x8] sm:$0xff] }
   0xf   :  { %v65_v1 = vld [vmem:[%s15886_s13] sm:$0xff]  ;;  %v67_v4 = vld [vmem:[%s15886_s13 + $0x10] sm:$0xff]  ;;  %v66_v6 = vld [vmem:[%s15886_s13 + $0x8] sm:$0xff] }
  0x10   :  { %v12468_v3 = vadd.f32 %v65_v1, %v60_v0  ;;  %v12479_v7 = vadd.f32 %v67_v4, %v62_v2  ;;  %v12481_v8 = vadd.f32 %v66_v6, %v61_v5  ;;  %v63_v9 = vld [vmem:[%s15885_s29 + $0x18] sm:$0xff]  ;;  %v64_v11 = vld [vmem:[%s15885_s29 + $0x20] sm:$0xff] }
  0x11   :  { %v68_v10 = vld [vmem:[%s15886_s13 + $0x18] sm:$0xff]  ;;  %v69_v14 = vld [vmem:[%s15886_s13 + $0x20] sm:$0xff] }
  0x12   :  { %v83_v12 = vsel %vm82_vm0, %v12468_v3, 0.0  ;;  %v12494_v13 = vadd.f32 %v68_v10, %v63_v9 }
  0x13   :  { %23 = vsyncpa [#allocation3], 0  ;;  %84 = vadd.xlane.f32.xlu0 %v83_v12  ;;  %v89_v15 = vsel %vm82_vm0, %v12479_v7, 0.0  ;;  %v86_v16 = vsel %vm82_vm0, %v12481_v8, 0.0  ;;  %v12503_v17 = vadd.f32 %v69_v14, %v64_v11  ;;  %v173_v45 = vld [vmem:[%s15838_s5 + $0x10] sm:$0xf] }
  0x14   :  { %90 = vadd.xlane.f32.xlu1 %v89_v15  ;;  %v92_v18 = vsel %vm82_vm0, %v12494_v13, 0.0  ;;  %vm189_vm1 = vcmask 1043456   ;;  %v12348_v46 = vmov 0.0   ;;  %v172_v47 = vld [vmem:[%s15838_s5 + $0x8] sm:$0xff]  ;;  %vm12349_vm2 = vmmov 0   ;;  %v171_v48 = vld [vmem:[%s15838_s5] sm:$0xff] }
  0x15   :  { %v95_v19 = vsel %vm82_vm0, %v12503_v17, 0.0  ;;  %10481 = vmatprep.subr.mxu0 %v12348_v46  ;;  %10502 = vmatprep.subr.mxu1 %v12348_v46  ;;  %v9408_v1 = vld [vmem:[%s15836_s3] ss:$0 sm:$0xff]  ;;  %s15876_s27 = smov 108   ;;  %s15874_s28 = smov 103   ;;  %vm298_vm3 = vcmask 39936  }
  0x16   :  { %10482 = vmatpush3.msk.msra.mxu0 %vm189_vm1, %v173_v45  ;;  %10487 = vmatprep.mubr.msk.f32.mxu0 %vm12349_vm2, %v12348_v46  ;;  %v9409_v4 = vld [vmem:[%s15837_s4] ss:$0 sm:$0xff]  ;;  %s15872_s30 = smov 123   ;;  %s15870_s0 = smov 88   ;;  %vm419_vm4 = vcmask 326656   ;;  %vm928_vm5 = vcmask 1044480  }
  0x17   :  { %87 = vadd.xlane.f32.xlu0 %v86_v16  ;;  %10483 = vmatprep.subr.mxu0 %v12348_v46  ;;  %s15887_s13 = sld [smem:[#allocation7_spill]]  ;;  %s15868_s26 = smov 83   ;;  %vm2229_vm6 = vcmask 654336  }
  0x18   :  { %93 = vadd.xlane.f32.xlu1 %v92_v18  ;;  %10512 = vmatprep.mubr.msk.f32.mxu1 %vm12349_vm2, %v12348_v46  ;;  %s15866_s19 = smov 98   ;;  %s15864_s1 = smov 118  }
  0x19   :  { %10484 = vmatpush3.msra.mxu0 %v172_v47  ;;  %s15862_s29 = smov 78   ;;  %s15860_s23 = smov 93  }
  0x1a   :  { %10485 = vmatprep.subr.mxu0 %v12348_v46  ;;  %s15858_s24 = smov 113   ;;  %s15856_s22 = smov 73  }
  0x1b   :  { %96 = vadd.xlane.f32.xlu0 %v95_v19  ;;  %10486 = vmatpush3.msra.mxu0 %v171_v48  ;;  %s15888_s20 = sld [smem:[#allocation8_spill]]  ;;  %s15889_s25 = smov 78  }
  0x1c   :  { %10527 = vmatprep.subr.mxu0 %v12348_v46  ;;  %s15892_s21 = smov 73   ;;  %s15896_s2 = smov 98  }
  0x9c   :  { %v85_v20 = vpop.xlane.xlu0 %84 }
  0x9d   :  { %v99_v21 = vmul.f32 0.05, %v85_v20  ;;  %v91_v22 = vpop.xlane.xlu1 %90 }
  0x9e   :  { %v101_v23 = vmul.f32 0.05, %v91_v22 }
  0x9f   :  { %v12510_v24 = vsub.f32 %v12468_v3, %v99_v21 }
  0xa0   :  { %v12513_v25 = vsub.f32 %v12479_v7, %v101_v23  ;;  %v88_v26 = vpop.xlane.xlu0 %87 }
  0xa1   :  { %v100_v27 = vmul.f32 0.05, %v88_v26  ;;  %v94_v28 = vpop.xlane.xlu1 %93  ;;  %v109_v29 = vmul.f32 %v12510_v24, %v12510_v24 }
  0xa2   :  { %v102_v30 = vmul.f32 0.05, %v94_v28  ;;  %v111_v31 = vmul.f32 %v12513_v25, %v12513_v25 }
  0xa3   :  { %v105_v32 = vsub.f32 %v12481_v8, %v100_v27  ;;  %v114_v33 = vsel %vm82_vm0, %v109_v29, 0.0 }
  0xa4   :  { %v12522_v34 = vsub.f32 %v12494_v13, %v102_v30  ;;  %115 = vadd.xlane.f32.xlu1 %v114_v33  ;;  %v97_v35 = vpop.xlane.xlu0 %96  ;;  %v120_v37 = vsel %vm82_vm0, %v111_v31, 0.0 }
  0xa5   :  { %v103_v36 = vmul.f32 0.05, %v97_v35  ;;  %v110_v38 = vmul.f32 %v105_v32, %v105_v32 }
  0xa6   :  { %v112_v39 = vmul.f32 %v12522_v34, %v12522_v34 }
  0xa7   :  { %v12528_v40 = vsub.f32 %v12503_v17, %v103_v36  ;;  %v117_v41 = vsel %vm82_vm0, %v110_v38, 0.0 }
  0xa8   :  { %121 = vadd.xlane.f32.xlu1 %v120_v37  ;;  %118 = vadd.xlane.f32.xlu0 %v117_v41  ;;  %v123_v42 = vsel %vm82_vm0, %v112_v39, 0.0 }
  0xa9   :  { %v113_v43 = vmul.f32 %v12528_v40, %v12528_v40 }
  0xab   :  { %v126_v44 = vsel %vm82_vm0, %v113_v43, 0.0 }
  0xac   :  { %124 = vadd.xlane.f32.xlu0 %v123_v42  ;;  %127 = vadd.xlane.f32.xlu1 %v126_v44 }
 0x12d   :  { %v116_v49 = vpop.xlane.xlu1 %115 }
 0x12e   :  { %v129_v50 = vmul.f32 0.05, %v116_v49 }
 0x130   :  { %v134_v51 = vadd.f32 1e-05, %v129_v50 }
 0x131   :  { %v122_v52 = vpop.xlane.xlu1 %121  ;;  %v119_v53 = vpop.xlane.xlu0 %118 }
 0x132   :  { %11898 = vrsqrt.f32 %v134_v51  ;;  %v131_v54 = vmul.f32 0.05, %v122_v52  ;;  %v130_v55 = vmul.f32 0.05, %v119_v53 }
 0x134   :  { %v136_v56 = vadd.f32 1e-05, %v131_v54  ;;  %v135_v57 = vadd.f32 1e-05, %v130_v55 }
 0x135   :  { %v128_v58 = vpop.xlane.xlu1 %127  ;;  %v125_v59 = vpop.xlane.xlu0 %124 }
 0x136   :  { %11900 = vrsqrt.f32 %v136_v56  ;;  %v133_v60 = vmul.f32 0.05, %v128_v58  ;;  %v132_v61 = vmul.f32 0.05, %v125_v59  ;;  %v12689_v58 = vld [vmem:[%s15887_s13] sm:$0xff] }
 0x137   :  { %11902 = vrsqrt.f32 %v135_v57 }
 0x138   :  { %v137_v62 = vadd.f32 1e-05, %v132_v61  ;;  %v138_v63 = vadd.f32 1e-05, %v133_v60 }
 0x13a   :  { %11904 = vrsqrt.f32 %v137_v62 }
 0x13b   :  { %11906 = vrsqrt.f32 %v138_v63  ;;  %v12697_v63 = vld [vmem:[%s15887_s13 + $0x8] sm:$0xff] }
 0x13f   :  { %v11899_v0 = vpop.eup %11898 }
 0x140   :  { %v144_v2 = vmul.f32 %v11899_v0, %v12510_v24 }
 0x142   :  { %v155_v5 = vmul.f32 %v9408_v1, %v144_v2 }
 0x143   :  { %v11901_v6 = vpop.eup %11900 }
 0x144   :  { %v11903_v9 = vpop.eup %11902  ;;  %v166_v10 = vadd.f32 %v9409_v4, %v155_v5  ;;  %v146_v12 = vmul.f32 %v11901_v6, %v12513_v25  ;;  %v12707_v6 = vld [vmem:[%s15887_s13 + $0x10] sm:$0xff] }
 0x145   :  { %v145_v11 = vmul.f32 %v11903_v9, %v105_v32 }
 0x146   :  { %10488 = vmatmul.mubr.msk.f32.vlgmr.msra.gmra.mxu0 %vm82_vm0, %v166_v10  ;;  %v157_v18 = vmul.f32 %v9408_v1, %v146_v12 }
 0x147   :  { %10490 = vmatprep.mubr.msk.f32.mxu0 %vm12349_vm2, %v12348_v46  ;;  %v156_v14 = vmul.f32 %v9408_v1, %v145_v11  ;;  %v11905_v15 = vpop.eup %11904 }
 0x148   :  { %v147_v19 = vmul.f32 %v11905_v15, %v12522_v34  ;;  %v11907_v20 = vpop.eup %11906  ;;  %v168_v21 = vadd.f32 %v9409_v4, %v157_v18  ;;  %v12715_v15 = vld [vmem:[%s15887_s13 + $0x18] sm:$0xff] }
 0x149   :  { %v167_v16 = vadd.f32 %v9409_v4, %v156_v14  ;;  %v148_v23 = vmul.f32 %v11907_v20, %v12528_v40 }
 0x14a   :  { %v158_v22 = vmul.f32 %v9408_v1, %v147_v19 }
 0x14b   :  { %10491 = vmatmul.mubr.msk.f32.gmra.mxu0 %vm82_vm0, %v167_v16  ;;  %v159_v25 = vmul.f32 %v9408_v1, %v148_v23 }
 0x14c   :  { %10493 = vmatprep.mubr.msk.f32.mxu0 %vm12349_vm2, %v12348_v46  ;;  %v169_v24 = vadd.f32 %v9409_v4, %v158_v22  ;;  %v12722_v22 = vld [vmem:[%s15887_s13 + $0x20] sm:$0xff] }
 0x14d   :  { %v170_v26 = vadd.f32 %v9409_v4, %v159_v25 }
 0x14f   :  { %10494 = vmatmul.mubr.msk.f32.gmra.mxu0 %vm82_vm0, %v168_v21 }
 0x150   :  { %10496 = vmatprep.mubr.msk.f32.mxu0 %vm12349_vm2, %v12348_v46 }
 0x153   :  { %10497 = vmatmul.mubr.msk.f32.gmra.mxu0 %vm82_vm0, %v169_v24 }
 0x154   :  { %10499 = vmatprep.mubr.msk.f32.mxu0 %vm12349_vm2, %v12348_v46 }
 0x157   :  { %10500 = vmatmul.mubr.msk.f32.gmra.mxu0 %vm82_vm0, %v170_v26 }
 0x158   :  { %10537 = vmatprep.mubr.msk.f32.mxu0 %vm12349_vm2, %v12348_v46 }
 0x206   :  { %v12579_v27 = vpop.f32.mrf.mxu0 }
 0x208   :  { %v10489_v28 = vpop.f32.mrf.mxu0 }
 0x20b   :  { %v12581_v29 = vpop.f32.mrf.mxu0 }
 0x20d   :  { %v10492_v30 = vpop.f32.mrf.mxu0 }
 0x20f   :  { %v12583_v31 = vpop.f32.mrf.mxu0 }
 0x211   :  { %v10495_v32 = vpop.f32.mrf.mxu0 }
 0x213   :  { %v12585_v33 = vpop.f32.mrf.mxu0 }
 0x214   :  { %294 = vrot.lane.b32.xlu1 %v12585_v33, %s15876_s27 }
 0x215   :  { %v10498_v34 = vpop.f32.mrf.mxu0 }
 0x217   :  { %v12589_v35 = vpop.f32.mrf.mxu0 }
 0x218   :  { %292 = vrot.lane.b32.xlu1 %v12583_v31, %s15876_s27  ;;  %296 = vrot.lane.b32.xlu0 %v12589_v35, %s15876_s27 }
 0x219   :  { %v10501_v36 = vpop.f32.mrf.mxu0 }
 0x21c   :  { %290 = vrot.lane.b32.xlu1 %v12581_v29, %s15876_s27  ;;  %288 = vrot.lane.b32.xlu0 %v12579_v27, %s15876_s27 }
 0x220   :  { %614 = vrot.lane.b32.xlu1 %v12589_v35, %s15874_s28  ;;  %612 = vrot.lane.b32.xlu0 %v12585_v33, %s15874_s28 }
 0x224   :  { %610 = vrot.lane.b32.xlu1 %v12583_v31, %s15874_s28  ;;  %608 = vrot.lane.b32.xlu0 %v12581_v29, %s15874_s28 }
 0x228   :  { %606 = vrot.lane.b32.xlu1 %v12579_v27, %s15874_s28  ;;  %596 = vrot.lane.b32.xlu0 %v12579_v27, %s15872_s30 }
 0x22c   :  { %598 = vrot.lane.b32.xlu1 %v12581_v29, %s15872_s30  ;;  %600 = vrot.lane.b32.xlu0 %v12583_v31, %s15872_s30 }
 0x230   :  { %602 = vrot.lane.b32.xlu1 %v12585_v33, %s15872_s30  ;;  %604 = vrot.lane.b32.xlu0 %v12589_v35, %s15872_s30 }
 0x234   :  { %481 = vrot.lane.b32.xlu1 %v12585_v33, %s15870_s0  ;;  %483 = vrot.lane.b32.xlu0 %v12589_v35, %s15870_s0 }
 0x238   :  { %479 = vrot.lane.b32.xlu1 %v12583_v31, %s15870_s0 }
 0x23c   :  { %477 = vrot.lane.b32.xlu1 %v12581_v29, %s15870_s0 }
 0x286   :  { %v295_v37 = vpop.permute.xlu1 %294 }
 0x28a   :  { %v293_v38 = vpop.permute.xlu1 %292  ;;  %v297_v39 = vpop.permute.xlu0 %296 }
 0x28b   :  { %10503 = vmatpush3.xpose.msk.msra.mxu1 %vm298_vm3, %v297_v39 }
 0x28c   :  { %10504 = vmatprep.subr.mxu1 %v12348_v46 }
 0x28e   :  { %v291_v40 = vpop.permute.xlu1 %290  ;;  %v289_v41 = vpop.permute.xlu0 %288 }
 0x28f   :  { %10505 = vmatpush3.xpose.msk.msra.mxu1 %vm298_vm3, %v295_v37 }
 0x290   :  { %10506 = vmatprep.subr.mxu1 %v12348_v46 }
 0x292   :  { %v615_v42 = vpop.permute.xlu1 %614  ;;  %v613_v43 = vpop.permute.xlu0 %612 }
 0x293   :  { %10507 = vmatpush3.xpose.msk.msra.mxu1 %vm298_vm3, %v293_v38 }
 0x294   :  { %10508 = vmatprep.subr.mxu1 %v12348_v46 }
 0x296   :  { %v611_v44 = vpop.permute.xlu1 %610  ;;  %v609_v45 = vpop.permute.xlu0 %608 }
 0x297   :  { %10509 = vmatpush3.xpose.msk.msra.mxu1 %vm298_vm3, %v291_v40 }
 0x298   :  { %10510 = vmatprep.subr.mxu1 %v12348_v46 }
 0x29a   :  { %v607_v47 = vpop.permute.xlu1 %606  ;;  %v597_v48 = vpop.permute.xlu0 %596 }
 0x29b   :  { %10511 = vmatpush3.xpose.msk.msra.mxu1 %vm298_vm3, %v289_v41 }
 0x29c   :  { %10552 = vmatprep.subr.mxu1 %v12348_v46 }
 0x29e   :  { %v599_v49 = vpop.permute.xlu1 %598  ;;  %10513 = vmatmul.mubr.msk.f32.vlgmr.msra.gmra.mxu1 %vm298_vm3, %v12579_v27  ;;  %v601_v50 = vpop.permute.xlu0 %600 }
 0x29f   :  { %10553 = vmatpush3.xpose.msk.msra.mxu1 %vm298_vm3, %v615_v42  ;;  %10515 = vmatprep.mubr.msk.f32.mxu1 %vm12349_vm2, %v12348_v46 }
 0x2a0   :  { %10554 = vmatprep.subr.mxu1 %v12348_v46 }
 0x2a2   :  { %v603_v51 = vpop.permute.xlu1 %602  ;;  %10516 = vmatmul.mubr.msk.f32.gmra.mxu1 %vm298_vm3, %v12581_v29  ;;  %v605_v52 = vpop.permute.xlu0 %604 }
 0x2a3   :  { %10555 = vmatpush3.xpose.msk.msra.mxu1 %vm298_vm3, %v613_v43  ;;  %10518 = vmatprep.mubr.msk.f32.mxu1 %vm12349_vm2, %v12348_v46 }
 0x2a4   :  { %10556 = vmatprep.subr.mxu1 %v12348_v46 }
 0x2a6   :  { %v482_v53 = vpop.permute.xlu1 %481  ;;  %10519 = vmatmul.mubr.msk.f32.gmra.mxu1 %vm298_vm3, %v12583_v31  ;;  %v484_v54 = vpop.permute.xlu0 %483 }
 0x2a7   :  { %10528 = vmatpush3.msra.mxu0 %v484_v54  ;;  %10557 = vmatpush3.xpose.msk.msra.mxu1 %vm298_vm3, %v611_v44 }
 0x2a8   :  { %10529 = vmatprep.subr.mxu0 %v12348_v46  ;;  %10521 = vmatprep.mubr.msk.f32.mxu1 %vm12349_vm2, %v12348_v46 }
 0x2a9   :  { %10530 = vmatpush3.msra.mxu0 %v482_v53  ;;  %10558 = vmatprep.subr.mxu1 %v12348_v46 }
 0x2aa   :  { %v480_v55 = vpop.permute.xlu1 %479  ;;  %10522 = vmatmul.mubr.msk.f32.gmra.mxu1 %vm298_vm3, %v12585_v33  ;;  %10531 = vmatprep.subr.mxu0 %v12348_v46 }
 0x2ab   :  { %10532 = vmatpush3.msra.mxu0 %v480_v55  ;;  %10559 = vmatpush3.xpose.msk.msra.mxu1 %vm298_vm3, %v609_v45 }
 0x2ac   :  { %10524 = vmatprep.mubr.msk.f32.mxu1 %vm12349_vm2, %v12348_v46  ;;  %10533 = vmatprep.subr.mxu0 %v12348_v46 }
 0x2ad   :  { %10560 = vmatprep.subr.mxu1 %v12348_v46 }
 0x2ae   :  { %v478_v56 = vpop.permute.xlu1 %477  ;;  %10525 = vmatmul.mubr.msk.f32.gmra.mxu1 %vm298_vm3, %v12589_v35 }
 0x2af   :  { %10534 = vmatpush3.msra.mxu0 %v478_v56  ;;  %10561 = vmatpush3.xpose.msk.msra.mxu1 %vm298_vm3, %v607_v47 }
 0x2b0   :  { %10562 = vmatprep.mubr.msk.f32.mxu1 %vm12349_vm2, %v12348_v46  ;;  %10535 = vmatprep.subr.mxu0 %v12348_v46 }
 0x2b1   :  { %10602 = vmatprep.subr.mxu1 %v12348_v46 }
 0x2b2   :  { %10563 = vmatmul.mubr.msk.f32.vlgmr.msra.gmra.mxu1 %vm298_vm3, %v597_v48 }
 0x2b3   :  { %10565 = vmatprep.mubr.msk.f32.mxu1 %vm12349_vm2, %v12348_v46 }
 0x2b6   :  { %10566 = vmatmul.mubr.msk.f32.gmra.mxu1 %vm298_vm3, %v599_v49 }
 0x2b7   :  { %10568 = vmatprep.mubr.msk.f32.mxu1 %vm12349_vm2, %v12348_v46 }
 0x2ba   :  { %10569 = vmatmul.mubr.msk.f32.gmra.mxu1 %vm298_vm3, %v601_v50 }
 0x2bb   :  { %10571 = vmatprep.mubr.msk.f32.mxu1 %vm12349_vm2, %v12348_v46 }
 0x2be   :  { %10572 = vmatmul.mubr.msk.f32.gmra.mxu1 %vm298_vm3, %v603_v51 }
 0x2bf   :  { %10574 = vmatprep.mubr.msk.f32.mxu1 %vm12349_vm2, %v12348_v46 }
 0x2c2   :  { %10575 = vmatmul.mubr.msk.f32.gmra.mxu1 %vm298_vm3, %v605_v52 }
 0x2c3   :  { %10604 = vmatprep.mubr.msk.f32.mxu1 %vm12349_vm2, %v12348_v46 }
 0x35e   :  { %v385_v57 = vpop.f32.mrf.mxu1 }
 0x35f   :  { %v409_v59 = vmul.f32 0.4472136, %v385_v57 }
 0x360   :  { %v10514_v60 = vpop.f32.mrf.mxu1 }
 0x361   :  { %v12692_v61 = vadd.f32 %v409_v59, %v12689_v58 }
 0x362   :  { %v390_v62 = vpop.f32.mrf.mxu1 }
 0x363   :  { %v410_v0 = vmul.f32 0.4472136, %v390_v62  ;;  %v420_v1 = vsel %vm419_vm4, %v12692_v61, -inf }
 0x364   :  { %421 = vmax.xlane.f32.xlu1 %v420_v1  ;;  %v10517_v2 = vpop.f32.mrf.mxu1 }
 0x365   :  { %v12702_v4 = vadd.f32 %v410_v0, %v12697_v63 }
 0x366   :  { %v395_v5 = vpop.f32.mrf.mxu1 }
 0x367   :  { %v411_v9 = vmul.f32 0.4472136, %v395_v5  ;;  %v423_v10 = vsel %vm419_vm4, %v12702_v4, -inf }
 0x368   :  { %424 = vmax.xlane.f32.xlu0 %v423_v10  ;;  %v10520_v11 = vpop.f32.mrf.mxu1 }
 0x369   :  { %v416_v12 = vadd.f32 %v411_v9, %v12707_v6 }
 0x36a   :  { %v400_v14 = vpop.f32.mrf.mxu1 }
 0x36b   :  { %v412_v16 = vmul.f32 0.4472136, %v400_v14  ;;  %v426_v18 = vsel %vm419_vm4, %v416_v12, -inf }
 0x36c   :  { %427 = vmax.xlane.f32.xlu0 %v426_v18  ;;  %v10523_v19 = vpop.f32.mrf.mxu1 }
 0x36d   :  { %v417_v20 = vadd.f32 %v412_v16, %v12715_v15 }
 0x36e   :  { %v405_v21 = vpop.f32.mrf.mxu1 }
 0x36f   :  { %v413_v23 = vmul.f32 0.4472136, %v405_v21  ;;  %v429_v24 = vsel %vm419_vm4, %v417_v20, -inf }
 0x370   :  { %430 = vmax.xlane.f32.xlu0 %v429_v24  ;;  %v10526_v25 = vpop.f32.mrf.mxu1 }
 0x371   :  { %v418_v26 = vadd.f32 %v413_v23, %v12722_v22 }
 0x372   :  { %v702_v28 = vpop.f32.mrf.mxu1 }
 0x373   :  { %v726_v30 = vmul.f32 0.4472136, %v702_v28  ;;  %v432_v32 = vsel %vm419_vm4, %v418_v26, -inf }
 0x374   :  { %433 = vmax.xlane.f32.xlu1 %v432_v32  ;;  %v10564_v34 = vpop.f32.mrf.mxu1 }
 0x375   :  { %v731_v36 = vadd.f32 %v726_v30, %v12689_v58 }
 0x376   :  { %v707_v37 = vpop.f32.mrf.mxu1 }
 0x377   :  { %v727_v38 = vmul.f32 0.4472136, %v707_v37  ;;  %v736_v39 = vsel %vm419_vm4, %v731_v36, -inf }
 0x378   :  { %737 = vmax.xlane.f32.xlu0 %v736_v39  ;;  %v10567_v40 = vpop.f32.mrf.mxu1 }
 0x379   :  { %v732_v41 = vadd.f32 %v727_v38, %v12697_v63 }
 0x37a   :  { %v712_v42 = vpop.f32.mrf.mxu1 }
 0x37b   :  { %v728_v43 = vmul.f32 0.4472136, %v712_v42  ;;  %v739_v44 = vsel %vm419_vm4, %v732_v41, -inf }
 0x37c   :  { %740 = vmax.xlane.f32.xlu1 %v739_v44  ;;  %v10570_v45 = vpop.f32.mrf.mxu1 }
 0x37d   :  { %v12732_v47 = vadd.f32 %v728_v43, %v12707_v6 }
 0x37e   :  { %v717_v48 = vpop.f32.mrf.mxu1 }
 0x37f   :  { %v742_v49 = vsel %vm419_vm4, %v12732_v47, -inf  ;;  %v729_v53 = vmul.f32 0.4472136, %v717_v48 }
 0x380   :  { %743 = vmax.xlane.f32.xlu0 %v742_v49  ;;  %v10573_v50 = vpop.f32.mrf.mxu1 }
 0x381   :  { %v12741_v55 = vadd.f32 %v729_v53, %v12715_v15 }
 0x382   :  { %v722_v51 = vpop.f32.mrf.mxu1 }
 0x383   :  { %v730_v54 = vmul.f32 0.4472136, %v722_v51  ;;  %v745_v56 = vsel %vm419_vm4, %v12741_v55, -inf }
 0x384   :  { %v10576_v52 = vpop.f32.mrf.mxu1 }
 0x385   :  { %v12746_v57 = vadd.f32 %v730_v54, %v12722_v22 }
 0x387   :  { %v748_v59 = vsel %vm419_vm4, %v12746_v57, -inf }
 0x38d   :  { %475 = vrot.lane.b32.xlu1 %v12579_v27, %s15870_s0 }
 0x396   :  { %799 = vrot.lane.b32.xlu0 %v12589_v35, %s15868_s26 }
 0x3b1   :  { %746 = vmax.xlane.f32.xlu1 %v745_v56 }
 0x3b5   :  { %749 = vmax.xlane.f32.xlu0 %v748_v59 }
 0x3c2   :  { %797 = vrot.lane.b32.xlu1 %v12585_v33, %s15868_s26 }
 0x3cb   :  { %795 = vrot.lane.b32.xlu0 %v12583_v31, %s15868_s26 }
 0x3ed   :  { %v422_v60 = vpop.xlane.xlu1 %421 }
 0x3ee   :  { %v435_v62 = vsub.f32 %v12692_v61, %v422_v60 }
 0x3f0   :  { %v440_v0 = vmul.f32 1.442695, %v435_v62 }
 0x3f1   :  { %v425_v1 = vpop.xlane.xlu0 %424 }
 0x3f2   :  { %11908 = vpow2.f32 %v440_v0  ;;  %v436_v2 = vsub.f32 %v12702_v4, %v425_v1 }
 0x3f4   :  { %v442_v5 = vmul.f32 1.442695, %v436_v2 }
 0x3f5   :  { %v428_v9 = vpop.xlane.xlu0 %427 }
 0x3f6   :  { %11910 = vpow2.f32 %v442_v5  ;;  %v437_v10 = vsub.f32 %v416_v12, %v428_v9 }
 0x3f8   :  { %v444_v11 = vmul.f32 1.442695, %v437_v10 }
 0x3f9   :  { %v431_v14 = vpop.xlane.xlu0 %430 }
 0x3fa   :  { %11912 = vpow2.f32 %v444_v11  ;;  %v438_v16 = vsub.f32 %v417_v20, %v431_v14 }
 0x3fc   :  { %v446_v18 = vmul.f32 1.442695, %v438_v16 }
 0x3fd   :  { %v434_v19 = vpop.xlane.xlu1 %433 }
 0x3fe   :  { %11914 = vpow2.f32 %v446_v18  ;;  %v439_v21 = vsub.f32 %v418_v26, %v434_v19 }
 0x3ff   :  { %v12756_v23 = vpop.eup %11908 }
 0x400   :  { %v448_v61 = vmul.f32 1.442695, %v439_v21  ;;  %v450_v24 = vsel %vm419_vm4, %v12756_v23, 0.0 }
 0x401   :  { %451 = vadd.xlane.f32.xlu1 %v450_v24  ;;  %v738_v4 = vpop.xlane.xlu0 %737 }
 0x402   :  { %11916 = vpow2.f32 %v448_v61  ;;  %v751_v25 = vsub.f32 %v731_v36, %v738_v4 }
 0x403   :  { %v12760_v28 = vpop.eup %11910 }
 0x404   :  { %v756_v12 = vmul.f32 1.442695, %v751_v25  ;;  %v453_v20 = vsel %vm419_vm4, %v12760_v28, 0.0 }
 0x405   :  { %v741_v30 = vpop.xlane.xlu1 %740  ;;  %454 = vadd.xlane.f32.xlu0 %v453_v20 }
 0x406   :  { %11918 = vpow2.f32 %v756_v12  ;;  %v752_v26 = vsub.f32 %v732_v41, %v741_v30 }
 0x407   :  { %v12764_v32 = vpop.eup %11912 }
 0x408   :  { %v758_v34 = vmul.f32 1.442695, %v752_v26  ;;  %v456_v37 = vsel %vm419_vm4, %v12764_v32, 0.0 }
 0x409   :  { %v476_v38 = vpop.permute.xlu1 %475  ;;  %457 = vadd.xlane.f32.xlu1 %v456_v37  ;;  %v744_v39 = vpop.xlane.xlu0 %743 }
 0x40a   :  { %11920 = vpow2.f32 %v758_v34  ;;  %v753_v36 = vsub.f32 %v12732_v47, %v744_v39  ;;  %10536 = vmatpush3.msra.mxu0 %v476_v38 }
 0x40b   :  { %v12769_v40 = vpop.eup %11914  ;;  %10577 = vmatprep.subr.mxu0 %v12348_v46 }
 0x40c   :  { %v760_v42 = vmul.f32 1.442695, %v753_v36  ;;  %v459_v41 = vsel %vm419_vm4, %v12769_v40, 0.0 }
 0x40d   :  { %460 = vadd.xlane.f32.xlu0 %v459_v41  ;;  %v800_v52 = vpop.permute.xlu0 %799 }
 0x40e   :  { %11922 = vpow2.f32 %v760_v42 }
 0x40f   :  { %v12774_v43 = vpop.eup %11916 }
 0x410   :  { %v462_v44 = vsel %vm419_vm4, %v12774_v43, 0.0 }
 0x411   :  { %463 = vadd.xlane.f32.xlu1 %v462_v44 }
 0x413   :  { %v12778_v45 = vpop.eup %11918 }
 0x414   :  { %v766_v47 = vsel %vm419_vm4, %v12778_v45, 0.0 }
 0x415   :  { %767 = vadd.xlane.f32.xlu1 %v766_v47 }
 0x417   :  { %v12782_v48 = vpop.eup %11920 }
 0x418   :  { %v769_v49 = vsel %vm419_vm4, %v12782_v48, 0.0 }
 0x419   :  { %770 = vadd.xlane.f32.xlu0 %v769_v49 }
 0x41b   :  { %v12786_v50 = vpop.eup %11922 }
 0x41c   :  { %v772_v51 = vsel %vm419_vm4, %v12786_v50, 0.0 }
 0x41d   :  { %773 = vadd.xlane.f32.xlu1 %v772_v51 }
 0x42e   :  { %793 = vrot.lane.b32.xlu1 %v12581_v29, %s15868_s26 }
 0x432   :  { %1148 = vrot.lane.b32.xlu1 %v12589_v35, %s15866_s19 }
 0x436   :  { %1144 = vrot.lane.b32.xlu1 %v12583_v31, %s15866_s19 }
 0x43a   :  { %v747_v53 = vpop.xlane.xlu1 %746  ;;  %1140 = vrot.lane.b32.xlu1 %v12579_v27, %s15866_s19 }
 0x43b   :  { %v754_v54 = vsub.f32 %v12741_v55, %v747_v53 }
 0x43d   :  { %v762_v56 = vmul.f32 1.442695, %v754_v54 }
 0x43e   :  { %1132 = vrot.lane.b32.xlu1 %v12581_v29, %s15864_s1  ;;  %v750_v59 = vpop.xlane.xlu0 %749  ;;  %v798_v2 = vpop.permute.xlu1 %797 }
 0x43f   :  { %11924 = vpow2.f32 %v762_v56  ;;  %v755_v60 = vsub.f32 %v12746_v57, %v750_v59 }
 0x441   :  { %v764_v62 = vmul.f32 1.442695, %v755_v60 }
 0x442   :  { %1136 = vrot.lane.b32.xlu1 %v12585_v33, %s15864_s1  ;;  %v796_v5 = vpop.permute.xlu0 %795 }
 0x443   :  { %11926 = vpow2.f32 %v764_v62 }
 0x446   :  { %1333 = vrot.lane.b32.xlu1 %v12589_v35, %s15862_s29 }
 0x44a   :  { %1329 = vrot.lane.b32.xlu1 %v12583_v31, %s15862_s29 }
 0x44c   :  { %v12808_v55 = vpop.eup %11924 }
 0x44d   :  { %v775_v0 = vsel %vm419_vm4, %v12808_v55, 0.0 }
 0x44e   :  { %776 = vadd.xlane.f32.xlu0 %v775_v0  ;;  %1327 = vrot.lane.b32.xlu1 %v12581_v29, %s15862_s29 }
 0x450   :  { %v12814_v57 = vpop.eup %11926 }
 0x451   :  { %v778_v1 = vsel %vm419_vm4, %v12814_v57, 0.0 }
 0x452   :  { %1325 = vrot.lane.b32.xlu1 %v12579_v27, %s15862_s29  ;;  %779 = vadd.xlane.f32.xlu0 %v778_v1 }
 0x468   :  { %791 = vrot.lane.b32.xlu0 %v12579_v27, %s15868_s26 }
 0x46c   :  { %1146 = vrot.lane.b32.xlu0 %v12585_v33, %s15866_s19 }
 0x470   :  { %1142 = vrot.lane.b32.xlu0 %v12581_v29, %s15866_s19 }
 0x474   :  { %1130 = vrot.lane.b32.xlu0 %v12579_v27, %s15864_s1 }
 0x478   :  { %1134 = vrot.lane.b32.xlu0 %v12583_v31, %s15864_s1 }
 0x47c   :  { %1138 = vrot.lane.b32.xlu0 %v12589_v35, %s15864_s1 }
 0x480   :  { %1331 = vrot.lane.b32.xlu0 %v12585_v33, %s15862_s29  ;;  %s15890_s29 = smov 93  }
 0x48a   :  { %v452_v9 = vpop.xlane.xlu1 %451 }
 0x48b   :  { %11928 = vrcp.f32 %v452_v9 }
 0x48e   :  { %v455_v10 = vpop.xlane.xlu0 %454 }
 0x48f   :  { %11930 = vrcp.f32 %v455_v10 }
 0x492   :  { %v458_v11 = vpop.xlane.xlu1 %457 }
 0x493   :  { %11932 = vrcp.f32 %v458_v11 }
 0x496   :  { %v461_v14 = vpop.xlane.xlu0 %460 }
 0x497   :  { %11934 = vrcp.f32 %v461_v14 }
 0x498   :  { %v11929_v16 = vpop.eup %11928 }
 0x499   :  { %v470_v18 = vmul.f32 %v11929_v16, %v12756_v23 }
 0x49a   :  { %v464_v19 = vpop.xlane.xlu1 %463 }
 0x49b   :  { %11936 = vrcp.f32 %v464_v19  ;;  %10538 = vmatmul.mubr.msk.f32.vlgmr.msra.gmra.mxu0 %vm419_vm4, %v470_v18 }
 0x49c   :  { %v11931_v21 = vpop.eup %11930  ;;  %10578 = vmatpush3.msra.mxu0 %v800_v52  ;;  %10540 = vmatprep.mubr.msk.f32.mxu0 %vm12349_vm2, %v12348_v46 }
 0x49d   :  { %10579 = vmatprep.subr.mxu0 %v12348_v46  ;;  %v471_v61 = vmul.f32 %v11931_v21, %v12760_v28 }
 0x49e   :  { %10580 = vmatpush3.msra.mxu0 %v798_v2  ;;  %v768_v4 = vpop.xlane.xlu1 %767 }
 0x49f   :  { %10581 = vmatprep.subr.mxu0 %v12348_v46  ;;  %10541 = vmatmul.mubr.msk.f32.gmra.mxu0 %vm419_vm4, %v471_v61  ;;  %11938 = vrcp.f32 %v768_v4 }
 0x4a0   :  { %v11933_v24 = vpop.eup %11932  ;;  %10582 = vmatpush3.msra.mxu0 %v796_v5  ;;  %10543 = vmatprep.mubr.msk.f32.mxu0 %vm12349_vm2, %v12348_v46 }
 0x4a1   :  { %v472_v23 = vmul.f32 %v11933_v24, %v12764_v32  ;;  %10583 = vmatprep.subr.mxu0 %v12348_v46 }
 0x4a2   :  { %v771_v32 = vpop.xlane.xlu0 %770 }
 0x4a3   :  { %10544 = vmatmul.mubr.msk.f32.gmra.mxu0 %vm419_vm4, %v472_v23  ;;  %11940 = vrcp.f32 %v771_v32 }
 0x4a4   :  { %v11935_v25 = vpop.eup %11934  ;;  %10546 = vmatprep.mubr.msk.f32.mxu0 %vm12349_vm2, %v12348_v46 }
 0x4a5   :  { %v473_v28 = vmul.f32 %v11935_v25, %v12769_v40  ;;  %v595_v40 = vld [vmem:[%s15839_s6] sm:$0x1f] }
 0x4a6   :  { %v774_v12 = vpop.xlane.xlu1 %773 }
 0x4a7   :  { %10547 = vmatmul.mubr.msk.f32.gmra.mxu0 %vm419_vm4, %v473_v28  ;;  %11942 = vrcp.f32 %v774_v12 }
 0x4a8   :  { %v11937_v20 = vpop.eup %11936  ;;  %10549 = vmatprep.mubr.msk.f32.mxu0 %vm12349_vm2, %v12348_v46 }
 0x4a9   :  { %v474_v30 = vmul.f32 %v11937_v20, %v12774_v43 }
 0x4aa   :  { %v794_v26 = vpop.permute.xlu1 %793 }
 0x4ab   :  { %10550 = vmatmul.mubr.msk.f32.gmra.mxu0 %vm419_vm4, %v474_v30 }
 0x4ac   :  { %10584 = vmatpush3.msra.mxu0 %v794_v26  ;;  %10587 = vmatprep.mubr.msk.f32.mxu0 %vm12349_vm2, %v12348_v46  ;;  %v11939_v38 = vpop.eup %11938 }
 0x4ad   :  { %10585 = vmatprep.subr.mxu0 %v12348_v46  ;;  %v786_v39 = vmul.f32 %v11939_v38, %v12778_v45 }
 0x4ae   :  { %v1149_v51 = vpop.permute.xlu1 %1148 }
 0x4b0   :  { %v11941_v42 = vpop.eup %11940 }
 0x4b1   :  { %v787_v41 = vmul.f32 %v11941_v42, %v12782_v48  ;;  %v9446_v48 = vld [vmem:[%s15839_s6 + $0x8] sm:$0x1f] }
 0x4b2   :  { %10603 = vmatpush3.msk.msra.mxu1 %vm928_vm5, %v9446_v48  ;;  %v1145_v52 = vpop.permute.xlu1 %1144 }
 0x4b3   :  { %10636 = vmatprep.subr.mxu1 %v12348_v46 }
 0x4b4   :  { %v11943_v43 = vpop.eup %11942 }
 0x4b5   :  { %v788_v44 = vmul.f32 %v11943_v43, %v12786_v50 }
 0x4b6   :  { %v12889_v53 = vpop.permute.xlu1 %1140 }
 0x4ba   :  { %v12891_v56 = vpop.permute.xlu1 %1132 }
 0x4be   :  { %v12893_v60 = vpop.permute.xlu1 %1136 }
 0x4d7   :  { %v777_v34 = vpop.xlane.xlu0 %776 }
 0x4d8   :  { %11944 = vrcp.f32 %v777_v34 }
 0x4db   :  { %v780_v37 = vpop.xlane.xlu0 %779 }
 0x4dc   :  { %11946 = vrcp.f32 %v780_v37 }
 0x4df   :  { %v792_v36 = vpop.permute.xlu0 %791 }
 0x4e0   :  { %10586 = vmatpush3.msra.mxu0 %v792_v36 }
 0x4e1   :  { %10588 = vmatmul.mubr.msk.f32.vlgmr.msra.gmra.mxu0 %vm419_vm4, %v786_v39  ;;  %10619 = vmatprep.subr.mxu0 %v12348_v46 }
 0x4e2   :  { %10590 = vmatprep.mubr.msk.f32.mxu0 %vm12349_vm2, %v12348_v46  ;;  %10620 = vmatpush3.msk.msra.mxu0 %vm928_vm5, %v595_v40 }
 0x4e3   :  { %10661 = vmatprep.subr.mxu0 %v12348_v46  ;;  %v1147_v54 = vpop.permute.xlu0 %1146 }
 0x4e5   :  { %10591 = vmatmul.mubr.msk.f32.gmra.mxu0 %vm419_vm4, %v787_v41  ;;  %v11945_v45 = vpop.eup %11944 }
 0x4e6   :  { %10593 = vmatprep.mubr.msk.f32.mxu0 %vm12349_vm2, %v12348_v46  ;;  %v789_v47 = vmul.f32 %v11945_v45, %v12808_v55  ;;  %v1334_v55 = vpop.permute.xlu1 %1333 }
 0x4e7   :  { %v1143_v59 = vpop.permute.xlu0 %1142 }
 0x4e9   :  { %10594 = vmatmul.mubr.msk.f32.gmra.mxu0 %vm419_vm4, %v788_v44  ;;  %v11947_v49 = vpop.eup %11946 }
 0x4ea   :  { %10596 = vmatprep.mubr.msk.f32.mxu0 %vm12349_vm2, %v12348_v46  ;;  %v790_v50 = vmul.f32 %v11947_v49, %v12814_v57  ;;  %v1330_v57 = vpop.permute.xlu1 %1329 }
 0x4eb   :  { %v12895_v62 = vpop.permute.xlu0 %1130 }
 0x4ed   :  { %10597 = vmatmul.mubr.msk.f32.gmra.mxu0 %vm419_vm4, %v789_v47 }
 0x4ee   :  { %10599 = vmatprep.mubr.msk.f32.mxu0 %vm12349_vm2, %v12348_v46  ;;  %v1328_v9 = vpop.permute.xlu1 %1327 }
 0x4ef   :  { %v12897_v0 = vpop.permute.xlu0 %1134 }
 0x4f1   :  { %10600 = vmatmul.mubr.msk.f32.gmra.mxu0 %vm419_vm4, %v790_v50 }
 0x4f2   :  { %10621 = vmatprep.mubr.msk.f32.mxu0 %vm12349_vm2, %v12348_v46  ;;  %v1326_v18 = vpop.permute.xlu1 %1325 }
 0x4f3   :  { %v12899_v1 = vpop.permute.xlu0 %1138 }
 0x4f7   :  { %v1332_v10 = vpop.permute.xlu0 %1331 }
 0x55b   :  { %v571_v2 = vpop.f32.mrf.mxu0 }
 0x55c   :  { %10622 = vmatmul.mubr.msk.f32.vlgmr.msra.gmra.mxu0 %vm298_vm3, %v571_v2 }
 0x55d   :  { %10662 = vmatpush3.msra.mxu0 %v1334_v55  ;;  %v10539_v5 = vpop.f32.mrf.mxu0  ;;  %10624 = vmatprep.mubr.msk.f32.mxu0 %vm12349_vm2, %v12348_v46 }
 0x55e   :  { %10663 = vmatprep.subr.mxu0 %v12348_v46 }
 0x55f   :  { %10664 = vmatpush3.msra.mxu0 %v1332_v10  ;;  %v576_v11 = vpop.f32.mrf.mxu0 }
 0x560   :  { %10665 = vmatprep.subr.mxu0 %v12348_v46  ;;  %10625 = vmatmul.mubr.msk.f32.gmra.mxu0 %vm298_vm3, %v576_v11 }
 0x561   :  { %10666 = vmatpush3.msra.mxu0 %v1330_v57  ;;  %v10542_v14 = vpop.f32.mrf.mxu0  ;;  %10627 = vmatprep.mubr.msk.f32.mxu0 %vm12349_vm2, %v12348_v46 }
 0x562   :  { %10667 = vmatprep.subr.mxu0 %v12348_v46 }
 0x563   :  { %10668 = vmatpush3.msra.mxu0 %v1328_v9  ;;  %v581_v16 = vpop.f32.mrf.mxu0 }
 0x564   :  { %10669 = vmatprep.subr.mxu0 %v12348_v46  ;;  %10628 = vmatmul.mubr.msk.f32.gmra.mxu0 %vm298_vm3, %v581_v16 }
 0x565   :  { %10670 = vmatpush3.msra.mxu0 %v1326_v18  ;;  %v10545_v19 = vpop.f32.mrf.mxu0  ;;  %10630 = vmatprep.mubr.msk.f32.mxu0 %vm12349_vm2, %v12348_v46 }
 0x566   :  { %10703 = vmatprep.subr.mxu0 %v12348_v46 }
 0x567   :  { %v586_v21 = vpop.f32.mrf.mxu0 }
 0x568   :  { %10631 = vmatmul.mubr.msk.f32.gmra.mxu0 %vm298_vm3, %v586_v21 }
 0x569   :  { %v10548_v61 = vpop.f32.mrf.mxu0  ;;  %10633 = vmatprep.mubr.msk.f32.mxu0 %vm12349_vm2, %v12348_v46 }
 0x56b   :  { %v591_v24 = vpop.f32.mrf.mxu0 }
 0x56c   :  { %10634 = vmatmul.mubr.msk.f32.gmra.mxu0 %vm298_vm3, %v591_v24 }
 0x56d   :  { %v10551_v23 = vpop.f32.mrf.mxu0  ;;  %10671 = vmatprep.mubr.msk.f32.mxu0 %vm12349_vm2, %v12348_v46 }
 0x5a1   :  { %v887_v4 = vpop.f32.mrf.mxu0 }
 0x5a2   :  { %10605 = vmatmul.mubr.msk.f32.vlgmr.msra.gmra.mxu1 %vm298_vm3, %v887_v4 }
 0x5a3   :  { %10637 = vmatpush3.xpose.msk.msra.mxu1 %vm298_vm3, %v1149_v51  ;;  %v10589_v25 = vpop.f32.mrf.mxu0  ;;  %10607 = vmatprep.mubr.msk.f32.mxu1 %vm12349_vm2, %v12348_v46 }
 0x5a4   :  { %10638 = vmatprep.subr.mxu1 %v12348_v46 }
 0x5a5   :  { %v892_v28 = vpop.f32.mrf.mxu0 }
 0x5a6   :  { %10608 = vmatmul.mubr.msk.f32.gmra.mxu1 %vm298_vm3, %v892_v28 }
 0x5a7   :  { %10639 = vmatpush3.xpose.msk.msra.mxu1 %vm298_vm3, %v1147_v54  ;;  %v10592_v12 = vpop.f32.mrf.mxu0  ;;  %10610 = vmatprep.mubr.msk.f32.mxu1 %vm12349_vm2, %v12348_v46 }
 0x5a8   :  { %10640 = vmatprep.subr.mxu1 %v12348_v46 }
 0x5a9   :  { %v897_v20 = vpop.f32.mrf.mxu0 }
 0x5aa   :  { %10611 = vmatmul.mubr.msk.f32.gmra.mxu1 %vm298_vm3, %v897_v20 }
 0x5ab   :  { %10641 = vmatpush3.xpose.msk.msra.mxu1 %vm298_vm3, %v1145_v52  ;;  %v10595_v30 = vpop.f32.mrf.mxu0  ;;  %10613 = vmatprep.mubr.msk.f32.mxu1 %vm12349_vm2, %v12348_v46 }
 0x5ac   :  { %10642 = vmatprep.subr.mxu1 %v12348_v46 }
 0x5ad   :  { %v902_v26 = vpop.f32.mrf.mxu0 }
 0x5ae   :  { %10614 = vmatmul.mubr.msk.f32.gmra.mxu1 %vm298_vm3, %v902_v26 }
 0x5af   :  { %10643 = vmatpush3.xpose.msk.msra.mxu1 %vm298_vm3, %v1143_v59  ;;  %v10598_v32 = vpop.f32.mrf.mxu0  ;;  %10616 = vmatprep.mubr.msk.f32.mxu1 %vm12349_vm2, %v12348_v46 }
 0x5b0   :  { %10644 = vmatprep.subr.mxu1 %v12348_v46 }
 0x5b1   :  { %v907_v34 = vpop.f32.mrf.mxu0 }
 0x5b2   :  { %10617 = vmatmul.mubr.msk.f32.gmra.mxu1 %vm298_vm3, %v907_v34 }
 0x5b3   :  { %10645 = vmatpush3.xpose.msk.msra.mxu1 %vm298_vm3, %v12889_v53  ;;  %v10601_v37 = vpop.f32.mrf.mxu0  ;;  %10646 = vmatprep.mubr.msk.f32.mxu1 %vm12349_vm2, %v12348_v46 }
 0x5b4   :  { %10686 = vmatprep.subr.mxu1 %v12348_v46 }
 0x5b6   :  { %10647 = vmatmul.mubr.msk.f32.vlgmr.msra.gmra.mxu1 %vm298_vm3, %v12895_v62 }
 0x5b7   :  { %10649 = vmatprep.mubr.msk.f32.mxu1 %vm12349_vm2, %v12348_v46 }
 0x5ba   :  { %10650 = vmatmul.mubr.msk.f32.gmra.mxu1 %vm298_vm3, %v12891_v56 }
 0x5bb   :  { %10652 = vmatprep.mubr.msk.f32.mxu1 %vm12349_vm2, %v12348_v46 }
 0x5be   :  { %10653 = vmatmul.mubr.msk.f32.gmra.mxu1 %vm298_vm3, %v12897_v0 }
 0x5bf   :  { %10655 = vmatprep.mubr.msk.f32.mxu1 %vm12349_vm2, %v12348_v46 }
 0x5c2   :  { %10656 = vmatmul.mubr.msk.f32.gmra.mxu1 %vm298_vm3, %v12893_v60 }
 0x5c3   :  { %10658 = vmatprep.mubr.msk.f32.mxu1 %vm12349_vm2, %v12348_v46 }
 0x5c6   :  { %10659 = vmatmul.mubr.msk.f32.gmra.mxu1 %vm298_vm3, %v12899_v1 }
 0x5c7   :  { %10688 = vmatprep.mubr.msk.f32.mxu1 %vm12349_vm2, %v12348_v46 }
 0x61c   :  { %v12967_v38 = vpop.f32.mrf.mxu0 }
 0x61e   :  { %v10623_v39 = vpop.f32.mrf.mxu0 }
 0x620   :  { %v12969_v36 = vpop.f32.mrf.mxu0 }
 0x622   :  { %v10626_v40 = vpop.f32.mrf.mxu0 }
 0x624   :  { %v12971_v42 = vpop.f32.mrf.mxu0 }
 0x626   :  { %v10629_v41 = vpop.f32.mrf.mxu0 }
 0x628   :  { %v12973_v43 = vpop.f32.mrf.mxu0 }
 0x62a   :  { %v10632_v44 = vpop.f32.mrf.mxu0 }
 0x62c   :  { %v12975_v45 = vpop.f32.mrf.mxu0 }
 0x62e   :  { %v10635_v47 = vpop.f32.mrf.mxu0 }
 0x662   :  { %v12977_v49 = vpop.f32.mrf.mxu1 }
 0x664   :  { %v10606_v48 = vpop.f32.mrf.mxu1 }
 0x666   :  { %v12979_v50 = vpop.f32.mrf.mxu1 }
 0x668   :  { %v10609_v51 = vpop.f32.mrf.mxu1 }
 0x66a   :  { %v12981_v52 = vpop.f32.mrf.mxu1 }
 0x66c   :  { %v10612_v53 = vpop.f32.mrf.mxu1 }
 0x66e   :  { %v12983_v54 = vpop.f32.mrf.mxu1 }
 0x670   :  { %v10615_v56 = vpop.f32.mrf.mxu1 }
 0x672   :  { %v12985_v59 = vpop.f32.mrf.mxu1 }
 0x674   :  { %v10618_v60 = vpop.f32.mrf.mxu1 }
 0x676   :  { %v1236_v62 = vpop.f32.mrf.mxu1 }
 0x677   :  { %v1260_v55 = vmul.f32 0.4472136, %v1236_v62 }
 0x678   :  { %v10648_v0 = vpop.f32.mrf.mxu1 }
 0x679   :  { %v1265_v57 = vadd.f32 %v1260_v55, %v12689_v58 }
 0x67a   :  { %v1241_v1 = vpop.f32.mrf.mxu1 }
 0x67b   :  { %v1261_v2 = vmul.f32 0.4472136, %v1241_v1  ;;  %v1270_v5 = vsel %vm419_vm4, %v1265_v57, -inf }
 0x67c   :  { %1271 = vmax.xlane.f32.xlu1 %v1270_v5  ;;  %v10651_v9 = vpop.f32.mrf.mxu1 }
 0x67d   :  { %v1266_v10 = vadd.f32 %v1261_v2, %v12697_v63 }
 0x67e   :  { %v1246_v11 = vpop.f32.mrf.mxu1 }
 0x67f   :  { %v1262_v14 = vmul.f32 0.4472136, %v1246_v11  ;;  %v1273_v16 = vsel %vm419_vm4, %v1266_v10, -inf }
 0x680   :  { %1274 = vmax.xlane.f32.xlu0 %v1273_v16  ;;  %v10654_v18 = vpop.f32.mrf.mxu1 }
 0x681   :  { %v1267_v19 = vadd.f32 %v1262_v14, %v12707_v6 }
 0x682   :  { %v1251_v21 = vpop.f32.mrf.mxu1 }
 0x683   :  { %v1263_v61 = vmul.f32 0.4472136, %v1251_v21  ;;  %v1276_v58 = vsel %vm419_vm4, %v1267_v19, -inf }
 0x684   :  { %1277 = vmax.xlane.f32.xlu0 %v1276_v58  ;;  %v10657_v24 = vpop.f32.mrf.mxu1 }
 0x685   :  { %v1268_v23 = vadd.f32 %v1263_v61, %v12715_v15 }
 0x686   :  { %v1256_v4 = vpop.f32.mrf.mxu1 }
 0x687   :  { %v1264_v25 = vmul.f32 0.4472136, %v1256_v4  ;;  %v1279_v63 = vsel %vm419_vm4, %v1268_v23, -inf }
 0x688   :  { %1280 = vmax.xlane.f32.xlu0 %v1279_v63  ;;  %v10660_v28 = vpop.f32.mrf.mxu1 }
 0x689   :  { %v1269_v12 = vadd.f32 %v1264_v25, %v12722_v22 }
 0x68b   :  { %v1282_v20 = vsel %vm419_vm4, %v1269_v12, -inf }
 0x68c   :  { %1283 = vmax.xlane.f32.xlu1 %v1282_v20 }
 0x69d   :  { %1576 = vrot.lane.b32.xlu1 %v12585_v33, %s15860_s23 }
 0x69e   :  { %1578 = vrot.lane.b32.xlu0 %v12589_v35, %s15860_s23 }
 0x705   :  { %v1272_v6 = vpop.xlane.xlu1 %1271 }
 0x706   :  { %v1285_v30 = vsub.f32 %v1265_v57, %v1272_v6 }
 0x708   :  { %v1290_v26 = vmul.f32 1.442695, %v1285_v30 }
 0x709   :  { %v1275_v32 = vpop.xlane.xlu0 %1274 }
 0x70a   :  { %11948 = vpow2.f32 %v1290_v26  ;;  %v1286_v34 = vsub.f32 %v1266_v10, %v1275_v32 }
 0x70c   :  { %v1292_v37 = vmul.f32 1.442695, %v1286_v34 }
 0x70d   :  { %v1278_v39 = vpop.xlane.xlu0 %1277 }
 0x70e   :  { %11950 = vpow2.f32 %v1292_v37  ;;  %v1287_v40 = vsub.f32 %v1267_v19, %v1278_v39  ;;  %v9474_v37 = vld [vmem:[%s15839_s6 + $0x10] sm:$0x1f] }
 0x70f   :  { %10687 = vmatpush3.msk.msra.mxu1 %vm928_vm5, %v9474_v37 }
 0x710   :  { %v1294_v41 = vmul.f32 1.442695, %v1287_v40  ;;  %10728 = vmatprep.subr.mxu1 %v12348_v46 }
 0x711   :  { %v1281_v60 = vpop.xlane.xlu0 %1280 }
 0x712   :  { %11952 = vpow2.f32 %v1294_v41  ;;  %v1288_v62 = vsub.f32 %v1268_v23, %v1281_v60 }
 0x714   :  { %v1296_v0 = vmul.f32 1.442695, %v1288_v62 }
 0x715   :  { %v1284_v55 = vpop.xlane.xlu1 %1283  ;;  %v1579_v11 = vpop.permute.xlu0 %1578 }
 0x716   :  { %v1289_v57 = vsub.f32 %v1269_v12, %v1284_v55  ;;  %11954 = vpow2.f32 %v1296_v0 }
 0x717   :  { %v11949_v44 = vpop.eup %11948 }
 0x718   :  { %v1300_v47 = vsel %vm419_vm4, %v11949_v44, 0.0  ;;  %v1298_v1 = vmul.f32 1.442695, %v1289_v57 }
 0x719   :  { %1301 = vadd.xlane.f32.xlu0 %v1300_v47  ;;  %v1577_v14 = vpop.permute.xlu1 %1576 }
 0x71a   :  { %11956 = vpow2.f32 %v1298_v1 }
 0x71b   :  { %v11951_v48 = vpop.eup %11950 }
 0x71c   :  { %v1303_v51 = vsel %vm419_vm4, %v11951_v48, 0.0 }
 0x71d   :  { %1304 = vadd.xlane.f32.xlu1 %v1303_v51 }
 0x71f   :  { %v11953_v53 = vpop.eup %11952 }
 0x720   :  { %v1306_v56 = vsel %vm419_vm4, %v11953_v53, 0.0 }
 0x721   :  { %1307 = vadd.xlane.f32.xlu0 %v1306_v56 }
 0x723   :  { %v11955_v2 = vpop.eup %11954 }
 0x724   :  { %v1309_v5 = vsel %vm419_vm4, %v11955_v2, 0.0 }
 0x727   :  { %v11957_v9 = vpop.eup %11956 }
 0x728   :  { %v1312_v10 = vsel %vm419_vm4, %v11957_v9, 0.0 }
 0x72e   :  { %1572 = vrot.lane.b32.xlu1 %v12581_v29, %s15860_s23 }
 0x737   :  { %1574 = vrot.lane.b32.xlu0 %v12583_v31, %s15860_s23 }
 0x752   :  { %1310 = vadd.xlane.f32.xlu1 %v1309_v5 }
 0x756   :  { %1313 = vadd.xlane.f32.xlu0 %v1312_v10 }
 0x763   :  { %1560 = vrot.lane.b32.xlu1 %v12579_v27, %s15858_s24 }
 0x767   :  { %1564 = vrot.lane.b32.xlu1 %v12583_v31, %s15858_s24 }
 0x76b   :  { %1568 = vrot.lane.b32.xlu1 %v12589_v35, %s15858_s24 }
 0x76c   :  { %1570 = vrot.lane.b32.xlu0 %v12579_v27, %s15860_s23  ;;  %s15891_s23 = smov 113  }
 0x770   :  { %1562 = vrot.lane.b32.xlu0 %v12581_v29, %s15858_s24 }
 0x774   :  { %1566 = vrot.lane.b32.xlu0 %v12585_v33, %s15858_s24  ;;  %s15897_s24 = smov 118  }
 0x7a2   :  { %v1302_v16 = vpop.xlane.xlu0 %1301 }
 0x7a3   :  { %11958 = vrcp.f32 %v1302_v16 }
 0x7a6   :  { %v1305_v18 = vpop.xlane.xlu1 %1304 }
 0x7a7   :  { %11960 = vrcp.f32 %v1305_v18 }
 0x7aa   :  { %v1308_v19 = vpop.xlane.xlu0 %1307  ;;  %v1573_v63 = vpop.permute.xlu1 %1572 }
 0x7ab   :  { %11962 = vrcp.f32 %v1308_v19  ;;  %v12309_v19 = vld [vmem:[%s15887_s13 + $0x8] sm:$0xff] }
 0x7ae   :  { %v1575_v25 = vpop.permute.xlu0 %1574 }
 0x7b0   :  { %v11959_v21 = vpop.eup %11958 }
 0x7b1   :  { %v1320_v61 = vmul.f32 %v11959_v21, %v11949_v44 }
 0x7b3   :  { %10672 = vmatmul.mubr.msk.f32.vlgmr.msra.gmra.mxu0 %vm419_vm4, %v1320_v61 }
 0x7b4   :  { %v11961_v58 = vpop.eup %11960  ;;  %10704 = vmatpush3.xpose.msk.msra.mxu0 %vm298_vm3, %v1579_v11  ;;  %10674 = vmatprep.mubr.msk.f32.mxu0 %vm12349_vm2, %v12348_v46 }
 0x7b5   :  { %10705 = vmatprep.subr.mxu0 %v12348_v46  ;;  %v1321_v24 = vmul.f32 %v11961_v58, %v11951_v48 }
 0x7b7   :  { %10675 = vmatmul.mubr.msk.f32.gmra.mxu0 %vm419_vm4, %v1321_v24 }
 0x7b8   :  { %v11963_v23 = vpop.eup %11962  ;;  %10706 = vmatpush3.xpose.msk.msra.mxu0 %vm298_vm3, %v1577_v14  ;;  %10677 = vmatprep.mubr.msk.f32.mxu0 %vm12349_vm2, %v12348_v46 }
 0x7b9   :  { %10707 = vmatprep.subr.mxu0 %v12348_v46  ;;  %v1322_v4 = vmul.f32 %v11963_v23, %v11953_v53 }
 0x7bb   :  { %10678 = vmatmul.mubr.msk.f32.gmra.mxu0 %vm419_vm4, %v1322_v4  ;;  %v12310_v4 = vld [vmem:[%s15887_s13 + $0x10] sm:$0xff] }
 0x7bc   :  { %10708 = vmatpush3.xpose.msk.msra.mxu0 %vm298_vm3, %v1575_v25  ;;  %10680 = vmatprep.mubr.msk.f32.mxu0 %vm12349_vm2, %v12348_v46 }
 0x7bd   :  { %10709 = vmatprep.subr.mxu0 %v12348_v46 }
 0x7c0   :  { %10710 = vmatpush3.xpose.msk.msra.mxu0 %vm298_vm3, %v1573_v63 }
 0x7c1   :  { %10711 = vmatprep.subr.mxu0 %v12348_v46 }
 0x7db   :  { %v1311_v28 = vpop.xlane.xlu1 %1310 }
 0x7dc   :  { %11964 = vrcp.f32 %v1311_v28 }
 0x7df   :  { %v1314_v12 = vpop.xlane.xlu0 %1313  ;;  %v1561_v34 = vpop.permute.xlu1 %1560 }
 0x7e0   :  { %11966 = vrcp.f32 %v1314_v12 }
 0x7e3   :  { %v1571_v20 = vpop.permute.xlu0 %1570  ;;  %v1565_v40 = vpop.permute.xlu1 %1564 }
 0x7e4   :  { %10712 = vmatpush3.xpose.msk.msra.mxu0 %vm298_vm3, %v1571_v20 }
 0x7e5   :  { %10753 = vmatprep.subr.mxu0 %v12348_v46 }
 0x7e7   :  { %v1563_v39 = vpop.permute.xlu0 %1562  ;;  %v1569_v44 = vpop.permute.xlu1 %1568 }
 0x7e9   :  { %v11965_v6 = vpop.eup %11964 }
 0x7ea   :  { %v1323_v30 = vmul.f32 %v11965_v6, %v11955_v2 }
 0x7eb   :  { %v1567_v41 = vpop.permute.xlu0 %1566 }
 0x7ec   :  { %10681 = vmatmul.mubr.msk.f32.gmra.mxu0 %vm419_vm4, %v1323_v30 }
 0x7ed   :  { %v11967_v26 = vpop.eup %11966  ;;  %10683 = vmatprep.mubr.msk.f32.mxu0 %vm12349_vm2, %v12348_v46 }
 0x7ee   :  { %v1324_v32 = vmul.f32 %v11967_v26, %v11957_v9  ;;  %v12308_v9 = vld [vmem:[%s15887_s13] sm:$0xff] }
 0x7f0   :  { %10684 = vmatmul.mubr.msk.f32.gmra.mxu0 %vm419_vm4, %v1324_v32 }
 0x7f1   :  { %10713 = vmatprep.mubr.msk.f32.mxu0 %vm12349_vm2, %v12348_v46 }
 0x7f4   :  { %10714 = vmatmul.mubr.msk.f32.vlgmr.msra.gmra.mxu0 %vm298_vm3, %v1561_v34 }
 0x7f5   :  { %10716 = vmatprep.mubr.msk.f32.mxu0 %vm12349_vm2, %v12348_v46 }
 0x7f8   :  { %10717 = vmatmul.mubr.msk.f32.gmra.mxu0 %vm298_vm3, %v1563_v39 }
 0x7f9   :  { %10719 = vmatprep.mubr.msk.f32.mxu0 %vm12349_vm2, %v12348_v46 }
 0x7fc   :  { %10720 = vmatmul.mubr.msk.f32.gmra.mxu0 %vm298_vm3, %v1565_v40 }
 0x7fd   :  { %10722 = vmatprep.mubr.msk.f32.mxu0 %vm12349_vm2, %v12348_v46 }
 0x800   :  { %10723 = vmatmul.mubr.msk.f32.gmra.mxu0 %vm298_vm3, %v1567_v41 }
 0x801   :  { %10725 = vmatprep.mubr.msk.f32.mxu0 %vm12349_vm2, %v12348_v46 }
 0x804   :  { %10726 = vmatmul.mubr.msk.f32.gmra.mxu0 %vm298_vm3, %v1569_v44  ;;  %v1112_v44 = vadd.f32 %v12969_v36, %v12979_v50 }
 0x805   :  { %10755 = vmatprep.mubr.msk.f32.mxu0 %vm12349_vm2, %v12348_v46 }
 0x873   :  { %v1421_v47 = vpop.f32.mrf.mxu0 }
 0x874   :  { %10689 = vmatmul.mubr.msk.f32.vlgmr.msra.gmra.mxu1 %vm298_vm3, %v1421_v47 }
 0x875   :  { %v10673_v48 = vpop.f32.mrf.mxu0  ;;  %10691 = vmatprep.mubr.msk.f32.mxu1 %vm12349_vm2, %v12348_v46 }
 0x877   :  { %v1426_v51 = vpop.f32.mrf.mxu0 }
 0x878   :  { %10692 = vmatmul.mubr.msk.f32.gmra.mxu1 %vm298_vm3, %v1426_v51 }
 0x879   :  { %v10676_v53 = vpop.f32.mrf.mxu0  ;;  %10694 = vmatprep.mubr.msk.f32.mxu1 %vm12349_vm2, %v12348_v46 }
 0x87b   :  { %v1431_v56 = vpop.f32.mrf.mxu0 }
 0x87c   :  { %10695 = vmatmul.mubr.msk.f32.gmra.mxu1 %vm298_vm3, %v1431_v56 }
 0x87d   :  { %v10679_v60 = vpop.f32.mrf.mxu0  ;;  %10697 = vmatprep.mubr.msk.f32.mxu1 %vm12349_vm2, %v12348_v46 }
 0x8ac   :  { %v1436_v62 = vpop.f32.mrf.mxu0 }
 0x8ad   :  { %10698 = vmatmul.mubr.msk.f32.gmra.mxu1 %vm298_vm3, %v1436_v62 }
 0x8ae   :  { %v10682_v55 = vpop.f32.mrf.mxu0  ;;  %10700 = vmatprep.mubr.msk.f32.mxu1 %vm12349_vm2, %v12348_v46 }
 0x8b0   :  { %v1441_v0 = vpop.f32.mrf.mxu0 }
 0x8b1   :  { %10701 = vmatmul.mubr.msk.f32.gmra.mxu1 %vm298_vm3, %v1441_v0 }
 0x8b2   :  { %v10685_v57 = vpop.f32.mrf.mxu0  ;;  %10738 = vmatprep.mubr.msk.f32.mxu1 %vm12349_vm2, %v12348_v46 }
 0x8b4   :  { %v1666_v1 = vpop.f32.mrf.mxu0 }
 0x8b5   :  { %v1690_v2 = vmul.f32 0.4472136, %v1666_v1 }
 0x8b6   :  { %v10715_v5 = vpop.f32.mrf.mxu0 }
 0x8b7   :  { %v1695_v10 = vadd.f32 %v12308_v9, %v1690_v2 }
 0x8b8   :  { %v1671_v11 = vpop.f32.mrf.mxu0 }
 0x8b9   :  { %v1691_v14 = vmul.f32 0.4472136, %v1671_v11  ;;  %v1700_v16 = vsel %vm419_vm4, %v1695_v10, -inf }
 0x8ba   :  { %1701 = vmax.xlane.f32.xlu0 %v1700_v16  ;;  %v10718_v18 = vpop.f32.mrf.mxu0 }
 0x8bb   :  { %v1696_v21 = vadd.f32 %v12309_v19, %v1691_v14 }
 0x8bc   :  { %v1676_v61 = vpop.f32.mrf.mxu0 }
 0x8bd   :  { %v1692_v58 = vmul.f32 0.4472136, %v1676_v61  ;;  %v1703_v24 = vsel %vm419_vm4, %v1696_v21, -inf }
 0x8be   :  { %1704 = vmax.xlane.f32.xlu1 %v1703_v24  ;;  %v10721_v23 = vpop.f32.mrf.mxu0 }
 0x8bf   :  { %v1697_v25 = vadd.f32 %v12310_v4, %v1692_v58 }
 0x8c0   :  { %v1681_v63 = vpop.f32.mrf.mxu0 }
 0x8c1   :  { %v1693_v28 = vmul.f32 0.4472136, %v1681_v63  ;;  %v1706_v12 = vsel %vm419_vm4, %v1697_v25, -inf }
 0x8c2   :  { %1707 = vmax.xlane.f32.xlu0 %v1706_v12  ;;  %v10724_v20 = vpop.f32.mrf.mxu0 }
 0x8c3   :  { %v1698_v6 = vadd.f32 %v1693_v28, %v12715_v15  ;;  %v1107_v15 = vadd.f32 %v12967_v38, %v12977_v49  ;;  %v1127_v20 = vadd.f32 %v12975_v45, %v12985_v59 }
 0x8c4   :  { %v1686_v30 = vpop.f32.mrf.mxu0 }
 0x8c5   :  { %v1694_v26 = vmul.f32 0.4472136, %v1686_v30  ;;  %v1709_v32 = vsel %vm419_vm4, %v1698_v6, -inf }
 0x8c6   :  { %1710 = vmax.xlane.f32.xlu0 %v1709_v32  ;;  %v10727_v34 = vpop.f32.mrf.mxu0 }
 0x8c7   :  { %v1699_v37 = vadd.f32 %v1694_v26, %v12722_v22 }
 0x8c9   :  { %v1712_v39 = vsel %vm419_vm4, %v1699_v37, -inf }
 0x8ca   :  { %1713 = vmax.xlane.f32.xlu0 %v1712_v39 }
 0x8cf   :  { %1761 = vrot.lane.b32.xlu1 %v12585_v33, %s15856_s22 }
 0x8d3   :  { %1759 = vrot.lane.b32.xlu1 %v12583_v31, %s15856_s22  ;;  %v1117_v31 = vadd.f32 %v12971_v42, %v12981_v52 }
 0x8e0   :  { %1763 = vrot.lane.b32.xlu0 %v12589_v35, %s15856_s22 }
 0x934   :  { %v1531_v40 = vpop.f32.mrf.mxu1 }
 0x935   :  { %v13106_v41 = vadd.f32 %v1531_v40, %v1107_v15 }
 0x936   :  { %v10690_v22 = vpop.f32.mrf.mxu1 }
 0x938   :  { %v1536_v47 = vpop.f32.mrf.mxu1 }
 0x939   :  { %v13110_v48 = vadd.f32 %v1536_v47, %v1112_v44 }
 0x93a   :  { %v10693_v33 = vpop.f32.mrf.mxu1 }
 0x93c   :  { %v1541_v51 = vpop.f32.mrf.mxu1 }
 0x93d   :  { %v13114_v53 = vadd.f32 %v1541_v51, %v1117_v31 }
 0x93e   :  { %v10696_v35 = vpop.f32.mrf.mxu1 }
 0x943   :  { %v1702_v56 = vpop.xlane.xlu0 %1701 }
 0x944   :  { %v1715_v38 = vsub.f32 %v1695_v10, %v1702_v56 }
 0x946   :  { %v1720_v49 = vmul.f32 1.442695, %v1715_v38 }
 0x947   :  { %v1705_v60 = vpop.xlane.xlu1 %1704 }
 0x948   :  { %11968 = vpow2.f32 %v1720_v49  ;;  %v1716_v62 = vsub.f32 %v1696_v21, %v1705_v60 }
 0x94a   :  { %v1722_v55 = vmul.f32 1.442695, %v1716_v62 }
 0x94b   :  { %v1708_v0 = vpop.xlane.xlu0 %1707  ;;  %v1762_v9 = vpop.permute.xlu1 %1761 }
 0x94c   :  { %11970 = vpow2.f32 %v1722_v55  ;;  %v1717_v36 = vsub.f32 %v1697_v25, %v1708_v0  ;;  %v1122_v25 = vadd.f32 %v12973_v43, %v12983_v54  ;;  %v9496_v43 = vld [vmem:[%s15839_s6 + $0x18] sm:$0x1f] }
 0x94d   :  { %10754 = vmatpush3.msk.msra.mxu0 %vm928_vm5, %v9496_v43 }
 0x94e   :  { %v1724_v50 = vmul.f32 1.442695, %v1717_v36  ;;  %10791 = vmatprep.subr.mxu0 %v12348_v46 }
 0x94f   :  { %v1711_v57 = vpop.xlane.xlu0 %1710  ;;  %v1760_v19 = vpop.permute.xlu1 %1759 }
 0x950   :  { %11972 = vpow2.f32 %v1724_v50  ;;  %v1718_v1 = vsub.f32 %v1698_v6, %v1711_v57 }
 0x952   :  { %v1726_v2 = vmul.f32 1.442695, %v1718_v1 }
 0x953   :  { %v1714_v42 = vpop.xlane.xlu0 %1713 }
 0x954   :  { %11974 = vpow2.f32 %v1726_v2  ;;  %v1719_v52 = vsub.f32 %v1699_v37, %v1714_v42  ;;  %v9503_v2 = vld [vmem:[%s15840_s7] ss:$0 sm:$0xff] }
 0x955   :  { %v11969_v5 = vpop.eup %11968 }
 0x956   :  { %v1728_v11 = vmul.f32 1.442695, %v1719_v52  ;;  %v1730_v10 = vsel %vm419_vm4, %v11969_v5, 0.0 }
 0x957   :  { %1731 = vadd.xlane.f32.xlu1 %v1730_v10  ;;  %v1764_v14 = vpop.permute.xlu0 %1763 }
 0x958   :  { %11976 = vpow2.f32 %v1728_v11  ;;  %10729 = vmatpush3.msra.mxu1 %v1764_v14 }
 0x959   :  { %v11971_v16 = vpop.eup %11970  ;;  %10730 = vmatprep.subr.mxu1 %v12348_v46 }
 0x95a   :  { %10731 = vmatpush3.msra.mxu1 %v1762_v9  ;;  %v1733_v18 = vsel %vm419_vm4, %v11971_v16, 0.0 }
 0x95b   :  { %1734 = vadd.xlane.f32.xlu0 %v1733_v18  ;;  %10732 = vmatprep.subr.mxu1 %v12348_v46 }
 0x95c   :  { %10733 = vmatpush3.msra.mxu1 %v1760_v19 }
 0x95d   :  { %v11973_v21 = vpop.eup %11972  ;;  %10734 = vmatprep.subr.mxu1 %v12348_v46 }
 0x95e   :  { %v1736_v61 = vsel %vm419_vm4, %v11973_v21, 0.0 }
 0x95f   :  { %1737 = vadd.xlane.f32.xlu1 %v1736_v61 }
 0x961   :  { %v11975_v58 = vpop.eup %11974 }
 0x962   :  { %v1739_v24 = vsel %vm419_vm4, %v11975_v58, 0.0 }
 0x963   :  { %1740 = vadd.xlane.f32.xlu0 %v1739_v24 }
 0x965   :  { %v11977_v23 = vpop.eup %11976 }
 0x966   :  { %v1742_v4 = vsel %vm419_vm4, %v11977_v23, 0.0 }
 0x967   :  { %1743 = vadd.xlane.f32.xlu1 %v1742_v4 }
 0x96d   :  { %v1546_v63 = vpop.f32.mrf.mxu1 }
 0x96e   :  { %v13126_v28 = vadd.f32 %v1546_v63, %v1122_v25 }
 0x96f   :  { %v10699_v12 = vpop.f32.mrf.mxu1 }
 0x971   :  { %v1551_v6 = vpop.f32.mrf.mxu1 }
 0x972   :  { %v13130_v30 = vadd.f32 %v1551_v6, %v1127_v20 }
 0x973   :  { %v10702_v26 = vpop.f32.mrf.mxu1 }
 0x978   :  { %1757 = vrot.lane.b32.xlu1 %v12581_v29, %s15856_s22 }
 0x979   :  { %1755 = vrot.lane.b32.xlu0 %v12579_v27, %s15856_s22 }
 0x9e0   :  { %v1732_v54 = vpop.xlane.xlu1 %1731 }
 0x9e1   :  { %11978 = vrcp.f32 %v1732_v54 }
 0x9e4   :  { %v1735_v45 = vpop.xlane.xlu0 %1734 }
 0x9e5   :  { %11980 = vrcp.f32 %v1735_v45 }
 0x9e8   :  { %v1738_v59 = vpop.xlane.xlu1 %1737 }
 0x9e9   :  { %11982 = vrcp.f32 %v1738_v59 }
 0x9ec   :  { %v1741_v32 = vpop.xlane.xlu0 %1740 }
 0x9ed   :  { %11984 = vrcp.f32 %v1741_v32 }
 0x9ee   :  { %v11979_v29 = vpop.eup %11978 }
 0x9ef   :  { %v1750_v27 = vmul.f32 %v11979_v29, %v11969_v5 }
 0x9f0   :  { %v1744_v34 = vpop.xlane.xlu1 %1743  ;;  %v1756_v39 = vpop.permute.xlu0 %1755 }
 0x9f1   :  { %11986 = vrcp.f32 %v1744_v34 }
 0x9f2   :  { %v11981_v15 = vpop.eup %11980 }
 0x9f3   :  { %v1751_v40 = vmul.f32 %v11981_v15, %v11971_v16 }
 0x9f4   :  { %v1758_v37 = vpop.permute.xlu1 %1757 }
 0x9f5   :  { %10735 = vmatpush3.msra.mxu1 %v1758_v37 }
 0x9f6   :  { %10736 = vmatprep.subr.mxu1 %v12348_v46  ;;  %v11983_v22 = vpop.eup %11982 }
 0x9f7   :  { %10737 = vmatpush3.msra.mxu1 %v1756_v39  ;;  %v1752_v44 = vmul.f32 %v11983_v22, %v11973_v21 }
 0x9f8   :  { %10739 = vmatmul.mubr.msk.f32.vlgmr.msra.gmra.mxu1 %vm419_vm4, %v1750_v27  ;;  %10770 = vmatprep.subr.mxu1 %v12348_v46 }
 0x9f9   :  { %10741 = vmatprep.mubr.msk.f32.mxu1 %vm12349_vm2, %v12348_v46 }
 0x9fa   :  { %v11985_v47 = vpop.eup %11984 }
 0x9fb   :  { %v1753_v33 = vmul.f32 %v11985_v47, %v11975_v58 }
 0x9fc   :  { %10742 = vmatmul.mubr.msk.f32.gmra.mxu1 %vm419_vm4, %v1751_v40 }
 0x9fd   :  { %10744 = vmatprep.mubr.msk.f32.mxu1 %vm12349_vm2, %v12348_v46 }
 0x9fe   :  { %v11987_v31 = vpop.eup %11986 }
 0x9ff   :  { %v1754_v51 = vmul.f32 %v11987_v31, %v11977_v23 }
 0xa00   :  { %10745 = vmatmul.mubr.msk.f32.gmra.mxu1 %vm419_vm4, %v1752_v44 }
 0xa01   :  { %10747 = vmatprep.mubr.msk.f32.mxu1 %vm12349_vm2, %v12348_v46 }
 0xa04   :  { %10748 = vmatmul.mubr.msk.f32.gmra.mxu1 %vm419_vm4, %v1753_v33 }
 0xa05   :  { %10750 = vmatprep.mubr.msk.f32.mxu1 %vm12349_vm2, %v12348_v46 }
 0xa08   :  { %10751 = vmatmul.mubr.msk.f32.gmra.mxu1 %vm419_vm4, %v1754_v51 }
 0xa09   :  { %10776 = vmatprep.mubr.msk.f32.mxu1 %vm12349_vm2, %v12348_v46 }
 0xab8   :  { %v1851_v35 = vpop.f32.mrf.mxu1 }
 0xab9   :  { %10756 = vmatmul.mubr.msk.f32.vlgmr.msra.gmra.mxu0 %vm298_vm3, %v1851_v35 }
 0xaba   :  { %v10740_v56 = vpop.f32.mrf.mxu1  ;;  %10758 = vmatprep.mubr.msk.f32.mxu0 %vm12349_vm2, %v12348_v46 }
 0xabc   :  { %v1856_v38 = vpop.f32.mrf.mxu1 }
 0xabd   :  { %10759 = vmatmul.mubr.msk.f32.gmra.mxu0 %vm298_vm3, %v1856_v38 }
 0xabe   :  { %v10743_v49 = vpop.f32.mrf.mxu1  ;;  %10761 = vmatprep.mubr.msk.f32.mxu0 %vm12349_vm2, %v12348_v46 }
 0xabf   :  { %v2098_v49 = vld [vmem:[%s15843_s10 + $0x10] sm:$0xf] }
 0xac0   :  { %v1861_v60 = vpop.f32.mrf.mxu1  ;;  %10771 = vmatpush3.msk.msra.mxu1 %vm189_vm1, %v2098_v49 }
 0xac1   :  { %10762 = vmatmul.mubr.msk.f32.gmra.mxu0 %vm298_vm3, %v1861_v60  ;;  %v2097_v60 = vld [vmem:[%s15843_s10 + $0x8] sm:$0xff]  ;;  %10772 = vmatprep.subr.mxu1 %v12348_v46 }
 0xac2   :  { %v10746_v62 = vpop.f32.mrf.mxu1  ;;  %10764 = vmatprep.mubr.msk.f32.mxu0 %vm12349_vm2, %v12348_v46  ;;  %10773 = vmatpush3.msra.mxu1 %v2097_v60 }
 0xac3   :  { %v2096_v62 = vld [vmem:[%s15843_s10] sm:$0xff]  ;;  %10774 = vmatprep.subr.mxu1 %v12348_v46 }
 0xac4   :  { %v1866_v55 = vpop.f32.mrf.mxu1  ;;  %10775 = vmatpush3.msra.mxu1 %v2096_v62 }
 0xac5   :  { %10765 = vmatmul.mubr.msk.f32.gmra.mxu0 %vm298_vm3, %v1866_v55  ;;  %10826 = vmatprep.subr.mxu1 %v12348_v46  ;;  %v2228_v55 = vld [vmem:[%s15845_s12 + $0x48] sm:$0xff] }
 0xac6   :  { %v10749_v0 = vpop.f32.mrf.mxu1  ;;  %10767 = vmatprep.mubr.msk.f32.mxu0 %vm12349_vm2, %v12348_v46  ;;  %10792 = vmatpush3.msra.mxu0 %v2228_v55 }
 0xac7   :  { %v2227_v0 = vld [vmem:[%s15845_s12 + $0x40] sm:$0xff]  ;;  %10793 = vmatprep.subr.mxu0 %v12348_v46 }
 0xac8   :  { %v1871_v36 = vpop.f32.mrf.mxu1  ;;  %10794 = vmatpush3.msra.mxu0 %v2227_v0 }
 0xac9   :  { %10768 = vmatmul.mubr.msk.f32.gmra.mxu0 %vm298_vm3, %v1871_v36  ;;  %v2226_v36 = vld [vmem:[%s15845_s12 + $0x38] sm:$0xff]  ;;  %10795 = vmatprep.subr.mxu0 %v12348_v46 }
 0xaca   :  { %v10752_v50 = vpop.f32.mrf.mxu1  ;;  %10811 = vmatprep.mubr.msk.f32.mxu0 %vm12349_vm2, %v12348_v46  ;;  %10796 = vmatpush3.msra.mxu0 %v2226_v36 }
 0xacb   :  { %v2225_v50 = vld [vmem:[%s15845_s12 + $0x30] sm:$0xff]  ;;  %10797 = vmatprep.subr.mxu0 %v12348_v46 }
 0xacc   :  { %10798 = vmatpush3.msra.mxu0 %v2225_v50 }
 0xacd   :  { %10799 = vmatprep.subr.mxu0 %v12348_v46 }
 0xb79   :  { %v1961_v57 = vpop.f32.mrf.mxu0 }
 0xb7a   :  { %v1985_v1 = vadd.f32 %v1961_v57, %v13106_v41  ;;  %v2224_v57 = vld [vmem:[%s15845_s12 + $0x28] sm:$0xff] }
 0xb7b   :  { %v10757_v42 = vpop.f32.mrf.mxu0  ;;  %10800 = vmatpush3.msra.mxu0 %v2224_v57 }
 0xb7c   :  { %v1990_v52 = vadd.f32 %v1985_v1, %v12468_v3  ;;  %v2223_v1 = vld [vmem:[%s15845_s12 + $0x20] sm:$0xff]  ;;  %10801 = vmatprep.subr.mxu0 %v12348_v46 }
 0xb7d   :  { %v1966_v5 = vpop.f32.mrf.mxu0  ;;  %10802 = vmatpush3.msra.mxu0 %v2223_v1 }
 0xb7e   :  { %v13178_v9 = vadd.f32 %v9503_v2, %v1990_v52  ;;  %v1986_v11 = vadd.f32 %v1966_v5, %v13110_v48  ;;  %10803 = vmatprep.subr.mxu0 %v12348_v46 }
 0xb7f   :  { %v10760_v10 = vpop.f32.mrf.mxu0 }
 0xb80   :  { %v1991_v14 = vadd.f32 %v1986_v11, %v12481_v8  ;;  %v2009_v16 = vsel %vm82_vm0, %v13178_v9, 0.0 }
 0xb81   :  { %2010 = vadd.xlane.f32.xlu1 %v2009_v16  ;;  %v1971_v41 = vpop.f32.mrf.mxu0 }
 0xb82   :  { %v13184_v18 = vadd.f32 %v9503_v2, %v1991_v14  ;;  %v1987_v19 = vadd.f32 %v1971_v41, %v13114_v53 }
 0xb83   :  { %v10763_v21 = vpop.f32.mrf.mxu0 }
 0xb84   :  { %v1992_v3 = vadd.f32 %v1987_v19, %v12479_v7  ;;  %v2012_v61 = vsel %vm82_vm0, %v13184_v18, 0.0 }
 0xb85   :  { %2013 = vadd.xlane.f32.xlu0 %v2012_v61  ;;  %v1976_v48 = vpop.f32.mrf.mxu0 }
 0xb86   :  { %v13190_v58 = vadd.f32 %v9503_v2, %v1992_v3  ;;  %v1988_v8 = vadd.f32 %v1976_v48, %v13126_v28 }
 0xb87   :  { %v10766_v24 = vpop.f32.mrf.mxu0 }
 0xb88   :  { %v1993_v23 = vadd.f32 %v1988_v8, %v12494_v13  ;;  %v2015_v4 = vsel %vm82_vm0, %v13190_v58, 0.0 }
 0xb89   :  { %2016 = vadd.xlane.f32.xlu0 %v2015_v4  ;;  %v1981_v53 = vpop.f32.mrf.mxu0 }
 0xb8a   :  { %v13196_v25 = vadd.f32 %v9503_v2, %v1993_v23  ;;  %v1989_v7 = vadd.f32 %v1981_v53, %v13130_v30  ;;  %v9504_v23 = vld [vmem:[%s15841_s8] ss:$0 sm:$0xff] }
 0xb8b   :  { %v10769_v63 = vpop.f32.mrf.mxu0 }
 0xb8c   :  { %v1994_v12 = vadd.f32 %v1989_v7, %v12503_v17  ;;  %v2018_v20 = vsel %vm82_vm0, %v13196_v25, 0.0  ;;  %v9505_v7 = vld [vmem:[%s15842_s9] ss:$0 sm:$0xff] }
 0xb8d   :  { %2019 = vadd.xlane.f32.xlu0 %v2018_v20 }
 0xb8e   :  { %v13202_v28 = vadd.f32 %v9503_v2, %v1994_v12  ;;  %v2222_v2 = vld [vmem:[%s15845_s12 + $0x18] sm:$0xff] }
 0xb8f   :  { %10804 = vmatpush3.msra.mxu0 %v2222_v2 }
 0xb90   :  { %v2021_v13 = vsel %vm82_vm0, %v13202_v28, 0.0  ;;  %10805 = vmatprep.subr.mxu0 %v12348_v46 }
 0xb91   :  { %2022 = vadd.xlane.f32.xlu1 %v2021_v13 }
 0xc0a   :  { %v2011_v6 = vpop.xlane.xlu1 %2010 }
 0xc0b   :  { %v2024_v26 = vmul.f32 0.05, %v2011_v6 }
 0xc0d   :  { %v13207_v43 = vsub.f32 %v13178_v9, %v2024_v26 }
 0xc0e   :  { %v2014_v54 = vpop.xlane.xlu0 %2013 }
 0xc0f   :  { %v2025_v30 = vmul.f32 0.05, %v2014_v54  ;;  %v2034_v17 = vmul.f32 %v13207_v43, %v13207_v43 }
 0xc11   :  { %v13212_v45 = vsub.f32 %v13184_v18, %v2025_v30  ;;  %v2039_v59 = vsel %vm82_vm0, %v2034_v17, 0.0 }
 0xc12   :  { %v2017_v32 = vpop.xlane.xlu0 %2016  ;;  %2040 = vadd.xlane.f32.xlu0 %v2039_v59 }
 0xc13   :  { %v2026_v34 = vmul.f32 0.05, %v2017_v32  ;;  %v2035_v29 = vmul.f32 %v13212_v45, %v13212_v45 }
 0xc15   :  { %v13218_v37 = vsub.f32 %v13190_v58, %v2026_v34  ;;  %v2042_v27 = vsel %vm82_vm0, %v2035_v29, 0.0 }
 0xc16   :  { %v2020_v39 = vpop.xlane.xlu0 %2019  ;;  %2043 = vadd.xlane.f32.xlu1 %v2042_v27 }
 0xc17   :  { %v2027_v15 = vmul.f32 0.05, %v2020_v39  ;;  %v2036_v40 = vmul.f32 %v13218_v37, %v13218_v37 }
 0xc19   :  { %v13224_v22 = vsub.f32 %v13196_v25, %v2027_v15  ;;  %v2045_v44 = vsel %vm82_vm0, %v2036_v40, 0.0  ;;  %v2221_v15 = vld [vmem:[%s15845_s12 + $0x10] sm:$0xff]  ;;  %v2220_v40 = vld [vmem:[%s15845_s12 + $0x8] sm:$0xff] }
 0xc1a   :  { %2046 = vadd.xlane.f32.xlu0 %v2045_v44  ;;  %v2023_v47 = vpop.xlane.xlu1 %2022  ;;  %10806 = vmatpush3.msra.mxu0 %v2221_v15  ;;  %v9506_v44 = vld [vmem:[%s15844_s11] ss:$0 sm:$0xff] }
 0xc1b   :  { %v2028_v33 = vmul.f32 0.05, %v2023_v47  ;;  %v2037_v31 = vmul.f32 %v13224_v22, %v13224_v22  ;;  %10807 = vmatprep.subr.mxu0 %v12348_v46 }
 0xc1c   :  { %10808 = vmatpush3.msra.mxu0 %v2220_v40 }
 0xc1d   :  { %v13230_v51 = vsub.f32 %v13202_v28, %v2028_v33  ;;  %v2048_v35 = vsel %vm82_vm0, %v2037_v31, 0.0  ;;  %10809 = vmatprep.subr.mxu0 %v12348_v46 }
 0xc1e   :  { %2049 = vadd.xlane.f32.xlu1 %v2048_v35 }
 0xc1f   :  { %v2038_v56 = vmul.f32 %v13230_v51, %v13230_v51 }
 0xc21   :  { %v2051_v38 = vsel %vm82_vm0, %v2038_v56, 0.0 }
 0xc22   :  { %2052 = vadd.xlane.f32.xlu0 %v2051_v38 }
 0xc9b   :  { %v2041_v42 = vpop.xlane.xlu0 %2040 }
 0xc9c   :  { %v2054_v52 = vmul.f32 0.05, %v2041_v42 }
 0xc9e   :  { %v2059_v5 = vadd.f32 1e-05, %v2054_v52 }
 0xc9f   :  { %v2044_v11 = vpop.xlane.xlu1 %2043 }
 0xca0   :  { %11988 = vrsqrt.f32 %v2059_v5  ;;  %v2055_v10 = vmul.f32 0.05, %v2044_v11 }
 0xca2   :  { %v2060_v14 = vadd.f32 1e-05, %v2055_v10  ;;  %v9518_v10 = vld [vmem:[%s15888_s20] ss:$0 sm:$0xff] }
 0xca3   :  { %v2047_v16 = vpop.xlane.xlu0 %2046 }
 0xca4   :  { %11990 = vrsqrt.f32 %v2060_v14  ;;  %v2056_v41 = vmul.f32 0.05, %v2047_v16 }
 0xca6   :  { %v2061_v19 = vadd.f32 1e-05, %v2056_v41 }
 0xca7   :  { %v2050_v21 = vpop.xlane.xlu1 %2049 }
 0xca8   :  { %11992 = vrsqrt.f32 %v2061_v19  ;;  %v2057_v3 = vmul.f32 0.05, %v2050_v21 }
 0xcaa   :  { %v2062_v61 = vadd.f32 1e-05, %v2057_v3 }
 0xcab   :  { %v2053_v48 = vpop.xlane.xlu0 %2052 }
 0xcac   :  { %11994 = vrsqrt.f32 %v2062_v61  ;;  %v2058_v8 = vmul.f32 0.05, %v2053_v48 }
 0xcad   :  { %v11989_v24 = vpop.eup %11988 }
 0xcae   :  { %v2069_v4 = vmul.f32 %v11989_v24, %v13207_v43  ;;  %v2063_v53 = vadd.f32 1e-05, %v2058_v8 }
 0xcb0   :  { %v2080_v63 = vmul.f32 %v9504_v23, %v2069_v4  ;;  %11996 = vrsqrt.f32 %v2063_v53 }
 0xcb1   :  { %v11991_v12 = vpop.eup %11990 }
 0xcb2   :  { %v2091_v20 = vadd.f32 %v9505_v7, %v2080_v63  ;;  %v2070_v13 = vmul.f32 %v11991_v12, %v13212_v45 }
 0xcb4   :  { %10777 = vmatmul.mubr.msk.f32.vlgmr.msra.gmra.mxu1 %vm82_vm0, %v2091_v20  ;;  %v2081_v6 = vmul.f32 %v9504_v23, %v2070_v13 }
 0xcb5   :  { %v11993_v26 = vpop.eup %11992  ;;  %10779 = vmatprep.mubr.msk.f32.mxu1 %vm12349_vm2, %v12348_v46 }
 0xcb6   :  { %v2092_v54 = vadd.f32 %v9505_v7, %v2081_v6  ;;  %v2071_v43 = vmul.f32 %v11993_v26, %v13218_v37 }
 0xcb8   :  { %10780 = vmatmul.mubr.msk.f32.gmra.mxu1 %vm82_vm0, %v2092_v54  ;;  %v2082_v30 = vmul.f32 %v9504_v23, %v2071_v43 }
 0xcb9   :  { %v11995_v17 = vpop.eup %11994  ;;  %10782 = vmatprep.mubr.msk.f32.mxu1 %vm12349_vm2, %v12348_v46 }
 0xcba   :  { %v2093_v59 = vadd.f32 %v9505_v7, %v2082_v30  ;;  %v2072_v45 = vmul.f32 %v11995_v17, %v13224_v22  ;;  %v2219_v22 = vld [vmem:[%s15845_s12] sm:$0xff] }
 0xcbb   :  { %10810 = vmatpush3.msra.mxu0 %v2219_v22 }
 0xcbc   :  { %10783 = vmatmul.mubr.msk.f32.gmra.mxu1 %vm82_vm0, %v2093_v59  ;;  %v2083_v32 = vmul.f32 %v9504_v23, %v2072_v45  ;;  %10847 = vmatprep.subr.mxu0 %v12348_v46 }
 0xcbd   :  { %v11997_v34 = vpop.eup %11996  ;;  %10785 = vmatprep.mubr.msk.f32.mxu1 %vm12349_vm2, %v12348_v46 }
 0xcbe   :  { %v2094_v29 = vadd.f32 %v9505_v7, %v2083_v32  ;;  %v2073_v37 = vmul.f32 %v11997_v34, %v13230_v51 }
 0xcc0   :  { %10786 = vmatmul.mubr.msk.f32.gmra.mxu1 %vm82_vm0, %v2094_v29  ;;  %v2084_v27 = vmul.f32 %v9504_v23, %v2073_v37 }
 0xcc1   :  { %10788 = vmatprep.mubr.msk.f32.mxu1 %vm12349_vm2, %v12348_v46 }
 0xcc2   :  { %v2095_v39 = vadd.f32 %v9505_v7, %v2084_v27 }
 0xcc4   :  { %10789 = vmatmul.mubr.msk.f32.gmra.mxu1 %vm82_vm0, %v2095_v39 }
 0xcc5   :  { %10832 = vmatprep.mubr.msk.f32.mxu1 %vm12349_vm2, %v12348_v46 }
 0xd74   :  { %v2190_v47 = vpop.f32.mrf.mxu1 }
 0xd75   :  { %v2191_v33 = vadd.f32 %v9506_v44, %v2190_v47 }
 0xd76   :  { %v10778_v31 = vpop.f32.mrf.mxu1 }
 0xd77   :  { %v2214_v51 = vmax.f32 %v2191_v33, 0.0 }
 0xd78   :  { %v2195_v35 = vpop.f32.mrf.mxu1 }
 0xd79   :  { %v2196_v56 = vadd.f32 %v9506_v44, %v2195_v35  ;;  %10812 = vmatmul.mubr.msk.f32.vlgmr.msra.gmra.mxu0 %vm2229_vm6, %v2214_v51 }
 0xd7a   :  { %v10781_v38 = vpop.f32.mrf.mxu1  ;;  %10814 = vmatprep.mubr.msk.f32.mxu0 %vm12349_vm2, %v12348_v46 }
 0xd7b   :  { %v2215_v49 = vmax.f32 %v2196_v56, 0.0 }
 0xd7c   :  { %v2200_v60 = vpop.f32.mrf.mxu1 }
 0xd7d   :  { %v2201_v62 = vadd.f32 %v9506_v44, %v2200_v60  ;;  %10815 = vmatmul.mubr.msk.f32.gmra.mxu0 %vm2229_vm6, %v2215_v49  ;;  %v9525_v60 = vld [vmem:[%s15838_s5 + $0x28] sm:$0xf] }
 0xd7e   :  { %v10784_v55 = vpop.f32.mrf.mxu1  ;;  %10817 = vmatprep.mubr.msk.f32.mxu0 %vm12349_vm2, %v12348_v46  ;;  %10827 = vmatpush3.msk.msra.mxu1 %vm189_vm1, %v9525_v60 }
 0xd7f   :  { %v2216_v0 = vmax.f32 %v2201_v62, 0.0  ;;  %v9524_v62 = vld [vmem:[%s15838_s5 + $0x20] sm:$0xff]  ;;  %10828 = vmatprep.subr.mxu1 %v12348_v46  ;;  %v9523_v55 = vld [vmem:[%s15838_s5 + $0x18] sm:$0xff] }
 0xd80   :  { %v2205_v36 = vpop.f32.mrf.mxu1  ;;  %10829 = vmatpush3.msra.mxu1 %v9524_v62 }
 0xd81   :  { %v2206_v50 = vadd.f32 %v9506_v44, %v2205_v36  ;;  %10818 = vmatmul.mubr.msk.f32.gmra.mxu0 %vm2229_vm6, %v2216_v0  ;;  %10830 = vmatprep.subr.mxu1 %v12348_v46 }
 0xd82   :  { %v10787_v57 = vpop.f32.mrf.mxu1  ;;  %10820 = vmatprep.mubr.msk.f32.mxu0 %vm12349_vm2, %v12348_v46  ;;  %10831 = vmatpush3.msra.mxu1 %v9523_v55 }
 0xd83   :  { %v2217_v1 = vmax.f32 %v2206_v50, 0.0  ;;  %10872 = vmatprep.subr.mxu1 %v12348_v46 }
 0xd84   :  { %v2210_v2 = vpop.f32.mrf.mxu1 }
 0xd85   :  { %v2211_v42 = vadd.f32 %v9506_v44, %v2210_v2  ;;  %10821 = vmatmul.mubr.msk.f32.gmra.mxu0 %vm2229_vm6, %v2217_v1 }
 0xd86   :  { %v10790_v52 = vpop.f32.mrf.mxu1  ;;  %10823 = vmatprep.mubr.msk.f32.mxu0 %vm12349_vm2, %v12348_v46 }
 0xd87   :  { %v2218_v5 = vmax.f32 %v2211_v42, 0.0 }
 0xd89   :  { %10824 = vmatmul.mubr.msk.f32.gmra.mxu0 %vm2229_vm6, %v2218_v5 }
 0xd8a   :  { %10857 = vmatprep.mubr.msk.f32.mxu0 %vm12349_vm2, %v12348_v46 }
 0xe39   :  { %v2311_v11 = vpop.f32.mrf.mxu0 }
 0xe3a   :  { %v2335_v14 = vadd.f32 %v2311_v11, %v13178_v9 }
 0xe3b   :  { %v10813_v16 = vpop.f32.mrf.mxu0 }
 0xe3c   :  { %v13337_v41 = vadd.f32 %v9518_v10, %v2335_v14 }
 0xe3d   :  { %v2316_v19 = vpop.f32.mrf.mxu0 }
 0xe3e   :  { %v2336_v21 = vadd.f32 %v2316_v19, %v13184_v18  ;;  %v2356_v3 = vsel %vm82_vm0, %v13337_v41, 0.0 }
 0xe3f   :  { %2357 = vadd.xlane.f32.xlu1 %v2356_v3  ;;  %v10816_v61 = vpop.f32.mrf.mxu0  ;;  %v9521_v3 = vld [vmem:[%s15836_s3 + $0x1] ss:$0 sm:$0xff] }
 0xe40   :  { %v13342_v48 = vadd.f32 %v9518_v10, %v2336_v21 }
 0xe41   :  { %v2321_v8 = vpop.f32.mrf.mxu0 }
 0xe42   :  { %v2337_v24 = vadd.f32 %v2321_v8, %v13190_v58  ;;  %v2359_v23 = vsel %vm82_vm0, %v13342_v48, 0.0 }
 0xe43   :  { %2360 = vadd.xlane.f32.xlu0 %v2359_v23  ;;  %v10819_v9 = vpop.f32.mrf.mxu0 }
 0xe44   :  { %v13347_v4 = vadd.f32 %v9518_v10, %v2337_v24  ;;  %v9522_v24 = vld [vmem:[%s15837_s4 + $0x1] ss:$0 sm:$0xff] }
 0xe45   :  { %v2326_v53 = vpop.f32.mrf.mxu0 }
 0xe46   :  { %v2338_v18 = vadd.f32 %v2326_v53, %v13196_v25  ;;  %v2362_v7 = vsel %vm82_vm0, %v13347_v4, 0.0 }
 0xe47   :  { %2363 = vadd.xlane.f32.xlu1 %v2362_v7  ;;  %v10822_v63 = vpop.f32.mrf.mxu0 }
 0xe48   :  { %v13352_v12 = vadd.f32 %v9518_v10, %v2338_v18 }
 0xe49   :  { %v2331_v20 = vpop.f32.mrf.mxu0 }
 0xe4a   :  { %v2339_v58 = vadd.f32 %v2331_v20, %v13202_v28  ;;  %v2365_v13 = vsel %vm82_vm0, %v13352_v12, 0.0 }
 0xe4b   :  { %2366 = vadd.xlane.f32.xlu0 %v2365_v13  ;;  %v10825_v6 = vpop.f32.mrf.mxu0 }
 0xe4c   :  { %v13357_v26 = vadd.f32 %v9518_v10, %v2339_v58 }
 0xe4e   :  { %v2368_v25 = vsel %vm82_vm0, %v13357_v26, 0.0 }
 0xe4f   :  { %2369 = vadd.xlane.f32.xlu1 %v2368_v25 }
 0xec8   :  { %v2358_v54 = vpop.xlane.xlu1 %2357 }
 0xec9   :  { %v2371_v43 = vmul.f32 0.05, %v2358_v54 }
 0xecb   :  { %v2376_v30 = vsub.f32 %v13337_v41, %v2371_v43 }
 0xecc   :  { %v2361_v17 = vpop.xlane.xlu0 %2360 }
 0xecd   :  { %v2372_v59 = vmul.f32 0.05, %v2361_v17  ;;  %v2381_v45 = vmul.f32 %v2376_v30, %v2376_v30 }
 0xecf   :  { %v2377_v28 = vsub.f32 %v13342_v48, %v2372_v59  ;;  %v2386_v32 = vsel %vm82_vm0, %v2381_v45, 0.0 }
 0xed0   :  { %v2364_v34 = vpop.xlane.xlu1 %2363  ;;  %2387 = vadd.xlane.f32.xlu0 %v2386_v32 }
 0xed1   :  { %v2373_v29 = vmul.f32 0.05, %v2364_v34  ;;  %v2382_v37 = vmul.f32 %v2377_v28, %v2377_v28 }
 0xed3   :  { %v2378_v27 = vsub.f32 %v13347_v4, %v2373_v29  ;;  %v2389_v39 = vsel %vm82_vm0, %v2382_v37, 0.0 }
 0xed4   :  { %v2367_v15 = vpop.xlane.xlu0 %2366  ;;  %2390 = vadd.xlane.f32.xlu1 %v2389_v39 }
 0xed5   :  { %v2374_v40 = vmul.f32 0.05, %v2367_v15  ;;  %v2383_v22 = vmul.f32 %v2378_v27, %v2378_v27 }
 0xed7   :  { %v2379_v44 = vsub.f32 %v13352_v12, %v2374_v40  ;;  %v2392_v47 = vsel %vm82_vm0, %v2383_v22, 0.0 }
 0xed8   :  { %2393 = vadd.xlane.f32.xlu0 %v2392_v47  ;;  %v2370_v33 = vpop.xlane.xlu1 %2369 }
 0xed9   :  { %v2375_v31 = vmul.f32 0.05, %v2370_v33  ;;  %v2384_v51 = vmul.f32 %v2379_v44, %v2379_v44 }
 0xedb   :  { %v2380_v35 = vsub.f32 %v13357_v26, %v2375_v31  ;;  %v2395_v56 = vsel %vm82_vm0, %v2384_v51, 0.0 }
 0xedc   :  { %2396 = vadd.xlane.f32.xlu1 %v2395_v56 }
 0xedd   :  { %v2385_v38 = vmul.f32 %v2380_v35, %v2380_v35 }
 0xedf   :  { %v2398_v49 = vsel %vm82_vm0, %v2385_v38, 0.0 }
 0xee0   :  { %2399 = vadd.xlane.f32.xlu0 %v2398_v49 }
 0xf59   :  { %v2388_v0 = vpop.xlane.xlu0 %2387 }
 0xf5a   :  { %v2401_v36 = vmul.f32 0.05, %v2388_v0 }
 0xf5c   :  { %v2406_v50 = vadd.f32 1e-05, %v2401_v36 }
 0xf5d   :  { %v2391_v57 = vpop.xlane.xlu1 %2390 }
 0xf5e   :  { %11998 = vrsqrt.f32 %v2406_v50  ;;  %v2402_v1 = vmul.f32 0.05, %v2391_v57 }
 0xf60   :  { %v2407_v2 = vadd.f32 1e-05, %v2402_v1 }
 0xf61   :  { %v2394_v42 = vpop.xlane.xlu0 %2393 }
 0xf62   :  { %12000 = vrsqrt.f32 %v2407_v2  ;;  %v2403_v52 = vmul.f32 0.05, %v2394_v42 }
 0xf64   :  { %v2408_v5 = vadd.f32 1e-05, %v2403_v52 }
 0xf65   :  { %v2397_v11 = vpop.xlane.xlu1 %2396 }
 0xf66   :  { %12002 = vrsqrt.f32 %v2408_v5  ;;  %v2404_v10 = vmul.f32 0.05, %v2397_v11 }
 0xf68   :  { %v2409_v14 = vadd.f32 1e-05, %v2404_v10  ;;  %v13512_v10 = vld [vmem:[%s15887_s13] sm:$0xff] }
 0xf69   :  { %v2400_v16 = vpop.xlane.xlu0 %2399 }
 0xf6a   :  { %12004 = vrsqrt.f32 %v2409_v14  ;;  %v2405_v19 = vmul.f32 0.05, %v2400_v16 }
 0xf6b   :  { %v11999_v21 = vpop.eup %11998 }
 0xf6c   :  { %v2416_v61 = vmul.f32 %v11999_v21, %v2376_v30  ;;  %v2410_v8 = vadd.f32 1e-05, %v2405_v19 }
 0xf6e   :  { %v2427_v23 = vmul.f32 %v9521_v3, %v2416_v61  ;;  %12006 = vrsqrt.f32 %v2410_v8  ;;  %v13522_v61 = vld [vmem:[%s15887_s13 + $0x8] sm:$0xff] }
 0xf6f   :  { %v12001_v9 = vpop.eup %12000 }
 0xf70   :  { %v2438_v53 = vadd.f32 %v9522_v24, %v2427_v23  ;;  %v2417_v18 = vmul.f32 %v12001_v9, %v2377_v28 }
 0xf72   :  { %10833 = vmatmul.mubr.msk.f32.vlgmr.msra.gmra.mxu1 %vm82_vm0, %v2438_v53  ;;  %v2428_v7 = vmul.f32 %v9521_v3, %v2417_v18  ;;  %v13532_v18 = vld [vmem:[%s15887_s13 + $0x10] sm:$0xff] }
 0xf73   :  { %v12003_v63 = vpop.eup %12002  ;;  %10835 = vmatprep.mubr.msk.f32.mxu1 %vm12349_vm2, %v12348_v46 }
 0xf74   :  { %v2439_v20 = vadd.f32 %v9522_v24, %v2428_v7  ;;  %v2418_v58 = vmul.f32 %v12003_v63, %v2378_v27 }
 0xf76   :  { %10836 = vmatmul.mubr.msk.f32.gmra.mxu1 %vm82_vm0, %v2439_v20  ;;  %v2429_v13 = vmul.f32 %v9521_v3, %v2418_v58 }
 0xf77   :  { %v12005_v6 = vpop.eup %12004  ;;  %10838 = vmatprep.mubr.msk.f32.mxu1 %vm12349_vm2, %v12348_v46 }
 0xf78   :  { %v2440_v25 = vadd.f32 %v9522_v24, %v2429_v13  ;;  %v2419_v54 = vmul.f32 %v12005_v6, %v2379_v44  ;;  %v13539_v6 = vld [vmem:[%s15887_s13 + $0x18] sm:$0xff] }
 0xf7a   :  { %10839 = vmatmul.mubr.msk.f32.gmra.mxu1 %vm82_vm0, %v2440_v25  ;;  %v2430_v43 = vmul.f32 %v9521_v3, %v2419_v54 }
 0xf7b   :  { %v12007_v30 = vpop.eup %12006  ;;  %10841 = vmatprep.mubr.msk.f32.mxu1 %vm12349_vm2, %v12348_v46 }
 0xf7c   :  { %v2441_v17 = vadd.f32 %v9522_v24, %v2430_v43  ;;  %v2420_v59 = vmul.f32 %v12007_v30, %v2380_v35 }
 0xf7e   :  { %10842 = vmatmul.mubr.msk.f32.gmra.mxu1 %vm82_vm0, %v2441_v17  ;;  %v2431_v45 = vmul.f32 %v9521_v3, %v2420_v59  ;;  %v13546_v59 = vld [vmem:[%s15887_s13 + $0x20] sm:$0xff] }
 0xf7f   :  { %10844 = vmatprep.mubr.msk.f32.mxu1 %vm12349_vm2, %v12348_v46 }
 0xf80   :  { %v2442_v28 = vadd.f32 %v9522_v24, %v2431_v45 }
 0xf82   :  { %10845 = vmatmul.mubr.msk.f32.gmra.mxu1 %vm82_vm0, %v2442_v28 }
 0xf83   :  { %10882 = vmatprep.mubr.msk.f32.mxu1 %vm12349_vm2, %v12348_v46 }
0x1032   :  { %v13405_v32 = vpop.f32.mrf.mxu1 }
0x1034   :  { %v10834_v34 = vpop.f32.mrf.mxu1 }
0x1036   :  { %v13407_v29 = vpop.f32.mrf.mxu1 }
0x1038   :  { %v10837_v37 = vpop.f32.mrf.mxu1 }
0x103a   :  { %v13409_v27 = vpop.f32.mrf.mxu1 }
0x103c   :  { %v10840_v39 = vpop.f32.mrf.mxu1 }
0x103e   :  { %v13411_v15 = vpop.f32.mrf.mxu1 }
0x103f   :  { %2566 = vrot.lane.b32.xlu0 %v13411_v15, %s15876_s27 }
0x1040   :  { %v10843_v40 = vpop.f32.mrf.mxu1 }
0x1042   :  { %v13415_v22 = vpop.f32.mrf.mxu1 }
0x1043   :  { %2885 = vrot.lane.b32.xlu0 %v13415_v22, %s15874_s28  ;;  %2568 = vrot.lane.b32.xlu1 %v13415_v22, %s15876_s27 }
0x1044   :  { %v10846_v44 = vpop.f32.mrf.mxu1 }
0x1047   :  { %2881 = vrot.lane.b32.xlu0 %v13409_v27, %s15874_s28  ;;  %2564 = vrot.lane.b32.xlu1 %v13409_v27, %s15876_s27 }
0x104b   :  { %2877 = vrot.lane.b32.xlu0 %v13405_v32, %s15874_s28  ;;  %2562 = vrot.lane.b32.xlu1 %v13407_v29, %s15876_s27 }
0x104f   :  { %2869 = vrot.lane.b32.xlu0 %v13407_v29, %s15872_s30  ;;  %2560 = vrot.lane.b32.xlu1 %v13405_v32, %s15876_s27 }
0x1053   :  { %2873 = vrot.lane.b32.xlu0 %v13411_v15, %s15872_s30  ;;  %2883 = vrot.lane.b32.xlu1 %v13411_v15, %s15874_s28 }
0x1057   :  { %2751 = vrot.lane.b32.xlu0 %v13411_v15, %s15870_s0  ;;  %2879 = vrot.lane.b32.xlu1 %v13407_v29, %s15874_s28 }
0x105b   :  { %2867 = vrot.lane.b32.xlu1 %v13405_v32, %s15872_s30 }
0x105f   :  { %2871 = vrot.lane.b32.xlu1 %v13409_v27, %s15872_s30 }
0x1063   :  { %2875 = vrot.lane.b32.xlu1 %v13415_v22, %s15872_s30 }
0x1067   :  { %2749 = vrot.lane.b32.xlu1 %v13409_v27, %s15870_s0 }
0x106b   :  { %2753 = vrot.lane.b32.xlu1 %v13415_v22, %s15870_s0 }
0x10b1   :  { %v2567_v33 = vpop.permute.xlu0 %2566 }
0x10b5   :  { %v2569_v47 = vpop.permute.xlu1 %2568  ;;  %v2886_v35 = vpop.permute.xlu0 %2885 }
0x10b6   :  { %10848 = vmatpush3.xpose.msk.msra.mxu0 %vm298_vm3, %v2569_v47 }
0x10b7   :  { %10849 = vmatprep.subr.mxu0 %v12348_v46 }
0x10b9   :  { %v2565_v31 = vpop.permute.xlu1 %2564  ;;  %v2882_v49 = vpop.permute.xlu0 %2881 }
0x10ba   :  { %10850 = vmatpush3.xpose.msk.msra.mxu0 %vm298_vm3, %v2567_v33 }
0x10bb   :  { %10851 = vmatprep.subr.mxu0 %v12348_v46 }
0x10bd   :  { %v2563_v51 = vpop.permute.xlu1 %2562  ;;  %v2878_v62 = vpop.permute.xlu0 %2877 }
0x10be   :  { %10852 = vmatpush3.xpose.msk.msra.mxu0 %vm298_vm3, %v2565_v31 }
0x10bf   :  { %10853 = vmatprep.subr.mxu0 %v12348_v46 }
0x10c1   :  { %v2561_v56 = vpop.permute.xlu1 %2560  ;;  %v2870_v36 = vpop.permute.xlu0 %2869 }
0x10c2   :  { %10854 = vmatpush3.xpose.msk.msra.mxu0 %vm298_vm3, %v2563_v51 }
0x10c3   :  { %10855 = vmatprep.subr.mxu0 %v12348_v46 }
0x10c5   :  { %v2884_v38 = vpop.permute.xlu1 %2883  ;;  %v2874_v57 = vpop.permute.xlu0 %2873 }
0x10c6   :  { %10856 = vmatpush3.xpose.msk.msra.mxu0 %vm298_vm3, %v2561_v56 }
0x10c7   :  { %10897 = vmatprep.subr.mxu0 %v12348_v46 }
0x10c9   :  { %10858 = vmatmul.mubr.msk.f32.vlgmr.msra.gmra.mxu0 %vm298_vm3, %v13405_v32  ;;  %v2880_v60 = vpop.permute.xlu1 %2879  ;;  %v2752_v42 = vpop.permute.xlu0 %2751 }
0x10ca   :  { %10898 = vmatpush3.xpose.msk.msra.mxu0 %vm298_vm3, %v2886_v35  ;;  %10860 = vmatprep.mubr.msk.f32.mxu0 %vm12349_vm2, %v12348_v46 }
0x10cb   :  { %10899 = vmatprep.subr.mxu0 %v12348_v46 }
0x10cd   :  { %10861 = vmatmul.mubr.msk.f32.gmra.mxu0 %vm298_vm3, %v13407_v29  ;;  %v2868_v55 = vpop.permute.xlu1 %2867 }
0x10ce   :  { %10900 = vmatpush3.xpose.msk.msra.mxu0 %vm298_vm3, %v2884_v38  ;;  %10863 = vmatprep.mubr.msk.f32.mxu0 %vm12349_vm2, %v12348_v46 }
0x10cf   :  { %10901 = vmatprep.subr.mxu0 %v12348_v46 }
0x10d1   :  { %10864 = vmatmul.mubr.msk.f32.gmra.mxu0 %vm298_vm3, %v13409_v27  ;;  %v2872_v0 = vpop.permute.xlu1 %2871 }
0x10d2   :  { %10902 = vmatpush3.xpose.msk.msra.mxu0 %vm298_vm3, %v2882_v49  ;;  %10866 = vmatprep.mubr.msk.f32.mxu0 %vm12349_vm2, %v12348_v46 }
0x10d3   :  { %10903 = vmatprep.subr.mxu0 %v12348_v46 }
0x10d5   :  { %10867 = vmatmul.mubr.msk.f32.gmra.mxu0 %vm298_vm3, %v13411_v15  ;;  %v2876_v50 = vpop.permute.xlu1 %2875 }
0x10d6   :  { %10904 = vmatpush3.xpose.msk.msra.mxu0 %vm298_vm3, %v2880_v60  ;;  %10869 = vmatprep.mubr.msk.f32.mxu0 %vm12349_vm2, %v12348_v46 }
0x10d7   :  { %10905 = vmatprep.subr.mxu0 %v12348_v46 }
0x10d9   :  { %10870 = vmatmul.mubr.msk.f32.gmra.mxu0 %vm298_vm3, %v13415_v22  ;;  %v2750_v1 = vpop.permute.xlu1 %2749 }
0x10da   :  { %10906 = vmatpush3.xpose.msk.msra.mxu0 %vm298_vm3, %v2878_v62  ;;  %10907 = vmatprep.mubr.msk.f32.mxu0 %vm12349_vm2, %v12348_v46 }
0x10db   :  { %10947 = vmatprep.subr.mxu0 %v12348_v46 }
0x10dd   :  { %10908 = vmatmul.mubr.msk.f32.vlgmr.msra.gmra.mxu0 %vm298_vm3, %v2868_v55  ;;  %v2754_v2 = vpop.permute.xlu1 %2753 }
0x10de   :  { %10873 = vmatpush3.msra.mxu1 %v2754_v2  ;;  %10910 = vmatprep.mubr.msk.f32.mxu0 %vm12349_vm2, %v12348_v46 }
0x10df   :  { %10874 = vmatprep.subr.mxu1 %v12348_v46 }
0x10e0   :  { %10875 = vmatpush3.msra.mxu1 %v2752_v42 }
0x10e1   :  { %10876 = vmatprep.subr.mxu1 %v12348_v46  ;;  %10911 = vmatmul.mubr.msk.f32.gmra.mxu0 %vm298_vm3, %v2870_v36 }
0x10e2   :  { %10877 = vmatpush3.msra.mxu1 %v2750_v1  ;;  %10913 = vmatprep.mubr.msk.f32.mxu0 %vm12349_vm2, %v12348_v46 }
0x10e3   :  { %10878 = vmatprep.subr.mxu1 %v12348_v46 }
0x10e5   :  { %10914 = vmatmul.mubr.msk.f32.gmra.mxu0 %vm298_vm3, %v2872_v0 }
0x10e6   :  { %10916 = vmatprep.mubr.msk.f32.mxu0 %vm12349_vm2, %v12348_v46 }
0x10e9   :  { %10917 = vmatmul.mubr.msk.f32.gmra.mxu0 %vm298_vm3, %v2874_v57 }
0x10ea   :  { %10919 = vmatprep.mubr.msk.f32.mxu0 %vm12349_vm2, %v12348_v46 }
0x10ed   :  { %10920 = vmatmul.mubr.msk.f32.gmra.mxu0 %vm298_vm3, %v2876_v50 }
0x10ee   :  { %10949 = vmatprep.mubr.msk.f32.mxu0 %vm12349_vm2, %v12348_v46 }
0x1189   :  { %v2656_v52 = vpop.f32.mrf.mxu0 }
0x118a   :  { %v2680_v5 = vmul.f32 0.4472136, %v2656_v52 }
0x118b   :  { %v10859_v11 = vpop.f32.mrf.mxu0 }
0x118c   :  { %v13515_v14 = vadd.f32 %v13512_v10, %v2680_v5 }
0x118d   :  { %v2661_v16 = vpop.f32.mrf.mxu0 }
0x118e   :  { %v2681_v19 = vmul.f32 0.4472136, %v2661_v16  ;;  %v2690_v21 = vsel %vm419_vm4, %v13515_v14, -inf }
0x118f   :  { %2691 = vmax.xlane.f32.xlu0 %v2690_v21  ;;  %v10862_v3 = vpop.f32.mrf.mxu0 }
0x1190   :  { %v13525_v8 = vadd.f32 %v13522_v61, %v2681_v19 }
0x1191   :  { %v2666_v24 = vpop.f32.mrf.mxu0 }
0x1192   :  { %v2682_v23 = vmul.f32 0.4472136, %v2666_v24  ;;  %v2693_v9 = vsel %vm419_vm4, %v13525_v8, -inf }
0x1193   :  { %2694 = vmax.xlane.f32.xlu1 %v2693_v9  ;;  %v10865_v53 = vpop.f32.mrf.mxu0 }
0x1194   :  { %v2687_v7 = vadd.f32 %v13532_v18, %v2682_v23 }
0x1195   :  { %v2671_v63 = vpop.f32.mrf.mxu0 }
0x1196   :  { %v2683_v20 = vmul.f32 0.4472136, %v2671_v63  ;;  %v2696_v58 = vsel %vm419_vm4, %v2687_v7, -inf }
0x1197   :  { %2697 = vmax.xlane.f32.xlu0 %v2696_v58  ;;  %v10868_v13 = vpop.f32.mrf.mxu0 }
0x1198   :  { %v2688_v25 = vadd.f32 %v13539_v6, %v2683_v20 }
0x1199   :  { %v2676_v54 = vpop.f32.mrf.mxu0 }
0x119a   :  { %v2684_v43 = vmul.f32 0.4472136, %v2676_v54  ;;  %v2699_v30 = vsel %vm419_vm4, %v2688_v25, -inf }
0x119b   :  { %2700 = vmax.xlane.f32.xlu0 %v2699_v30  ;;  %v10871_v17 = vpop.f32.mrf.mxu0 }
0x119c   :  { %v2689_v45 = vadd.f32 %v13546_v59, %v2684_v43 }
0x119d   :  { %v2973_v28 = vpop.f32.mrf.mxu0 }
0x119e   :  { %v2997_v34 = vmul.f32 0.4472136, %v2973_v28  ;;  %v2702_v37 = vsel %vm419_vm4, %v2689_v45, -inf }
0x119f   :  { %2703 = vmax.xlane.f32.xlu0 %v2702_v37  ;;  %v10909_v39 = vpop.f32.mrf.mxu0 }
0x11a0   :  { %v3002_v40 = vadd.f32 %v13512_v10, %v2997_v34 }
0x11a1   :  { %v2978_v44 = vpop.f32.mrf.mxu0 }
0x11a2   :  { %v2998_v47 = vmul.f32 0.4472136, %v2978_v44  ;;  %v3007_v33 = vsel %vm419_vm4, %v3002_v40, -inf }
0x11a3   :  { %3008 = vmax.xlane.f32.xlu1 %v3007_v33  ;;  %v10912_v31 = vpop.f32.mrf.mxu0 }
0x11a4   :  { %v3003_v51 = vadd.f32 %v13522_v61, %v2998_v47 }
0x11a5   :  { %v2983_v35 = vpop.f32.mrf.mxu0 }
0x11a6   :  { %v2999_v56 = vmul.f32 0.4472136, %v2983_v35  ;;  %v3010_v38 = vsel %vm419_vm4, %v3003_v51, -inf }
0x11a7   :  { %3011 = vmax.xlane.f32.xlu0 %v3010_v38  ;;  %v10915_v49 = vpop.f32.mrf.mxu0 }
0x11a8   :  { %v3004_v60 = vadd.f32 %v13532_v18, %v2999_v56 }
0x11a9   :  { %v2988_v62 = vpop.f32.mrf.mxu0 }
0x11aa   :  { %v3013_v55 = vsel %vm419_vm4, %v3004_v60, -inf  ;;  %v3000_v57 = vmul.f32 0.4472136, %v2988_v62 }
0x11ab   :  { %3014 = vmax.xlane.f32.xlu1 %v3013_v55  ;;  %v10918_v0 = vpop.f32.mrf.mxu0 }
0x11ac   :  { %v13561_v1 = vadd.f32 %v13539_v6, %v3000_v57 }
0x11ad   :  { %v2993_v36 = vpop.f32.mrf.mxu0 }
0x11ae   :  { %v3001_v2 = vmul.f32 0.4472136, %v2993_v36  ;;  %v3016_v52 = vsel %vm419_vm4, %v13561_v1, -inf }
0x11af   :  { %v10921_v50 = vpop.f32.mrf.mxu0 }
0x11b0   :  { %v13564_v42 = vadd.f32 %v13546_v59, %v3001_v2 }
0x11b2   :  { %v3019_v5 = vsel %vm419_vm4, %v13564_v42, -inf }
0x11bc   :  { %3070 = vrot.lane.b32.xlu1 %v13415_v22, %s15868_s26 }
0x11bd   :  { %2747 = vrot.lane.b32.xlu0 %v13407_v29, %s15870_s0 }
0x11dc   :  { %3017 = vmax.xlane.f32.xlu0 %v3016_v52 }
0x11e0   :  { %3020 = vmax.xlane.f32.xlu1 %v3019_v5 }
0x11f2   :  { %2745 = vrot.lane.b32.xlu0 %v13405_v32, %s15870_s0 }
0x1218   :  { %v2692_v11 = vpop.xlane.xlu0 %2691 }
0x1219   :  { %v2705_v16 = vsub.f32 %v13515_v14, %v2692_v11 }
0x121b   :  { %v2710_v19 = vmul.f32 1.442695, %v2705_v16 }
0x121c   :  { %v2695_v21 = vpop.xlane.xlu1 %2694 }
0x121d   :  { %12008 = vpow2.f32 %v2710_v19  ;;  %v2706_v3 = vsub.f32 %v13525_v8, %v2695_v21 }
0x121f   :  { %v2712_v24 = vmul.f32 1.442695, %v2706_v3 }
0x1220   :  { %v2698_v23 = vpop.xlane.xlu0 %2697 }
0x1221   :  { %12010 = vpow2.f32 %v2712_v24  ;;  %v2707_v9 = vsub.f32 %v2687_v7, %v2698_v23 }
0x1223   :  { %v2714_v53 = vmul.f32 1.442695, %v2707_v9 }
0x1224   :  { %v2701_v63 = vpop.xlane.xlu0 %2700 }
0x1225   :  { %12012 = vpow2.f32 %v2714_v53  ;;  %v2708_v20 = vsub.f32 %v2688_v25, %v2701_v63 }
0x1227   :  { %v2716_v58 = vmul.f32 1.442695, %v2708_v20 }
0x1228   :  { %v2704_v13 = vpop.xlane.xlu0 %2703 }
0x1229   :  { %12014 = vpow2.f32 %v2716_v58  ;;  %v2709_v54 = vsub.f32 %v2689_v45, %v2704_v13 }
0x122a   :  { %v13574_v43 = vpop.eup %12008 }
0x122b   :  { %v2718_v14 = vmul.f32 1.442695, %v2709_v54  ;;  %v2720_v30 = vsel %vm419_vm4, %v13574_v43, 0.0 }
0x122c   :  { %v3009_v17 = vpop.xlane.xlu1 %3008  ;;  %2721 = vadd.xlane.f32.xlu0 %v2720_v30 }
0x122d   :  { %12016 = vpow2.f32 %v2718_v14  ;;  %v3022_v8 = vsub.f32 %v3002_v40, %v3009_v17 }
0x122e   :  { %v13578_v28 = vpop.eup %12010 }
0x122f   :  { %v3027_v7 = vmul.f32 1.442695, %v3022_v8  ;;  %v2723_v25 = vsel %vm419_vm4, %v13578_v28, 0.0 }
0x1230   :  { %v3012_v34 = vpop.xlane.xlu0 %3011  ;;  %2724 = vadd.xlane.f32.xlu1 %v2723_v25 }
0x1231   :  { %12018 = vpow2.f32 %v3027_v7  ;;  %v3023_v45 = vsub.f32 %v3003_v51, %v3012_v34 }
0x1232   :  { %v13582_v37 = vpop.eup %12012 }
0x1233   :  { %v3029_v39 = vmul.f32 1.442695, %v3023_v45  ;;  %v2726_v44 = vsel %vm419_vm4, %v13582_v37, 0.0 }
0x1234   :  { %v2748_v47 = vpop.permute.xlu0 %2747  ;;  %v3015_v33 = vpop.xlane.xlu1 %3014  ;;  %2727 = vadd.xlane.f32.xlu0 %v2726_v44 }
0x1235   :  { %12020 = vpow2.f32 %v3029_v39  ;;  %v3024_v40 = vsub.f32 %v3004_v60, %v3015_v33  ;;  %10879 = vmatpush3.msra.mxu1 %v2748_v47 }
0x1236   :  { %v13586_v31 = vpop.eup %12014  ;;  %10880 = vmatprep.subr.mxu1 %v12348_v46 }
0x1237   :  { %v3031_v35 = vmul.f32 1.442695, %v3024_v40  ;;  %v2729_v51 = vsel %vm419_vm4, %v13586_v31, 0.0 }
0x1238   :  { %2730 = vadd.xlane.f32.xlu1 %v2729_v51  ;;  %v3071_v50 = vpop.permute.xlu1 %3070 }
0x1239   :  { %12022 = vpow2.f32 %v3031_v35  ;;  %v9547_v35 = vld [vmem:[%s15839_s6 + $0x20] sm:$0x1f] }
0x123a   :  { %v13591_v56 = vpop.eup %12016 }
0x123b   :  { %v2732_v38 = vsel %vm419_vm4, %v13591_v56, 0.0 }
0x123c   :  { %2733 = vadd.xlane.f32.xlu0 %v2732_v38 }
0x123e   :  { %v13595_v49 = vpop.eup %12018 }
0x123f   :  { %v3037_v60 = vsel %vm419_vm4, %v13595_v49, 0.0 }
0x1240   :  { %3038 = vadd.xlane.f32.xlu0 %v3037_v60 }
0x1242   :  { %v13599_v62 = vpop.eup %12020 }
0x1243   :  { %v3040_v55 = vsel %vm419_vm4, %v13599_v62, 0.0 }
0x1244   :  { %3041 = vadd.xlane.f32.xlu1 %v3040_v55  ;;  %v9563_v55 = vld [vmem:[%s15839_s6 + $0x28] sm:$0x1f] }
0x1245   :  { %10948 = vmatpush3.msk.msra.mxu0 %vm928_vm5, %v9563_v55 }
0x1246   :  { %v13603_v0 = vpop.eup %12022  ;;  %10981 = vmatprep.subr.mxu0 %v12348_v46 }
0x1247   :  { %v3043_v36 = vsel %vm419_vm4, %v13603_v0, 0.0 }
0x1248   :  { %3044 = vadd.xlane.f32.xlu0 %v3043_v36 }
0x1255   :  { %3066 = vrot.lane.b32.xlu1 %v13409_v27, %s15868_s26 }
0x1259   :  { %3064 = vrot.lane.b32.xlu1 %v13407_v29, %s15868_s26 }
0x125e   :  { %3068 = vrot.lane.b32.xlu0 %v13411_v15, %s15868_s26 }
0x1262   :  { %3418 = vrot.lane.b32.xlu0 %v13415_v22, %s15866_s19 }
0x1265   :  { %v3018_v57 = vpop.xlane.xlu0 %3017 }
0x1266   :  { %v3025_v2 = vsub.f32 %v13561_v1, %v3018_v57  ;;  %3414 = vrot.lane.b32.xlu0 %v13409_v27, %s15866_s19 }
0x1268   :  { %v3033_v52 = vmul.f32 1.442695, %v3025_v2 }
0x1269   :  { %v2746_v5 = vpop.permute.xlu0 %2745  ;;  %v3021_v11 = vpop.xlane.xlu1 %3020 }
0x126a   :  { %v3026_v16 = vsub.f32 %v13564_v42, %v3021_v11  ;;  %3410 = vrot.lane.b32.xlu0 %v13405_v32, %s15866_s19  ;;  %10881 = vmatpush3.msra.mxu1 %v2746_v5  ;;  %12024 = vpow2.f32 %v3033_v52 }
0x126b   :  { %10922 = vmatprep.subr.mxu1 %v12348_v46 }
0x126c   :  { %v3035_v19 = vmul.f32 1.442695, %v3026_v16 }
0x126e   :  { %3402 = vrot.lane.b32.xlu0 %v13407_v29, %s15864_s1  ;;  %12026 = vpow2.f32 %v3035_v19 }
0x1272   :  { %3406 = vrot.lane.b32.xlu0 %v13411_v15, %s15864_s1 }
0x1276   :  { %3603 = vrot.lane.b32.xlu0 %v13415_v22, %s15889_s25 }
0x1277   :  { %v13628_v1 = vpop.eup %12024 }
0x1278   :  { %v3046_v42 = vsel %vm419_vm4, %v13628_v1, 0.0 }
0x127b   :  { %v13632_v21 = vpop.eup %12026 }
0x127c   :  { %v3049_v3 = vsel %vm419_vm4, %v13632_v21, 0.0 }
0x127d   :  { %3047 = vadd.xlane.f32.xlu1 %v3046_v42 }
0x1281   :  { %3050 = vadd.xlane.f32.xlu1 %v3049_v3 }
0x1292   :  { %3062 = vrot.lane.b32.xlu1 %v13405_v32, %s15868_s26  ;;  %s15893_s26 = smov 123  }
0x1296   :  { %3416 = vrot.lane.b32.xlu1 %v13411_v15, %s15866_s19 }
0x129a   :  { %3412 = vrot.lane.b32.xlu1 %v13407_v29, %s15866_s19  ;;  %s15894_s19 = smov 88  }
0x129e   :  { %3400 = vrot.lane.b32.xlu1 %v13405_v32, %s15864_s1 }
0x12a2   :  { %3404 = vrot.lane.b32.xlu1 %v13409_v27, %s15864_s1 }
0x12a6   :  { %3408 = vrot.lane.b32.xlu1 %v13415_v22, %s15864_s1  ;;  %s15895_s1 = smov 83  }
0x12aa   :  { %3601 = vrot.lane.b32.xlu1 %v13411_v15, %s15889_s25 }
0x12ae   :  { %3599 = vrot.lane.b32.xlu1 %v13409_v27, %s15889_s25 }
0x12b2   :  { %3597 = vrot.lane.b32.xlu1 %v13407_v29, %s15889_s25 }
0x12b5   :  { %v2722_v24 = vpop.xlane.xlu0 %2721 }
0x12b6   :  { %12028 = vrcp.f32 %v2722_v24 }
0x12b9   :  { %v2725_v23 = vpop.xlane.xlu1 %2724 }
0x12ba   :  { %12030 = vrcp.f32 %v2725_v23 }
0x12bd   :  { %v2728_v9 = vpop.xlane.xlu0 %2727 }
0x12be   :  { %12032 = vrcp.f32 %v2728_v9 }
0x12c1   :  { %v2731_v53 = vpop.xlane.xlu1 %2730 }
0x12c2   :  { %12034 = vrcp.f32 %v2731_v53 }
0x12c3   :  { %v12029_v63 = vpop.eup %12028 }
0x12c4   :  { %v2740_v20 = vmul.f32 %v12029_v63, %v13574_v43 }
0x12c5   :  { %v2734_v58 = vpop.xlane.xlu0 %2733 }
0x12c6   :  { %12036 = vrcp.f32 %v2734_v58  ;;  %10883 = vmatmul.mubr.msk.f32.vlgmr.msra.gmra.mxu1 %vm419_vm4, %v2740_v20 }
0x12c7   :  { %v12031_v13 = vpop.eup %12030  ;;  %10923 = vmatpush3.msra.mxu1 %v3071_v50  ;;  %10885 = vmatprep.mubr.msk.f32.mxu1 %vm12349_vm2, %v12348_v46 }
0x12c8   :  { %v2741_v54 = vmul.f32 %v12031_v13, %v13578_v28  ;;  %10924 = vmatprep.subr.mxu1 %v12348_v46 }
0x12c9   :  { %v3039_v30 = vpop.xlane.xlu0 %3038 }
0x12ca   :  { %10886 = vmatmul.mubr.msk.f32.gmra.mxu1 %vm419_vm4, %v2741_v54  ;;  %12038 = vrcp.f32 %v3039_v30 }
0x12cb   :  { %v12033_v14 = vpop.eup %12032  ;;  %10888 = vmatprep.mubr.msk.f32.mxu1 %vm12349_vm2, %v12348_v46 }
0x12cc   :  { %v2742_v43 = vmul.f32 %v12033_v14, %v13582_v37 }
0x12cd   :  { %v3042_v17 = vpop.xlane.xlu1 %3041 }
0x12ce   :  { %10889 = vmatmul.mubr.msk.f32.gmra.mxu1 %vm419_vm4, %v2742_v43  ;;  %12040 = vrcp.f32 %v3042_v17 }
0x12cf   :  { %v12035_v8 = vpop.eup %12034  ;;  %10891 = vmatprep.mubr.msk.f32.mxu1 %vm12349_vm2, %v12348_v46 }
0x12d0   :  { %v2743_v28 = vmul.f32 %v12035_v8, %v13586_v31 }
0x12d1   :  { %v3045_v7 = vpop.xlane.xlu0 %3044  ;;  %v3067_v34 = vpop.permute.xlu1 %3066 }
0x12d2   :  { %10892 = vmatmul.mubr.msk.f32.gmra.mxu1 %vm419_vm4, %v2743_v28  ;;  %12042 = vrcp.f32 %v3045_v7 }
0x12d3   :  { %v12037_v25 = vpop.eup %12036  ;;  %10894 = vmatprep.mubr.msk.f32.mxu1 %vm12349_vm2, %v12348_v46 }
0x12d4   :  { %v2744_v45 = vmul.f32 %v12037_v25, %v13591_v56 }
0x12d5   :  { %v3069_v37 = vpop.permute.xlu0 %3068  ;;  %v3065_v39 = vpop.permute.xlu1 %3064 }
0x12d6   :  { %10895 = vmatmul.mubr.msk.f32.gmra.mxu1 %vm419_vm4, %v2744_v45 }
0x12d7   :  { %10925 = vmatpush3.msra.mxu1 %v3069_v37  ;;  %10932 = vmatprep.mubr.msk.f32.mxu1 %vm12349_vm2, %v12348_v46  ;;  %v12039_v33 = vpop.eup %12038 }
0x12d8   :  { %10926 = vmatprep.subr.mxu1 %v12348_v46  ;;  %v3057_v40 = vmul.f32 %v12039_v33, %v13595_v49 }
0x12d9   :  { %10927 = vmatpush3.msra.mxu1 %v3067_v34  ;;  %v3419_v57 = vpop.permute.xlu0 %3418 }
0x12da   :  { %10928 = vmatprep.subr.mxu1 %v12348_v46 }
0x12db   :  { %10929 = vmatpush3.msra.mxu1 %v3065_v39  ;;  %v12041_v51 = vpop.eup %12040 }
0x12dc   :  { %10930 = vmatprep.subr.mxu1 %v12348_v46  ;;  %v3058_v56 = vmul.f32 %v12041_v51, %v13599_v62 }
0x12dd   :  { %v3415_v52 = vpop.permute.xlu0 %3414 }
0x12df   :  { %v12043_v38 = vpop.eup %12042 }
0x12e0   :  { %v3059_v49 = vmul.f32 %v12043_v38, %v13603_v0 }
0x12e1   :  { %v13711_v11 = vpop.permute.xlu0 %3410 }
0x12e5   :  { %v13715_v19 = vpop.permute.xlu0 %3402 }
0x12e9   :  { %v13719_v42 = vpop.permute.xlu0 %3406 }
0x12ed   :  { %v3604_v24 = vpop.permute.xlu0 %3603 }
0x1306   :  { %v3048_v44 = vpop.xlane.xlu1 %3047 }
0x1307   :  { %12044 = vrcp.f32 %v3048_v44 }
0x130a   :  { %v3051_v47 = vpop.xlane.xlu1 %3050 }
0x130b   :  { %12046 = vrcp.f32 %v3051_v47 }
0x130e   :  { %v3063_v31 = vpop.permute.xlu1 %3062 }
0x130f   :  { %10931 = vmatpush3.msra.mxu1 %v3063_v31 }
0x1310   :  { %10933 = vmatmul.mubr.msk.f32.vlgmr.msra.gmra.mxu1 %vm419_vm4, %v3057_v40  ;;  %10964 = vmatprep.subr.mxu1 %v12348_v46 }
0x1311   :  { %10935 = vmatprep.mubr.msk.f32.mxu1 %vm12349_vm2, %v12348_v46  ;;  %10965 = vmatpush3.msk.msra.mxu1 %vm928_vm5, %v9547_v35 }
0x1312   :  { %11006 = vmatprep.subr.mxu1 %v12348_v46  ;;  %v3417_v50 = vpop.permute.xlu1 %3416 }
0x1314   :  { %10936 = vmatmul.mubr.msk.f32.gmra.mxu1 %vm419_vm4, %v3058_v56  ;;  %v12045_v60 = vpop.eup %12044 }
0x1315   :  { %10938 = vmatprep.mubr.msk.f32.mxu1 %vm12349_vm2, %v12348_v46  ;;  %v3060_v62 = vmul.f32 %v12045_v60, %v13628_v1 }
0x1316   :  { %v3413_v2 = vpop.permute.xlu1 %3412 }
0x1318   :  { %10939 = vmatmul.mubr.msk.f32.gmra.mxu1 %vm419_vm4, %v3059_v49  ;;  %v12047_v36 = vpop.eup %12046 }
0x1319   :  { %10941 = vmatprep.mubr.msk.f32.mxu1 %vm12349_vm2, %v12348_v46  ;;  %v3061_v0 = vmul.f32 %v12047_v36, %v13632_v21 }
0x131a   :  { %v13709_v5 = vpop.permute.xlu1 %3400 }
0x131c   :  { %10942 = vmatmul.mubr.msk.f32.gmra.mxu1 %vm419_vm4, %v3060_v62 }
0x131d   :  { %10944 = vmatprep.mubr.msk.f32.mxu1 %vm12349_vm2, %v12348_v46 }
0x131e   :  { %v13713_v16 = vpop.permute.xlu1 %3404 }
0x1320   :  { %10945 = vmatmul.mubr.msk.f32.gmra.mxu1 %vm419_vm4, %v3061_v0 }
0x1321   :  { %10966 = vmatprep.mubr.msk.f32.mxu1 %vm12349_vm2, %v12348_v46 }
0x1322   :  { %v13717_v1 = vpop.permute.xlu1 %3408 }
0x1326   :  { %v3602_v21 = vpop.permute.xlu1 %3601 }
0x132a   :  { %v3600_v23 = vpop.permute.xlu1 %3599 }
0x132e   :  { %v3598_v20 = vpop.permute.xlu1 %3597 }
0x1386   :  { %v2841_v3 = vpop.f32.mrf.mxu1 }
0x1387   :  { %10967 = vmatmul.mubr.msk.f32.vlgmr.msra.gmra.mxu1 %vm298_vm3, %v2841_v3 }
0x1388   :  { %11007 = vmatpush3.msra.mxu1 %v3604_v24  ;;  %v10884_v9 = vpop.f32.mrf.mxu1  ;;  %10969 = vmatprep.mubr.msk.f32.mxu1 %vm12349_vm2, %v12348_v46 }
0x1389   :  { %11008 = vmatprep.subr.mxu1 %v12348_v46 }
0x138a   :  { %11009 = vmatpush3.msra.mxu1 %v3602_v21  ;;  %v2846_v53 = vpop.f32.mrf.mxu1 }
0x138b   :  { %11010 = vmatprep.subr.mxu1 %v12348_v46  ;;  %10970 = vmatmul.mubr.msk.f32.gmra.mxu1 %vm298_vm3, %v2846_v53 }
0x138c   :  { %11011 = vmatpush3.msra.mxu1 %v3600_v23  ;;  %v10887_v63 = vpop.f32.mrf.mxu1  ;;  %10972 = vmatprep.mubr.msk.f32.mxu1 %vm12349_vm2, %v12348_v46 }
0x138d   :  { %11012 = vmatprep.subr.mxu1 %v12348_v46 }
0x138e   :  { %11013 = vmatpush3.msra.mxu1 %v3598_v20  ;;  %v2851_v58 = vpop.f32.mrf.mxu1 }
0x138f   :  { %10973 = vmatmul.mubr.msk.f32.gmra.mxu1 %vm298_vm3, %v2851_v58  ;;  %11014 = vmatprep.subr.mxu1 %v12348_v46 }
0x1390   :  { %v10890_v13 = vpop.f32.mrf.mxu1  ;;  %10975 = vmatprep.mubr.msk.f32.mxu1 %vm12349_vm2, %v12348_v46 }
0x1392   :  { %v2856_v54 = vpop.f32.mrf.mxu1 }
0x1393   :  { %10976 = vmatmul.mubr.msk.f32.gmra.mxu1 %vm298_vm3, %v2856_v54 }
0x1394   :  { %v10893_v14 = vpop.f32.mrf.mxu1  ;;  %10978 = vmatprep.mubr.msk.f32.mxu1 %vm12349_vm2, %v12348_v46 }
0x1396   :  { %v2861_v43 = vpop.f32.mrf.mxu1 }
0x1397   :  { %10979 = vmatmul.mubr.msk.f32.gmra.mxu1 %vm298_vm3, %v2861_v43 }
0x1398   :  { %v10896_v30 = vpop.f32.mrf.mxu1  ;;  %11016 = vmatprep.mubr.msk.f32.mxu1 %vm12349_vm2, %v12348_v46 }
0x13d0   :  { %v3158_v17 = vpop.f32.mrf.mxu1 }
0x13d1   :  { %10950 = vmatmul.mubr.msk.f32.vlgmr.msra.gmra.mxu0 %vm298_vm3, %v3158_v17 }
0x13d2   :  { %10982 = vmatpush3.xpose.msk.msra.mxu0 %vm298_vm3, %v3419_v57  ;;  %v10934_v8 = vpop.f32.mrf.mxu1  ;;  %10952 = vmatprep.mubr.msk.f32.mxu0 %vm12349_vm2, %v12348_v46 }
0x13d3   :  { %10983 = vmatprep.subr.mxu0 %v12348_v46 }
0x13d4   :  { %v3163_v28 = vpop.f32.mrf.mxu1 }
0x13d5   :  { %10953 = vmatmul.mubr.msk.f32.gmra.mxu0 %vm298_vm3, %v3163_v28 }
0x13d6   :  { %10984 = vmatpush3.xpose.msk.msra.mxu0 %vm298_vm3, %v3417_v50  ;;  %v10937_v7 = vpop.f32.mrf.mxu1  ;;  %10955 = vmatprep.mubr.msk.f32.mxu0 %vm12349_vm2, %v12348_v46 }
0x13d7   :  { %10985 = vmatprep.subr.mxu0 %v12348_v46 }
0x13d8   :  { %v3168_v25 = vpop.f32.mrf.mxu1 }
0x13d9   :  { %10956 = vmatmul.mubr.msk.f32.gmra.mxu0 %vm298_vm3, %v3168_v25 }
0x13da   :  { %10986 = vmatpush3.xpose.msk.msra.mxu0 %vm298_vm3, %v3415_v52  ;;  %v10940_v34 = vpop.f32.mrf.mxu1  ;;  %10958 = vmatprep.mubr.msk.f32.mxu0 %vm12349_vm2, %v12348_v46 }
0x13db   :  { %10987 = vmatprep.subr.mxu0 %v12348_v46 }
0x13dc   :  { %v3173_v45 = vpop.f32.mrf.mxu1 }
0x13dd   :  { %10959 = vmatmul.mubr.msk.f32.gmra.mxu0 %vm298_vm3, %v3173_v45 }
0x13de   :  { %10988 = vmatpush3.xpose.msk.msra.mxu0 %vm298_vm3, %v3413_v2  ;;  %v10943_v37 = vpop.f32.mrf.mxu1  ;;  %10961 = vmatprep.mubr.msk.f32.mxu0 %vm12349_vm2, %v12348_v46 }
0x13df   :  { %10989 = vmatprep.subr.mxu0 %v12348_v46 }
0x13e0   :  { %v3178_v39 = vpop.f32.mrf.mxu1 }
0x13e1   :  { %10962 = vmatmul.mubr.msk.f32.gmra.mxu0 %vm298_vm3, %v3178_v39 }
0x13e2   :  { %10990 = vmatpush3.xpose.msk.msra.mxu0 %vm298_vm3, %v13711_v11  ;;  %v10946_v44 = vpop.f32.mrf.mxu1  ;;  %10991 = vmatprep.mubr.msk.f32.mxu0 %vm12349_vm2, %v12348_v46 }
0x13e3   :  { %11031 = vmatprep.subr.mxu0 %v12348_v46 }
0x13e5   :  { %10992 = vmatmul.mubr.msk.f32.vlgmr.msra.gmra.mxu0 %vm298_vm3, %v13709_v5 }
0x13e6   :  { %10994 = vmatprep.mubr.msk.f32.mxu0 %vm12349_vm2, %v12348_v46 }
0x13e9   :  { %10995 = vmatmul.mubr.msk.f32.gmra.mxu0 %vm298_vm3, %v13715_v19 }
0x13ea   :  { %10997 = vmatprep.mubr.msk.f32.mxu0 %vm12349_vm2, %v12348_v46 }
0x13ed   :  { %10998 = vmatmul.mubr.msk.f32.gmra.mxu0 %vm298_vm3, %v13713_v16 }
0x13ee   :  { %11000 = vmatprep.mubr.msk.f32.mxu0 %vm12349_vm2, %v12348_v46 }
0x13f1   :  { %11001 = vmatmul.mubr.msk.f32.gmra.mxu0 %vm298_vm3, %v13719_v42 }
0x13f2   :  { %11003 = vmatprep.mubr.msk.f32.mxu0 %vm12349_vm2, %v12348_v46 }
0x13f5   :  { %11004 = vmatmul.mubr.msk.f32.gmra.mxu0 %vm298_vm3, %v13717_v1 }
0x13f6   :  { %11033 = vmatprep.mubr.msk.f32.mxu0 %vm12349_vm2, %v12348_v46 }
0x1447   :  { %v13786_v47 = vpop.f32.mrf.mxu1 }
0x1449   :  { %v10968_v33 = vpop.f32.mrf.mxu1 }
0x144b   :  { %v13788_v40 = vpop.f32.mrf.mxu1 }
0x144d   :  { %v10971_v31 = vpop.f32.mrf.mxu1 }
0x144f   :  { %v13790_v35 = vpop.f32.mrf.mxu1 }
0x1451   :  { %v10974_v51 = vpop.f32.mrf.mxu1 }
0x1453   :  { %v13792_v56 = vpop.f32.mrf.mxu1 }
0x1455   :  { %v10977_v38 = vpop.f32.mrf.mxu1 }
0x1457   :  { %v13794_v49 = vpop.f32.mrf.mxu1 }
0x1459   :  { %v10980_v60 = vpop.f32.mrf.mxu1 }
0x1491   :  { %v13796_v55 = vpop.f32.mrf.mxu0 }
0x1493   :  { %v10951_v62 = vpop.f32.mrf.mxu0 }
0x1495   :  { %v13798_v36 = vpop.f32.mrf.mxu0 }
0x1497   :  { %v10954_v0 = vpop.f32.mrf.mxu0 }
0x1499   :  { %v13800_v50 = vpop.f32.mrf.mxu0 }
0x149b   :  { %v10957_v57 = vpop.f32.mrf.mxu0 }
0x149d   :  { %v13802_v2 = vpop.f32.mrf.mxu0 }
0x149f   :  { %v10960_v52 = vpop.f32.mrf.mxu0 }
0x14a1   :  { %v13804_v5 = vpop.f32.mrf.mxu0 }
0x14a3   :  { %v10963_v11 = vpop.f32.mrf.mxu0 }
0x14a5   :  { %v3506_v16 = vpop.f32.mrf.mxu0 }
0x14a6   :  { %v3530_v19 = vmul.f32 0.4472136, %v3506_v16 }
0x14a7   :  { %v10993_v1 = vpop.f32.mrf.mxu0 }
0x14a8   :  { %v3535_v42 = vadd.f32 %v13512_v10, %v3530_v19 }
0x14a9   :  { %v3511_v21 = vpop.f32.mrf.mxu0 }
0x14aa   :  { %v3531_v3 = vmul.f32 0.4472136, %v3511_v21  ;;  %v3540_v24 = vsel %vm419_vm4, %v3535_v42, -inf }
0x14ab   :  { %3541 = vmax.xlane.f32.xlu0 %v3540_v24  ;;  %v10996_v23 = vpop.f32.mrf.mxu0 }
0x14ac   :  { %v3536_v9 = vadd.f32 %v13522_v61, %v3531_v3 }
0x14ad   :  { %v3516_v53 = vpop.f32.mrf.mxu0 }
0x14ae   :  { %v3532_v63 = vmul.f32 0.4472136, %v3516_v53  ;;  %v3543_v20 = vsel %vm419_vm4, %v3536_v9, -inf }
0x14af   :  { %3544 = vmax.xlane.f32.xlu1 %v3543_v20  ;;  %v10999_v58 = vpop.f32.mrf.mxu0 }
0x14b0   :  { %v3537_v13 = vadd.f32 %v13532_v18, %v3532_v63 }
0x14b1   :  { %v3521_v54 = vpop.f32.mrf.mxu0 }
0x14b2   :  { %v3533_v14 = vmul.f32 0.4472136, %v3521_v54  ;;  %v3546_v43 = vsel %vm419_vm4, %v3537_v13, -inf }
0x14b3   :  { %3547 = vmax.xlane.f32.xlu0 %v3546_v43  ;;  %v11002_v30 = vpop.f32.mrf.mxu0 }
0x14b4   :  { %v3538_v17 = vadd.f32 %v13539_v6, %v3533_v14 }
0x14b5   :  { %v3526_v8 = vpop.f32.mrf.mxu0 }
0x14b6   :  { %v3534_v28 = vmul.f32 0.4472136, %v3526_v8  ;;  %v3549_v7 = vsel %vm419_vm4, %v3538_v17, -inf }
0x14b7   :  { %3550 = vmax.xlane.f32.xlu0 %v3549_v7  ;;  %v11005_v25 = vpop.f32.mrf.mxu0 }
0x14b8   :  { %v3539_v34 = vadd.f32 %v13546_v59, %v3534_v28 }
0x14ba   :  { %v3552_v45 = vsel %vm419_vm4, %v3539_v34, -inf }
0x14bb   :  { %3553 = vmax.xlane.f32.xlu0 %v3552_v45 }
0x14c0   :  { %3848 = vrot.lane.b32.xlu1 %v13415_v22, %s15890_s29 }
0x14d1   :  { %3595 = vrot.lane.b32.xlu0 %v13405_v32, %s15889_s25 }
0x1534   :  { %v3542_v37 = vpop.xlane.xlu0 %3541 }
0x1535   :  { %v3555_v39 = vsub.f32 %v3535_v42, %v3542_v37 }
0x1537   :  { %v3560_v44 = vmul.f32 1.442695, %v3555_v39 }
0x1538   :  { %v3545_v33 = vpop.xlane.xlu1 %3544 }
0x1539   :  { %12048 = vpow2.f32 %v3560_v44  ;;  %v3556_v31 = vsub.f32 %v3536_v9, %v3545_v33 }
0x153b   :  { %v3562_v51 = vmul.f32 1.442695, %v3556_v31 }
0x153c   :  { %v3548_v38 = vpop.xlane.xlu0 %3547 }
0x153d   :  { %12050 = vpow2.f32 %v3562_v51  ;;  %v3557_v19 = vsub.f32 %v3537_v13, %v3548_v38  ;;  %v3849_v13 = vpop.permute.xlu1 %3848  ;;  %v9591_v51 = vld [vmem:[%s15839_s6 + $0x30] sm:$0x1f] }
0x153e   :  { %11032 = vmatpush3.msk.msra.mxu0 %vm928_vm5, %v9591_v51 }
0x153f   :  { %v3564_v1 = vmul.f32 1.442695, %v3557_v19  ;;  %11073 = vmatprep.subr.mxu0 %v12348_v46 }
0x1540   :  { %v3551_v60 = vpop.xlane.xlu0 %3550 }
0x1541   :  { %v3558_v42 = vsub.f32 %v3538_v17, %v3551_v60  ;;  %12052 = vpow2.f32 %v3564_v1 }
0x1543   :  { %v3566_v21 = vmul.f32 1.442695, %v3558_v42 }
0x1544   :  { %v3554_v62 = vpop.xlane.xlu0 %3553 }
0x1545   :  { %12054 = vpow2.f32 %v3566_v21  ;;  %v3559_v53 = vsub.f32 %v3539_v34, %v3554_v62 }
0x1546   :  { %v12049_v0 = vpop.eup %12048 }
0x1547   :  { %v3570_v57 = vsel %vm419_vm4, %v12049_v0, 0.0  ;;  %v3568_v63 = vmul.f32 1.442695, %v3559_v53 }
0x1548   :  { %3571 = vadd.xlane.f32.xlu1 %v3570_v57  ;;  %v3596_v52 = vpop.permute.xlu0 %3595 }
0x1549   :  { %11015 = vmatpush3.msra.mxu1 %v3596_v52  ;;  %12056 = vpow2.f32 %v3568_v63 }
0x154a   :  { %v12051_v11 = vpop.eup %12050  ;;  %11048 = vmatprep.subr.mxu1 %v12348_v46 }
0x154b   :  { %v3573_v16 = vsel %vm419_vm4, %v12051_v11, 0.0 }
0x154c   :  { %3574 = vadd.xlane.f32.xlu0 %v3573_v16 }
0x154e   :  { %v12053_v3 = vpop.eup %12052 }
0x154f   :  { %v3576_v24 = vsel %vm419_vm4, %v12053_v3, 0.0 }
0x1552   :  { %v12055_v23 = vpop.eup %12054 }
0x1553   :  { %v3579_v9 = vsel %vm419_vm4, %v12055_v23, 0.0 }
0x1556   :  { %v12057_v20 = vpop.eup %12056 }
0x1557   :  { %v3582_v58 = vsel %vm419_vm4, %v12057_v20, 0.0 }
0x1559   :  { %3844 = vrot.lane.b32.xlu1 %v13409_v27, %s15890_s29 }
0x1562   :  { %3846 = vrot.lane.b32.xlu0 %v13411_v15, %s15890_s29 }
0x157d   :  { %3577 = vadd.xlane.f32.xlu1 %v3576_v24 }
0x1581   :  { %3580 = vadd.xlane.f32.xlu0 %v3579_v9 }
0x158e   :  { %3840 = vrot.lane.b32.xlu1 %v13405_v32, %s15890_s29 }
0x1597   :  { %3842 = vrot.lane.b32.xlu0 %v13407_v29, %s15890_s29 }
0x159b   :  { %3830 = vrot.lane.b32.xlu0 %v13405_v32, %s15891_s23 }
0x159f   :  { %3834 = vrot.lane.b32.xlu0 %v13409_v27, %s15891_s23 }
0x15a3   :  { %3838 = vrot.lane.b32.xlu0 %v13415_v22, %s15891_s23 }
0x15b2   :  { %3583 = vadd.xlane.f32.xlu1 %v3582_v58 }
0x15c3   :  { %3832 = vrot.lane.b32.xlu1 %v13407_v29, %s15891_s23 }
0x15c7   :  { %3836 = vrot.lane.b32.xlu1 %v13411_v15, %s15891_s23 }
0x15d1   :  { %v3572_v54 = vpop.xlane.xlu1 %3571 }
0x15d2   :  { %12058 = vrcp.f32 %v3572_v54 }
0x15d5   :  { %v3575_v14 = vpop.xlane.xlu0 %3574  ;;  %v3845_v7 = vpop.permute.xlu1 %3844 }
0x15d6   :  { %12060 = vrcp.f32 %v3575_v14 }
0x15d9   :  { %v3847_v28 = vpop.permute.xlu0 %3846 }
0x15df   :  { %v12059_v43 = vpop.eup %12058 }
0x15e0   :  { %v3590_v30 = vmul.f32 %v12059_v43, %v12049_v0 }
0x15e2   :  { %11017 = vmatmul.mubr.msk.f32.vlgmr.msra.gmra.mxu1 %vm419_vm4, %v3590_v30 }
0x15e3   :  { %v12061_v17 = vpop.eup %12060  ;;  %11049 = vmatpush3.xpose.msk.msra.mxu1 %vm298_vm3, %v3849_v13  ;;  %11019 = vmatprep.mubr.msk.f32.mxu1 %vm12349_vm2, %v12348_v46 }
0x15e4   :  { %11050 = vmatprep.subr.mxu1 %v12348_v46  ;;  %v3591_v8 = vmul.f32 %v12061_v17, %v12051_v11 }
0x15e6   :  { %11020 = vmatmul.mubr.msk.f32.gmra.mxu1 %vm419_vm4, %v3591_v8 }
0x15e7   :  { %11051 = vmatpush3.xpose.msk.msra.mxu1 %vm298_vm3, %v3847_v28  ;;  %11022 = vmatprep.mubr.msk.f32.mxu1 %vm12349_vm2, %v12348_v46 }
0x15e8   :  { %11052 = vmatprep.subr.mxu1 %v12348_v46 }
0x15eb   :  { %11053 = vmatpush3.xpose.msk.msra.mxu1 %vm298_vm3, %v3845_v7 }
0x15ec   :  { %11054 = vmatprep.subr.mxu1 %v12348_v46 }
0x1606   :  { %v3578_v25 = vpop.xlane.xlu1 %3577 }
0x1607   :  { %12062 = vrcp.f32 %v3578_v25 }
0x160a   :  { %v3581_v34 = vpop.xlane.xlu0 %3580  ;;  %v3841_v37 = vpop.permute.xlu1 %3840 }
0x160b   :  { %12064 = vrcp.f32 %v3581_v34 }
0x160e   :  { %v3843_v45 = vpop.permute.xlu0 %3842 }
0x160f   :  { %11055 = vmatpush3.xpose.msk.msra.mxu1 %vm298_vm3, %v3843_v45 }
0x1610   :  { %11056 = vmatprep.subr.mxu1 %v12348_v46 }
0x1612   :  { %v3831_v0 = vpop.permute.xlu0 %3830 }
0x1613   :  { %11057 = vmatpush3.xpose.msk.msra.mxu1 %vm298_vm3, %v3841_v37 }
0x1614   :  { %v12063_v39 = vpop.eup %12062  ;;  %11098 = vmatprep.subr.mxu1 %v12348_v46 }
0x1615   :  { %v3592_v44 = vmul.f32 %v12063_v39, %v12053_v3 }
0x1616   :  { %v3835_v52 = vpop.permute.xlu0 %3834 }
0x1617   :  { %11023 = vmatmul.mubr.msk.f32.gmra.mxu1 %vm419_vm4, %v3592_v44 }
0x1618   :  { %v12065_v33 = vpop.eup %12064  ;;  %11025 = vmatprep.mubr.msk.f32.mxu1 %vm12349_vm2, %v12348_v46 }
0x1619   :  { %v3593_v31 = vmul.f32 %v12065_v33, %v12055_v23 }
0x161a   :  { %v3839_v16 = vpop.permute.xlu0 %3838 }
0x161b   :  { %11026 = vmatmul.mubr.msk.f32.gmra.mxu1 %vm419_vm4, %v3593_v31 }
0x161c   :  { %11028 = vmatprep.mubr.msk.f32.mxu1 %vm12349_vm2, %v12348_v46 }
0x163b   :  { %v3584_v38 = vpop.xlane.xlu1 %3583 }
0x163c   :  { %12066 = vrcp.f32 %v3584_v38 }
0x163f   :  { %v3833_v57 = vpop.permute.xlu1 %3832 }
0x1643   :  { %v3837_v11 = vpop.permute.xlu1 %3836 }
0x1649   :  { %v12067_v60 = vpop.eup %12066 }
0x164a   :  { %v3594_v62 = vmul.f32 %v12067_v60, %v12057_v20 }
0x164c   :  { %11029 = vmatmul.mubr.msk.f32.gmra.mxu1 %vm419_vm4, %v3594_v62 }
0x164d   :  { %11058 = vmatprep.mubr.msk.f32.mxu1 %vm12349_vm2, %v12348_v46 }
0x1650   :  { %11059 = vmatmul.mubr.msk.f32.vlgmr.msra.gmra.mxu1 %vm298_vm3, %v3831_v0 }
0x1651   :  { %11061 = vmatprep.mubr.msk.f32.mxu1 %vm12349_vm2, %v12348_v46 }
0x1654   :  { %11062 = vmatmul.mubr.msk.f32.gmra.mxu1 %vm298_vm3, %v3833_v57 }
0x1655   :  { %11064 = vmatprep.mubr.msk.f32.mxu1 %vm12349_vm2, %v12348_v46 }
0x1658   :  { %11065 = vmatmul.mubr.msk.f32.gmra.mxu1 %vm298_vm3, %v3835_v52  ;;  %v3382_v52 = vadd.f32 %v13788_v40, %v13798_v36 }
0x1659   :  { %11067 = vmatprep.mubr.msk.f32.mxu1 %vm12349_vm2, %v12348_v46 }
0x165c   :  { %11068 = vmatmul.mubr.msk.f32.gmra.mxu1 %vm298_vm3, %v3837_v11 }
0x165d   :  { %11070 = vmatprep.mubr.msk.f32.mxu1 %vm12349_vm2, %v12348_v46 }
0x1660   :  { %11071 = vmatmul.mubr.msk.f32.gmra.mxu1 %vm298_vm3, %v3839_v16 }
0x1661   :  { %11100 = vmatprep.mubr.msk.f32.mxu1 %vm12349_vm2, %v12348_v46 }
0x16a2   :  { %v3691_v19 = vpop.f32.mrf.mxu1 }
0x16a3   :  { %11034 = vmatmul.mubr.msk.f32.vlgmr.msra.gmra.mxu0 %vm298_vm3, %v3691_v19  ;;  %v3387_v19 = vadd.f32 %v13790_v35, %v13800_v50 }
0x16a4   :  { %v11018_v1 = vpop.f32.mrf.mxu1  ;;  %11036 = vmatprep.mubr.msk.f32.mxu0 %vm12349_vm2, %v12348_v46 }
0x16a6   :  { %v3696_v42 = vpop.f32.mrf.mxu1 }
0x16a7   :  { %11037 = vmatmul.mubr.msk.f32.gmra.mxu0 %vm298_vm3, %v3696_v42 }
0x16a8   :  { %v11021_v21 = vpop.f32.mrf.mxu1  ;;  %11039 = vmatprep.mubr.msk.f32.mxu0 %vm12349_vm2, %v12348_v46 }
0x16d7   :  { %v3701_v3 = vpop.f32.mrf.mxu1 }
0x16d8   :  { %11040 = vmatmul.mubr.msk.f32.gmra.mxu0 %vm298_vm3, %v3701_v3 }
0x16d9   :  { %v11024_v24 = vpop.f32.mrf.mxu1  ;;  %11042 = vmatprep.mubr.msk.f32.mxu0 %vm12349_vm2, %v12348_v46 }
0x16db   :  { %v3706_v23 = vpop.f32.mrf.mxu1 }
0x16dc   :  { %11043 = vmatmul.mubr.msk.f32.gmra.mxu0 %vm298_vm3, %v3706_v23 }
0x16dd   :  { %v11027_v9 = vpop.f32.mrf.mxu1  ;;  %11045 = vmatprep.mubr.msk.f32.mxu0 %vm12349_vm2, %v12348_v46 }
0x170c   :  { %v3711_v53 = vpop.f32.mrf.mxu1 }
0x170d   :  { %11046 = vmatmul.mubr.msk.f32.gmra.mxu0 %vm298_vm3, %v3711_v53 }
0x170e   :  { %v11030_v63 = vpop.f32.mrf.mxu1  ;;  %11083 = vmatprep.mubr.msk.f32.mxu0 %vm12349_vm2, %v12348_v46 }
0x1710   :  { %v3936_v20 = vpop.f32.mrf.mxu1 }
0x1711   :  { %v3960_v58 = vmul.f32 0.4472136, %v3936_v20 }
0x1712   :  { %v11060_v13 = vpop.f32.mrf.mxu1 }
0x1713   :  { %v3965_v54 = vadd.f32 %v13512_v10, %v3960_v58 }
0x1714   :  { %v3941_v14 = vpop.f32.mrf.mxu1 }
0x1715   :  { %v3961_v43 = vmul.f32 0.4472136, %v3941_v14  ;;  %v3970_v30 = vsel %vm419_vm4, %v3965_v54, -inf }
0x1716   :  { %3971 = vmax.xlane.f32.xlu1 %v3970_v30  ;;  %v11063_v17 = vpop.f32.mrf.mxu1 }
0x1717   :  { %v3966_v8 = vadd.f32 %v13522_v61, %v3961_v43 }
0x1718   :  { %v3946_v28 = vpop.f32.mrf.mxu1 }
0x1719   :  { %v3962_v7 = vmul.f32 0.4472136, %v3946_v28  ;;  %v3973_v25 = vsel %vm419_vm4, %v3966_v8, -inf }
0x171a   :  { %3974 = vmax.xlane.f32.xlu0 %v3973_v25  ;;  %v11066_v34 = vpop.f32.mrf.mxu1 }
0x171b   :  { %v3967_v45 = vadd.f32 %v13532_v18, %v3962_v7  ;;  %v3377_v18 = vadd.f32 %v13786_v47, %v13796_v55  ;;  %v3392_v47 = vadd.f32 %v13792_v56, %v13802_v2 }
0x171c   :  { %v3951_v37 = vpop.f32.mrf.mxu1 }
0x171d   :  { %v3963_v39 = vmul.f32 0.4472136, %v3951_v37  ;;  %v3976_v10 = vsel %vm419_vm4, %v3967_v45, -inf }
0x171e   :  { %3977 = vmax.xlane.f32.xlu0 %v3976_v10  ;;  %v11069_v44 = vpop.f32.mrf.mxu1 }
0x171f   :  { %v3968_v33 = vadd.f32 %v13539_v6, %v3963_v39  ;;  %v3397_v39 = vadd.f32 %v13794_v49, %v13804_v5  ;;  %v9613_v49 = vld [vmem:[%s15839_s6 + $0x38] sm:$0x1f] }
0x1720   :  { %v3956_v31 = vpop.f32.mrf.mxu1  ;;  %11099 = vmatpush3.msk.msra.mxu1 %vm928_vm5, %v9613_v49 }
0x1721   :  { %v3964_v51 = vmul.f32 0.4472136, %v3956_v31  ;;  %v3979_v61 = vsel %vm419_vm4, %v3968_v33, -inf  ;;  %11136 = vmatprep.subr.mxu1 %v12348_v46 }
0x1722   :  { %3980 = vmax.xlane.f32.xlu0 %v3979_v61  ;;  %v11072_v38 = vpop.f32.mrf.mxu1 }
0x1723   :  { %v3969_v60 = vadd.f32 %v13546_v59, %v3964_v51 }
0x1725   :  { %v3982_v62 = vsel %vm419_vm4, %v3969_v60, -inf }
0x1726   :  { %3983 = vmax.xlane.f32.xlu1 %v3982_v62 }
0x1737   :  { %4033 = vrot.lane.b32.xlu1 %v13415_v22, %s15892_s21 }
0x1763   :  { %v3801_v0 = vpop.f32.mrf.mxu0 }
0x1764   :  { %v13918_v57 = vadd.f32 %v3801_v0, %v3377_v18 }
0x1765   :  { %v11035_v6 = vpop.f32.mrf.mxu0 }
0x1767   :  { %v3806_v11 = vpop.f32.mrf.mxu0 }
0x1768   :  { %v13922_v16 = vadd.f32 %v3806_v11, %v3382_v52 }
0x1769   :  { %v11038_v59 = vpop.f32.mrf.mxu0 }
0x1798   :  { %v3811_v1 = vpop.f32.mrf.mxu0 }
0x1799   :  { %v13926_v42 = vadd.f32 %v3811_v1, %v3387_v19 }
0x179a   :  { %v11041_v22 = vpop.f32.mrf.mxu0 }
0x179c   :  { %v3816_v55 = vpop.f32.mrf.mxu0 }
0x179d   :  { %v13930_v21 = vadd.f32 %v3816_v55, %v3392_v47 }
0x179e   :  { %v11044_v3 = vpop.f32.mrf.mxu0 }
0x179f   :  { %v3972_v24 = vpop.xlane.xlu1 %3971 }
0x17a0   :  { %v3985_v40 = vsub.f32 %v3965_v54, %v3972_v24 }
0x17a2   :  { %v3990_v36 = vmul.f32 1.442695, %v3985_v40 }
0x17a3   :  { %v3975_v23 = vpop.xlane.xlu0 %3974 }
0x17a4   :  { %12068 = vpow2.f32 %v3990_v36  ;;  %v3986_v9 = vsub.f32 %v3966_v8, %v3975_v23 }
0x17a6   :  { %v3992_v53 = vmul.f32 1.442695, %v3986_v9 }
0x17a7   :  { %v3978_v63 = vpop.xlane.xlu0 %3977 }
0x17a8   :  { %12070 = vpow2.f32 %v3992_v53  ;;  %v3987_v35 = vsub.f32 %v3967_v45, %v3978_v63 }
0x17aa   :  { %v3994_v50 = vmul.f32 1.442695, %v3987_v35 }
0x17ab   :  { %v3981_v20 = vpop.xlane.xlu0 %3980 }
0x17ac   :  { %12072 = vpow2.f32 %v3994_v50  ;;  %v3988_v58 = vsub.f32 %v3968_v33, %v3981_v20  ;;  %v9621_v50 = vld [vmem:[%s15840_s7 + $0x1] ss:$0 sm:$0xff] }
0x17ae   :  { %v3996_v13 = vmul.f32 1.442695, %v3988_v58 }
0x17af   :  { %v3984_v56 = vpop.xlane.xlu1 %3983 }
0x17b0   :  { %12074 = vpow2.f32 %v3996_v13  ;;  %v3989_v2 = vsub.f32 %v3969_v60, %v3984_v56 }
0x17b1   :  { %v12069_v14 = vpop.eup %12068 }
0x17b2   :  { %v3998_v43 = vmul.f32 1.442695, %v3989_v2  ;;  %v4000_v54 = vsel %vm419_vm4, %v12069_v14, 0.0 }
0x17b3   :  { %4001 = vadd.xlane.f32.xlu0 %v4000_v54  ;;  %v4034_v30 = vpop.permute.xlu1 %4033 }
0x17b4   :  { %12076 = vpow2.f32 %v3998_v43  ;;  %11074 = vmatpush3.msra.mxu0 %v4034_v30 }
0x17b5   :  { %v12071_v17 = vpop.eup %12070  ;;  %11075 = vmatprep.subr.mxu0 %v12348_v46 }
0x17b6   :  { %v4003_v8 = vsel %vm419_vm4, %v12071_v17, 0.0 }
0x17b7   :  { %4004 = vadd.xlane.f32.xlu1 %v4003_v8 }
0x17b9   :  { %v12073_v28 = vpop.eup %12072 }
0x17ba   :  { %v4006_v7 = vsel %vm419_vm4, %v12073_v28, 0.0 }
0x17bb   :  { %4007 = vadd.xlane.f32.xlu0 %v4006_v7 }
0x17bd   :  { %v12075_v25 = vpop.eup %12074 }
0x17be   :  { %v4009_v34 = vsel %vm419_vm4, %v12075_v25, 0.0 }
0x17bf   :  { %4010 = vadd.xlane.f32.xlu1 %v4009_v34 }
0x17c1   :  { %v12077_v45 = vpop.eup %12076 }
0x17c2   :  { %v4012_v37 = vsel %vm419_vm4, %v12077_v45, 0.0 }
0x17c3   :  { %4013 = vadd.xlane.f32.xlu0 %v4012_v37 }
0x17cd   :  { %v3821_v10 = vpop.f32.mrf.mxu0 }
0x17ce   :  { %v13940_v44 = vadd.f32 %v3821_v10, %v3397_v39 }
0x17cf   :  { %v11047_v33 = vpop.f32.mrf.mxu0 }
0x17d0   :  { %4029 = vrot.lane.b32.xlu1 %v13409_v27, %s15892_s21 }
0x17d4   :  { %4027 = vrot.lane.b32.xlu1 %v13407_v29, %s15892_s21 }
0x17d8   :  { %4025 = vrot.lane.b32.xlu1 %v13405_v32, %s15892_s21 }
0x17d9   :  { %4031 = vrot.lane.b32.xlu0 %v13411_v15, %s15892_s21 }
0x183c   :  { %v4002_v5 = vpop.xlane.xlu0 %4001 }
0x183d   :  { %12078 = vrcp.f32 %v4002_v5 }
0x1840   :  { %v4005_v31 = vpop.xlane.xlu1 %4004 }
0x1841   :  { %12080 = vrcp.f32 %v4005_v31 }
0x1844   :  { %v4008_v27 = vpop.xlane.xlu0 %4007 }
0x1845   :  { %12082 = vrcp.f32 %v4008_v27 }
0x1848   :  { %v4011_v51 = vpop.xlane.xlu1 %4010 }
0x1849   :  { %12084 = vrcp.f32 %v4011_v51 }
0x184a   :  { %v12079_v15 = vpop.eup %12078 }
0x184b   :  { %v4020_v60 = vmul.f32 %v12079_v15, %v12069_v14 }
0x184c   :  { %v4030_v29 = vpop.permute.xlu1 %4029  ;;  %v4014_v61 = vpop.xlane.xlu0 %4013 }
0x184d   :  { %12086 = vrcp.f32 %v4014_v61 }
0x184e   :  { %v12081_v18 = vpop.eup %12080 }
0x184f   :  { %v4021_v0 = vmul.f32 %v12081_v18, %v12071_v17 }
0x1850   :  { %v4028_v32 = vpop.permute.xlu1 %4027  ;;  %v4032_v38 = vpop.permute.xlu0 %4031 }
0x1851   :  { %11076 = vmatpush3.msra.mxu0 %v4032_v38 }
0x1852   :  { %11077 = vmatprep.subr.mxu0 %v12348_v46  ;;  %v12083_v6 = vpop.eup %12082 }
0x1853   :  { %11078 = vmatpush3.msra.mxu0 %v4030_v29  ;;  %v4022_v52 = vmul.f32 %v12083_v6, %v12073_v28 }
0x1854   :  { %11079 = vmatprep.subr.mxu0 %v12348_v46  ;;  %v4026_v62 = vpop.permute.xlu1 %4025 }
0x1855   :  { %11080 = vmatpush3.msra.mxu0 %v4028_v32 }
0x1856   :  { %11081 = vmatprep.subr.mxu0 %v12348_v46  ;;  %v12085_v11 = vpop.eup %12084 }
0x1857   :  { %11082 = vmatpush3.msra.mxu0 %v4026_v62  ;;  %v4023_v59 = vmul.f32 %v12085_v11, %v12075_v25 }
0x1858   :  { %11084 = vmatmul.mubr.msk.f32.vlgmr.msra.gmra.mxu0 %vm419_vm4, %v4020_v60  ;;  %11115 = vmatprep.subr.mxu0 %v12348_v46 }
0x1859   :  { %11086 = vmatprep.mubr.msk.f32.mxu0 %vm12349_vm2, %v12348_v46 }
0x185a   :  { %v12087_v19 = vpop.eup %12086 }
0x185b   :  { %v4024_v1 = vmul.f32 %v12087_v19, %v12077_v45 }
0x185c   :  { %11087 = vmatmul.mubr.msk.f32.gmra.mxu0 %vm419_vm4, %v4021_v0 }
0x185d   :  { %11089 = vmatprep.mubr.msk.f32.mxu0 %vm12349_vm2, %v12348_v46 }
0x1860   :  { %11090 = vmatmul.mubr.msk.f32.gmra.mxu0 %vm419_vm4, %v4022_v52 }
0x1861   :  { %11092 = vmatprep.mubr.msk.f32.mxu0 %vm12349_vm2, %v12348_v46 }
0x1864   :  { %11093 = vmatmul.mubr.msk.f32.gmra.mxu0 %vm419_vm4, %v4023_v59 }
0x1865   :  { %11095 = vmatprep.mubr.msk.f32.mxu0 %vm12349_vm2, %v12348_v46 }
0x1868   :  { %11096 = vmatmul.mubr.msk.f32.gmra.mxu0 %vm419_vm4, %v4024_v1 }
0x1869   :  { %11121 = vmatprep.mubr.msk.f32.mxu0 %vm12349_vm2, %v12348_v46 }
0x1918   :  { %v4121_v22 = vpop.f32.mrf.mxu0 }
0x1919   :  { %11101 = vmatmul.mubr.msk.f32.vlgmr.msra.gmra.mxu1 %vm298_vm3, %v4121_v22 }
0x191a   :  { %v11085_v47 = vpop.f32.mrf.mxu0  ;;  %11103 = vmatprep.mubr.msk.f32.mxu1 %vm12349_vm2, %v12348_v46 }
0x191c   :  { %v4126_v55 = vpop.f32.mrf.mxu0 }
0x191d   :  { %11104 = vmatmul.mubr.msk.f32.gmra.mxu1 %vm298_vm3, %v4126_v55 }
0x191e   :  { %v11088_v3 = vpop.f32.mrf.mxu0  ;;  %11106 = vmatprep.mubr.msk.f32.mxu1 %vm12349_vm2, %v12348_v46 }
0x191f   :  { %v9628_v3 = vld [vmem:[%s15843_s10 + $0x28] sm:$0xf] }
0x1920   :  { %v4131_v24 = vpop.f32.mrf.mxu0  ;;  %11116 = vmatpush3.msk.msra.mxu0 %vm189_vm1, %v9628_v3 }
0x1921   :  { %11107 = vmatmul.mubr.msk.f32.gmra.mxu1 %vm298_vm3, %v4131_v24  ;;  %11117 = vmatprep.subr.mxu0 %v12348_v46  ;;  %v9627_v24 = vld [vmem:[%s15843_s10 + $0x20] sm:$0xff] }
0x1922   :  { %v11091_v40 = vpop.f32.mrf.mxu0  ;;  %11109 = vmatprep.mubr.msk.f32.mxu1 %vm12349_vm2, %v12348_v46  ;;  %11118 = vmatpush3.msra.mxu0 %v9627_v24 }
0x1923   :  { %v9626_v40 = vld [vmem:[%s15843_s10 + $0x18] sm:$0xff]  ;;  %11119 = vmatprep.subr.mxu0 %v12348_v46 }
0x1924   :  { %v4136_v36 = vpop.f32.mrf.mxu0  ;;  %11120 = vmatpush3.msra.mxu0 %v9626_v40 }
0x1925   :  { %11110 = vmatmul.mubr.msk.f32.gmra.mxu1 %vm298_vm3, %v4136_v36  ;;  %11171 = vmatprep.subr.mxu0 %v12348_v46  ;;  %v9646_v36 = vld [vmem:[%s15845_s12 + $0x98] sm:$0xff] }
0x1926   :  { %v11094_v23 = vpop.f32.mrf.mxu0  ;;  %11112 = vmatprep.mubr.msk.f32.mxu1 %vm12349_vm2, %v12348_v46  ;;  %11137 = vmatpush3.msra.mxu1 %v9646_v36 }
0x1927   :  { %v9645_v23 = vld [vmem:[%s15845_s12 + $0x90] sm:$0xff]  ;;  %11138 = vmatprep.subr.mxu1 %v12348_v46 }
0x1928   :  { %v4141_v9 = vpop.f32.mrf.mxu0  ;;  %11139 = vmatpush3.msra.mxu1 %v9645_v23 }
0x1929   :  { %11113 = vmatmul.mubr.msk.f32.gmra.mxu1 %vm298_vm3, %v4141_v9  ;;  %v9644_v9 = vld [vmem:[%s15845_s12 + $0x88] sm:$0xff]  ;;  %11140 = vmatprep.subr.mxu1 %v12348_v46 }
0x192a   :  { %v11097_v53 = vpop.f32.mrf.mxu0  ;;  %11156 = vmatprep.mubr.msk.f32.mxu1 %vm12349_vm2, %v12348_v46  ;;  %11141 = vmatpush3.msra.mxu1 %v9644_v9 }
0x192b   :  { %v9643_v53 = vld [vmem:[%s15845_s12 + $0x80] sm:$0xff]  ;;  %11142 = vmatprep.subr.mxu1 %v12348_v46 }
0x192c   :  { %11143 = vmatpush3.msra.mxu1 %v9643_v53 }
0x192d   :  { %11144 = vmatprep.subr.mxu1 %v12348_v46 }
0x19d9   :  { %v4231_v63 = vpop.f32.mrf.mxu1 }
0x19da   :  { %v4255_v35 = vadd.f32 %v4231_v63, %v13918_v57  ;;  %v9642_v63 = vld [vmem:[%s15845_s12 + $0x78] sm:$0xff] }
0x19db   :  { %v11102_v20 = vpop.f32.mrf.mxu1  ;;  %11145 = vmatpush3.msra.mxu1 %v9642_v63 }
0x19dc   :  { %v4260_v58 = vadd.f32 %v4255_v35, %v13337_v41  ;;  %v9641_v35 = vld [vmem:[%s15845_s12 + $0x70] sm:$0xff]  ;;  %11146 = vmatprep.subr.mxu1 %v12348_v46 }
0x19dd   :  { %v4236_v13 = vpop.f32.mrf.mxu1  ;;  %11147 = vmatpush3.msra.mxu1 %v9641_v35 }
0x19de   :  { %v13994_v56 = vadd.f32 %v9621_v50, %v4260_v58  ;;  %v4256_v2 = vadd.f32 %v4236_v13, %v13922_v16  ;;  %11148 = vmatprep.subr.mxu1 %v12348_v46 }
0x19df   :  { %v11105_v14 = vpop.f32.mrf.mxu1 }
0x19e0   :  { %v4261_v43 = vadd.f32 %v4256_v2, %v13342_v48  ;;  %v4282_v54 = vsel %vm82_vm0, %v13994_v56, 0.0 }
0x19e1   :  { %4283 = vadd.xlane.f32.xlu0 %v4282_v54  ;;  %v4241_v57 = vpop.f32.mrf.mxu1 }
0x19e2   :  { %v14000_v30 = vadd.f32 %v9621_v50, %v4261_v43  ;;  %v4257_v17 = vadd.f32 %v4241_v57, %v13926_v42 }
0x19e3   :  { %v11108_v8 = vpop.f32.mrf.mxu1 }
0x19e4   :  { %v4262_v41 = vadd.f32 %v4257_v17, %v13347_v4  ;;  %v4285_v28 = vsel %vm82_vm0, %v14000_v30, 0.0 }
0x19e5   :  { %4286 = vadd.xlane.f32.xlu1 %v4285_v28  ;;  %v4246_v16 = vpop.f32.mrf.mxu1 }
0x19e6   :  { %v14006_v7 = vadd.f32 %v9621_v50, %v4262_v41  ;;  %v4258_v48 = vadd.f32 %v4246_v16, %v13930_v21 }
0x19e7   :  { %v11111_v25 = vpop.f32.mrf.mxu1 }
0x19e8   :  { %v4263_v34 = vadd.f32 %v4258_v48, %v13352_v12  ;;  %v4288_v45 = vsel %vm82_vm0, %v14006_v7, 0.0 }
0x19e9   :  { %4289 = vadd.xlane.f32.xlu0 %v4288_v45  ;;  %v4251_v42 = vpop.f32.mrf.mxu1 }
0x19ea   :  { %v14012_v37 = vadd.f32 %v9621_v50, %v4263_v34  ;;  %v4259_v4 = vadd.f32 %v4251_v42, %v13940_v44  ;;  %v9624_v34 = vld [vmem:[%s15841_s8 + $0x1] ss:$0 sm:$0xff] }
0x19eb   :  { %v11114_v39 = vpop.f32.mrf.mxu1 }
0x19ec   :  { %v4264_v10 = vadd.f32 %v4259_v4, %v13357_v26  ;;  %v4291_v33 = vsel %vm82_vm0, %v14012_v37, 0.0  ;;  %v9625_v4 = vld [vmem:[%s15842_s9 + $0x1] ss:$0 sm:$0xff] }
0x19ed   :  { %4292 = vadd.xlane.f32.xlu0 %v4291_v33 }
0x19ee   :  { %v14018_v21 = vadd.f32 %v9621_v50, %v4264_v10  ;;  %v9640_v50 = vld [vmem:[%s15845_s12 + $0x68] sm:$0xff] }
0x19ef   :  { %11149 = vmatpush3.msra.mxu1 %v9640_v50 }
0x19f0   :  { %v4294_v12 = vsel %vm82_vm0, %v14018_v21, 0.0  ;;  %11150 = vmatprep.subr.mxu1 %v12348_v46 }
0x19f1   :  { %4295 = vadd.xlane.f32.xlu0 %v4294_v12 }
0x1a6a   :  { %v4284_v49 = vpop.xlane.xlu0 %4283 }
0x1a6b   :  { %v4297_v5 = vmul.f32 0.05, %v4284_v49 }
0x1a6d   :  { %v14023_v31 = vsub.f32 %v13994_v56, %v4297_v5 }
0x1a6e   :  { %v4287_v27 = vpop.xlane.xlu1 %4286 }
0x1a6f   :  { %v4298_v44 = vmul.f32 0.05, %v4287_v27  ;;  %v4307_v26 = vmul.f32 %v14023_v31, %v14023_v31 }
0x1a71   :  { %v14028_v51 = vsub.f32 %v14000_v30, %v4298_v44  ;;  %v4312_v29 = vsel %vm82_vm0, %v4307_v26, 0.0 }
0x1a72   :  { %4313 = vadd.xlane.f32.xlu1 %v4312_v29  ;;  %v4290_v61 = vpop.xlane.xlu0 %4289 }
0x1a73   :  { %v4299_v32 = vmul.f32 0.05, %v4290_v61  ;;  %v4308_v38 = vmul.f32 %v14028_v51, %v14028_v51 }
0x1a75   :  { %v14034_v15 = vsub.f32 %v14006_v7, %v4299_v32  ;;  %v4315_v60 = vsel %vm82_vm0, %v4308_v38, 0.0 }
0x1a76   :  { %v4293_v62 = vpop.xlane.xlu0 %4292  ;;  %4316 = vadd.xlane.f32.xlu0 %v4315_v60 }
0x1a77   :  { %v4300_v18 = vmul.f32 0.05, %v4293_v62  ;;  %v4309_v0 = vmul.f32 %v14034_v15, %v14034_v15 }
0x1a79   :  { %v14040_v6 = vsub.f32 %v14012_v37, %v4300_v18  ;;  %v4318_v52 = vsel %vm82_vm0, %v4309_v0, 0.0  ;;  %v9639_v18 = vld [vmem:[%s15845_s12 + $0x60] sm:$0xff]  ;;  %v9638_v0 = vld [vmem:[%s15845_s12 + $0x58] sm:$0xff] }
0x1a7a   :  { %4319 = vadd.xlane.f32.xlu1 %v4318_v52  ;;  %v4296_v11 = vpop.xlane.xlu0 %4295  ;;  %11151 = vmatpush3.msra.mxu1 %v9639_v18  ;;  %v9630_v52 = vld [vmem:[%s15844_s11 + $0x1] ss:$0 sm:$0xff] }
0x1a7b   :  { %v4301_v59 = vmul.f32 0.05, %v4296_v11  ;;  %v4310_v19 = vmul.f32 %v14040_v6, %v14040_v6  ;;  %11152 = vmatprep.subr.mxu1 %v12348_v46 }
0x1a7c   :  { %11153 = vmatpush3.msra.mxu1 %v9638_v0 }
0x1a7d   :  { %v14046_v1 = vsub.f32 %v14018_v21, %v4301_v59  ;;  %v4321_v22 = vsel %vm82_vm0, %v4310_v19, 0.0  ;;  %11154 = vmatprep.subr.mxu1 %v12348_v46 }
0x1a7e   :  { %4322 = vadd.xlane.f32.xlu0 %v4321_v22 }
0x1a7f   :  { %v4311_v47 = vmul.f32 %v14046_v1, %v14046_v1 }
0x1a81   :  { %v4324_v55 = vsel %vm82_vm0, %v4311_v47, 0.0 }
0x1a82   :  { %4325 = vadd.xlane.f32.xlu1 %v4324_v55 }
0x1afb   :  { %v4314_v20 = vpop.xlane.xlu1 %4313 }
0x1afc   :  { %v4327_v58 = vmul.f32 0.05, %v4314_v20 }
0x1afe   :  { %v4332_v13 = vadd.f32 1e-05, %v4327_v58 }
0x1aff   :  { %v4317_v2 = vpop.xlane.xlu0 %4316 }
0x1b00   :  { %12088 = vrsqrt.f32 %v4332_v13  ;;  %v4328_v14 = vmul.f32 0.05, %v4317_v2 }
0x1b02   :  { %v4333_v43 = vadd.f32 1e-05, %v4328_v14  ;;  %v9653_v14 = vld [vmem:[%s15888_s20 + $0x1] ss:$0 sm:$0xff] }
0x1b03   :  { %v4320_v54 = vpop.xlane.xlu1 %4319 }
0x1b04   :  { %12090 = vrsqrt.f32 %v4333_v43  ;;  %v4329_v57 = vmul.f32 0.05, %v4320_v54 }
0x1b06   :  { %v4334_v17 = vadd.f32 1e-05, %v4329_v57 }
0x1b07   :  { %v4323_v8 = vpop.xlane.xlu0 %4322 }
0x1b08   :  { %12092 = vrsqrt.f32 %v4334_v17  ;;  %v4330_v41 = vmul.f32 0.05, %v4323_v8 }
0x1b0a   :  { %v4335_v28 = vadd.f32 1e-05, %v4330_v41 }
0x1b0b   :  { %v4326_v16 = vpop.xlane.xlu1 %4325 }
0x1b0c   :  { %12094 = vrsqrt.f32 %v4335_v28  ;;  %v4331_v48 = vmul.f32 0.05, %v4326_v16 }
0x1b0d   :  { %v12089_v25 = vpop.eup %12088 }
0x1b0e   :  { %v4342_v45 = vmul.f32 %v12089_v25, %v14023_v31  ;;  %v4336_v42 = vadd.f32 1e-05, %v4331_v48 }
0x1b10   :  { %v4353_v39 = vmul.f32 %v9624_v34, %v4342_v45  ;;  %12096 = vrsqrt.f32 %v4336_v42 }
0x1b11   :  { %v12091_v10 = vpop.eup %12090 }
0x1b12   :  { %v4364_v33 = vadd.f32 %v9625_v4, %v4353_v39  ;;  %v4343_v12 = vmul.f32 %v12091_v10, %v14028_v51 }
0x1b14   :  { %11122 = vmatmul.mubr.msk.f32.vlgmr.msra.gmra.mxu0 %vm82_vm0, %v4364_v33  ;;  %v4354_v49 = vmul.f32 %v9624_v34, %v4343_v12 }
0x1b15   :  { %v12093_v5 = vpop.eup %12092  ;;  %11124 = vmatprep.mubr.msk.f32.mxu0 %vm12349_vm2, %v12348_v46 }
0x1b16   :  { %v4365_v27 = vadd.f32 %v9625_v4, %v4354_v49  ;;  %v4344_v31 = vmul.f32 %v12093_v5, %v14034_v15 }
0x1b18   :  { %11125 = vmatmul.mubr.msk.f32.gmra.mxu0 %vm82_vm0, %v4365_v27  ;;  %v4355_v44 = vmul.f32 %v9624_v34, %v4344_v31 }
0x1b19   :  { %v12095_v26 = vpop.eup %12094  ;;  %11127 = vmatprep.mubr.msk.f32.mxu0 %vm12349_vm2, %v12348_v46 }
0x1b1a   :  { %v4366_v29 = vadd.f32 %v9625_v4, %v4355_v44  ;;  %v4345_v51 = vmul.f32 %v12095_v26, %v14040_v6  ;;  %v9637_v6 = vld [vmem:[%s15845_s12 + $0x50] sm:$0xff] }
0x1b1b   :  { %11155 = vmatpush3.msra.mxu1 %v9637_v6 }
0x1b1c   :  { %11128 = vmatmul.mubr.msk.f32.gmra.mxu0 %vm82_vm0, %v4366_v29  ;;  %v4356_v61 = vmul.f32 %v9624_v34, %v4345_v51  ;;  %11192 = vmatprep.subr.mxu1 %v12348_v46 }
0x1b1d   :  { %v12097_v32 = vpop.eup %12096  ;;  %11130 = vmatprep.mubr.msk.f32.mxu0 %vm12349_vm2, %v12348_v46 }
0x1b1e   :  { %v4367_v38 = vadd.f32 %v9625_v4, %v4356_v61  ;;  %v4346_v15 = vmul.f32 %v12097_v32, %v14046_v1 }
0x1b20   :  { %11131 = vmatmul.mubr.msk.f32.gmra.mxu0 %vm82_vm0, %v4367_v38  ;;  %v4357_v60 = vmul.f32 %v9624_v34, %v4346_v15 }
0x1b21   :  { %11133 = vmatprep.mubr.msk.f32.mxu0 %vm12349_vm2, %v12348_v46 }
0x1b22   :  { %v4368_v62 = vadd.f32 %v9625_v4, %v4357_v60 }
0x1b24   :  { %11134 = vmatmul.mubr.msk.f32.gmra.mxu0 %vm82_vm0, %v4368_v62 }
0x1b25   :  { %11177 = vmatprep.mubr.msk.f32.mxu0 %vm12349_vm2, %v12348_v46 }
0x1bd4   :  { %v4465_v11 = vpop.f32.mrf.mxu0 }
0x1bd5   :  { %v4466_v59 = vadd.f32 %v9630_v52, %v4465_v11 }
0x1bd6   :  { %v11123_v19 = vpop.f32.mrf.mxu0 }
0x1bd7   :  { %v4489_v1 = vmax.f32 %v4466_v59, 0.0 }
0x1bd8   :  { %v4470_v22 = vpop.f32.mrf.mxu0 }
0x1bd9   :  { %v4471_v47 = vadd.f32 %v9630_v52, %v4470_v22  ;;  %11157 = vmatmul.mubr.msk.f32.vlgmr.msra.gmra.mxu1 %vm2229_vm6, %v4489_v1 }
0x1bda   :  { %v11126_v55 = vpop.f32.mrf.mxu0  ;;  %11159 = vmatprep.mubr.msk.f32.mxu1 %vm12349_vm2, %v12348_v46 }
0x1bdb   :  { %v4490_v3 = vmax.f32 %v4471_v47, 0.0 }
0x1bdc   :  { %v4475_v24 = vpop.f32.mrf.mxu0 }
0x1bdd   :  { %v4476_v40 = vadd.f32 %v9630_v52, %v4475_v24  ;;  %11160 = vmatmul.mubr.msk.f32.gmra.mxu1 %vm2229_vm6, %v4490_v3  ;;  %v9660_v24 = vld [vmem:[%s15838_s5 + $0x40] sm:$0xf] }
0x1bde   :  { %v11129_v36 = vpop.f32.mrf.mxu0  ;;  %11162 = vmatprep.mubr.msk.f32.mxu1 %vm12349_vm2, %v12348_v46  ;;  %11172 = vmatpush3.msk.msra.mxu0 %vm189_vm1, %v9660_v24 }
0x1bdf   :  { %v4491_v23 = vmax.f32 %v4476_v40, 0.0  ;;  %11173 = vmatprep.subr.mxu0 %v12348_v46  ;;  %v9659_v40 = vld [vmem:[%s15838_s5 + $0x38] sm:$0xff]  ;;  %v9658_v36 = vld [vmem:[%s15838_s5 + $0x30] sm:$0xff] }
0x1be0   :  { %v4480_v9 = vpop.f32.mrf.mxu0  ;;  %11174 = vmatpush3.msra.mxu0 %v9659_v40 }
0x1be1   :  { %v4481_v53 = vadd.f32 %v9630_v52, %v4480_v9  ;;  %11163 = vmatmul.mubr.msk.f32.gmra.mxu1 %vm2229_vm6, %v4491_v23  ;;  %11175 = vmatprep.subr.mxu0 %v12348_v46 }
0x1be2   :  { %v11132_v63 = vpop.f32.mrf.mxu0  ;;  %11165 = vmatprep.mubr.msk.f32.mxu1 %vm12349_vm2, %v12348_v46  ;;  %11176 = vmatpush3.msra.mxu0 %v9658_v36 }
0x1be3   :  { %v4492_v35 = vmax.f32 %v4481_v53, 0.0  ;;  %11217 = vmatprep.subr.mxu0 %v12348_v46 }
0x1be4   :  { %v4485_v50 = vpop.f32.mrf.mxu0 }
0x1be5   :  { %v4486_v20 = vadd.f32 %v9630_v52, %v4485_v50  ;;  %11166 = vmatmul.mubr.msk.f32.gmra.mxu1 %vm2229_vm6, %v4492_v35 }
0x1be6   :  { %v11135_v58 = vpop.f32.mrf.mxu0  ;;  %11168 = vmatprep.mubr.msk.f32.mxu1 %vm12349_vm2, %v12348_v46 }
0x1be7   :  { %v4493_v13 = vmax.f32 %v4486_v20, 0.0 }
0x1be9   :  { %11169 = vmatmul.mubr.msk.f32.gmra.mxu1 %vm2229_vm6, %v4493_v13 }
0x1bea   :  { %11202 = vmatprep.mubr.msk.f32.mxu1 %vm12349_vm2, %v12348_v46 }
0x1c99   :  { %v4586_v2 = vpop.f32.mrf.mxu1 }
0x1c9a   :  { %v4610_v43 = vadd.f32 %v4586_v2, %v13994_v56 }
0x1c9b   :  { %v11158_v54 = vpop.f32.mrf.mxu1 }
0x1c9c   :  { %v14153_v57 = vadd.f32 %v9653_v14, %v4610_v43 }
0x1c9d   :  { %v4591_v17 = vpop.f32.mrf.mxu1 }
0x1c9e   :  { %v4611_v8 = vadd.f32 %v4591_v17, %v14000_v30  ;;  %v4632_v41 = vsel %vm82_vm0, %v14153_v57, 0.0 }
0x1c9f   :  { %4633 = vadd.xlane.f32.xlu0 %v4632_v41  ;;  %v11161_v28 = vpop.f32.mrf.mxu1  ;;  %v9656_v41 = vld [vmem:[%s15836_s3 + $0x2] ss:$0 sm:$0xff] }
0x1ca0   :  { %v14158_v16 = vadd.f32 %v9653_v14, %v4611_v8 }
0x1ca1   :  { %v4596_v48 = vpop.f32.mrf.mxu1 }
0x1ca2   :  { %v4612_v25 = vadd.f32 %v4596_v48, %v14006_v7  ;;  %v4635_v34 = vsel %vm82_vm0, %v14158_v16, 0.0 }
0x1ca3   :  { %4636 = vadd.xlane.f32.xlu1 %v4635_v34  ;;  %v11164_v56 = vpop.f32.mrf.mxu1 }
0x1ca4   :  { %v14163_v45 = vadd.f32 %v9653_v14, %v4612_v25  ;;  %v9657_v25 = vld [vmem:[%s15837_s4 + $0x2] ss:$0 sm:$0xff] }
0x1ca5   :  { %v4601_v42 = vpop.f32.mrf.mxu1 }
0x1ca6   :  { %v4613_v30 = vadd.f32 %v4601_v42, %v14012_v37  ;;  %v4638_v4 = vsel %vm82_vm0, %v14163_v45, 0.0 }
0x1ca7   :  { %4639 = vadd.xlane.f32.xlu0 %v4638_v4  ;;  %v11167_v39 = vpop.f32.mrf.mxu1 }
0x1ca8   :  { %v14168_v10 = vadd.f32 %v9653_v14, %v4613_v30 }
0x1ca9   :  { %v4606_v33 = vpop.f32.mrf.mxu1 }
0x1caa   :  { %v4614_v7 = vadd.f32 %v4606_v33, %v14018_v21  ;;  %v4641_v12 = vsel %vm82_vm0, %v14168_v10, 0.0 }
0x1cab   :  { %4642 = vadd.xlane.f32.xlu1 %v4641_v12  ;;  %v11170_v49 = vpop.f32.mrf.mxu1 }
0x1cac   :  { %v14173_v5 = vadd.f32 %v9653_v14, %v4614_v7 }
0x1cae   :  { %v4644_v37 = vsel %vm82_vm0, %v14173_v5, 0.0 }
0x1caf   :  { %4645 = vadd.xlane.f32.xlu0 %v4644_v37 }
0x1d28   :  { %v4634_v27 = vpop.xlane.xlu0 %4633 }
0x1d29   :  { %v4647_v31 = vmul.f32 0.05, %v4634_v27 }
0x1d2b   :  { %v4652_v44 = vsub.f32 %v14153_v57, %v4647_v31 }
0x1d2c   :  { %v4637_v26 = vpop.xlane.xlu1 %4636 }
0x1d2d   :  { %v4648_v29 = vmul.f32 0.05, %v4637_v26  ;;  %v4657_v51 = vmul.f32 %v4652_v44, %v4652_v44 }
0x1d2f   :  { %v4653_v21 = vsub.f32 %v14158_v16, %v4648_v29  ;;  %v4662_v61 = vsel %vm82_vm0, %v4657_v51, 0.0 }
0x1d30   :  { %v4640_v32 = vpop.xlane.xlu0 %4639  ;;  %4663 = vadd.xlane.f32.xlu1 %v4662_v61 }
0x1d31   :  { %v4649_v38 = vmul.f32 0.05, %v4640_v32  ;;  %v4658_v15 = vmul.f32 %v4653_v21, %v4653_v21 }
0x1d33   :  { %v4654_v60 = vsub.f32 %v14163_v45, %v4649_v38  ;;  %v4665_v62 = vsel %vm82_vm0, %v4658_v15, 0.0 }
0x1d34   :  { %v4643_v18 = vpop.xlane.xlu1 %4642  ;;  %4666 = vadd.xlane.f32.xlu0 %v4665_v62 }
0x1d35   :  { %v4650_v0 = vmul.f32 0.05, %v4643_v18  ;;  %v4659_v6 = vmul.f32 %v4654_v60, %v4654_v60 }
0x1d37   :  { %v4655_v52 = vsub.f32 %v14168_v10, %v4650_v0  ;;  %v4668_v11 = vsel %vm82_vm0, %v4659_v6, 0.0 }
0x1d38   :  { %4669 = vadd.xlane.f32.xlu1 %v4668_v11  ;;  %v4646_v59 = vpop.xlane.xlu0 %4645 }
0x1d39   :  { %v4651_v19 = vmul.f32 0.05, %v4646_v59  ;;  %v4660_v1 = vmul.f32 %v4655_v52, %v4655_v52 }
0x1d3b   :  { %v4656_v22 = vsub.f32 %v14173_v5, %v4651_v19  ;;  %v4671_v47 = vsel %vm82_vm0, %v4660_v1, 0.0 }
0x1d3c   :  { %4672 = vadd.xlane.f32.xlu0 %v4671_v47 }
0x1d3d   :  { %v4661_v55 = vmul.f32 %v4656_v22, %v4656_v22 }
0x1d3f   :  { %v4674_v3 = vsel %vm82_vm0, %v4661_v55, 0.0 }
0x1d40   :  { %4675 = vadd.xlane.f32.xlu1 %v4674_v3 }
0x1db9   :  { %v4664_v23 = vpop.xlane.xlu1 %4663 }
0x1dba   :  { %v4677_v9 = vmul.f32 0.05, %v4664_v23 }
0x1dbc   :  { %v4682_v53 = vadd.f32 1e-05, %v4677_v9 }
0x1dbd   :  { %v4667_v63 = vpop.xlane.xlu0 %4666 }
0x1dbe   :  { %12098 = vrsqrt.f32 %v4682_v53  ;;  %v4678_v35 = vmul.f32 0.05, %v4667_v63 }
0x1dc0   :  { %v4683_v50 = vadd.f32 1e-05, %v4678_v35 }
0x1dc1   :  { %v4670_v20 = vpop.xlane.xlu1 %4669 }
0x1dc2   :  { %12100 = vrsqrt.f32 %v4683_v50  ;;  %v4679_v58 = vmul.f32 0.05, %v4670_v20 }
0x1dc4   :  { %v4684_v13 = vadd.f32 1e-05, %v4679_v58 }
0x1dc5   :  { %v4673_v2 = vpop.xlane.xlu0 %4672 }
0x1dc6   :  { %12102 = vrsqrt.f32 %v4684_v13  ;;  %v4680_v14 = vmul.f32 0.05, %v4673_v2 }
0x1dc8   :  { %v4685_v43 = vadd.f32 1e-05, %v4680_v14 }
0x1dc9   :  { %v4676_v54 = vpop.xlane.xlu1 %4675 }
0x1dca   :  { %12104 = vrsqrt.f32 %v4685_v43  ;;  %v4681_v17 = vmul.f32 0.05, %v4676_v54  ;;  %v14331_v43 = vld [vmem:[%s15887_s13] sm:$0xff] }
0x1dcb   :  { %v12099_v8 = vpop.eup %12098 }
0x1dcc   :  { %v4692_v28 = vmul.f32 %v12099_v8, %v4652_v44  ;;  %v4686_v48 = vadd.f32 1e-05, %v4681_v17 }
0x1dce   :  { %v4703_v34 = vmul.f32 %v9656_v41, %v4692_v28  ;;  %12106 = vrsqrt.f32 %v4686_v48  ;;  %v14341_v48 = vld [vmem:[%s15887_s13 + $0x8] sm:$0xff] }
0x1dcf   :  { %v12101_v56 = vpop.eup %12100 }
0x1dd0   :  { %v4714_v42 = vadd.f32 %v9657_v25, %v4703_v34  ;;  %v4693_v30 = vmul.f32 %v12101_v56, %v4653_v21 }
0x1dd2   :  { %11178 = vmatmul.mubr.msk.f32.vlgmr.msra.gmra.mxu0 %vm82_vm0, %v4714_v42  ;;  %v4704_v4 = vmul.f32 %v9656_v41, %v4693_v30 }
0x1dd3   :  { %v12103_v39 = vpop.eup %12102  ;;  %11180 = vmatprep.mubr.msk.f32.mxu0 %vm12349_vm2, %v12348_v46 }
0x1dd4   :  { %v4715_v33 = vadd.f32 %v9657_v25, %v4704_v4  ;;  %v4694_v7 = vmul.f32 %v12103_v39, %v4654_v60  ;;  %v14351_v4 = vld [vmem:[%s15887_s13 + $0x10] sm:$0xff] }
0x1dd6   :  { %11181 = vmatmul.mubr.msk.f32.gmra.mxu0 %vm82_vm0, %v4715_v33  ;;  %v4705_v12 = vmul.f32 %v9656_v41, %v4694_v7 }
0x1dd7   :  { %v12105_v49 = vpop.eup %12104  ;;  %11183 = vmatprep.mubr.msk.f32.mxu0 %vm12349_vm2, %v12348_v46 }
0x1dd8   :  { %v4716_v37 = vadd.f32 %v9657_v25, %v4705_v12  ;;  %v4695_v27 = vmul.f32 %v12105_v49, %v4655_v52 }
0x1dda   :  { %11184 = vmatmul.mubr.msk.f32.gmra.mxu0 %vm82_vm0, %v4716_v37  ;;  %v4706_v31 = vmul.f32 %v9656_v41, %v4695_v27  ;;  %v14358_v37 = vld [vmem:[%s15887_s13 + $0x18] sm:$0xff] }
0x1ddb   :  { %v12107_v44 = vpop.eup %12106  ;;  %11186 = vmatprep.mubr.msk.f32.mxu0 %vm12349_vm2, %v12348_v46 }
0x1ddc   :  { %v4717_v26 = vadd.f32 %v9657_v25, %v4706_v31  ;;  %v4696_v29 = vmul.f32 %v12107_v44, %v4656_v22 }
0x1dde   :  { %11187 = vmatmul.mubr.msk.f32.gmra.mxu0 %vm82_vm0, %v4717_v26  ;;  %v4707_v51 = vmul.f32 %v9656_v41, %v4696_v29 }
0x1ddf   :  { %11189 = vmatprep.mubr.msk.f32.mxu0 %vm12349_vm2, %v12348_v46 }
0x1de0   :  { %v4718_v21 = vadd.f32 %v9657_v25, %v4707_v51  ;;  %v14365_v51 = vld [vmem:[%s15887_s13 + $0x20] sm:$0xff] }
0x1de2   :  { %11190 = vmatmul.mubr.msk.f32.gmra.mxu0 %vm82_vm0, %v4718_v21 }
0x1de3   :  { %11227 = vmatprep.mubr.msk.f32.mxu0 %vm12349_vm2, %v12348_v46 }
0x1e92   :  { %v14221_v61 = vpop.f32.mrf.mxu0 }
0x1e94   :  { %v11179_v32 = vpop.f32.mrf.mxu0 }
0x1e96   :  { %v14223_v38 = vpop.f32.mrf.mxu0 }
0x1e98   :  { %v11182_v15 = vpop.f32.mrf.mxu0 }
0x1e9a   :  { %v14225_v60 = vpop.f32.mrf.mxu0 }
0x1e9c   :  { %v11185_v62 = vpop.f32.mrf.mxu0 }
0x1e9e   :  { %v14227_v18 = vpop.f32.mrf.mxu0 }
0x1e9f   :  { %4842 = vrot.lane.b32.xlu1 %v14227_v18, %s15876_s27 }
0x1ea0   :  { %v11188_v0 = vpop.f32.mrf.mxu0 }
0x1ea2   :  { %v14231_v6 = vpop.f32.mrf.mxu0 }
0x1ea3   :  { %4840 = vrot.lane.b32.xlu1 %v14225_v60, %s15876_s27  ;;  %4844 = vrot.lane.b32.xlu0 %v14231_v6, %s15876_s27 }
0x1ea4   :  { %v11191_v52 = vpop.f32.mrf.mxu0 }
0x1ea7   :  { %4838 = vrot.lane.b32.xlu1 %v14223_v38, %s15876_s27  ;;  %4836 = vrot.lane.b32.xlu0 %v14221_v61, %s15876_s27 }
0x1eab   :  { %5161 = vrot.lane.b32.xlu1 %v14231_v6, %s15874_s28  ;;  %5159 = vrot.lane.b32.xlu0 %v14227_v18, %s15874_s28 }
0x1eaf   :  { %5157 = vrot.lane.b32.xlu1 %v14225_v60, %s15874_s28  ;;  %5155 = vrot.lane.b32.xlu0 %v14223_v38, %s15874_s28 }
0x1eb3   :  { %5153 = vrot.lane.b32.xlu1 %v14221_v61, %s15874_s28  ;;  %5143 = vrot.lane.b32.xlu0 %v14221_v61, %s15893_s26 }
0x1eb7   :  { %5145 = vrot.lane.b32.xlu1 %v14223_v38, %s15893_s26  ;;  %5147 = vrot.lane.b32.xlu0 %v14225_v60, %s15893_s26 }
0x1ebb   :  { %5149 = vrot.lane.b32.xlu1 %v14227_v18, %s15893_s26  ;;  %5151 = vrot.lane.b32.xlu0 %v14231_v6, %s15893_s26 }
0x1ebf   :  { %5027 = vrot.lane.b32.xlu1 %v14227_v18, %s15894_s19  ;;  %5029 = vrot.lane.b32.xlu0 %v14231_v6, %s15894_s19 }
0x1ec3   :  { %5025 = vrot.lane.b32.xlu1 %v14225_v60, %s15894_s19 }
0x1ec7   :  { %5023 = vrot.lane.b32.xlu1 %v14223_v38, %s15894_s19 }
0x1f11   :  { %v4843_v11 = vpop.permute.xlu1 %4842 }
0x1f15   :  { %v4841_v59 = vpop.permute.xlu1 %4840  ;;  %v4845_v19 = vpop.permute.xlu0 %4844 }
0x1f16   :  { %11193 = vmatpush3.xpose.msk.msra.mxu1 %vm298_vm3, %v4845_v19 }
0x1f17   :  { %11194 = vmatprep.subr.mxu1 %v12348_v46 }
0x1f19   :  { %v4839_v1 = vpop.permute.xlu1 %4838  ;;  %v4837_v22 = vpop.permute.xlu0 %4836 }
0x1f1a   :  { %11195 = vmatpush3.xpose.msk.msra.mxu1 %vm298_vm3, %v4843_v11 }
0x1f1b   :  { %11196 = vmatprep.subr.mxu1 %v12348_v46 }
0x1f1d   :  { %v5162_v47 = vpop.permute.xlu1 %5161  ;;  %v5160_v55 = vpop.permute.xlu0 %5159 }
0x1f1e   :  { %11197 = vmatpush3.xpose.msk.msra.mxu1 %vm298_vm3, %v4841_v59 }
0x1f1f   :  { %11198 = vmatprep.subr.mxu1 %v12348_v46 }
0x1f21   :  { %v5158_v3 = vpop.permute.xlu1 %5157  ;;  %v5156_v24 = vpop.permute.xlu0 %5155 }
0x1f22   :  { %11199 = vmatpush3.xpose.msk.msra.mxu1 %vm298_vm3, %v4839_v1 }
0x1f23   :  { %11200 = vmatprep.subr.mxu1 %v12348_v46 }
0x1f25   :  { %v5154_v40 = vpop.permute.xlu1 %5153  ;;  %v5144_v36 = vpop.permute.xlu0 %5143 }
0x1f26   :  { %11201 = vmatpush3.xpose.msk.msra.mxu1 %vm298_vm3, %v4837_v22 }
0x1f27   :  { %11242 = vmatprep.subr.mxu1 %v12348_v46 }
0x1f29   :  { %v5146_v23 = vpop.permute.xlu1 %5145  ;;  %11203 = vmatmul.mubr.msk.f32.vlgmr.msra.gmra.mxu1 %vm298_vm3, %v14221_v61  ;;  %v5148_v9 = vpop.permute.xlu0 %5147 }
0x1f2a   :  { %11243 = vmatpush3.xpose.msk.msra.mxu1 %vm298_vm3, %v5162_v47  ;;  %11205 = vmatprep.mubr.msk.f32.mxu1 %vm12349_vm2, %v12348_v46 }
0x1f2b   :  { %11244 = vmatprep.subr.mxu1 %v12348_v46 }
0x1f2d   :  { %v5150_v53 = vpop.permute.xlu1 %5149  ;;  %11206 = vmatmul.mubr.msk.f32.gmra.mxu1 %vm298_vm3, %v14223_v38  ;;  %v5152_v63 = vpop.permute.xlu0 %5151 }
0x1f2e   :  { %11245 = vmatpush3.xpose.msk.msra.mxu1 %vm298_vm3, %v5160_v55  ;;  %11208 = vmatprep.mubr.msk.f32.mxu1 %vm12349_vm2, %v12348_v46 }
0x1f2f   :  { %11246 = vmatprep.subr.mxu1 %v12348_v46 }
0x1f31   :  { %v5028_v35 = vpop.permute.xlu1 %5027  ;;  %11209 = vmatmul.mubr.msk.f32.gmra.mxu1 %vm298_vm3, %v14225_v60  ;;  %v5030_v50 = vpop.permute.xlu0 %5029 }
0x1f32   :  { %11218 = vmatpush3.msra.mxu0 %v5030_v50  ;;  %11247 = vmatpush3.xpose.msk.msra.mxu1 %vm298_vm3, %v5158_v3 }
0x1f33   :  { %11219 = vmatprep.subr.mxu0 %v12348_v46  ;;  %11211 = vmatprep.mubr.msk.f32.mxu1 %vm12349_vm2, %v12348_v46 }
0x1f34   :  { %11220 = vmatpush3.msra.mxu0 %v5028_v35  ;;  %11248 = vmatprep.subr.mxu1 %v12348_v46 }
0x1f35   :  { %v5026_v20 = vpop.permute.xlu1 %5025  ;;  %11212 = vmatmul.mubr.msk.f32.gmra.mxu1 %vm298_vm3, %v14227_v18  ;;  %11221 = vmatprep.subr.mxu0 %v12348_v46 }
0x1f36   :  { %11222 = vmatpush3.msra.mxu0 %v5026_v20  ;;  %11249 = vmatpush3.xpose.msk.msra.mxu1 %vm298_vm3, %v5156_v24 }
0x1f37   :  { %11214 = vmatprep.mubr.msk.f32.mxu1 %vm12349_vm2, %v12348_v46  ;;  %11223 = vmatprep.subr.mxu0 %v12348_v46 }
0x1f38   :  { %11250 = vmatprep.subr.mxu1 %v12348_v46 }
0x1f39   :  { %v5024_v58 = vpop.permute.xlu1 %5023  ;;  %11215 = vmatmul.mubr.msk.f32.gmra.mxu1 %vm298_vm3, %v14231_v6 }
0x1f3a   :  { %11224 = vmatpush3.msra.mxu0 %v5024_v58  ;;  %11251 = vmatpush3.xpose.msk.msra.mxu1 %vm298_vm3, %v5154_v40 }
0x1f3b   :  { %11252 = vmatprep.mubr.msk.f32.mxu1 %vm12349_vm2, %v12348_v46  ;;  %11225 = vmatprep.subr.mxu0 %v12348_v46 }
0x1f3c   :  { %11292 = vmatprep.subr.mxu1 %v12348_v46 }
0x1f3d   :  { %11253 = vmatmul.mubr.msk.f32.vlgmr.msra.gmra.mxu1 %vm298_vm3, %v5144_v36 }
0x1f3e   :  { %11255 = vmatprep.mubr.msk.f32.mxu1 %vm12349_vm2, %v12348_v46 }
0x1f41   :  { %11256 = vmatmul.mubr.msk.f32.gmra.mxu1 %vm298_vm3, %v5146_v23 }
0x1f42   :  { %11258 = vmatprep.mubr.msk.f32.mxu1 %vm12349_vm2, %v12348_v46 }
0x1f45   :  { %11259 = vmatmul.mubr.msk.f32.gmra.mxu1 %vm298_vm3, %v5148_v9 }
0x1f46   :  { %11261 = vmatprep.mubr.msk.f32.mxu1 %vm12349_vm2, %v12348_v46 }
0x1f49   :  { %11262 = vmatmul.mubr.msk.f32.gmra.mxu1 %vm298_vm3, %v5150_v53 }
0x1f4a   :  { %11264 = vmatprep.mubr.msk.f32.mxu1 %vm12349_vm2, %v12348_v46 }
0x1f4d   :  { %11265 = vmatmul.mubr.msk.f32.gmra.mxu1 %vm298_vm3, %v5152_v63 }
0x1f4e   :  { %11294 = vmatprep.mubr.msk.f32.mxu1 %vm12349_vm2, %v12348_v46 }
0x1fe9   :  { %v4932_v13 = vpop.f32.mrf.mxu1 }
0x1fea   :  { %v4956_v2 = vmul.f32 0.4472136, %v4932_v13 }
0x1feb   :  { %v11204_v14 = vpop.f32.mrf.mxu1 }
0x1fec   :  { %v14334_v54 = vadd.f32 %v14331_v43, %v4956_v2 }
0x1fed   :  { %v4937_v17 = vpop.f32.mrf.mxu1 }
0x1fee   :  { %v4957_v8 = vmul.f32 0.4472136, %v4937_v17  ;;  %v4966_v41 = vsel %vm419_vm4, %v14334_v54, -inf }
0x1fef   :  { %4967 = vmax.xlane.f32.xlu1 %v4966_v41  ;;  %v11207_v28 = vpop.f32.mrf.mxu1 }
0x1ff0   :  { %v14344_v25 = vadd.f32 %v14341_v48, %v4957_v8 }
0x1ff1   :  { %v4942_v34 = vpop.f32.mrf.mxu1 }
0x1ff2   :  { %v4958_v56 = vmul.f32 0.4472136, %v4942_v34  ;;  %v4969_v42 = vsel %vm419_vm4, %v14344_v25, -inf }
0x1ff3   :  { %4970 = vmax.xlane.f32.xlu0 %v4969_v42  ;;  %v11210_v30 = vpop.f32.mrf.mxu1 }
0x1ff4   :  { %v4963_v39 = vadd.f32 %v14351_v4, %v4958_v56 }
0x1ff5   :  { %v4947_v33 = vpop.f32.mrf.mxu1 }
0x1ff6   :  { %v4959_v7 = vmul.f32 0.4472136, %v4947_v33  ;;  %v4972_v12 = vsel %vm419_vm4, %v4963_v39, -inf }
0x1ff7   :  { %4973 = vmax.xlane.f32.xlu0 %v4972_v12  ;;  %v11213_v49 = vpop.f32.mrf.mxu1 }
0x1ff8   :  { %v4964_v27 = vadd.f32 %v14358_v37, %v4959_v7 }
0x1ff9   :  { %v4952_v31 = vpop.f32.mrf.mxu1 }
0x1ffa   :  { %v4960_v44 = vmul.f32 0.4472136, %v4952_v31  ;;  %v4975_v26 = vsel %vm419_vm4, %v4964_v27, -inf }
0x1ffb   :  { %4976 = vmax.xlane.f32.xlu0 %v4975_v26  ;;  %v11216_v29 = vpop.f32.mrf.mxu1 }
0x1ffc   :  { %v4965_v21 = vadd.f32 %v14365_v51, %v4960_v44 }
0x1ffd   :  { %v5249_v32 = vpop.f32.mrf.mxu1 }
0x1ffe   :  { %v5273_v15 = vmul.f32 0.4472136, %v5249_v32  ;;  %v4978_v62 = vsel %vm419_vm4, %v4965_v21, -inf }
0x1fff   :  { %4979 = vmax.xlane.f32.xlu1 %v4978_v62  ;;  %v11254_v0 = vpop.f32.mrf.mxu1 }
0x2000   :  { %v5278_v52 = vadd.f32 %v14331_v43, %v5273_v15 }
0x2001   :  { %v5254_v11 = vpop.f32.mrf.mxu1 }
0x2002   :  { %v5274_v59 = vmul.f32 0.4472136, %v5254_v11  ;;  %v5283_v19 = vsel %vm419_vm4, %v5278_v52, -inf }
0x2003   :  { %5284 = vmax.xlane.f32.xlu0 %v5283_v19  ;;  %v11257_v1 = vpop.f32.mrf.mxu1 }
0x2004   :  { %v5279_v22 = vadd.f32 %v14341_v48, %v5274_v59 }
0x2005   :  { %v5259_v47 = vpop.f32.mrf.mxu1 }
0x2006   :  { %v5275_v55 = vmul.f32 0.4472136, %v5259_v47  ;;  %v5286_v3 = vsel %vm419_vm4, %v5279_v22, -inf }
0x2007   :  { %5287 = vmax.xlane.f32.xlu1 %v5286_v3  ;;  %v11260_v24 = vpop.f32.mrf.mxu1 }
0x2008   :  { %v5280_v40 = vadd.f32 %v14351_v4, %v5275_v55 }
0x2009   :  { %v5264_v36 = vpop.f32.mrf.mxu1 }
0x200a   :  { %v5289_v23 = vsel %vm419_vm4, %v5280_v40, -inf  ;;  %v5276_v35 = vmul.f32 0.4472136, %v5264_v36 }
0x200b   :  { %5290 = vmax.xlane.f32.xlu0 %v5289_v23  ;;  %v11263_v9 = vpop.f32.mrf.mxu1 }
0x200c   :  { %v14380_v50 = vadd.f32 %v14358_v37, %v5276_v35 }
0x200d   :  { %v5269_v53 = vpop.f32.mrf.mxu1 }
0x200e   :  { %v5277_v20 = vmul.f32 0.4472136, %v5269_v53  ;;  %v5292_v13 = vsel %vm419_vm4, %v14380_v50, -inf }
0x200f   :  { %v11266_v63 = vpop.f32.mrf.mxu1 }
0x2010   :  { %v14383_v58 = vadd.f32 %v14365_v51, %v5277_v20 }
0x2012   :  { %v5295_v2 = vsel %vm419_vm4, %v14383_v58, -inf }
0x2018   :  { %5021 = vrot.lane.b32.xlu1 %v14221_v61, %s15894_s19 }
0x2021   :  { %5346 = vrot.lane.b32.xlu0 %v14231_v6, %s15895_s1 }
0x203c   :  { %5293 = vmax.xlane.f32.xlu1 %v5292_v13 }
0x2040   :  { %5296 = vmax.xlane.f32.xlu0 %v5295_v2 }
0x204d   :  { %5344 = vrot.lane.b32.xlu1 %v14227_v18, %s15895_s1 }
0x2056   :  { %5342 = vrot.lane.b32.xlu0 %v14225_v60, %s15895_s1 }
0x2078   :  { %v4968_v14 = vpop.xlane.xlu1 %4967 }
0x2079   :  { %v4981_v17 = vsub.f32 %v14334_v54, %v4968_v14 }
0x207b   :  { %v4986_v8 = vmul.f32 1.442695, %v4981_v17 }
0x207c   :  { %v4971_v41 = vpop.xlane.xlu0 %4970 }
0x207d   :  { %12108 = vpow2.f32 %v4986_v8  ;;  %v4982_v28 = vsub.f32 %v14344_v25, %v4971_v41 }
0x207f   :  { %v4988_v34 = vmul.f32 1.442695, %v4982_v28 }
0x2080   :  { %v4974_v56 = vpop.xlane.xlu0 %4973 }
0x2081   :  { %12110 = vpow2.f32 %v4988_v34  ;;  %v4983_v42 = vsub.f32 %v4963_v39, %v4974_v56 }
0x2083   :  { %v4990_v30 = vmul.f32 1.442695, %v4983_v42 }
0x2084   :  { %v4977_v33 = vpop.xlane.xlu0 %4976 }
0x2085   :  { %12112 = vpow2.f32 %v4990_v30  ;;  %v4984_v7 = vsub.f32 %v4964_v27, %v4977_v33 }
0x2087   :  { %v4992_v12 = vmul.f32 1.442695, %v4984_v7 }
0x2088   :  { %v4980_v49 = vpop.xlane.xlu1 %4979 }
0x2089   :  { %12114 = vpow2.f32 %v4992_v12  ;;  %v4985_v31 = vsub.f32 %v4965_v21, %v4980_v49 }
0x208a   :  { %v14395_v44 = vpop.eup %12108 }
0x208b   :  { %v4994_v54 = vmul.f32 1.442695, %v4985_v31  ;;  %v4996_v26 = vsel %vm419_vm4, %v14395_v44, 0.0 }
0x208c   :  { %4997 = vadd.xlane.f32.xlu1 %v4996_v26  ;;  %v5285_v25 = vpop.xlane.xlu0 %5284 }
0x208d   :  { %12116 = vpow2.f32 %v4994_v54  ;;  %v5298_v29 = vsub.f32 %v5278_v52, %v5285_v25 }
0x208e   :  { %v14399_v32 = vpop.eup %12110 }
0x208f   :  { %v5303_v39 = vmul.f32 1.442695, %v5298_v29  ;;  %v4999_v27 = vsel %vm419_vm4, %v14399_v32, 0.0 }
0x2090   :  { %v5288_v15 = vpop.xlane.xlu1 %5287  ;;  %5000 = vadd.xlane.f32.xlu0 %v4999_v27 }
0x2091   :  { %12118 = vpow2.f32 %v5303_v39  ;;  %v5299_v21 = vsub.f32 %v5279_v22, %v5288_v15 }
0x2092   :  { %v14403_v62 = vpop.eup %12112 }
0x2093   :  { %v5305_v0 = vmul.f32 1.442695, %v5299_v21  ;;  %v5002_v11 = vsel %vm419_vm4, %v14403_v62, 0.0 }
0x2094   :  { %v5022_v59 = vpop.permute.xlu1 %5021  ;;  %5003 = vadd.xlane.f32.xlu1 %v5002_v11  ;;  %v5291_v19 = vpop.xlane.xlu0 %5290 }
0x2095   :  { %12120 = vpow2.f32 %v5305_v0  ;;  %v5300_v52 = vsub.f32 %v5280_v40, %v5291_v19  ;;  %11226 = vmatpush3.msra.mxu0 %v5022_v59 }
0x2096   :  { %v14407_v1 = vpop.eup %12114  ;;  %11267 = vmatprep.subr.mxu0 %v12348_v46 }
0x2097   :  { %v5307_v47 = vmul.f32 1.442695, %v5300_v52  ;;  %v5005_v22 = vsel %vm419_vm4, %v14407_v1, 0.0 }
0x2098   :  { %5006 = vadd.xlane.f32.xlu0 %v5005_v22  ;;  %v5347_v63 = vpop.permute.xlu0 %5346 }
0x2099   :  { %12122 = vpow2.f32 %v5307_v47 }
0x209a   :  { %v14412_v55 = vpop.eup %12116 }
0x209b   :  { %v5008_v3 = vsel %vm419_vm4, %v14412_v55, 0.0 }
0x209c   :  { %5009 = vadd.xlane.f32.xlu1 %v5008_v3 }
0x209e   :  { %v14416_v24 = vpop.eup %12118 }
0x209f   :  { %v5313_v40 = vsel %vm419_vm4, %v14416_v24, 0.0 }
0x20a0   :  { %5314 = vadd.xlane.f32.xlu1 %v5313_v40 }
0x20a2   :  { %v14420_v36 = vpop.eup %12120 }
0x20a3   :  { %v5316_v23 = vsel %vm419_vm4, %v14420_v36, 0.0 }
0x20a4   :  { %5317 = vadd.xlane.f32.xlu0 %v5316_v23 }
0x20a6   :  { %v14424_v9 = vpop.eup %12122 }
0x20a7   :  { %v5319_v53 = vsel %vm419_vm4, %v14424_v9, 0.0 }
0x20a8   :  { %5320 = vadd.xlane.f32.xlu1 %v5319_v53 }
0x20b9   :  { %5340 = vrot.lane.b32.xlu1 %v14223_v38, %s15895_s1 }
0x20bd   :  { %5694 = vrot.lane.b32.xlu1 %v14231_v6, %s15896_s2 }
0x20c1   :  { %5690 = vrot.lane.b32.xlu1 %v14225_v60, %s15896_s2 }
0x20c5   :  { %v5294_v35 = vpop.xlane.xlu1 %5293  ;;  %5686 = vrot.lane.b32.xlu1 %v14221_v61, %s15896_s2 }
0x20c6   :  { %v5301_v20 = vsub.f32 %v14380_v50, %v5294_v35 }
0x20c8   :  { %v5309_v13 = vmul.f32 1.442695, %v5301_v20 }
0x20c9   :  { %5678 = vrot.lane.b32.xlu1 %v14223_v38, %s15897_s24  ;;  %v5297_v2 = vpop.xlane.xlu0 %5296  ;;  %v5345_v28 = vpop.permute.xlu1 %5344 }
0x20ca   :  { %12124 = vpow2.f32 %v5309_v13  ;;  %v5302_v14 = vsub.f32 %v14383_v58, %v5297_v2 }
0x20cc   :  { %v5311_v17 = vmul.f32 1.442695, %v5302_v14 }
0x20cd   :  { %5682 = vrot.lane.b32.xlu1 %v14227_v18, %s15897_s24  ;;  %v5343_v34 = vpop.permute.xlu0 %5342 }
0x20ce   :  { %12126 = vpow2.f32 %v5311_v17 }
0x20d1   :  { %5879 = vrot.lane.b32.xlu1 %v14231_v6, %s15889_s25 }
0x20d5   :  { %5875 = vrot.lane.b32.xlu1 %v14225_v60, %s15889_s25 }
0x20d7   :  { %v14446_v50 = vpop.eup %12124 }
0x20d8   :  { %v5322_v8 = vsel %vm419_vm4, %v14446_v50, 0.0 }
0x20d9   :  { %5323 = vadd.xlane.f32.xlu0 %v5322_v8  ;;  %5873 = vrot.lane.b32.xlu1 %v14223_v38, %s15889_s25 }
0x20db   :  { %v14452_v58 = vpop.eup %12126 }
0x20dc   :  { %v5325_v41 = vsel %vm419_vm4, %v14452_v58, 0.0 }
0x20dd   :  { %5871 = vrot.lane.b32.xlu1 %v14221_v61, %s15889_s25  ;;  %5326 = vadd.xlane.f32.xlu0 %v5325_v41 }
0x20f3   :  { %5338 = vrot.lane.b32.xlu0 %v14221_v61, %s15895_s1 }
0x20f7   :  { %5692 = vrot.lane.b32.xlu0 %v14227_v18, %s15896_s2 }
0x20fb   :  { %5688 = vrot.lane.b32.xlu0 %v14223_v38, %s15896_s2 }
0x20ff   :  { %5676 = vrot.lane.b32.xlu0 %v14221_v61, %s15897_s24 }
0x2103   :  { %5680 = vrot.lane.b32.xlu0 %v14225_v60, %s15897_s24 }
0x2107   :  { %5684 = vrot.lane.b32.xlu0 %v14231_v6, %s15897_s24 }
0x210b   :  { %5877 = vrot.lane.b32.xlu0 %v14227_v18, %s15889_s25 }
0x2115   :  { %v4998_v56 = vpop.xlane.xlu1 %4997 }
0x2116   :  { %12128 = vrcp.f32 %v4998_v56 }
0x2119   :  { %v5001_v42 = vpop.xlane.xlu0 %5000 }
0x211a   :  { %12130 = vrcp.f32 %v5001_v42 }
0x211d   :  { %v5004_v30 = vpop.xlane.xlu1 %5003 }
0x211e   :  { %12132 = vrcp.f32 %v5004_v30 }
0x2121   :  { %v5007_v33 = vpop.xlane.xlu0 %5006 }
0x2122   :  { %12134 = vrcp.f32 %v5007_v33 }
0x2123   :  { %v12129_v7 = vpop.eup %12128 }
0x2124   :  { %v5016_v12 = vmul.f32 %v12129_v7, %v14395_v44 }
0x2125   :  { %v5010_v49 = vpop.xlane.xlu1 %5009 }
0x2126   :  { %12136 = vrcp.f32 %v5010_v49  ;;  %11228 = vmatmul.mubr.msk.f32.vlgmr.msra.gmra.mxu0 %vm419_vm4, %v5016_v12 }
0x2127   :  { %v12131_v31 = vpop.eup %12130  ;;  %11268 = vmatpush3.msra.mxu0 %v5347_v63  ;;  %11230 = vmatprep.mubr.msk.f32.mxu0 %vm12349_vm2, %v12348_v46 }
0x2128   :  { %11269 = vmatprep.subr.mxu0 %v12348_v46  ;;  %v5017_v54 = vmul.f32 %v12131_v31, %v14399_v32 }
0x2129   :  { %11270 = vmatpush3.msra.mxu0 %v5345_v28  ;;  %v5315_v25 = vpop.xlane.xlu1 %5314 }
0x212a   :  { %11271 = vmatprep.subr.mxu0 %v12348_v46  ;;  %11231 = vmatmul.mubr.msk.f32.gmra.mxu0 %vm419_vm4, %v5017_v54  ;;  %12138 = vrcp.f32 %v5315_v25 }
0x212b   :  { %v12133_v26 = vpop.eup %12132  ;;  %11272 = vmatpush3.msra.mxu0 %v5343_v34  ;;  %11233 = vmatprep.mubr.msk.f32.mxu0 %vm12349_vm2, %v12348_v46 }
0x212c   :  { %v5018_v44 = vmul.f32 %v12133_v26, %v14403_v62  ;;  %11273 = vmatprep.subr.mxu0 %v12348_v46 }
0x212d   :  { %v5318_v62 = vpop.xlane.xlu0 %5317 }
0x212e   :  { %11234 = vmatmul.mubr.msk.f32.gmra.mxu0 %vm419_vm4, %v5018_v44  ;;  %12140 = vrcp.f32 %v5318_v62 }
0x212f   :  { %v12135_v29 = vpop.eup %12134  ;;  %11236 = vmatprep.mubr.msk.f32.mxu0 %vm12349_vm2, %v12348_v46 }
0x2130   :  { %v5019_v32 = vmul.f32 %v12135_v29, %v14407_v1  ;;  %v9682_v1 = vld [vmem:[%s15839_s6 + $0x40] sm:$0x1f] }
0x2131   :  { %v5321_v39 = vpop.xlane.xlu1 %5320 }
0x2132   :  { %11237 = vmatmul.mubr.msk.f32.gmra.mxu0 %vm419_vm4, %v5019_v32  ;;  %12142 = vrcp.f32 %v5321_v39 }
0x2133   :  { %v12137_v27 = vpop.eup %12136  ;;  %11239 = vmatprep.mubr.msk.f32.mxu0 %vm12349_vm2, %v12348_v46 }
0x2134   :  { %v5020_v15 = vmul.f32 %v12137_v27, %v14412_v55 }
0x2135   :  { %v5341_v21 = vpop.permute.xlu1 %5340 }
0x2136   :  { %11240 = vmatmul.mubr.msk.f32.gmra.mxu0 %vm419_vm4, %v5020_v15 }
0x2137   :  { %11274 = vmatpush3.msra.mxu0 %v5341_v21  ;;  %11277 = vmatprep.mubr.msk.f32.mxu0 %vm12349_vm2, %v12348_v46  ;;  %v12139_v59 = vpop.eup %12138 }
0x2138   :  { %11275 = vmatprep.subr.mxu0 %v12348_v46  ;;  %v5333_v19 = vmul.f32 %v12139_v59, %v14416_v24 }
0x2139   :  { %v5695_v53 = vpop.permute.xlu1 %5694 }
0x213b   :  { %v12141_v47 = vpop.eup %12140 }
0x213c   :  { %v5334_v22 = vmul.f32 %v12141_v47, %v14420_v36  ;;  %v9698_v36 = vld [vmem:[%s15839_s6 + $0x48] sm:$0x1f] }
0x213d   :  { %11293 = vmatpush3.msk.msra.mxu1 %vm928_vm5, %v9698_v36  ;;  %v5691_v63 = vpop.permute.xlu1 %5690 }
0x213e   :  { %11326 = vmatprep.subr.mxu1 %v12348_v46 }
0x213f   :  { %v12143_v55 = vpop.eup %12142 }
0x2140   :  { %v5335_v3 = vmul.f32 %v12143_v55, %v14424_v9 }
0x2141   :  { %v14527_v35 = vpop.permute.xlu1 %5686 }
0x2145   :  { %v14529_v13 = vpop.permute.xlu1 %5678 }
0x2149   :  { %v14531_v14 = vpop.permute.xlu1 %5682 }
0x2162   :  { %v5324_v0 = vpop.xlane.xlu0 %5323 }
0x2163   :  { %12144 = vrcp.f32 %v5324_v0 }
0x2166   :  { %v5327_v11 = vpop.xlane.xlu0 %5326 }
0x2167   :  { %12146 = vrcp.f32 %v5327_v11 }
0x216a   :  { %v5339_v52 = vpop.permute.xlu0 %5338 }
0x216b   :  { %11276 = vmatpush3.msra.mxu0 %v5339_v52 }
0x216c   :  { %11278 = vmatmul.mubr.msk.f32.vlgmr.msra.gmra.mxu0 %vm419_vm4, %v5333_v19  ;;  %11309 = vmatprep.subr.mxu0 %v12348_v46 }
0x216d   :  { %11280 = vmatprep.mubr.msk.f32.mxu0 %vm12349_vm2, %v12348_v46  ;;  %11310 = vmatpush3.msk.msra.mxu0 %vm928_vm5, %v9682_v1 }
0x216e   :  { %11351 = vmatprep.subr.mxu0 %v12348_v46  ;;  %v5693_v20 = vpop.permute.xlu0 %5692 }
0x2170   :  { %11281 = vmatmul.mubr.msk.f32.gmra.mxu0 %vm419_vm4, %v5334_v22  ;;  %v12145_v24 = vpop.eup %12144 }
0x2171   :  { %11283 = vmatprep.mubr.msk.f32.mxu0 %vm12349_vm2, %v12348_v46  ;;  %v5336_v40 = vmul.f32 %v12145_v24, %v14446_v50  ;;  %v5880_v50 = vpop.permute.xlu1 %5879 }
0x2172   :  { %v5689_v2 = vpop.permute.xlu0 %5688 }
0x2174   :  { %11284 = vmatmul.mubr.msk.f32.gmra.mxu0 %vm419_vm4, %v5335_v3  ;;  %v12147_v23 = vpop.eup %12146 }
0x2175   :  { %11286 = vmatprep.mubr.msk.f32.mxu0 %vm12349_vm2, %v12348_v46  ;;  %v5337_v9 = vmul.f32 %v12147_v23, %v14452_v58  ;;  %v5876_v58 = vpop.permute.xlu1 %5875 }
0x2176   :  { %v14533_v17 = vpop.permute.xlu0 %5676 }
0x2178   :  { %11287 = vmatmul.mubr.msk.f32.gmra.mxu0 %vm419_vm4, %v5336_v40 }
0x2179   :  { %11289 = vmatprep.mubr.msk.f32.mxu0 %vm12349_vm2, %v12348_v46  ;;  %v5874_v56 = vpop.permute.xlu1 %5873 }
0x217a   :  { %v14535_v8 = vpop.permute.xlu0 %5680 }
0x217c   :  { %11290 = vmatmul.mubr.msk.f32.gmra.mxu0 %vm419_vm4, %v5337_v9 }
0x217d   :  { %11311 = vmatprep.mubr.msk.f32.mxu0 %vm12349_vm2, %v12348_v46  ;;  %v5872_v12 = vpop.permute.xlu1 %5871 }
0x217e   :  { %v14537_v41 = vpop.permute.xlu0 %5684 }
0x2182   :  { %v5878_v42 = vpop.permute.xlu0 %5877 }
0x21e6   :  { %v5117_v28 = vpop.f32.mrf.mxu0 }
0x21e7   :  { %11312 = vmatmul.mubr.msk.f32.vlgmr.msra.gmra.mxu0 %vm298_vm3, %v5117_v28 }
0x21e8   :  { %11352 = vmatpush3.msra.mxu0 %v5880_v50  ;;  %v11229_v34 = vpop.f32.mrf.mxu0  ;;  %11314 = vmatprep.mubr.msk.f32.mxu0 %vm12349_vm2, %v12348_v46 }
0x21e9   :  { %11353 = vmatprep.subr.mxu0 %v12348_v46 }
0x21ea   :  { %11354 = vmatpush3.msra.mxu0 %v5878_v42  ;;  %v5122_v30 = vpop.f32.mrf.mxu0 }
0x21eb   :  { %11355 = vmatprep.subr.mxu0 %v12348_v46  ;;  %11315 = vmatmul.mubr.msk.f32.gmra.mxu0 %vm298_vm3, %v5122_v30 }
0x21ec   :  { %11356 = vmatpush3.msra.mxu0 %v5876_v58  ;;  %v11232_v33 = vpop.f32.mrf.mxu0  ;;  %11317 = vmatprep.mubr.msk.f32.mxu0 %vm12349_vm2, %v12348_v46 }
0x21ed   :  { %11357 = vmatprep.subr.mxu0 %v12348_v46 }
0x21ee   :  { %11358 = vmatpush3.msra.mxu0 %v5874_v56  ;;  %v5127_v7 = vpop.f32.mrf.mxu0 }
0x21ef   :  { %11359 = vmatprep.subr.mxu0 %v12348_v46  ;;  %11318 = vmatmul.mubr.msk.f32.gmra.mxu0 %vm298_vm3, %v5127_v7 }
0x21f0   :  { %11360 = vmatpush3.msra.mxu0 %v5872_v12  ;;  %v11235_v49 = vpop.f32.mrf.mxu0  ;;  %11320 = vmatprep.mubr.msk.f32.mxu0 %vm12349_vm2, %v12348_v46 }
0x21f1   :  { %11393 = vmatprep.subr.mxu0 %v12348_v46 }
0x21f2   :  { %v5132_v31 = vpop.f32.mrf.mxu0 }
0x21f3   :  { %11321 = vmatmul.mubr.msk.f32.gmra.mxu0 %vm298_vm3, %v5132_v31 }
0x21f4   :  { %v11238_v54 = vpop.f32.mrf.mxu0  ;;  %11323 = vmatprep.mubr.msk.f32.mxu0 %vm12349_vm2, %v12348_v46 }
0x21f6   :  { %v5137_v26 = vpop.f32.mrf.mxu0 }
0x21f7   :  { %11324 = vmatmul.mubr.msk.f32.gmra.mxu0 %vm298_vm3, %v5137_v26 }
0x21f8   :  { %v11241_v44 = vpop.f32.mrf.mxu0  ;;  %11361 = vmatprep.mubr.msk.f32.mxu0 %vm12349_vm2, %v12348_v46 }
0x222c   :  { %v5434_v25 = vpop.f32.mrf.mxu0 }
0x222d   :  { %11295 = vmatmul.mubr.msk.f32.vlgmr.msra.gmra.mxu1 %vm298_vm3, %v5434_v25 }
0x222e   :  { %11327 = vmatpush3.xpose.msk.msra.mxu1 %vm298_vm3, %v5695_v53  ;;  %v11279_v29 = vpop.f32.mrf.mxu0  ;;  %11297 = vmatprep.mubr.msk.f32.mxu1 %vm12349_vm2, %v12348_v46 }
0x222f   :  { %11328 = vmatprep.subr.mxu1 %v12348_v46 }
0x2230   :  { %v5439_v32 = vpop.f32.mrf.mxu0 }
0x2231   :  { %11298 = vmatmul.mubr.msk.f32.gmra.mxu1 %vm298_vm3, %v5439_v32 }
0x2232   :  { %11329 = vmatpush3.xpose.msk.msra.mxu1 %vm298_vm3, %v5693_v20  ;;  %v11282_v39 = vpop.f32.mrf.mxu0  ;;  %11300 = vmatprep.mubr.msk.f32.mxu1 %vm12349_vm2, %v12348_v46 }
0x2233   :  { %11330 = vmatprep.subr.mxu1 %v12348_v46 }
0x2234   :  { %v5444_v27 = vpop.f32.mrf.mxu0 }
0x2235   :  { %11301 = vmatmul.mubr.msk.f32.gmra.mxu1 %vm298_vm3, %v5444_v27 }
0x2236   :  { %11331 = vmatpush3.xpose.msk.msra.mxu1 %vm298_vm3, %v5691_v63  ;;  %v11285_v15 = vpop.f32.mrf.mxu0  ;;  %11303 = vmatprep.mubr.msk.f32.mxu1 %vm12349_vm2, %v12348_v46 }
0x2237   :  { %11332 = vmatprep.subr.mxu1 %v12348_v46 }
0x2238   :  { %v5449_v21 = vpop.f32.mrf.mxu0 }
0x2239   :  { %11304 = vmatmul.mubr.msk.f32.gmra.mxu1 %vm298_vm3, %v5449_v21 }
0x223a   :  { %11333 = vmatpush3.xpose.msk.msra.mxu1 %vm298_vm3, %v5689_v2  ;;  %v11288_v62 = vpop.f32.mrf.mxu0  ;;  %11306 = vmatprep.mubr.msk.f32.mxu1 %vm12349_vm2, %v12348_v46 }
0x223b   :  { %11334 = vmatprep.subr.mxu1 %v12348_v46 }
0x223c   :  { %v5454_v0 = vpop.f32.mrf.mxu0 }
0x223d   :  { %11307 = vmatmul.mubr.msk.f32.gmra.mxu1 %vm298_vm3, %v5454_v0 }
0x223e   :  { %11335 = vmatpush3.xpose.msk.msra.mxu1 %vm298_vm3, %v14527_v35  ;;  %v11291_v11 = vpop.f32.mrf.mxu0  ;;  %11336 = vmatprep.mubr.msk.f32.mxu1 %vm12349_vm2, %v12348_v46 }
0x223f   :  { %11376 = vmatprep.subr.mxu1 %v12348_v46 }
0x2241   :  { %11337 = vmatmul.mubr.msk.f32.vlgmr.msra.gmra.mxu1 %vm298_vm3, %v14533_v17 }
0x2242   :  { %11339 = vmatprep.mubr.msk.f32.mxu1 %vm12349_vm2, %v12348_v46 }
0x2245   :  { %11340 = vmatmul.mubr.msk.f32.gmra.mxu1 %vm298_vm3, %v14529_v13 }
0x2246   :  { %11342 = vmatprep.mubr.msk.f32.mxu1 %vm12349_vm2, %v12348_v46 }
0x2249   :  { %11343 = vmatmul.mubr.msk.f32.gmra.mxu1 %vm298_vm3, %v14535_v8 }
0x224a   :  { %11345 = vmatprep.mubr.msk.f32.mxu1 %vm12349_vm2, %v12348_v46 }
0x224d   :  { %11346 = vmatmul.mubr.msk.f32.gmra.mxu1 %vm298_vm3, %v14531_v14 }
0x224e   :  { %11348 = vmatprep.mubr.msk.f32.mxu1 %vm12349_vm2, %v12348_v46 }
0x2251   :  { %11349 = vmatmul.mubr.msk.f32.gmra.mxu1 %vm298_vm3, %v14537_v41 }
0x2252   :  { %11378 = vmatprep.mubr.msk.f32.mxu1 %vm12349_vm2, %v12348_v46 }
0x22a7   :  { %v14605_v59 = vpop.f32.mrf.mxu0 }
0x22a9   :  { %v11313_v19 = vpop.f32.mrf.mxu0 }
0x22ab   :  { %v14607_v52 = vpop.f32.mrf.mxu0 }
0x22ad   :  { %v11316_v1 = vpop.f32.mrf.mxu0 }
0x22af   :  { %v14609_v47 = vpop.f32.mrf.mxu0 }
0x22b1   :  { %v11319_v22 = vpop.f32.mrf.mxu0 }
0x22b3   :  { %v14611_v55 = vpop.f32.mrf.mxu0 }
0x22b5   :  { %v11322_v3 = vpop.f32.mrf.mxu0 }
0x22b7   :  { %v14613_v24 = vpop.f32.mrf.mxu0 }
0x22b9   :  { %v11325_v40 = vpop.f32.mrf.mxu0 }
0x22ed   :  { %v14615_v23 = vpop.f32.mrf.mxu1 }
0x22ef   :  { %v11296_v36 = vpop.f32.mrf.mxu1 }
0x22f1   :  { %v14617_v9 = vpop.f32.mrf.mxu1 }
0x22f3   :  { %v11299_v53 = vpop.f32.mrf.mxu1 }
0x22f5   :  { %v14619_v63 = vpop.f32.mrf.mxu1 }
0x22f7   :  { %v11302_v35 = vpop.f32.mrf.mxu1 }
0x22f9   :  { %v14621_v20 = vpop.f32.mrf.mxu1 }
0x22fb   :  { %v11305_v13 = vpop.f32.mrf.mxu1 }
0x22fd   :  { %v14623_v2 = vpop.f32.mrf.mxu1 }
0x22ff   :  { %v11308_v14 = vpop.f32.mrf.mxu1 }
0x2301   :  { %v5782_v17 = vpop.f32.mrf.mxu1 }
0x2302   :  { %v5806_v50 = vmul.f32 0.4472136, %v5782_v17 }
0x2303   :  { %v11338_v8 = vpop.f32.mrf.mxu1 }
0x2304   :  { %v5811_v58 = vadd.f32 %v14331_v43, %v5806_v50 }
0x2305   :  { %v5787_v41 = vpop.f32.mrf.mxu1 }
0x2306   :  { %v5807_v28 = vmul.f32 0.4472136, %v5787_v41  ;;  %v5816_v34 = vsel %vm419_vm4, %v5811_v58, -inf }
0x2307   :  { %5817 = vmax.xlane.f32.xlu1 %v5816_v34  ;;  %v11341_v56 = vpop.f32.mrf.mxu1 }
0x2308   :  { %v5812_v42 = vadd.f32 %v14341_v48, %v5807_v28 }
0x2309   :  { %v5792_v30 = vpop.f32.mrf.mxu1 }
0x230a   :  { %v5808_v33 = vmul.f32 0.4472136, %v5792_v30  ;;  %v5819_v7 = vsel %vm419_vm4, %v5812_v42, -inf }
0x230b   :  { %5820 = vmax.xlane.f32.xlu0 %v5819_v7  ;;  %v11344_v12 = vpop.f32.mrf.mxu1 }
0x230c   :  { %v5813_v49 = vadd.f32 %v14351_v4, %v5808_v33 }
0x230d   :  { %v5797_v31 = vpop.f32.mrf.mxu1 }
0x230e   :  { %v5809_v54 = vmul.f32 0.4472136, %v5797_v31  ;;  %v5822_v26 = vsel %vm419_vm4, %v5813_v49, -inf }
0x230f   :  { %5823 = vmax.xlane.f32.xlu0 %v5822_v26  ;;  %v11347_v44 = vpop.f32.mrf.mxu1 }
0x2310   :  { %v5814_v25 = vadd.f32 %v14358_v37, %v5809_v54 }
0x2311   :  { %v5802_v29 = vpop.f32.mrf.mxu1 }
0x2312   :  { %v5810_v32 = vmul.f32 0.4472136, %v5802_v29  ;;  %v5825_v39 = vsel %vm419_vm4, %v5814_v25, -inf }
0x2313   :  { %5826 = vmax.xlane.f32.xlu0 %v5825_v39  ;;  %v11350_v27 = vpop.f32.mrf.mxu1 }
0x2314   :  { %v5815_v15 = vadd.f32 %v14365_v51, %v5810_v32 }
0x2316   :  { %v5828_v21 = vsel %vm419_vm4, %v5815_v15, -inf }
0x2317   :  { %5829 = vmax.xlane.f32.xlu1 %v5828_v21 }
0x2328   :  { %6122 = vrot.lane.b32.xlu1 %v14227_v18, %s15890_s29 }
0x2329   :  { %6124 = vrot.lane.b32.xlu0 %v14231_v6, %s15890_s29 }
0x2390   :  { %v5818_v62 = vpop.xlane.xlu1 %5817 }
0x2391   :  { %v5831_v0 = vsub.f32 %v5811_v58, %v5818_v62 }
0x2393   :  { %v5836_v11 = vmul.f32 1.442695, %v5831_v0 }
0x2394   :  { %v5821_v19 = vpop.xlane.xlu0 %5820 }
0x2395   :  { %12148 = vpow2.f32 %v5836_v11  ;;  %v5832_v1 = vsub.f32 %v5812_v42, %v5821_v19 }
0x2397   :  { %v5838_v22 = vmul.f32 1.442695, %v5832_v1 }
0x2398   :  { %v5824_v3 = vpop.xlane.xlu0 %5823 }
0x2399   :  { %12150 = vpow2.f32 %v5838_v22  ;;  %v5833_v40 = vsub.f32 %v5813_v49, %v5824_v3 }
0x239b   :  { %v5840_v36 = vmul.f32 1.442695, %v5833_v40 }
0x239c   :  { %v5827_v8 = vpop.xlane.xlu0 %5826 }
0x239d   :  { %12152 = vpow2.f32 %v5840_v36  ;;  %v5834_v58 = vsub.f32 %v5814_v25, %v5827_v8  ;;  %v9726_v36 = vld [vmem:[%s15839_s6 + $0x50] sm:$0x1f] }
0x239e   :  { %11377 = vmatpush3.msk.msra.mxu1 %vm928_vm5, %v9726_v36 }
0x239f   :  { %v5842_v28 = vmul.f32 1.442695, %v5834_v58  ;;  %11418 = vmatprep.subr.mxu1 %v12348_v46 }
0x23a0   :  { %v5830_v41 = vpop.xlane.xlu1 %5829  ;;  %v6125_v12 = vpop.permute.xlu0 %6124 }
0x23a1   :  { %v5835_v34 = vsub.f32 %v5815_v15, %v5830_v41  ;;  %12154 = vpow2.f32 %v5842_v28 }
0x23a2   :  { %v12149_v53 = vpop.eup %12148 }
0x23a3   :  { %v5846_v35 = vsel %vm419_vm4, %v12149_v53, 0.0  ;;  %v5844_v56 = vmul.f32 1.442695, %v5835_v34 }
0x23a4   :  { %5847 = vadd.xlane.f32.xlu0 %v5846_v35  ;;  %v6123_v49 = vpop.permute.xlu1 %6122 }
0x23a5   :  { %12156 = vpow2.f32 %v5844_v56 }
0x23a6   :  { %v12151_v13 = vpop.eup %12150 }
0x23a7   :  { %v5849_v14 = vsel %vm419_vm4, %v12151_v13, 0.0 }
0x23a8   :  { %5850 = vadd.xlane.f32.xlu1 %v5849_v14 }
0x23aa   :  { %v12153_v17 = vpop.eup %12152 }
0x23ab   :  { %v5852_v50 = vsel %vm419_vm4, %v12153_v17, 0.0 }
0x23ac   :  { %5853 = vadd.xlane.f32.xlu0 %v5852_v50 }
0x23ae   :  { %v12155_v42 = vpop.eup %12154 }
0x23af   :  { %v5855_v30 = vsel %vm419_vm4, %v12155_v42, 0.0 }
0x23b2   :  { %v12157_v33 = vpop.eup %12156 }
0x23b3   :  { %v5858_v7 = vsel %vm419_vm4, %v12157_v33, 0.0 }
0x23b9   :  { %6118 = vrot.lane.b32.xlu1 %v14223_v38, %s15890_s29 }
0x23c2   :  { %6120 = vrot.lane.b32.xlu0 %v14225_v60, %s15890_s29 }
0x23dd   :  { %5856 = vadd.xlane.f32.xlu1 %v5855_v30 }
0x23e1   :  { %5859 = vadd.xlane.f32.xlu0 %v5858_v7 }
0x23ee   :  { %6106 = vrot.lane.b32.xlu1 %v14221_v61, %s15891_s23 }
0x23f2   :  { %6110 = vrot.lane.b32.xlu1 %v14225_v60, %s15891_s23 }
0x23f6   :  { %6114 = vrot.lane.b32.xlu1 %v14231_v6, %s15891_s23 }
0x23f7   :  { %6116 = vrot.lane.b32.xlu0 %v14221_v61, %s15890_s29 }
0x23fb   :  { %6108 = vrot.lane.b32.xlu0 %v14223_v38, %s15891_s23 }
0x23ff   :  { %6112 = vrot.lane.b32.xlu0 %v14227_v18, %s15891_s23 }
0x242d   :  { %v5848_v31 = vpop.xlane.xlu0 %5847 }
0x242e   :  { %12158 = vrcp.f32 %v5848_v31 }
0x2431   :  { %v5851_v54 = vpop.xlane.xlu1 %5850 }
0x2432   :  { %12160 = vrcp.f32 %v5851_v54 }
0x2435   :  { %v5854_v26 = vpop.xlane.xlu0 %5853  ;;  %v6119_v21 = vpop.permute.xlu1 %6118 }
0x2436   :  { %12162 = vrcp.f32 %v5854_v26 }
0x2439   :  { %v6121_v15 = vpop.permute.xlu0 %6120 }
0x243b   :  { %v12159_v44 = vpop.eup %12158 }
0x243c   :  { %v5866_v25 = vmul.f32 %v12159_v44, %v12149_v53 }
0x243e   :  { %11362 = vmatmul.mubr.msk.f32.vlgmr.msra.gmra.mxu0 %vm419_vm4, %v5866_v25 }
0x243f   :  { %v12161_v29 = vpop.eup %12160  ;;  %11394 = vmatpush3.xpose.msk.msra.mxu0 %vm298_vm3, %v6125_v12  ;;  %11364 = vmatprep.mubr.msk.f32.mxu0 %vm12349_vm2, %v12348_v46 }
0x2440   :  { %11395 = vmatprep.subr.mxu0 %v12348_v46  ;;  %v5867_v32 = vmul.f32 %v12161_v29, %v12151_v13 }
0x2442   :  { %11365 = vmatmul.mubr.msk.f32.gmra.mxu0 %vm419_vm4, %v5867_v32 }
0x2443   :  { %v12163_v39 = vpop.eup %12162  ;;  %11396 = vmatpush3.xpose.msk.msra.mxu0 %vm298_vm3, %v6123_v49  ;;  %11367 = vmatprep.mubr.msk.f32.mxu0 %vm12349_vm2, %v12348_v46 }
0x2444   :  { %11397 = vmatprep.subr.mxu0 %v12348_v46  ;;  %v5868_v27 = vmul.f32 %v12163_v39, %v12153_v17 }
0x2446   :  { %11368 = vmatmul.mubr.msk.f32.gmra.mxu0 %vm419_vm4, %v5868_v27 }
0x2447   :  { %11398 = vmatpush3.xpose.msk.msra.mxu0 %vm298_vm3, %v6121_v15  ;;  %11370 = vmatprep.mubr.msk.f32.mxu0 %vm12349_vm2, %v12348_v46 }
0x2448   :  { %11399 = vmatprep.subr.mxu0 %v12348_v46 }
0x244b   :  { %11400 = vmatpush3.xpose.msk.msra.mxu0 %vm298_vm3, %v6119_v21 }
0x244c   :  { %11401 = vmatprep.subr.mxu0 %v12348_v46 }
0x2466   :  { %v5857_v62 = vpop.xlane.xlu1 %5856 }
0x2467   :  { %12164 = vrcp.f32 %v5857_v62 }
0x246a   :  { %v5860_v0 = vpop.xlane.xlu0 %5859  ;;  %v6107_v40 = vpop.permute.xlu1 %6106 }
0x246b   :  { %12166 = vrcp.f32 %v5860_v0 }
0x246e   :  { %v6117_v11 = vpop.permute.xlu0 %6116  ;;  %v6111_v35 = vpop.permute.xlu1 %6110 }
0x246f   :  { %11402 = vmatpush3.xpose.msk.msra.mxu0 %vm298_vm3, %v6117_v11 }
0x2470   :  { %11443 = vmatprep.subr.mxu0 %v12348_v46 }
0x2472   :  { %v6109_v53 = vpop.permute.xlu0 %6108  ;;  %v6115_v14 = vpop.permute.xlu1 %6114 }
0x2474   :  { %v12165_v19 = vpop.eup %12164 }
0x2475   :  { %v5869_v1 = vmul.f32 %v12165_v19, %v12155_v42 }
0x2476   :  { %v6113_v13 = vpop.permute.xlu0 %6112 }
0x2477   :  { %11371 = vmatmul.mubr.msk.f32.gmra.mxu0 %vm419_vm4, %v5869_v1 }
0x2478   :  { %v12167_v22 = vpop.eup %12166  ;;  %11373 = vmatprep.mubr.msk.f32.mxu0 %vm12349_vm2, %v12348_v46 }
0x2479   :  { %v5870_v3 = vmul.f32 %v12167_v22, %v12157_v33 }
0x247b   :  { %11374 = vmatmul.mubr.msk.f32.gmra.mxu0 %vm419_vm4, %v5870_v3 }
0x247c   :  { %11403 = vmatprep.mubr.msk.f32.mxu0 %vm12349_vm2, %v12348_v46 }
0x247f   :  { %11404 = vmatmul.mubr.msk.f32.vlgmr.msra.gmra.mxu0 %vm298_vm3, %v6107_v40 }
0x2480   :  { %11406 = vmatprep.mubr.msk.f32.mxu0 %vm12349_vm2, %v12348_v46 }
0x2483   :  { %11407 = vmatmul.mubr.msk.f32.gmra.mxu0 %vm298_vm3, %v6109_v53 }
0x2484   :  { %11409 = vmatprep.mubr.msk.f32.mxu0 %vm12349_vm2, %v12348_v46 }
0x2487   :  { %11410 = vmatmul.mubr.msk.f32.gmra.mxu0 %vm298_vm3, %v6111_v35 }
0x2488   :  { %11412 = vmatprep.mubr.msk.f32.mxu0 %vm12349_vm2, %v12348_v46 }
0x248b   :  { %11413 = vmatmul.mubr.msk.f32.gmra.mxu0 %vm298_vm3, %v6113_v13 }
0x248c   :  { %11415 = vmatprep.mubr.msk.f32.mxu0 %vm12349_vm2, %v12348_v46 }
0x248f   :  { %11416 = vmatmul.mubr.msk.f32.gmra.mxu0 %vm298_vm3, %v6115_v14 }
0x2490   :  { %11445 = vmatprep.mubr.msk.f32.mxu0 %vm12349_vm2, %v12348_v46 }
0x24fe   :  { %v5967_v17 = vpop.f32.mrf.mxu0 }
0x24ff   :  { %11379 = vmatmul.mubr.msk.f32.vlgmr.msra.gmra.mxu1 %vm298_vm3, %v5967_v17 }
0x2500   :  { %v11363_v50 = vpop.f32.mrf.mxu0  ;;  %11381 = vmatprep.mubr.msk.f32.mxu1 %vm12349_vm2, %v12348_v46 }
0x2502   :  { %v5972_v8 = vpop.f32.mrf.mxu0 }
0x2503   :  { %11382 = vmatmul.mubr.msk.f32.gmra.mxu1 %vm298_vm3, %v5972_v8 }
0x2504   :  { %v11366_v58 = vpop.f32.mrf.mxu0  ;;  %11384 = vmatprep.mubr.msk.f32.mxu1 %vm12349_vm2, %v12348_v46 }
0x2506   :  { %v5977_v41 = vpop.f32.mrf.mxu0 }
0x2507   :  { %11385 = vmatmul.mubr.msk.f32.gmra.mxu1 %vm298_vm3, %v5977_v41 }
0x2508   :  { %v11369_v28 = vpop.f32.mrf.mxu0  ;;  %11387 = vmatprep.mubr.msk.f32.mxu1 %vm12349_vm2, %v12348_v46 }
0x2537   :  { %v5982_v34 = vpop.f32.mrf.mxu0 }
0x2538   :  { %11388 = vmatmul.mubr.msk.f32.gmra.mxu1 %vm298_vm3, %v5982_v34 }
0x2539   :  { %v11372_v56 = vpop.f32.mrf.mxu0  ;;  %11390 = vmatprep.mubr.msk.f32.mxu1 %vm12349_vm2, %v12348_v46 }
0x253b   :  { %v5987_v42 = vpop.f32.mrf.mxu0 }
0x253c   :  { %11391 = vmatmul.mubr.msk.f32.gmra.mxu1 %vm298_vm3, %v5987_v42 }
0x253d   :  { %v11375_v30 = vpop.f32.mrf.mxu0  ;;  %11428 = vmatprep.mubr.msk.f32.mxu1 %vm12349_vm2, %v12348_v46 }
0x253f   :  { %v6212_v33 = vpop.f32.mrf.mxu0 }
0x2540   :  { %v6236_v7 = vmul.f32 0.4472136, %v6212_v33 }
0x2541   :  { %v11405_v12 = vpop.f32.mrf.mxu0 }
0x2542   :  { %v6241_v49 = vadd.f32 %v14331_v43, %v6236_v7 }
0x2543   :  { %v6217_v31 = vpop.f32.mrf.mxu0 }
0x2544   :  { %v6237_v54 = vmul.f32 0.4472136, %v6217_v31  ;;  %v6246_v26 = vsel %vm419_vm4, %v6241_v49, -inf }
0x2545   :  { %6247 = vmax.xlane.f32.xlu0 %v6246_v26  ;;  %v11408_v44 = vpop.f32.mrf.mxu0 }
0x2546   :  { %v6242_v25 = vadd.f32 %v14341_v48, %v6237_v54 }
0x2547   :  { %v6222_v29 = vpop.f32.mrf.mxu0 }
0x2548   :  { %v6238_v32 = vmul.f32 0.4472136, %v6222_v29  ;;  %v6249_v39 = vsel %vm419_vm4, %v6242_v25, -inf }
0x2549   :  { %6250 = vmax.xlane.f32.xlu1 %v6249_v39  ;;  %v11411_v27 = vpop.f32.mrf.mxu0 }
0x254a   :  { %v6243_v15 = vadd.f32 %v14351_v4, %v6238_v32  ;;  %v5653_v4 = vadd.f32 %v14605_v59, %v14615_v23 }
0x254b   :  { %v6227_v21 = vpop.f32.mrf.mxu0 }
0x254c   :  { %v6239_v62 = vmul.f32 0.4472136, %v6227_v21  ;;  %v6252_v43 = vsel %vm419_vm4, %v6243_v15, -inf }
0x254d   :  { %6253 = vmax.xlane.f32.xlu0 %v6252_v43  ;;  %v11414_v0 = vpop.f32.mrf.mxu0 }
0x254e   :  { %v6244_v11 = vadd.f32 %v14358_v37, %v6239_v62  ;;  %v5673_v0 = vadd.f32 %v14613_v24, %v14623_v2 }
0x254f   :  { %v6232_v19 = vpop.f32.mrf.mxu0 }
0x2550   :  { %v6240_v1 = vmul.f32 0.4472136, %v6232_v19  ;;  %v6255_v48 = vsel %vm419_vm4, %v6244_v11, -inf }
0x2551   :  { %6256 = vmax.xlane.f32.xlu0 %v6255_v48  ;;  %v11417_v22 = vpop.f32.mrf.mxu0 }
0x2552   :  { %v6245_v3 = vadd.f32 %v14365_v51, %v6240_v1  ;;  %v5658_v51 = vadd.f32 %v14607_v52, %v14617_v9 }
0x2554   :  { %v6258_v40 = vsel %vm419_vm4, %v6245_v3, -inf }
0x2555   :  { %6259 = vmax.xlane.f32.xlu0 %v6258_v40 }
0x255a   :  { %6307 = vrot.lane.b32.xlu1 %v14227_v18, %s15892_s21 }
0x255e   :  { %6305 = vrot.lane.b32.xlu1 %v14225_v60, %s15892_s21  ;;  %v5663_v60 = vadd.f32 %v14609_v47, %v14619_v63 }
0x256b   :  { %6309 = vrot.lane.b32.xlu0 %v14231_v6, %s15892_s21 }
0x25bf   :  { %v6077_v37 = vpop.f32.mrf.mxu1 }
0x25c0   :  { %v14738_v36 = vadd.f32 %v6077_v37, %v5653_v4 }
0x25c1   :  { %v11380_v53 = vpop.f32.mrf.mxu1 }
0x25c3   :  { %v6082_v35 = vpop.f32.mrf.mxu1 }
0x25c4   :  { %v14742_v13 = vadd.f32 %v6082_v35, %v5658_v51 }
0x25c5   :  { %v11383_v18 = vpop.f32.mrf.mxu1 }
0x25c7   :  { %v6087_v14 = vpop.f32.mrf.mxu1 }
0x25c8   :  { %v14746_v17 = vadd.f32 %v6087_v14, %v5663_v60 }
0x25c9   :  { %v11386_v6 = vpop.f32.mrf.mxu1 }
0x25ce   :  { %v6248_v50 = vpop.xlane.xlu0 %6247 }
0x25cf   :  { %v6261_v59 = vsub.f32 %v6241_v49, %v6248_v50 }
0x25d1   :  { %v6266_v23 = vmul.f32 1.442695, %v6261_v59 }
0x25d2   :  { %v6251_v8 = vpop.xlane.xlu1 %6250 }
0x25d3   :  { %12168 = vpow2.f32 %v6266_v23  ;;  %v6262_v58 = vsub.f32 %v6242_v25, %v6251_v8 }
0x25d5   :  { %v6268_v41 = vmul.f32 1.442695, %v6262_v58 }
0x25d6   :  { %v6254_v28 = vpop.xlane.xlu0 %6253  ;;  %v6308_v33 = vpop.permute.xlu1 %6307 }
0x25d7   :  { %12170 = vpow2.f32 %v6268_v41  ;;  %v6263_v52 = vsub.f32 %v6243_v15, %v6254_v28  ;;  %v5668_v15 = vadd.f32 %v14611_v55, %v14621_v20  ;;  %v9748_v55 = vld [vmem:[%s15839_s6 + $0x58] sm:$0x1f] }
0x25d8   :  { %11444 = vmatpush3.msk.msra.mxu0 %vm928_vm5, %v9748_v55 }
0x25d9   :  { %v6270_v9 = vmul.f32 1.442695, %v6263_v52  ;;  %11481 = vmatprep.subr.mxu0 %v12348_v46 }
0x25da   :  { %v6257_v34 = vpop.xlane.xlu0 %6256  ;;  %v6306_v26 = vpop.permute.xlu1 %6305 }
0x25db   :  { %12172 = vpow2.f32 %v6270_v9  ;;  %v6264_v56 = vsub.f32 %v6244_v11, %v6257_v34 }
0x25dd   :  { %v6272_v42 = vmul.f32 1.442695, %v6264_v56 }
0x25de   :  { %v6260_v47 = vpop.xlane.xlu0 %6259 }
0x25df   :  { %12174 = vpow2.f32 %v6272_v42  ;;  %v6265_v63 = vsub.f32 %v6245_v3, %v6260_v47  ;;  %v9756_v42 = vld [vmem:[%s15840_s7 + $0x2] ss:$0 sm:$0xff] }
0x25e0   :  { %v12169_v30 = vpop.eup %12168 }
0x25e1   :  { %v6274_v7 = vmul.f32 1.442695, %v6265_v63  ;;  %v6276_v12 = vsel %vm419_vm4, %v12169_v30, 0.0 }
0x25e2   :  { %6277 = vadd.xlane.f32.xlu1 %v6276_v12  ;;  %v6310_v49 = vpop.permute.xlu0 %6309 }
0x25e3   :  { %12176 = vpow2.f32 %v6274_v7  ;;  %11419 = vmatpush3.msra.mxu1 %v6310_v49 }
0x25e4   :  { %v12171_v31 = vpop.eup %12170  ;;  %11420 = vmatprep.subr.mxu1 %v12348_v46 }
0x25e5   :  { %11421 = vmatpush3.msra.mxu1 %v6308_v33  ;;  %v6279_v54 = vsel %vm419_vm4, %v12171_v31, 0.0 }
0x25e6   :  { %6280 = vadd.xlane.f32.xlu0 %v6279_v54  ;;  %11422 = vmatprep.subr.mxu1 %v12348_v46 }
0x25e7   :  { %11423 = vmatpush3.msra.mxu1 %v6306_v26 }
0x25e8   :  { %v12173_v44 = vpop.eup %12172  ;;  %11424 = vmatprep.subr.mxu1 %v12348_v46 }
0x25e9   :  { %v6282_v25 = vsel %vm419_vm4, %v12173_v44, 0.0 }
0x25ea   :  { %6283 = vadd.xlane.f32.xlu1 %v6282_v25 }
0x25ec   :  { %v12175_v29 = vpop.eup %12174 }
0x25ed   :  { %v6285_v32 = vsel %vm419_vm4, %v12175_v29, 0.0 }
0x25ee   :  { %6286 = vadd.xlane.f32.xlu0 %v6285_v32 }
0x25f0   :  { %v12177_v39 = vpop.eup %12176 }
0x25f1   :  { %v6288_v27 = vsel %vm419_vm4, %v12177_v39, 0.0 }
0x25f2   :  { %6289 = vadd.xlane.f32.xlu1 %v6288_v27 }
0x25f8   :  { %v6092_v21 = vpop.f32.mrf.mxu1 }
0x25f9   :  { %v14758_v62 = vadd.f32 %v6092_v21, %v5668_v15 }
0x25fa   :  { %v11389_v43 = vpop.f32.mrf.mxu1 }
0x25fc   :  { %v6097_v11 = vpop.f32.mrf.mxu1 }
0x25fd   :  { %v14762_v19 = vadd.f32 %v6097_v11, %v5673_v0 }
0x25fe   :  { %v11392_v1 = vpop.f32.mrf.mxu1 }
0x2603   :  { %6303 = vrot.lane.b32.xlu1 %v14223_v38, %s15892_s21 }
0x2604   :  { %6301 = vrot.lane.b32.xlu0 %v14221_v61, %s15892_s21 }
0x266b   :  { %v6278_v20 = vpop.xlane.xlu1 %6277 }
0x266c   :  { %12178 = vrcp.f32 %v6278_v20 }
0x266f   :  { %v6281_v24 = vpop.xlane.xlu0 %6280 }
0x2670   :  { %12180 = vrcp.f32 %v6281_v24 }
0x2673   :  { %v6284_v2 = vpop.xlane.xlu1 %6283 }
0x2674   :  { %12182 = vrcp.f32 %v6284_v2 }
0x2677   :  { %v6287_v48 = vpop.xlane.xlu0 %6286 }
0x2678   :  { %12184 = vrcp.f32 %v6287_v48 }
0x2679   :  { %v12179_v38 = vpop.eup %12178 }
0x267a   :  { %v6296_v61 = vmul.f32 %v12179_v38, %v12169_v30 }
0x267b   :  { %v6290_v22 = vpop.xlane.xlu1 %6289  ;;  %v6302_v40 = vpop.permute.xlu0 %6301 }
0x267c   :  { %12186 = vrcp.f32 %v6290_v22 }
0x267d   :  { %v12181_v4 = vpop.eup %12180 }
0x267e   :  { %v6297_v37 = vmul.f32 %v12181_v4, %v12171_v31 }
0x267f   :  { %v6304_v3 = vpop.permute.xlu1 %6303 }
0x2680   :  { %11425 = vmatpush3.msra.mxu1 %v6304_v3 }
0x2681   :  { %11426 = vmatprep.subr.mxu1 %v12348_v46  ;;  %v12183_v53 = vpop.eup %12182 }
0x2682   :  { %11427 = vmatpush3.msra.mxu1 %v6302_v40  ;;  %v6298_v51 = vmul.f32 %v12183_v53, %v12173_v44 }
0x2683   :  { %11429 = vmatmul.mubr.msk.f32.vlgmr.msra.gmra.mxu1 %vm419_vm4, %v6296_v61  ;;  %11460 = vmatprep.subr.mxu1 %v12348_v46 }
0x2684   :  { %11431 = vmatprep.mubr.msk.f32.mxu1 %vm12349_vm2, %v12348_v46 }
0x2685   :  { %v12185_v35 = vpop.eup %12184 }
0x2686   :  { %v6299_v18 = vmul.f32 %v12185_v35, %v12175_v29 }
0x2687   :  { %11432 = vmatmul.mubr.msk.f32.gmra.mxu1 %vm419_vm4, %v6297_v37 }
0x2688   :  { %11434 = vmatprep.mubr.msk.f32.mxu1 %vm12349_vm2, %v12348_v46 }
0x2689   :  { %v12187_v60 = vpop.eup %12186 }
0x268a   :  { %v6300_v14 = vmul.f32 %v12187_v60, %v12177_v39 }
0x268b   :  { %11435 = vmatmul.mubr.msk.f32.gmra.mxu1 %vm419_vm4, %v6298_v51 }
0x268c   :  { %11437 = vmatprep.mubr.msk.f32.mxu1 %vm12349_vm2, %v12348_v46 }
0x268f   :  { %11438 = vmatmul.mubr.msk.f32.gmra.mxu1 %vm419_vm4, %v6299_v18 }
0x2690   :  { %11440 = vmatprep.mubr.msk.f32.mxu1 %vm12349_vm2, %v12348_v46 }
0x2693   :  { %11441 = vmatmul.mubr.msk.f32.gmra.mxu1 %vm419_vm4, %v6300_v14 }
0x2694   :  { %11466 = vmatprep.mubr.msk.f32.mxu1 %vm12349_vm2, %v12348_v46 }
0x2743   :  { %v6397_v6 = vpop.f32.mrf.mxu1 }
0x2744   :  { %11446 = vmatmul.mubr.msk.f32.vlgmr.msra.gmra.mxu0 %vm298_vm3, %v6397_v6 }
0x2745   :  { %v11430_v50 = vpop.f32.mrf.mxu1  ;;  %11448 = vmatprep.mubr.msk.f32.mxu0 %vm12349_vm2, %v12348_v46 }
0x2747   :  { %v6402_v59 = vpop.f32.mrf.mxu1 }
0x2748   :  { %11449 = vmatmul.mubr.msk.f32.gmra.mxu0 %vm298_vm3, %v6402_v59 }
0x2749   :  { %v11433_v23 = vpop.f32.mrf.mxu1  ;;  %11451 = vmatprep.mubr.msk.f32.mxu0 %vm12349_vm2, %v12348_v46 }
0x274a   :  { %v9763_v23 = vld [vmem:[%s15843_s10 + $0x40] sm:$0xf] }
0x274b   :  { %v6407_v8 = vpop.f32.mrf.mxu1  ;;  %11461 = vmatpush3.msk.msra.mxu1 %vm189_vm1, %v9763_v23 }
0x274c   :  { %11452 = vmatmul.mubr.msk.f32.gmra.mxu0 %vm298_vm3, %v6407_v8  ;;  %11462 = vmatprep.subr.mxu1 %v12348_v46  ;;  %v9762_v8 = vld [vmem:[%s15843_s10 + $0x38] sm:$0xff] }
0x274d   :  { %v11436_v58 = vpop.f32.mrf.mxu1  ;;  %11454 = vmatprep.mubr.msk.f32.mxu0 %vm12349_vm2, %v12348_v46  ;;  %11463 = vmatpush3.msra.mxu1 %v9762_v8 }
0x274e   :  { %v9761_v58 = vld [vmem:[%s15843_s10 + $0x30] sm:$0xff]  ;;  %11464 = vmatprep.subr.mxu1 %v12348_v46 }
0x274f   :  { %v6412_v41 = vpop.f32.mrf.mxu1  ;;  %11465 = vmatpush3.msra.mxu1 %v9761_v58 }
0x2750   :  { %11455 = vmatmul.mubr.msk.f32.gmra.mxu0 %vm298_vm3, %v6412_v41  ;;  %11516 = vmatprep.subr.mxu1 %v12348_v46  ;;  %v9781_v41 = vld [vmem:[%s15845_s12 + $0xe8] sm:$0xff] }
0x2751   :  { %v11439_v28 = vpop.f32.mrf.mxu1  ;;  %11457 = vmatprep.mubr.msk.f32.mxu0 %vm12349_vm2, %v12348_v46  ;;  %11482 = vmatpush3.msra.mxu0 %v9781_v41 }
0x2752   :  { %v9780_v28 = vld [vmem:[%s15845_s12 + $0xe0] sm:$0xff]  ;;  %11483 = vmatprep.subr.mxu0 %v12348_v46 }
0x2753   :  { %v6417_v52 = vpop.f32.mrf.mxu1  ;;  %11484 = vmatpush3.msra.mxu0 %v9780_v28 }
0x2754   :  { %11458 = vmatmul.mubr.msk.f32.gmra.mxu0 %vm298_vm3, %v6417_v52  ;;  %v9779_v52 = vld [vmem:[%s15845_s12 + $0xd8] sm:$0xff]  ;;  %11485 = vmatprep.subr.mxu0 %v12348_v46 }
0x2755   :  { %v11442_v9 = vpop.f32.mrf.mxu1  ;;  %11501 = vmatprep.mubr.msk.f32.mxu0 %vm12349_vm2, %v12348_v46  ;;  %11486 = vmatpush3.msra.mxu0 %v9779_v52 }
0x2756   :  { %v9778_v9 = vld [vmem:[%s15845_s12 + $0xd0] sm:$0xff]  ;;  %11487 = vmatprep.subr.mxu0 %v12348_v46 }
0x2757   :  { %11488 = vmatpush3.msra.mxu0 %v9778_v9 }
0x2758   :  { %11489 = vmatprep.subr.mxu0 %v12348_v46 }
0x2804   :  { %v6507_v34 = vpop.f32.mrf.mxu0 }
0x2805   :  { %v6531_v56 = vadd.f32 %v6507_v34, %v14738_v36  ;;  %v9777_v34 = vld [vmem:[%s15845_s12 + $0xc8] sm:$0xff] }
0x2806   :  { %v11447_v47 = vpop.f32.mrf.mxu0  ;;  %11490 = vmatpush3.msra.mxu0 %v9777_v34 }
0x2807   :  { %v6536_v63 = vadd.f32 %v6531_v56, %v14153_v57  ;;  %v9776_v56 = vld [vmem:[%s15845_s12 + $0xc0] sm:$0xff]  ;;  %11491 = vmatprep.subr.mxu0 %v12348_v46 }
0x2808   :  { %v6512_v30 = vpop.f32.mrf.mxu0  ;;  %11492 = vmatpush3.msra.mxu0 %v9776_v56 }
0x2809   :  { %v14810_v33 = vadd.f32 %v9756_v42, %v6536_v63  ;;  %v6532_v7 = vadd.f32 %v6512_v30, %v14742_v13  ;;  %11493 = vmatprep.subr.mxu0 %v12348_v46 }
0x280a   :  { %v11450_v12 = vpop.f32.mrf.mxu0 }
0x280b   :  { %v6537_v49 = vadd.f32 %v6532_v7, %v14158_v16  ;;  %v6558_v31 = vsel %vm82_vm0, %v14810_v33, 0.0 }
0x280c   :  { %6559 = vadd.xlane.f32.xlu1 %v6558_v31  ;;  %v6517_v36 = vpop.f32.mrf.mxu0 }
0x280d   :  { %v14816_v54 = vadd.f32 %v9756_v42, %v6537_v49  ;;  %v6533_v26 = vadd.f32 %v6517_v36, %v14746_v17 }
0x280e   :  { %v11453_v44 = vpop.f32.mrf.mxu0 }
0x280f   :  { %v6538_v57 = vadd.f32 %v6533_v26, %v14163_v45  ;;  %v6561_v25 = vsel %vm82_vm0, %v14816_v54, 0.0 }
0x2810   :  { %6562 = vadd.xlane.f32.xlu0 %v6561_v25  ;;  %v6522_v13 = vpop.f32.mrf.mxu0 }
0x2811   :  { %v14822_v29 = vadd.f32 %v9756_v42, %v6538_v57  ;;  %v6534_v16 = vadd.f32 %v6522_v13, %v14758_v62 }
0x2812   :  { %v11456_v32 = vpop.f32.mrf.mxu0 }
0x2813   :  { %v6539_v39 = vadd.f32 %v6534_v16, %v14168_v10  ;;  %v6564_v27 = vsel %vm82_vm0, %v14822_v29, 0.0 }
0x2814   :  { %6565 = vadd.xlane.f32.xlu0 %v6564_v27  ;;  %v6527_v17 = vpop.f32.mrf.mxu0 }
0x2815   :  { %v14828_v15 = vadd.f32 %v9756_v42, %v6539_v39  ;;  %v6535_v45 = vadd.f32 %v6527_v17, %v14762_v19  ;;  %v9759_v39 = vld [vmem:[%s15841_s8 + $0x2] ss:$0 sm:$0xff] }
0x2816   :  { %v11459_v21 = vpop.f32.mrf.mxu0 }
0x2817   :  { %v6540_v43 = vadd.f32 %v6535_v45, %v14173_v5  ;;  %v6567_v0 = vsel %vm82_vm0, %v14828_v15, 0.0  ;;  %v9760_v45 = vld [vmem:[%s15842_s9 + $0x2] ss:$0 sm:$0xff] }
0x2818   :  { %6568 = vadd.xlane.f32.xlu0 %v6567_v0 }
0x2819   :  { %v14834_v62 = vadd.f32 %v9756_v42, %v6540_v43  ;;  %v9775_v42 = vld [vmem:[%s15845_s12 + $0xb8] sm:$0xff] }
0x281a   :  { %11494 = vmatpush3.msra.mxu0 %v9775_v42 }
0x281b   :  { %v6570_v10 = vsel %vm82_vm0, %v14834_v62, 0.0  ;;  %11495 = vmatprep.subr.mxu0 %v12348_v46 }
0x281c   :  { %6571 = vadd.xlane.f32.xlu1 %v6570_v10 }
0x2895   :  { %v6560_v11 = vpop.xlane.xlu1 %6559 }
0x2896   :  { %v6573_v1 = vmul.f32 0.05, %v6560_v11 }
0x2898   :  { %v14839_v55 = vsub.f32 %v14810_v33, %v6573_v1 }
0x2899   :  { %v6563_v20 = vpop.xlane.xlu0 %6562 }
0x289a   :  { %v6574_v19 = vmul.f32 0.05, %v6563_v20  ;;  %v6583_v5 = vmul.f32 %v14839_v55, %v14839_v55 }
0x289c   :  { %v14844_v24 = vsub.f32 %v14816_v54, %v6574_v19  ;;  %v6588_v2 = vsel %vm82_vm0, %v6583_v5, 0.0 }
0x289d   :  { %v6566_v48 = vpop.xlane.xlu0 %6565  ;;  %6589 = vadd.xlane.f32.xlu0 %v6588_v2 }
0x289e   :  { %v6575_v22 = vmul.f32 0.05, %v6566_v48  ;;  %v6584_v38 = vmul.f32 %v14844_v24, %v14844_v24 }
0x28a0   :  { %v14850_v3 = vsub.f32 %v14822_v29, %v6575_v22  ;;  %v6591_v61 = vsel %vm82_vm0, %v6584_v38, 0.0 }
0x28a1   :  { %v6569_v40 = vpop.xlane.xlu0 %6568  ;;  %6592 = vadd.xlane.f32.xlu1 %v6591_v61 }
0x28a2   :  { %v6576_v4 = vmul.f32 0.05, %v6569_v40  ;;  %v6585_v37 = vmul.f32 %v14850_v3, %v14850_v3 }
0x28a4   :  { %v14856_v53 = vsub.f32 %v14828_v15, %v6576_v4  ;;  %v6594_v51 = vsel %vm82_vm0, %v6585_v37, 0.0  ;;  %v9774_v4 = vld [vmem:[%s15845_s12 + $0xb0] sm:$0xff]  ;;  %v9773_v37 = vld [vmem:[%s15845_s12 + $0xa8] sm:$0xff] }
0x28a5   :  { %6595 = vadd.xlane.f32.xlu0 %v6594_v51  ;;  %v6572_v35 = vpop.xlane.xlu1 %6571  ;;  %11496 = vmatpush3.msra.mxu0 %v9774_v4  ;;  %v9765_v51 = vld [vmem:[%s15844_s11 + $0x2] ss:$0 sm:$0xff] }
0x28a6   :  { %v6577_v18 = vmul.f32 0.05, %v6572_v35  ;;  %v6586_v60 = vmul.f32 %v14856_v53, %v14856_v53  ;;  %11497 = vmatprep.subr.mxu0 %v12348_v46 }
0x28a7   :  { %11498 = vmatpush3.msra.mxu0 %v9773_v37 }
0x28a8   :  { %v14862_v14 = vsub.f32 %v14834_v62, %v6577_v18  ;;  %v6597_v6 = vsel %vm82_vm0, %v6586_v60, 0.0  ;;  %11499 = vmatprep.subr.mxu0 %v12348_v46 }
0x28a9   :  { %6598 = vadd.xlane.f32.xlu1 %v6597_v6 }
0x28aa   :  { %v6587_v50 = vmul.f32 %v14862_v14, %v14862_v14 }
0x28ac   :  { %v6600_v59 = vsel %vm82_vm0, %v6587_v50, 0.0 }
0x28ad   :  { %6601 = vadd.xlane.f32.xlu0 %v6600_v59 }
0x2926   :  { %v6590_v47 = vpop.xlane.xlu0 %6589 }
0x2927   :  { %v6603_v63 = vmul.f32 0.05, %v6590_v47 }
0x2929   :  { %v6608_v30 = vadd.f32 1e-05, %v6603_v63 }
0x292a   :  { %v6593_v7 = vpop.xlane.xlu1 %6592 }
0x292b   :  { %12188 = vrsqrt.f32 %v6608_v30  ;;  %v6604_v12 = vmul.f32 0.05, %v6593_v7 }
0x292d   :  { %v6609_v49 = vadd.f32 1e-05, %v6604_v12  ;;  %v9788_v12 = vld [vmem:[%s15888_s20 + $0x2] ss:$0 sm:$0xff] }
0x292e   :  { %v6596_v31 = vpop.xlane.xlu0 %6595 }
0x292f   :  { %12190 = vrsqrt.f32 %v6609_v49  ;;  %v6605_v36 = vmul.f32 0.05, %v6596_v31 }
0x2931   :  { %v6610_v26 = vadd.f32 1e-05, %v6605_v36 }
0x2932   :  { %v6599_v44 = vpop.xlane.xlu1 %6598 }
0x2933   :  { %12192 = vrsqrt.f32 %v6610_v26  ;;  %v6606_v57 = vmul.f32 0.05, %v6599_v44 }
0x2935   :  { %v6611_v25 = vadd.f32 1e-05, %v6606_v57 }
0x2936   :  { %v6602_v13 = vpop.xlane.xlu0 %6601 }
0x2937   :  { %12194 = vrsqrt.f32 %v6611_v25  ;;  %v6607_v16 = vmul.f32 0.05, %v6602_v13 }
0x2938   :  { %v12189_v32 = vpop.eup %12188 }
0x2939   :  { %v6618_v27 = vmul.f32 %v12189_v32, %v14839_v55  ;;  %v6612_v17 = vadd.f32 1e-05, %v6607_v16 }
0x293b   :  { %v6629_v21 = vmul.f32 %v9759_v39, %v6618_v27  ;;  %12196 = vrsqrt.f32 %v6612_v17 }
0x293c   :  { %v12191_v43 = vpop.eup %12190 }
0x293d   :  { %v6640_v0 = vadd.f32 %v9760_v45, %v6629_v21  ;;  %v6619_v10 = vmul.f32 %v12191_v43, %v14844_v24 }
0x293f   :  { %11467 = vmatmul.mubr.msk.f32.vlgmr.msra.gmra.mxu1 %vm82_vm0, %v6640_v0  ;;  %v6630_v11 = vmul.f32 %v9759_v39, %v6619_v10 }
0x2940   :  { %v12193_v1 = vpop.eup %12192  ;;  %11469 = vmatprep.mubr.msk.f32.mxu1 %vm12349_vm2, %v12348_v46 }
0x2941   :  { %v6641_v20 = vadd.f32 %v9760_v45, %v6630_v11  ;;  %v6620_v55 = vmul.f32 %v12193_v1, %v14850_v3 }
0x2943   :  { %11470 = vmatmul.mubr.msk.f32.gmra.mxu1 %vm82_vm0, %v6641_v20  ;;  %v6631_v19 = vmul.f32 %v9759_v39, %v6620_v55 }
0x2944   :  { %v12195_v5 = vpop.eup %12194  ;;  %11472 = vmatprep.mubr.msk.f32.mxu1 %vm12349_vm2, %v12348_v46 }
0x2945   :  { %v6642_v2 = vadd.f32 %v9760_v45, %v6631_v19  ;;  %v6621_v24 = vmul.f32 %v12195_v5, %v14856_v53  ;;  %v9772_v53 = vld [vmem:[%s15845_s12 + $0xa0] sm:$0xff] }
0x2946   :  { %11500 = vmatpush3.msra.mxu0 %v9772_v53 }
0x2947   :  { %11473 = vmatmul.mubr.msk.f32.gmra.mxu1 %vm82_vm0, %v6642_v2  ;;  %v6632_v48 = vmul.f32 %v9759_v39, %v6621_v24  ;;  %11537 = vmatprep.subr.mxu0 %v12348_v46 }
0x2948   :  { %v12197_v22 = vpop.eup %12196  ;;  %11475 = vmatprep.mubr.msk.f32.mxu1 %vm12349_vm2, %v12348_v46 }
0x2949   :  { %v6643_v38 = vadd.f32 %v9760_v45, %v6632_v48  ;;  %v6622_v3 = vmul.f32 %v12197_v22, %v14862_v14 }
0x294b   :  { %11476 = vmatmul.mubr.msk.f32.gmra.mxu1 %vm82_vm0, %v6643_v38  ;;  %v6633_v61 = vmul.f32 %v9759_v39, %v6622_v3 }
0x294c   :  { %11478 = vmatprep.mubr.msk.f32.mxu1 %vm12349_vm2, %v12348_v46 }
0x294d   :  { %v6644_v40 = vadd.f32 %v9760_v45, %v6633_v61 }
0x294f   :  { %11479 = vmatmul.mubr.msk.f32.gmra.mxu1 %vm82_vm0, %v6644_v40 }
0x2950   :  { %11522 = vmatprep.mubr.msk.f32.mxu1 %vm12349_vm2, %v12348_v46 }
0x29ff   :  { %v6741_v35 = vpop.f32.mrf.mxu1 }
0x2a00   :  { %v6742_v18 = vadd.f32 %v9765_v51, %v6741_v35 }
0x2a01   :  { %v11468_v60 = vpop.f32.mrf.mxu1 }
0x2a02   :  { %v6765_v14 = vmax.f32 %v6742_v18, 0.0 }
0x2a03   :  { %v6746_v6 = vpop.f32.mrf.mxu1 }
0x2a04   :  { %v6747_v50 = vadd.f32 %v9765_v51, %v6746_v6  ;;  %11502 = vmatmul.mubr.msk.f32.vlgmr.msra.gmra.mxu0 %vm2229_vm6, %v6765_v14 }
0x2a05   :  { %v11471_v59 = vpop.f32.mrf.mxu1  ;;  %11504 = vmatprep.mubr.msk.f32.mxu0 %vm12349_vm2, %v12348_v46 }
0x2a06   :  { %v6766_v23 = vmax.f32 %v6747_v50, 0.0 }
0x2a07   :  { %v6751_v8 = vpop.f32.mrf.mxu1 }
0x2a08   :  { %v6752_v58 = vadd.f32 %v9765_v51, %v6751_v8  ;;  %11505 = vmatmul.mubr.msk.f32.gmra.mxu0 %vm2229_vm6, %v6766_v23  ;;  %v9795_v8 = vld [vmem:[%s15838_s5 + $0x58] sm:$0xf] }
0x2a09   :  { %v11474_v41 = vpop.f32.mrf.mxu1  ;;  %11507 = vmatprep.mubr.msk.f32.mxu0 %vm12349_vm2, %v12348_v46  ;;  %11517 = vmatpush3.msk.msra.mxu1 %vm189_vm1, %v9795_v8 }
0x2a0a   :  { %v6767_v28 = vmax.f32 %v6752_v58, 0.0  ;;  %11518 = vmatprep.subr.mxu1 %v12348_v46  ;;  %v9794_v58 = vld [vmem:[%s15838_s5 + $0x50] sm:$0xff]  ;;  %v9793_v41 = vld [vmem:[%s15838_s5 + $0x48] sm:$0xff] }
0x2a0b   :  { %v6756_v52 = vpop.f32.mrf.mxu1  ;;  %11519 = vmatpush3.msra.mxu1 %v9794_v58 }
0x2a0c   :  { %v6757_v9 = vadd.f32 %v9765_v51, %v6756_v52  ;;  %11508 = vmatmul.mubr.msk.f32.gmra.mxu0 %vm2229_vm6, %v6767_v28  ;;  %11520 = vmatprep.subr.mxu1 %v12348_v46 }
0x2a0d   :  { %v11477_v34 = vpop.f32.mrf.mxu1  ;;  %11510 = vmatprep.mubr.msk.f32.mxu0 %vm12349_vm2, %v12348_v46  ;;  %11521 = vmatpush3.msra.mxu1 %v9793_v41 }
0x2a0e   :  { %v6768_v56 = vmax.f32 %v6757_v9, 0.0  ;;  %11562 = vmatprep.subr.mxu1 %v12348_v46 }
0x2a0f   :  { %v6761_v42 = vpop.f32.mrf.mxu1 }
0x2a10   :  { %v6762_v47 = vadd.f32 %v9765_v51, %v6761_v42  ;;  %11511 = vmatmul.mubr.msk.f32.gmra.mxu0 %vm2229_vm6, %v6768_v56 }
0x2a11   :  { %v11480_v63 = vpop.f32.mrf.mxu1  ;;  %11513 = vmatprep.mubr.msk.f32.mxu0 %vm12349_vm2, %v12348_v46 }
0x2a12   :  { %v6769_v30 = vmax.f32 %v6762_v47, 0.0 }
0x2a14   :  { %11514 = vmatmul.mubr.msk.f32.gmra.mxu0 %vm2229_vm6, %v6769_v30 }
0x2a15   :  { %11547 = vmatprep.mubr.msk.f32.mxu0 %vm12349_vm2, %v12348_v46 }
0x2ac4   :  { %v6862_v7 = vpop.f32.mrf.mxu0 }
0x2ac5   :  { %v6886_v49 = vadd.f32 %v6862_v7, %v14810_v33 }
0x2ac6   :  { %v11503_v31 = vpop.f32.mrf.mxu0 }
0x2ac7   :  { %v14969_v36 = vadd.f32 %v9788_v12, %v6886_v49 }
0x2ac8   :  { %v6867_v26 = vpop.f32.mrf.mxu0 }
0x2ac9   :  { %v6887_v44 = vadd.f32 %v6867_v26, %v14816_v54  ;;  %v6908_v57 = vsel %vm82_vm0, %v14969_v36, 0.0 }
0x2aca   :  { %6909 = vadd.xlane.f32.xlu1 %v6908_v57  ;;  %v11506_v25 = vpop.f32.mrf.mxu0  ;;  %v9791_v57 = vld [vmem:[%s15836_s3 + $0x3] ss:$0 sm:$0xff]  ;;  %s15898_s3 = smov 108  }
0x2acb   :  { %v14974_v13 = vadd.f32 %v9788_v12, %v6887_v44 }
0x2acc   :  { %v6872_v16 = vpop.f32.mrf.mxu0 }
0x2acd   :  { %v6888_v32 = vadd.f32 %v6872_v16, %v14822_v29  ;;  %v6911_v39 = vsel %vm82_vm0, %v14974_v13, 0.0 }
0x2ace   :  { %6912 = vadd.xlane.f32.xlu0 %v6911_v39  ;;  %v11509_v33 = vpop.f32.mrf.mxu0 }
0x2acf   :  { %v14979_v27 = vadd.f32 %v9788_v12, %v6888_v32  ;;  %v9792_v32 = vld [vmem:[%s15837_s4 + $0x3] ss:$0 sm:$0xff]  ;;  %s15899_s4 = smov 103  }
0x2ad0   :  { %v6877_v17 = vpop.f32.mrf.mxu0 }
0x2ad1   :  { %v6889_v54 = vadd.f32 %v6877_v17, %v14828_v15  ;;  %v6914_v45 = vsel %vm82_vm0, %v14979_v27, 0.0 }
0x2ad2   :  { %6915 = vadd.xlane.f32.xlu1 %v6914_v45  ;;  %v11512_v21 = vpop.f32.mrf.mxu0 }
0x2ad3   :  { %v14984_v43 = vadd.f32 %v9788_v12, %v6889_v54 }
0x2ad4   :  { %v6882_v0 = vpop.f32.mrf.mxu0 }
0x2ad5   :  { %v6890_v29 = vadd.f32 %v6882_v0, %v14834_v62  ;;  %v6917_v10 = vsel %vm82_vm0, %v14984_v43, 0.0 }
0x2ad6   :  { %6918 = vadd.xlane.f32.xlu0 %v6917_v10  ;;  %v11515_v11 = vpop.f32.mrf.mxu0 }
0x2ad7   :  { %v14989_v1 = vadd.f32 %v9788_v12, %v6890_v29 }
0x2ad9   :  { %v6920_v15 = vsel %vm82_vm0, %v14989_v1, 0.0 }
0x2ada   :  { %6921 = vadd.xlane.f32.xlu1 %v6920_v15 }
0x2b53   :  { %v6910_v20 = vpop.xlane.xlu1 %6909 }
0x2b54   :  { %v6923_v55 = vmul.f32 0.05, %v6910_v20 }
0x2b56   :  { %v6928_v19 = vsub.f32 %v14969_v36, %v6923_v55 }
0x2b57   :  { %v6913_v5 = vpop.xlane.xlu0 %6912 }
0x2b58   :  { %v6924_v2 = vmul.f32 0.05, %v6913_v5  ;;  %v6933_v24 = vmul.f32 %v6928_v19, %v6928_v19 }
0x2b5a   :  { %v6929_v62 = vsub.f32 %v14974_v13, %v6924_v2  ;;  %v6938_v48 = vsel %vm82_vm0, %v6933_v24, 0.0 }
0x2b5b   :  { %v6916_v22 = vpop.xlane.xlu1 %6915  ;;  %6939 = vadd.xlane.f32.xlu0 %v6938_v48 }
0x2b5c   :  { %v6925_v38 = vmul.f32 0.05, %v6916_v22  ;;  %v6934_v3 = vmul.f32 %v6929_v62, %v6929_v62 }
0x2b5e   :  { %v6930_v61 = vsub.f32 %v14979_v27, %v6925_v38  ;;  %v6941_v40 = vsel %vm82_vm0, %v6934_v3, 0.0 }
0x2b5f   :  { %v6919_v4 = vpop.xlane.xlu0 %6918  ;;  %6942 = vadd.xlane.f32.xlu1 %v6941_v40 }
0x2b60   :  { %v6926_v37 = vmul.f32 0.05, %v6919_v4  ;;  %v6935_v53 = vmul.f32 %v6930_v61, %v6930_v61 }
0x2b62   :  { %v6931_v51 = vsub.f32 %v14984_v43, %v6926_v37  ;;  %v6944_v35 = vsel %vm82_vm0, %v6935_v53, 0.0 }
0x2b63   :  { %6945 = vadd.xlane.f32.xlu0 %v6944_v35  ;;  %v6922_v18 = vpop.xlane.xlu1 %6921 }
0x2b64   :  { %v6927_v60 = vmul.f32 0.05, %v6922_v18  ;;  %v6936_v14 = vmul.f32 %v6931_v51, %v6931_v51 }
0x2b66   :  { %v6932_v6 = vsub.f32 %v14989_v1, %v6927_v60  ;;  %v6947_v50 = vsel %vm82_vm0, %v6936_v14, 0.0 }
0x2b67   :  { %6948 = vadd.xlane.f32.xlu1 %v6947_v50 }
0x2b68   :  { %v6937_v59 = vmul.f32 %v6932_v6, %v6932_v6 }
0x2b6a   :  { %v6950_v23 = vsel %vm82_vm0, %v6937_v59, 0.0 }
0x2b6b   :  { %6951 = vadd.xlane.f32.xlu0 %v6950_v23 }
0x2be4   :  { %v6940_v28 = vpop.xlane.xlu0 %6939 }
0x2be5   :  { %v6953_v52 = vmul.f32 0.05, %v6940_v28 }
0x2be7   :  { %v6958_v9 = vadd.f32 1e-05, %v6953_v52 }
0x2be8   :  { %v6943_v34 = vpop.xlane.xlu1 %6942 }
0x2be9   :  { %12198 = vrsqrt.f32 %v6958_v9  ;;  %v6954_v56 = vmul.f32 0.05, %v6943_v34 }
0x2beb   :  { %v6959_v42 = vadd.f32 1e-05, %v6954_v56 }
0x2bec   :  { %v6946_v47 = vpop.xlane.xlu0 %6945 }
0x2bed   :  { %12200 = vrsqrt.f32 %v6959_v42  ;;  %v6955_v63 = vmul.f32 0.05, %v6946_v47 }
0x2bef   :  { %v6960_v30 = vadd.f32 1e-05, %v6955_v63 }
0x2bf0   :  { %v6949_v7 = vpop.xlane.xlu1 %6948 }
0x2bf1   :  { %12202 = vrsqrt.f32 %v6960_v30  ;;  %v6956_v12 = vmul.f32 0.05, %v6949_v7 }
0x2bf3   :  { %v6961_v49 = vadd.f32 1e-05, %v6956_v12  ;;  %v15144_v12 = vld [vmem:[%s15887_s13] sm:$0xff] }
0x2bf4   :  { %v6952_v31 = vpop.xlane.xlu0 %6951 }
0x2bf5   :  { %12204 = vrsqrt.f32 %v6961_v49  ;;  %v6957_v26 = vmul.f32 0.05, %v6952_v31 }
0x2bf6   :  { %v12199_v44 = vpop.eup %12198 }
0x2bf7   :  { %v6968_v25 = vmul.f32 %v12199_v44, %v6928_v19  ;;  %v6962_v16 = vadd.f32 1e-05, %v6957_v26 }
0x2bf9   :  { %v6979_v39 = vmul.f32 %v9791_v57, %v6968_v25  ;;  %12206 = vrsqrt.f32 %v6962_v16  ;;  %v15154_v25 = vld [vmem:[%s15887_s13 + $0x8] sm:$0xff] }
0x2bfa   :  { %v12201_v33 = vpop.eup %12200 }
0x2bfb   :  { %v6990_v17 = vadd.f32 %v9792_v32, %v6979_v39  ;;  %v6969_v54 = vmul.f32 %v12201_v33, %v6929_v62 }
0x2bfd   :  { %11523 = vmatmul.mubr.msk.f32.vlgmr.msra.gmra.mxu1 %vm82_vm0, %v6990_v17  ;;  %v6980_v45 = vmul.f32 %v9791_v57, %v6969_v54  ;;  %v15164_v54 = vld [vmem:[%s15887_s13 + $0x10] sm:$0xff] }
0x2bfe   :  { %v12203_v21 = vpop.eup %12202  ;;  %11525 = vmatprep.mubr.msk.f32.mxu1 %vm12349_vm2, %v12348_v46 }
0x2bff   :  { %v6991_v0 = vadd.f32 %v9792_v32, %v6980_v45  ;;  %v6970_v29 = vmul.f32 %v12203_v21, %v6930_v61 }
0x2c01   :  { %11526 = vmatmul.mubr.msk.f32.gmra.mxu1 %vm82_vm0, %v6991_v0  ;;  %v6981_v10 = vmul.f32 %v9791_v57, %v6970_v29 }
0x2c02   :  { %v12205_v11 = vpop.eup %12204  ;;  %11528 = vmatprep.mubr.msk.f32.mxu1 %vm12349_vm2, %v12348_v46 }
0x2c03   :  { %v6992_v15 = vadd.f32 %v9792_v32, %v6981_v10  ;;  %v6971_v20 = vmul.f32 %v12205_v11, %v6931_v51  ;;  %v15171_v11 = vld [vmem:[%s15887_s13 + $0x18] sm:$0xff] }
0x2c05   :  { %11529 = vmatmul.mubr.msk.f32.gmra.mxu1 %vm82_vm0, %v6992_v15  ;;  %v6982_v55 = vmul.f32 %v9791_v57, %v6971_v20 }
0x2c06   :  { %v12207_v19 = vpop.eup %12206  ;;  %11531 = vmatprep.mubr.msk.f32.mxu1 %vm12349_vm2, %v12348_v46 }
0x2c07   :  { %v6993_v5 = vadd.f32 %v9792_v32, %v6982_v55  ;;  %v6972_v2 = vmul.f32 %v12207_v19, %v6932_v6 }
0x2c09   :  { %11532 = vmatmul.mubr.msk.f32.gmra.mxu1 %vm82_vm0, %v6993_v5  ;;  %v6983_v24 = vmul.f32 %v9791_v57, %v6972_v2  ;;  %v15178_v2 = vld [vmem:[%s15887_s13 + $0x20] sm:$0xff]  ;;  %s15900_s13 = sld [smem:[#allocation9_spill]] }
0x2c0a   :  { %11534 = vmatprep.mubr.msk.f32.mxu1 %vm12349_vm2, %v12348_v46 }
0x2c0b   :  { %v6994_v62 = vadd.f32 %v9792_v32, %v6983_v24 }
0x2c0d   :  { %11535 = vmatmul.mubr.msk.f32.gmra.mxu1 %vm82_vm0, %v6994_v62 }
0x2c0e   :  { %11572 = vmatprep.mubr.msk.f32.mxu1 %vm12349_vm2, %v12348_v46 }
0x2cbd   :  { %v15037_v48 = vpop.f32.mrf.mxu1 }
0x2cbf   :  { %v11524_v22 = vpop.f32.mrf.mxu1 }
0x2cc1   :  { %v15039_v38 = vpop.f32.mrf.mxu1 }
0x2cc3   :  { %v11527_v3 = vpop.f32.mrf.mxu1 }
0x2cc5   :  { %v15041_v61 = vpop.f32.mrf.mxu1 }
0x2cc7   :  { %v11530_v40 = vpop.f32.mrf.mxu1 }
0x2cc9   :  { %v15043_v4 = vpop.f32.mrf.mxu1 }
0x2cca   :  { %7118 = vrot.lane.b32.xlu0 %v15043_v4, %s15898_s3 }
0x2ccb   :  { %v11533_v37 = vpop.f32.mrf.mxu1 }
0x2ccd   :  { %v15047_v53 = vpop.f32.mrf.mxu1 }
0x2cce   :  { %7437 = vrot.lane.b32.xlu0 %v15047_v53, %s15899_s4  ;;  %7120 = vrot.lane.b32.xlu1 %v15047_v53, %s15898_s3 }
0x2ccf   :  { %v11536_v51 = vpop.f32.mrf.mxu1 }
0x2cd2   :  { %7433 = vrot.lane.b32.xlu0 %v15041_v61, %s15899_s4  ;;  %7116 = vrot.lane.b32.xlu1 %v15041_v61, %s15898_s3 }
0x2cd6   :  { %7429 = vrot.lane.b32.xlu0 %v15037_v48, %s15899_s4  ;;  %7114 = vrot.lane.b32.xlu1 %v15039_v38, %s15898_s3 }
0x2cda   :  { %7421 = vrot.lane.b32.xlu0 %v15039_v38, %s15893_s26  ;;  %7112 = vrot.lane.b32.xlu1 %v15037_v48, %s15898_s3 }
0x2cde   :  { %7425 = vrot.lane.b32.xlu0 %v15043_v4, %s15893_s26  ;;  %7435 = vrot.lane.b32.xlu1 %v15043_v4, %s15899_s4 }
0x2ce2   :  { %7303 = vrot.lane.b32.xlu0 %v15043_v4, %s15894_s19  ;;  %7431 = vrot.lane.b32.xlu1 %v15039_v38, %s15899_s4 }
0x2ce6   :  { %7419 = vrot.lane.b32.xlu1 %v15037_v48, %s15893_s26 }
0x2cea   :  { %7423 = vrot.lane.b32.xlu1 %v15041_v61, %s15893_s26 }
0x2cee   :  { %7427 = vrot.lane.b32.xlu1 %v15047_v53, %s15893_s26 }
0x2cf2   :  { %7301 = vrot.lane.b32.xlu1 %v15041_v61, %s15894_s19 }
0x2cf6   :  { %7305 = vrot.lane.b32.xlu1 %v15047_v53, %s15894_s19 }
0x2d3c   :  { %v7119_v18 = vpop.permute.xlu0 %7118 }
0x2d40   :  { %v7121_v35 = vpop.permute.xlu1 %7120  ;;  %v7438_v6 = vpop.permute.xlu0 %7437 }
0x2d41   :  { %11538 = vmatpush3.xpose.msk.msra.mxu0 %vm298_vm3, %v7121_v35 }
0x2d42   :  { %11539 = vmatprep.subr.mxu0 %v12348_v46 }
0x2d44   :  { %v7117_v60 = vpop.permute.xlu1 %7116  ;;  %v7434_v23 = vpop.permute.xlu0 %7433 }
0x2d45   :  { %11540 = vmatpush3.xpose.msk.msra.mxu0 %vm298_vm3, %v7119_v18 }
0x2d46   :  { %11541 = vmatprep.subr.mxu0 %v12348_v46 }
0x2d48   :  { %v7115_v14 = vpop.permute.xlu1 %7114  ;;  %v7430_v58 = vpop.permute.xlu0 %7429 }
0x2d49   :  { %11542 = vmatpush3.xpose.msk.msra.mxu0 %vm298_vm3, %v7117_v60 }
0x2d4a   :  { %11543 = vmatprep.subr.mxu0 %v12348_v46 }
0x2d4c   :  { %v7113_v50 = vpop.permute.xlu1 %7112  ;;  %v7422_v52 = vpop.permute.xlu0 %7421 }
0x2d4d   :  { %11544 = vmatpush3.xpose.msk.msra.mxu0 %vm298_vm3, %v7115_v14 }
0x2d4e   :  { %11545 = vmatprep.subr.mxu0 %v12348_v46 }
0x2d50   :  { %v7436_v59 = vpop.permute.xlu1 %7435  ;;  %v7426_v34 = vpop.permute.xlu0 %7425 }
0x2d51   :  { %11546 = vmatpush3.xpose.msk.msra.mxu0 %vm298_vm3, %v7113_v50 }
0x2d52   :  { %11587 = vmatprep.subr.mxu0 %v12348_v46 }
0x2d54   :  { %11548 = vmatmul.mubr.msk.f32.vlgmr.msra.gmra.mxu0 %vm298_vm3, %v15037_v48  ;;  %v7432_v8 = vpop.permute.xlu1 %7431  ;;  %v7304_v47 = vpop.permute.xlu0 %7303 }
0x2d55   :  { %11588 = vmatpush3.xpose.msk.msra.mxu0 %vm298_vm3, %v7438_v6  ;;  %11550 = vmatprep.mubr.msk.f32.mxu0 %vm12349_vm2, %v12348_v46 }
0x2d56   :  { %11589 = vmatprep.subr.mxu0 %v12348_v46 }
0x2d58   :  { %11551 = vmatmul.mubr.msk.f32.gmra.mxu0 %vm298_vm3, %v15039_v38  ;;  %v7420_v41 = vpop.permute.xlu1 %7419 }
0x2d59   :  { %11590 = vmatpush3.xpose.msk.msra.mxu0 %vm298_vm3, %v7436_v59  ;;  %11553 = vmatprep.mubr.msk.f32.mxu0 %vm12349_vm2, %v12348_v46 }
0x2d5a   :  { %11591 = vmatprep.subr.mxu0 %v12348_v46 }
0x2d5c   :  { %11554 = vmatmul.mubr.msk.f32.gmra.mxu0 %vm298_vm3, %v15041_v61  ;;  %v7424_v28 = vpop.permute.xlu1 %7423 }
0x2d5d   :  { %11592 = vmatpush3.xpose.msk.msra.mxu0 %vm298_vm3, %v7434_v23  ;;  %11556 = vmatprep.mubr.msk.f32.mxu0 %vm12349_vm2, %v12348_v46 }
0x2d5e   :  { %11593 = vmatprep.subr.mxu0 %v12348_v46 }
0x2d60   :  { %11557 = vmatmul.mubr.msk.f32.gmra.mxu0 %vm298_vm3, %v15043_v4  ;;  %v7428_v9 = vpop.permute.xlu1 %7427 }
0x2d61   :  { %11594 = vmatpush3.xpose.msk.msra.mxu0 %vm298_vm3, %v7432_v8  ;;  %11559 = vmatprep.mubr.msk.f32.mxu0 %vm12349_vm2, %v12348_v46 }
0x2d62   :  { %11595 = vmatprep.subr.mxu0 %v12348_v46 }
0x2d64   :  { %11560 = vmatmul.mubr.msk.f32.gmra.mxu0 %vm298_vm3, %v15047_v53  ;;  %v7302_v56 = vpop.permute.xlu1 %7301 }
0x2d65   :  { %11596 = vmatpush3.xpose.msk.msra.mxu0 %vm298_vm3, %v7430_v58  ;;  %11597 = vmatprep.mubr.msk.f32.mxu0 %vm12349_vm2, %v12348_v46 }
0x2d66   :  { %11637 = vmatprep.subr.mxu0 %v12348_v46 }
0x2d68   :  { %11598 = vmatmul.mubr.msk.f32.vlgmr.msra.gmra.mxu0 %vm298_vm3, %v7420_v41  ;;  %v7306_v42 = vpop.permute.xlu1 %7305 }
0x2d69   :  { %11563 = vmatpush3.msra.mxu1 %v7306_v42  ;;  %11600 = vmatprep.mubr.msk.f32.mxu0 %vm12349_vm2, %v12348_v46 }
0x2d6a   :  { %11564 = vmatprep.subr.mxu1 %v12348_v46 }
0x2d6b   :  { %11565 = vmatpush3.msra.mxu1 %v7304_v47 }
0x2d6c   :  { %11566 = vmatprep.subr.mxu1 %v12348_v46  ;;  %11601 = vmatmul.mubr.msk.f32.gmra.mxu0 %vm298_vm3, %v7422_v52 }
0x2d6d   :  { %11567 = vmatpush3.msra.mxu1 %v7302_v56  ;;  %11603 = vmatprep.mubr.msk.f32.mxu0 %vm12349_vm2, %v12348_v46 }
0x2d6e   :  { %11568 = vmatprep.subr.mxu1 %v12348_v46 }
0x2d70   :  { %11604 = vmatmul.mubr.msk.f32.gmra.mxu0 %vm298_vm3, %v7424_v28 }
0x2d71   :  { %11606 = vmatprep.mubr.msk.f32.mxu0 %vm12349_vm2, %v12348_v46 }
0x2d74   :  { %11607 = vmatmul.mubr.msk.f32.gmra.mxu0 %vm298_vm3, %v7426_v34 }
0x2d75   :  { %11609 = vmatprep.mubr.msk.f32.mxu0 %vm12349_vm2, %v12348_v46 }
0x2d78   :  { %11610 = vmatmul.mubr.msk.f32.gmra.mxu0 %vm298_vm3, %v7428_v9 }
0x2d79   :  { %11639 = vmatprep.mubr.msk.f32.mxu0 %vm12349_vm2, %v12348_v46 }
0x2e14   :  { %v7208_v63 = vpop.f32.mrf.mxu0 }
0x2e15   :  { %v7232_v30 = vmul.f32 0.4472136, %v7208_v63 }
0x2e16   :  { %v11549_v7 = vpop.f32.mrf.mxu0 }
0x2e17   :  { %v15147_v49 = vadd.f32 %v15144_v12, %v7232_v30 }
0x2e18   :  { %v7213_v31 = vpop.f32.mrf.mxu0 }
0x2e19   :  { %v7233_v26 = vmul.f32 0.4472136, %v7213_v31  ;;  %v7242_v44 = vsel %vm419_vm4, %v15147_v49, -inf }
0x2e1a   :  { %7243 = vmax.xlane.f32.xlu0 %v7242_v44  ;;  %v11552_v57 = vpop.f32.mrf.mxu0 }
0x2e1b   :  { %v15157_v16 = vadd.f32 %v15154_v25, %v7233_v26 }
0x2e1c   :  { %v7218_v32 = vpop.f32.mrf.mxu0 }
0x2e1d   :  { %v7234_v39 = vmul.f32 0.4472136, %v7218_v32  ;;  %v7245_v33 = vsel %vm419_vm4, %v15157_v16, -inf }
0x2e1e   :  { %7246 = vmax.xlane.f32.xlu1 %v7245_v33  ;;  %v11555_v17 = vpop.f32.mrf.mxu0 }
0x2e1f   :  { %v7239_v45 = vadd.f32 %v15164_v54, %v7234_v39 }
0x2e20   :  { %v7223_v21 = vpop.f32.mrf.mxu0 }
0x2e21   :  { %v7235_v0 = vmul.f32 0.4472136, %v7223_v21  ;;  %v7248_v29 = vsel %vm419_vm4, %v7239_v45, -inf }
0x2e22   :  { %7249 = vmax.xlane.f32.xlu0 %v7248_v29  ;;  %v11558_v10 = vpop.f32.mrf.mxu0 }
0x2e23   :  { %v7240_v15 = vadd.f32 %v15171_v11, %v7235_v0 }
0x2e24   :  { %v7228_v20 = vpop.f32.mrf.mxu0 }
0x2e25   :  { %v7236_v55 = vmul.f32 0.4472136, %v7228_v20  ;;  %v7251_v19 = vsel %vm419_vm4, %v7240_v15, -inf }
0x2e26   :  { %7252 = vmax.xlane.f32.xlu0 %v7251_v19  ;;  %v11561_v5 = vpop.f32.mrf.mxu0 }
0x2e27   :  { %v7241_v24 = vadd.f32 %v15178_v2, %v7236_v55 }
0x2e28   :  { %v7525_v62 = vpop.f32.mrf.mxu0 }
0x2e29   :  { %v7549_v22 = vmul.f32 0.4472136, %v7525_v62  ;;  %v7254_v3 = vsel %vm419_vm4, %v7241_v24, -inf }
0x2e2a   :  { %7255 = vmax.xlane.f32.xlu0 %v7254_v3  ;;  %v11599_v40 = vpop.f32.mrf.mxu0 }
0x2e2b   :  { %v7554_v37 = vadd.f32 %v15144_v12, %v7549_v22 }
0x2e2c   :  { %v7530_v51 = vpop.f32.mrf.mxu0 }
0x2e2d   :  { %v7550_v35 = vmul.f32 0.4472136, %v7530_v51  ;;  %v7559_v18 = vsel %vm419_vm4, %v7554_v37, -inf }
0x2e2e   :  { %7560 = vmax.xlane.f32.xlu1 %v7559_v18  ;;  %v11602_v60 = vpop.f32.mrf.mxu0 }
0x2e2f   :  { %v7555_v14 = vadd.f32 %v15154_v25, %v7550_v35 }
0x2e30   :  { %v7535_v6 = vpop.f32.mrf.mxu0 }
0x2e31   :  { %v7551_v50 = vmul.f32 0.4472136, %v7535_v6  ;;  %v7562_v59 = vsel %vm419_vm4, %v7555_v14, -inf }
0x2e32   :  { %7563 = vmax.xlane.f32.xlu0 %v7562_v59  ;;  %v11605_v23 = vpop.f32.mrf.mxu0 }
0x2e33   :  { %v7556_v8 = vadd.f32 %v15164_v54, %v7551_v50 }
0x2e34   :  { %v7540_v58 = vpop.f32.mrf.mxu0 }
0x2e35   :  { %v7565_v41 = vsel %vm419_vm4, %v7556_v8, -inf  ;;  %v7552_v34 = vmul.f32 0.4472136, %v7540_v58 }
0x2e36   :  { %7566 = vmax.xlane.f32.xlu1 %v7565_v41  ;;  %v11608_v28 = vpop.f32.mrf.mxu0 }
0x2e37   :  { %v15193_v56 = vadd.f32 %v15171_v11, %v7552_v34 }
0x2e38   :  { %v7545_v52 = vpop.f32.mrf.mxu0 }
0x2e39   :  { %v7553_v42 = vmul.f32 0.4472136, %v7545_v52  ;;  %v7568_v63 = vsel %vm419_vm4, %v15193_v56, -inf }
0x2e3a   :  { %v11611_v9 = vpop.f32.mrf.mxu0 }
0x2e3b   :  { %v15196_v47 = vadd.f32 %v15178_v2, %v7553_v42 }
0x2e3d   :  { %v7571_v30 = vsel %vm419_vm4, %v15196_v47, -inf }
0x2e47   :  { %7622 = vrot.lane.b32.xlu1 %v15047_v53, %s15895_s1 }
0x2e48   :  { %7299 = vrot.lane.b32.xlu0 %v15039_v38, %s15894_s19 }
0x2e67   :  { %7569 = vmax.xlane.f32.xlu0 %v7568_v63 }
0x2e6b   :  { %7572 = vmax.xlane.f32.xlu1 %v7571_v30 }
0x2e7d   :  { %7297 = vrot.lane.b32.xlu0 %v15037_v48, %s15894_s19 }
0x2ea3   :  { %v7244_v7 = vpop.xlane.xlu0 %7243 }
0x2ea4   :  { %v7257_v31 = vsub.f32 %v15147_v49, %v7244_v7 }
0x2ea6   :  { %v7262_v26 = vmul.f32 1.442695, %v7257_v31 }
0x2ea7   :  { %v7247_v44 = vpop.xlane.xlu1 %7246 }
0x2ea8   :  { %12208 = vpow2.f32 %v7262_v26  ;;  %v7258_v57 = vsub.f32 %v15157_v16, %v7247_v44 }
0x2eaa   :  { %v7264_v32 = vmul.f32 1.442695, %v7258_v57 }
0x2eab   :  { %v7250_v39 = vpop.xlane.xlu0 %7249 }
0x2eac   :  { %12210 = vpow2.f32 %v7264_v32  ;;  %v7259_v33 = vsub.f32 %v7239_v45, %v7250_v39 }
0x2eae   :  { %v7266_v17 = vmul.f32 1.442695, %v7259_v33 }
0x2eaf   :  { %v7253_v21 = vpop.xlane.xlu0 %7252 }
0x2eb0   :  { %12212 = vpow2.f32 %v7266_v17  ;;  %v7260_v0 = vsub.f32 %v7240_v15, %v7253_v21 }
0x2eb2   :  { %v7268_v29 = vmul.f32 1.442695, %v7260_v0 }
0x2eb3   :  { %v7256_v10 = vpop.xlane.xlu0 %7255 }
0x2eb4   :  { %12214 = vpow2.f32 %v7268_v29  ;;  %v7261_v20 = vsub.f32 %v7241_v24, %v7256_v10 }
0x2eb5   :  { %v15206_v55 = vpop.eup %12208 }
0x2eb6   :  { %v7270_v49 = vmul.f32 1.442695, %v7261_v20  ;;  %v7272_v19 = vsel %vm419_vm4, %v15206_v55, 0.0 }
0x2eb7   :  { %v7561_v5 = vpop.xlane.xlu1 %7560  ;;  %7273 = vadd.xlane.f32.xlu0 %v7272_v19 }
0x2eb8   :  { %12216 = vpow2.f32 %v7270_v49  ;;  %v7574_v16 = vsub.f32 %v7554_v37, %v7561_v5 }
0x2eb9   :  { %v15210_v62 = vpop.eup %12210 }
0x2eba   :  { %v7579_v45 = vmul.f32 1.442695, %v7574_v16  ;;  %v7275_v15 = vsel %vm419_vm4, %v15210_v62, 0.0 }
0x2ebb   :  { %v7564_v22 = vpop.xlane.xlu0 %7563  ;;  %7276 = vadd.xlane.f32.xlu1 %v7275_v15 }
0x2ebc   :  { %12218 = vpow2.f32 %v7579_v45  ;;  %v7575_v24 = vsub.f32 %v7555_v14, %v7564_v22 }
0x2ebd   :  { %v15214_v3 = vpop.eup %12212 }
0x2ebe   :  { %v7581_v40 = vmul.f32 1.442695, %v7575_v24  ;;  %v7278_v51 = vsel %vm419_vm4, %v15214_v3, 0.0 }
0x2ebf   :  { %v7300_v35 = vpop.permute.xlu0 %7299  ;;  %v7567_v18 = vpop.xlane.xlu1 %7566  ;;  %7279 = vadd.xlane.f32.xlu0 %v7278_v51 }
0x2ec0   :  { %12220 = vpow2.f32 %v7581_v40  ;;  %v7576_v37 = vsub.f32 %v7556_v8, %v7567_v18  ;;  %11569 = vmatpush3.msra.mxu1 %v7300_v35 }
0x2ec1   :  { %v15218_v60 = vpop.eup %12214  ;;  %11570 = vmatprep.subr.mxu1 %v12348_v46 }
0x2ec2   :  { %v7583_v6 = vmul.f32 1.442695, %v7576_v37  ;;  %v7281_v14 = vsel %vm419_vm4, %v15218_v60, 0.0 }
0x2ec3   :  { %7282 = vadd.xlane.f32.xlu1 %v7281_v14  ;;  %v7623_v9 = vpop.permute.xlu1 %7622 }
0x2ec4   :  { %12222 = vpow2.f32 %v7583_v6  ;;  %v9817_v6 = vld [vmem:[%s15839_s6 + $0x60] sm:$0x1f] }
0x2ec5   :  { %v15223_v50 = vpop.eup %12216 }
0x2ec6   :  { %v7284_v59 = vsel %vm419_vm4, %v15223_v50, 0.0 }
0x2ec7   :  { %7285 = vadd.xlane.f32.xlu0 %v7284_v59 }
0x2ec9   :  { %v15227_v23 = vpop.eup %12218 }
0x2eca   :  { %v7589_v8 = vsel %vm419_vm4, %v15227_v23, 0.0 }
0x2ecb   :  { %7590 = vadd.xlane.f32.xlu0 %v7589_v8 }
0x2ecd   :  { %v15231_v58 = vpop.eup %12220 }
0x2ece   :  { %v7592_v41 = vsel %vm419_vm4, %v15231_v58, 0.0 }
0x2ecf   :  { %7593 = vadd.xlane.f32.xlu1 %v7592_v41  ;;  %v9833_v41 = vld [vmem:[%s15839_s6 + $0x68] sm:$0x1f] }
0x2ed0   :  { %11638 = vmatpush3.msk.msra.mxu0 %vm928_vm5, %v9833_v41 }
0x2ed1   :  { %v15235_v28 = vpop.eup %12222  ;;  %11671 = vmatprep.subr.mxu0 %v12348_v46 }
0x2ed2   :  { %v7595_v52 = vsel %vm419_vm4, %v15235_v28, 0.0 }
0x2ed3   :  { %7596 = vadd.xlane.f32.xlu0 %v7595_v52 }
0x2ee0   :  { %7618 = vrot.lane.b32.xlu1 %v15041_v61, %s15895_s1 }
0x2ee4   :  { %7616 = vrot.lane.b32.xlu1 %v15039_v38, %s15895_s1 }
0x2ee9   :  { %7620 = vrot.lane.b32.xlu0 %v15043_v4, %s15895_s1 }
0x2eed   :  { %7970 = vrot.lane.b32.xlu0 %v15047_v53, %s15896_s2 }
0x2ef0   :  { %v7570_v34 = vpop.xlane.xlu0 %7569 }
0x2ef1   :  { %v7577_v42 = vsub.f32 %v15193_v56, %v7570_v34  ;;  %7966 = vrot.lane.b32.xlu0 %v15041_v61, %s15896_s2 }
0x2ef3   :  { %v7585_v63 = vmul.f32 1.442695, %v7577_v42 }
0x2ef4   :  { %v7298_v30 = vpop.permute.xlu0 %7297  ;;  %v7573_v7 = vpop.xlane.xlu1 %7572 }
0x2ef5   :  { %v7578_v31 = vsub.f32 %v15196_v47, %v7573_v7  ;;  %7962 = vrot.lane.b32.xlu0 %v15037_v48, %s15896_s2  ;;  %11571 = vmatpush3.msra.mxu1 %v7298_v30  ;;  %12224 = vpow2.f32 %v7585_v63 }
0x2ef6   :  { %11612 = vmatprep.subr.mxu1 %v12348_v46 }
0x2ef7   :  { %v7587_v26 = vmul.f32 1.442695, %v7578_v31 }
0x2ef9   :  { %7954 = vrot.lane.b32.xlu0 %v15039_v38, %s15897_s24  ;;  %12226 = vpow2.f32 %v7587_v26 }
0x2efd   :  { %7958 = vrot.lane.b32.xlu0 %v15043_v4, %s15897_s24 }
0x2f01   :  { %8155 = vrot.lane.b32.xlu0 %v15047_v53, %s15889_s25 }
0x2f02   :  { %v15260_v56 = vpop.eup %12224 }
0x2f03   :  { %v7598_v47 = vsel %vm419_vm4, %v15260_v56, 0.0 }
0x2f06   :  { %v15264_v44 = vpop.eup %12226 }
0x2f07   :  { %v7601_v57 = vsel %vm419_vm4, %v15264_v44, 0.0 }
0x2f08   :  { %7599 = vadd.xlane.f32.xlu1 %v7598_v47 }
0x2f0c   :  { %7602 = vadd.xlane.f32.xlu1 %v7601_v57 }
0x2f1d   :  { %7614 = vrot.lane.b32.xlu1 %v15037_v48, %s15895_s1  ;;  %s15901_s1 = sld [smem:[#allocation10_spill]] }
0x2f21   :  { %7968 = vrot.lane.b32.xlu1 %v15043_v4, %s15896_s2 }
0x2f25   :  { %7964 = vrot.lane.b32.xlu1 %v15039_v38, %s15896_s2  ;;  %s12361_s2 = smov [#allocation2]  }
0x2f29   :  { %7952 = vrot.lane.b32.xlu1 %v15037_v48, %s15897_s24 }
0x2f2d   :  { %7956 = vrot.lane.b32.xlu1 %v15041_v61, %s15897_s24 }
0x2f31   :  { %7960 = vrot.lane.b32.xlu1 %v15047_v53, %s15897_s24 }
0x2f35   :  { %8153 = vrot.lane.b32.xlu1 %v15043_v4, %s15889_s25 }
0x2f39   :  { %8151 = vrot.lane.b32.xlu1 %v15041_v61, %s15889_s25 }
0x2f3d   :  { %8149 = vrot.lane.b32.xlu1 %v15039_v38, %s15889_s25 }
0x2f40   :  { %v7274_v32 = vpop.xlane.xlu0 %7273 }
0x2f41   :  { %12228 = vrcp.f32 %v7274_v32 }
0x2f44   :  { %v7277_v39 = vpop.xlane.xlu1 %7276 }
0x2f45   :  { %12230 = vrcp.f32 %v7277_v39 }
0x2f48   :  { %v7280_v33 = vpop.xlane.xlu0 %7279 }
0x2f49   :  { %12232 = vrcp.f32 %v7280_v33 }
0x2f4c   :  { %v7283_v17 = vpop.xlane.xlu1 %7282 }
0x2f4d   :  { %12234 = vrcp.f32 %v7283_v17 }
0x2f4e   :  { %v12229_v21 = vpop.eup %12228 }
0x2f4f   :  { %v7292_v0 = vmul.f32 %v12229_v21, %v15206_v55 }
0x2f50   :  { %v7286_v29 = vpop.xlane.xlu0 %7285 }
0x2f51   :  { %12236 = vrcp.f32 %v7286_v29  ;;  %11573 = vmatmul.mubr.msk.f32.vlgmr.msra.gmra.mxu1 %vm419_vm4, %v7292_v0 }
0x2f52   :  { %v12231_v10 = vpop.eup %12230  ;;  %11613 = vmatpush3.msra.mxu1 %v7623_v9  ;;  %11575 = vmatprep.mubr.msk.f32.mxu1 %vm12349_vm2, %v12348_v46 }
0x2f53   :  { %v7293_v20 = vmul.f32 %v12231_v10, %v15210_v62  ;;  %11614 = vmatprep.subr.mxu1 %v12348_v46 }
0x2f54   :  { %v7591_v19 = vpop.xlane.xlu0 %7590 }
0x2f55   :  { %11576 = vmatmul.mubr.msk.f32.gmra.mxu1 %vm419_vm4, %v7293_v20  ;;  %12238 = vrcp.f32 %v7591_v19 }
0x2f56   :  { %v12233_v49 = vpop.eup %12232  ;;  %11578 = vmatprep.mubr.msk.f32.mxu1 %vm12349_vm2, %v12348_v46 }
0x2f57   :  { %v7294_v55 = vmul.f32 %v12233_v49, %v15214_v3 }
0x2f58   :  { %v7594_v5 = vpop.xlane.xlu1 %7593 }
0x2f59   :  { %11579 = vmatmul.mubr.msk.f32.gmra.mxu1 %vm419_vm4, %v7294_v55  ;;  %12240 = vrcp.f32 %v7594_v5 }
0x2f5a   :  { %v12235_v16 = vpop.eup %12234  ;;  %11581 = vmatprep.mubr.msk.f32.mxu1 %vm12349_vm2, %v12348_v46 }
0x2f5b   :  { %v7295_v62 = vmul.f32 %v12235_v16, %v15218_v60 }
0x2f5c   :  { %v7597_v45 = vpop.xlane.xlu0 %7596  ;;  %v7619_v22 = vpop.permute.xlu1 %7618 }
0x2f5d   :  { %11582 = vmatmul.mubr.msk.f32.gmra.mxu1 %vm419_vm4, %v7295_v62  ;;  %12242 = vrcp.f32 %v7597_v45 }
0x2f5e   :  { %v12237_v15 = vpop.eup %12236  ;;  %11584 = vmatprep.mubr.msk.f32.mxu1 %vm12349_vm2, %v12348_v46 }
0x2f5f   :  { %v7296_v24 = vmul.f32 %v12237_v15, %v15223_v50 }
0x2f60   :  { %v7621_v3 = vpop.permute.xlu0 %7620  ;;  %v7617_v40 = vpop.permute.xlu1 %7616 }
0x2f61   :  { %11585 = vmatmul.mubr.msk.f32.gmra.mxu1 %vm419_vm4, %v7296_v24 }
0x2f62   :  { %11615 = vmatpush3.msra.mxu1 %v7621_v3  ;;  %11622 = vmatprep.mubr.msk.f32.mxu1 %vm12349_vm2, %v12348_v46  ;;  %v12239_v18 = vpop.eup %12238 }
0x2f63   :  { %11616 = vmatprep.subr.mxu1 %v12348_v46  ;;  %v7609_v37 = vmul.f32 %v12239_v18, %v15227_v23 }
0x2f64   :  { %11617 = vmatpush3.msra.mxu1 %v7619_v22  ;;  %v7971_v34 = vpop.permute.xlu0 %7970 }
0x2f65   :  { %11618 = vmatprep.subr.mxu1 %v12348_v46 }
0x2f66   :  { %11619 = vmatpush3.msra.mxu1 %v7617_v40  ;;  %v12241_v14 = vpop.eup %12240 }
0x2f67   :  { %11620 = vmatprep.subr.mxu1 %v12348_v46  ;;  %v7610_v50 = vmul.f32 %v12241_v14, %v15231_v58 }
0x2f68   :  { %v7967_v63 = vpop.permute.xlu0 %7966 }
0x2f6a   :  { %v12243_v59 = vpop.eup %12242 }
0x2f6b   :  { %v7611_v23 = vmul.f32 %v12243_v59, %v15235_v28 }
0x2f6c   :  { %v15343_v7 = vpop.permute.xlu0 %7962 }
0x2f70   :  { %v15347_v26 = vpop.permute.xlu0 %7954 }
0x2f74   :  { %v15351_v47 = vpop.permute.xlu0 %7958 }
0x2f78   :  { %v8156_v32 = vpop.permute.xlu0 %8155 }
0x2f91   :  { %v7600_v51 = vpop.xlane.xlu1 %7599 }
0x2f92   :  { %12244 = vrcp.f32 %v7600_v51 }
0x2f95   :  { %v7603_v35 = vpop.xlane.xlu1 %7602 }
0x2f96   :  { %12246 = vrcp.f32 %v7603_v35 }
0x2f99   :  { %v7615_v60 = vpop.permute.xlu1 %7614 }
0x2f9a   :  { %11621 = vmatpush3.msra.mxu1 %v7615_v60 }
0x2f9b   :  { %11623 = vmatmul.mubr.msk.f32.vlgmr.msra.gmra.mxu1 %vm419_vm4, %v7609_v37  ;;  %11654 = vmatprep.subr.mxu1 %v12348_v46 }
0x2f9c   :  { %11625 = vmatprep.mubr.msk.f32.mxu1 %vm12349_vm2, %v12348_v46  ;;  %11655 = vmatpush3.msk.msra.mxu1 %vm928_vm5, %v9817_v6 }
0x2f9d   :  { %11696 = vmatprep.subr.mxu1 %v12348_v46  ;;  %v7969_v9 = vpop.permute.xlu1 %7968 }
0x2f9f   :  { %11626 = vmatmul.mubr.msk.f32.gmra.mxu1 %vm419_vm4, %v7610_v50  ;;  %v12245_v8 = vpop.eup %12244 }
0x2fa0   :  { %11628 = vmatprep.mubr.msk.f32.mxu1 %vm12349_vm2, %v12348_v46  ;;  %v7612_v58 = vmul.f32 %v12245_v8, %v15260_v56 }
0x2fa1   :  { %v7965_v42 = vpop.permute.xlu1 %7964 }
0x2fa3   :  { %11629 = vmatmul.mubr.msk.f32.gmra.mxu1 %vm419_vm4, %v7611_v23  ;;  %v12247_v52 = vpop.eup %12246 }
0x2fa4   :  { %11631 = vmatprep.mubr.msk.f32.mxu1 %vm12349_vm2, %v12348_v46  ;;  %v7613_v28 = vmul.f32 %v12247_v52, %v15264_v44 }
0x2fa5   :  { %v15341_v30 = vpop.permute.xlu1 %7952 }
0x2fa7   :  { %11632 = vmatmul.mubr.msk.f32.gmra.mxu1 %vm419_vm4, %v7612_v58 }
0x2fa8   :  { %11634 = vmatprep.mubr.msk.f32.mxu1 %vm12349_vm2, %v12348_v46 }
0x2fa9   :  { %v15345_v31 = vpop.permute.xlu1 %7956 }
0x2fab   :  { %11635 = vmatmul.mubr.msk.f32.gmra.mxu1 %vm419_vm4, %v7613_v28 }
0x2fac   :  { %11656 = vmatprep.mubr.msk.f32.mxu1 %vm12349_vm2, %v12348_v46 }
0x2fad   :  { %v15349_v56 = vpop.permute.xlu1 %7960 }
0x2fb1   :  { %v8154_v44 = vpop.permute.xlu1 %8153 }
0x2fb5   :  { %v8152_v39 = vpop.permute.xlu1 %8151 }
0x2fb9   :  { %v8150_v0 = vpop.permute.xlu1 %8149 }
0x3011   :  { %v7393_v57 = vpop.f32.mrf.mxu1 }
0x3012   :  { %11657 = vmatmul.mubr.msk.f32.vlgmr.msra.gmra.mxu1 %vm298_vm3, %v7393_v57 }
0x3013   :  { %11697 = vmatpush3.msra.mxu1 %v8156_v32  ;;  %v11574_v33 = vpop.f32.mrf.mxu1  ;;  %11659 = vmatprep.mubr.msk.f32.mxu1 %vm12349_vm2, %v12348_v46 }
0x3014   :  { %11698 = vmatprep.subr.mxu1 %v12348_v46 }
0x3015   :  { %11699 = vmatpush3.msra.mxu1 %v8154_v44  ;;  %v7398_v17 = vpop.f32.mrf.mxu1 }
0x3016   :  { %11700 = vmatprep.subr.mxu1 %v12348_v46  ;;  %11660 = vmatmul.mubr.msk.f32.gmra.mxu1 %vm298_vm3, %v7398_v17 }
0x3017   :  { %11701 = vmatpush3.msra.mxu1 %v8152_v39  ;;  %v11577_v21 = vpop.f32.mrf.mxu1  ;;  %11662 = vmatprep.mubr.msk.f32.mxu1 %vm12349_vm2, %v12348_v46 }
0x3018   :  { %11702 = vmatprep.subr.mxu1 %v12348_v46 }
0x3019   :  { %11703 = vmatpush3.msra.mxu1 %v8150_v0  ;;  %v7403_v29 = vpop.f32.mrf.mxu1 }
0x301a   :  { %11663 = vmatmul.mubr.msk.f32.gmra.mxu1 %vm298_vm3, %v7403_v29  ;;  %11704 = vmatprep.subr.mxu1 %v12348_v46 }
0x301b   :  { %v11580_v10 = vpop.f32.mrf.mxu1  ;;  %11665 = vmatprep.mubr.msk.f32.mxu1 %vm12349_vm2, %v12348_v46 }
0x301d   :  { %v7408_v20 = vpop.f32.mrf.mxu1 }
0x301e   :  { %11666 = vmatmul.mubr.msk.f32.gmra.mxu1 %vm298_vm3, %v7408_v20 }
0x301f   :  { %v11583_v49 = vpop.f32.mrf.mxu1  ;;  %11668 = vmatprep.mubr.msk.f32.mxu1 %vm12349_vm2, %v12348_v46 }
0x3021   :  { %v7413_v55 = vpop.f32.mrf.mxu1 }
0x3022   :  { %11669 = vmatmul.mubr.msk.f32.gmra.mxu1 %vm298_vm3, %v7413_v55 }
0x3023   :  { %v11586_v19 = vpop.f32.mrf.mxu1  ;;  %11706 = vmatprep.mubr.msk.f32.mxu1 %vm12349_vm2, %v12348_v46 }
0x305b   :  { %v7710_v5 = vpop.f32.mrf.mxu1 }
0x305c   :  { %11640 = vmatmul.mubr.msk.f32.vlgmr.msra.gmra.mxu0 %vm298_vm3, %v7710_v5 }
0x305d   :  { %11672 = vmatpush3.xpose.msk.msra.mxu0 %vm298_vm3, %v7971_v34  ;;  %v11624_v16 = vpop.f32.mrf.mxu1  ;;  %11642 = vmatprep.mubr.msk.f32.mxu0 %vm12349_vm2, %v12348_v46 }
0x305e   :  { %11673 = vmatprep.subr.mxu0 %v12348_v46 }
0x305f   :  { %v7715_v62 = vpop.f32.mrf.mxu1 }
0x3060   :  { %11643 = vmatmul.mubr.msk.f32.gmra.mxu0 %vm298_vm3, %v7715_v62 }
0x3061   :  { %11674 = vmatpush3.xpose.msk.msra.mxu0 %vm298_vm3, %v7969_v9  ;;  %v11627_v45 = vpop.f32.mrf.mxu1  ;;  %11645 = vmatprep.mubr.msk.f32.mxu0 %vm12349_vm2, %v12348_v46 }
0x3062   :  { %11675 = vmatprep.subr.mxu0 %v12348_v46 }
0x3063   :  { %v7720_v15 = vpop.f32.mrf.mxu1 }
0x3064   :  { %11646 = vmatmul.mubr.msk.f32.gmra.mxu0 %vm298_vm3, %v7720_v15 }
0x3065   :  { %11676 = vmatpush3.xpose.msk.msra.mxu0 %vm298_vm3, %v7967_v63  ;;  %v11630_v22 = vpop.f32.mrf.mxu1  ;;  %11648 = vmatprep.mubr.msk.f32.mxu0 %vm12349_vm2, %v12348_v46 }
0x3066   :  { %11677 = vmatprep.subr.mxu0 %v12348_v46 }
0x3067   :  { %v7725_v24 = vpop.f32.mrf.mxu1 }
0x3068   :  { %11649 = vmatmul.mubr.msk.f32.gmra.mxu0 %vm298_vm3, %v7725_v24 }
0x3069   :  { %11678 = vmatpush3.xpose.msk.msra.mxu0 %vm298_vm3, %v7965_v42  ;;  %v11633_v3 = vpop.f32.mrf.mxu1  ;;  %11651 = vmatprep.mubr.msk.f32.mxu0 %vm12349_vm2, %v12348_v46 }
0x306a   :  { %11679 = vmatprep.subr.mxu0 %v12348_v46 }
0x306b   :  { %v7730_v40 = vpop.f32.mrf.mxu1 }
0x306c   :  { %11652 = vmatmul.mubr.msk.f32.gmra.mxu0 %vm298_vm3, %v7730_v40 }
0x306d   :  { %11680 = vmatpush3.xpose.msk.msra.mxu0 %vm298_vm3, %v15343_v7  ;;  %v11636_v51 = vpop.f32.mrf.mxu1  ;;  %11681 = vmatprep.mubr.msk.f32.mxu0 %vm12349_vm2, %v12348_v46 }
0x306e   :  { %11721 = vmatprep.subr.mxu0 %v12348_v46 }
0x3070   :  { %11682 = vmatmul.mubr.msk.f32.vlgmr.msra.gmra.mxu0 %vm298_vm3, %v15341_v30 }
0x3071   :  { %11684 = vmatprep.mubr.msk.f32.mxu0 %vm12349_vm2, %v12348_v46 }
0x3074   :  { %11685 = vmatmul.mubr.msk.f32.gmra.mxu0 %vm298_vm3, %v15347_v26 }
0x3075   :  { %11687 = vmatprep.mubr.msk.f32.mxu0 %vm12349_vm2, %v12348_v46 }
0x3078   :  { %11688 = vmatmul.mubr.msk.f32.gmra.mxu0 %vm298_vm3, %v15345_v31 }
0x3079   :  { %11690 = vmatprep.mubr.msk.f32.mxu0 %vm12349_vm2, %v12348_v46 }
0x307c   :  { %11691 = vmatmul.mubr.msk.f32.gmra.mxu0 %vm298_vm3, %v15351_v47 }
0x307d   :  { %11693 = vmatprep.mubr.msk.f32.mxu0 %vm12349_vm2, %v12348_v46 }
0x3080   :  { %11694 = vmatmul.mubr.msk.f32.gmra.mxu0 %vm298_vm3, %v15349_v56 }
0x3081   :  { %11723 = vmatprep.mubr.msk.f32.mxu0 %vm12349_vm2, %v12348_v46 }
0x30d2   :  { %v15418_v35 = vpop.f32.mrf.mxu1 }
0x30d4   :  { %v11658_v18 = vpop.f32.mrf.mxu1 }
0x30d6   :  { %v15420_v37 = vpop.f32.mrf.mxu1 }
0x30d8   :  { %v11661_v60 = vpop.f32.mrf.mxu1 }
0x30da   :  { %v15422_v6 = vpop.f32.mrf.mxu1 }
0x30dc   :  { %v11664_v14 = vpop.f32.mrf.mxu1 }
0x30de   :  { %v15424_v50 = vpop.f32.mrf.mxu1 }
0x30e0   :  { %v11667_v59 = vpop.f32.mrf.mxu1 }
0x30e2   :  { %v15426_v23 = vpop.f32.mrf.mxu1 }
0x30e4   :  { %v11670_v8 = vpop.f32.mrf.mxu1 }
0x311c   :  { %v15428_v41 = vpop.f32.mrf.mxu0 }
0x311e   :  { %v11641_v58 = vpop.f32.mrf.mxu0 }
0x3120   :  { %v15430_v52 = vpop.f32.mrf.mxu0 }
0x3122   :  { %v11644_v28 = vpop.f32.mrf.mxu0 }
0x3124   :  { %v15432_v9 = vpop.f32.mrf.mxu0 }
0x3126   :  { %v11647_v34 = vpop.f32.mrf.mxu0 }
0x3128   :  { %v15434_v42 = vpop.f32.mrf.mxu0 }
0x312a   :  { %v11650_v63 = vpop.f32.mrf.mxu0 }
0x312c   :  { %v15436_v30 = vpop.f32.mrf.mxu0 }
0x312e   :  { %v11653_v7 = vpop.f32.mrf.mxu0 }
0x3130   :  { %v8058_v31 = vpop.f32.mrf.mxu0 }
0x3131   :  { %v8082_v26 = vmul.f32 0.4472136, %v8058_v31 }
0x3132   :  { %v11683_v56 = vpop.f32.mrf.mxu0 }
0x3133   :  { %v8087_v47 = vadd.f32 %v15144_v12, %v8082_v26 }
0x3134   :  { %v8063_v44 = vpop.f32.mrf.mxu0 }
0x3135   :  { %v8083_v57 = vmul.f32 0.4472136, %v8063_v44  ;;  %v8092_v32 = vsel %vm419_vm4, %v8087_v47, -inf }
0x3136   :  { %8093 = vmax.xlane.f32.xlu0 %v8092_v32  ;;  %v11686_v39 = vpop.f32.mrf.mxu0 }
0x3137   :  { %v8088_v33 = vadd.f32 %v15154_v25, %v8083_v57 }
0x3138   :  { %v8068_v17 = vpop.f32.mrf.mxu0 }
0x3139   :  { %v8084_v21 = vmul.f32 0.4472136, %v8068_v17  ;;  %v8095_v0 = vsel %vm419_vm4, %v8088_v33, -inf }
0x313a   :  { %8096 = vmax.xlane.f32.xlu1 %v8095_v0  ;;  %v11689_v29 = vpop.f32.mrf.mxu0 }
0x313b   :  { %v8089_v10 = vadd.f32 %v15164_v54, %v8084_v21 }
0x313c   :  { %v8073_v20 = vpop.f32.mrf.mxu0 }
0x313d   :  { %v8085_v49 = vmul.f32 0.4472136, %v8073_v20  ;;  %v8098_v55 = vsel %vm419_vm4, %v8089_v10, -inf }
0x313e   :  { %8099 = vmax.xlane.f32.xlu0 %v8098_v55  ;;  %v11692_v19 = vpop.f32.mrf.mxu0 }
0x313f   :  { %v8090_v5 = vadd.f32 %v15171_v11, %v8085_v49 }
0x3140   :  { %v8078_v16 = vpop.f32.mrf.mxu0 }
0x3141   :  { %v8086_v62 = vmul.f32 0.4472136, %v8078_v16  ;;  %v8101_v45 = vsel %vm419_vm4, %v8090_v5, -inf }
0x3142   :  { %8102 = vmax.xlane.f32.xlu0 %v8101_v45  ;;  %v11695_v15 = vpop.f32.mrf.mxu0 }
0x3143   :  { %v8091_v22 = vadd.f32 %v15178_v2, %v8086_v62 }
0x3145   :  { %v8104_v24 = vsel %vm419_vm4, %v8091_v22, -inf }
0x3146   :  { %8105 = vmax.xlane.f32.xlu0 %v8104_v24 }
0x314b   :  { %8400 = vrot.lane.b32.xlu1 %v15047_v53, %s15890_s29 }
0x315c   :  { %8147 = vrot.lane.b32.xlu0 %v15037_v48, %s15889_s25  ;;  %s9397_s25 = sshll.u32 %s12361_s2, 4  ;;  %s9398_s25 = int_to_ptr.vmem [resolvable:$true] %s9397_s25 }
0x315d   :  { %p12331_p1 = scmp.lt.s32.totalorder %s9398_s25, %s9398_s25 }
0x31bf   :  { %v8094_v3 = vpop.xlane.xlu0 %8093 }
0x31c0   :  { %v8107_v40 = vsub.f32 %v8087_v47, %v8094_v3 }
0x31c2   :  { %v8112_v51 = vmul.f32 1.442695, %v8107_v40 }
0x31c3   :  { %v8097_v18 = vpop.xlane.xlu1 %8096 }
0x31c4   :  { %12248 = vpow2.f32 %v8112_v51  ;;  %v8108_v60 = vsub.f32 %v8088_v33, %v8097_v18 }
0x31c6   :  { %v8114_v14 = vmul.f32 1.442695, %v8108_v60 }
0x31c7   :  { %v8100_v59 = vpop.xlane.xlu0 %8099 }
0x31c8   :  { %12250 = vpow2.f32 %v8114_v14  ;;  %v8109_v26 = vsub.f32 %v8089_v10, %v8100_v59  ;;  %v8401_v10 = vpop.permute.xlu1 %8400  ;;  %v9861_v14 = vld [vmem:[%s15839_s6 + $0x70] sm:$0x1f] }
0x31c9   :  { %11722 = vmatpush3.msk.msra.mxu0 %vm928_vm5, %v9861_v14 }
0x31ca   :  { %v8116_v56 = vmul.f32 1.442695, %v8109_v26  ;;  %11763 = vmatprep.subr.mxu0 %v12348_v46 }
0x31cb   :  { %v8103_v8 = vpop.xlane.xlu0 %8102 }
0x31cc   :  { %v8110_v47 = vsub.f32 %v8090_v5, %v8103_v8  ;;  %12252 = vpow2.f32 %v8116_v56 }
0x31ce   :  { %v8118_v44 = vmul.f32 1.442695, %v8110_v47 }
0x31cf   :  { %v8106_v58 = vpop.xlane.xlu0 %8105 }
0x31d0   :  { %12254 = vpow2.f32 %v8118_v44  ;;  %v8111_v17 = vsub.f32 %v8091_v22, %v8106_v58 }
0x31d1   :  { %v12249_v28 = vpop.eup %12248 }
0x31d2   :  { %v8122_v34 = vsel %vm419_vm4, %v12249_v28, 0.0  ;;  %v8120_v21 = vmul.f32 1.442695, %v8111_v17 }
0x31d3   :  { %8123 = vadd.xlane.f32.xlu1 %v8122_v34  ;;  %v8148_v63 = vpop.permute.xlu0 %8147 }
0x31d4   :  { %11705 = vmatpush3.msra.mxu1 %v8148_v63  ;;  %12256 = vpow2.f32 %v8120_v21 }
0x31d5   :  { %v12251_v7 = vpop.eup %12250  ;;  %11738 = vmatprep.subr.mxu1 %v12348_v46 }
0x31d6   :  { %v8125_v31 = vsel %vm419_vm4, %v12251_v7, 0.0 }
0x31d7   :  { %8126 = vadd.xlane.f32.xlu0 %v8125_v31 }
0x31d9   :  { %v12253_v57 = vpop.eup %12252 }
0x31da   :  { %v8128_v32 = vsel %vm419_vm4, %v12253_v57, 0.0 }
0x31dd   :  { %v12255_v39 = vpop.eup %12254 }
0x31de   :  { %v8131_v33 = vsel %vm419_vm4, %v12255_v39, 0.0 }
0x31e1   :  { %v12257_v0 = vpop.eup %12256 }
0x31e2   :  { %v8134_v29 = vsel %vm419_vm4, %v12257_v0, 0.0 }
0x31e4   :  { %8396 = vrot.lane.b32.xlu1 %v15041_v61, %s15890_s29 }
0x31ed   :  { %8398 = vrot.lane.b32.xlu0 %v15043_v4, %s15890_s29 }
0x3208   :  { %8129 = vadd.xlane.f32.xlu1 %v8128_v32 }
0x320c   :  { %8132 = vadd.xlane.f32.xlu0 %v8131_v33 }
0x3219   :  { %8392 = vrot.lane.b32.xlu1 %v15037_v48, %s15890_s29 }
0x3222   :  { %8394 = vrot.lane.b32.xlu0 %v15039_v38, %s15890_s29  ;;  %s12326_s29 = scalar_lea.vmem %s9398_s25, 640 }
0x3223   :  { %p12327_p0 = scmp.ne.s32.totalorder %s9398_s25, %s12326_s29  ;;  %p12332_p2 = scmp.lt.s32.totalorder %s12326_s29, %s12326_s29 }
0x3225   :  { %p12333_p3 = por %p12332_p2, %p12331_p1 }
0x3226   :  { %8382 = vrot.lane.b32.xlu0 %v15037_v48, %s15891_s23 }
0x3227   :  { %p12334_p4 = pnand %p12333_p3, %p12327_p0 }
0x322a   :  { %8386 = vrot.lane.b32.xlu0 %v15041_v61, %s15891_s23 }
0x322e   :  { %8390 = vrot.lane.b32.xlu0 %v15047_v53, %s15891_s23 }
0x323d   :  { %8135 = vadd.xlane.f32.xlu1 %v8134_v29 }
0x324e   :  { %8384 = vrot.lane.b32.xlu1 %v15039_v38, %s15891_s23 }
0x3252   :  { %8388 = vrot.lane.b32.xlu1 %v15043_v4, %s15891_s23 }
0x325c   :  { %v8124_v20 = vpop.xlane.xlu1 %8123 }
0x325d   :  { %12258 = vrcp.f32 %v8124_v20 }
0x3260   :  { %v8127_v49 = vpop.xlane.xlu0 %8126  ;;  %v8397_v45 = vpop.permute.xlu1 %8396 }
0x3261   :  { %12260 = vrcp.f32 %v8127_v49 }
0x3264   :  { %v8399_v62 = vpop.permute.xlu0 %8398 }
0x326a   :  { %v12259_v55 = vpop.eup %12258 }
0x326b   :  { %v8142_v19 = vmul.f32 %v12259_v55, %v12249_v28 }
0x326d   :  { %11707 = vmatmul.mubr.msk.f32.vlgmr.msra.gmra.mxu1 %vm419_vm4, %v8142_v19 }
0x326e   :  { %v12261_v5 = vpop.eup %12260  ;;  %11739 = vmatpush3.xpose.msk.msra.mxu1 %vm298_vm3, %v8401_v10  ;;  %11709 = vmatprep.mubr.msk.f32.mxu1 %vm12349_vm2, %v12348_v46 }
0x326f   :  { %11740 = vmatprep.subr.mxu1 %v12348_v46  ;;  %v8143_v16 = vmul.f32 %v12261_v5, %v12251_v7 }
0x3271   :  { %11710 = vmatmul.mubr.msk.f32.gmra.mxu1 %vm419_vm4, %v8143_v16 }
0x3272   :  { %11741 = vmatpush3.xpose.msk.msra.mxu1 %vm298_vm3, %v8399_v62  ;;  %11712 = vmatprep.mubr.msk.f32.mxu1 %vm12349_vm2, %v12348_v46 }
0x3273   :  { %11742 = vmatprep.subr.mxu1 %v12348_v46 }
0x3276   :  { %11743 = vmatpush3.xpose.msk.msra.mxu1 %vm298_vm3, %v8397_v45 }
0x3277   :  { %11744 = vmatprep.subr.mxu1 %v12348_v46 }
0x3291   :  { %v8130_v15 = vpop.xlane.xlu1 %8129 }
0x3292   :  { %12262 = vrcp.f32 %v8130_v15 }
0x3295   :  { %v8133_v22 = vpop.xlane.xlu0 %8132  ;;  %v8393_v3 = vpop.permute.xlu1 %8392 }
0x3296   :  { %12264 = vrcp.f32 %v8133_v22 }
0x3299   :  { %v8395_v24 = vpop.permute.xlu0 %8394 }
0x329a   :  { %11745 = vmatpush3.xpose.msk.msra.mxu1 %vm298_vm3, %v8395_v24 }
0x329b   :  { %11746 = vmatprep.subr.mxu1 %v12348_v46 }
0x329d   :  { %v8383_v28 = vpop.permute.xlu0 %8382 }
0x329e   :  { %11747 = vmatpush3.xpose.msk.msra.mxu1 %vm298_vm3, %v8393_v3 }
0x329f   :  { %v12263_v40 = vpop.eup %12262  ;;  %11788 = vmatprep.subr.mxu1 %v12348_v46 }
0x32a0   :  { %v8144_v51 = vmul.f32 %v12263_v40, %v12253_v57 }
0x32a1   :  { %v8387_v63 = vpop.permute.xlu0 %8386 }
0x32a2   :  { %11713 = vmatmul.mubr.msk.f32.gmra.mxu1 %vm419_vm4, %v8144_v51 }
0x32a3   :  { %v12265_v18 = vpop.eup %12264  ;;  %11715 = vmatprep.mubr.msk.f32.mxu1 %vm12349_vm2, %v12348_v46 }
0x32a4   :  { %v8145_v60 = vmul.f32 %v12265_v18, %v12255_v39 }
0x32a5   :  { %v8391_v31 = vpop.permute.xlu0 %8390 }
0x32a6   :  { %11716 = vmatmul.mubr.msk.f32.gmra.mxu1 %vm419_vm4, %v8145_v60 }
0x32a7   :  { %11718 = vmatprep.mubr.msk.f32.mxu1 %vm12349_vm2, %v12348_v46 }
0x32c6   :  { %v8136_v59 = vpop.xlane.xlu1 %8135 }
0x32c7   :  { %12266 = vrcp.f32 %v8136_v59 }
0x32ca   :  { %v8385_v34 = vpop.permute.xlu1 %8384 }
0x32ce   :  { %v8389_v7 = vpop.permute.xlu1 %8388 }
0x32d4   :  { %v12267_v8 = vpop.eup %12266 }
0x32d5   :  { %v8146_v58 = vmul.f32 %v12267_v8, %v12257_v0 }
0x32d7   :  { %11719 = vmatmul.mubr.msk.f32.gmra.mxu1 %vm419_vm4, %v8146_v58 }
0x32d8   :  { %11748 = vmatprep.mubr.msk.f32.mxu1 %vm12349_vm2, %v12348_v46 }
0x32db   :  { %11749 = vmatmul.mubr.msk.f32.vlgmr.msra.gmra.mxu1 %vm298_vm3, %v8383_v28 }
0x32dc   :  { %11751 = vmatprep.mubr.msk.f32.mxu1 %vm12349_vm2, %v12348_v46 }
0x32df   :  { %11752 = vmatmul.mubr.msk.f32.gmra.mxu1 %vm298_vm3, %v8385_v34 }
0x32e0   :  { %11754 = vmatprep.mubr.msk.f32.mxu1 %vm12349_vm2, %v12348_v46 }
0x32e3   :  { %11755 = vmatmul.mubr.msk.f32.gmra.mxu1 %vm298_vm3, %v8387_v63  ;;  %v7934_v63 = vadd.f32 %v15420_v37, %v15430_v52 }
0x32e4   :  { %11757 = vmatprep.mubr.msk.f32.mxu1 %vm12349_vm2, %v12348_v46 }
0x32e7   :  { %11758 = vmatmul.mubr.msk.f32.gmra.mxu1 %vm298_vm3, %v8389_v7 }
0x32e8   :  { %11760 = vmatprep.mubr.msk.f32.mxu1 %vm12349_vm2, %v12348_v46 }
0x32eb   :  { %11761 = vmatmul.mubr.msk.f32.gmra.mxu1 %vm298_vm3, %v8391_v31 }
0x32ec   :  { %11790 = vmatprep.mubr.msk.f32.mxu1 %vm12349_vm2, %v12348_v46 }
0x332d   :  { %v8243_v26 = vpop.f32.mrf.mxu1 }
0x332e   :  { %11724 = vmatmul.mubr.msk.f32.vlgmr.msra.gmra.mxu0 %vm298_vm3, %v8243_v26  ;;  %v7939_v26 = vadd.f32 %v15422_v6, %v15432_v9 }
0x332f   :  { %v11708_v56 = vpop.f32.mrf.mxu1  ;;  %11726 = vmatprep.mubr.msk.f32.mxu0 %vm12349_vm2, %v12348_v46 }
0x3331   :  { %v8248_v47 = vpop.f32.mrf.mxu1 }
0x3332   :  { %11727 = vmatmul.mubr.msk.f32.gmra.mxu0 %vm298_vm3, %v8248_v47 }
0x3333   :  { %v11711_v44 = vpop.f32.mrf.mxu1  ;;  %11729 = vmatprep.mubr.msk.f32.mxu0 %vm12349_vm2, %v12348_v46 }
0x3362   :  { %v8253_v57 = vpop.f32.mrf.mxu1 }
0x3363   :  { %11730 = vmatmul.mubr.msk.f32.gmra.mxu0 %vm298_vm3, %v8253_v57 }
0x3364   :  { %v11714_v32 = vpop.f32.mrf.mxu1  ;;  %11732 = vmatprep.mubr.msk.f32.mxu0 %vm12349_vm2, %v12348_v46 }
0x3366   :  { %v8258_v39 = vpop.f32.mrf.mxu1 }
0x3367   :  { %11733 = vmatmul.mubr.msk.f32.gmra.mxu0 %vm298_vm3, %v8258_v39 }
0x3368   :  { %v11717_v33 = vpop.f32.mrf.mxu1  ;;  %11735 = vmatprep.mubr.msk.f32.mxu0 %vm12349_vm2, %v12348_v46 }
0x3397   :  { %v8263_v17 = vpop.f32.mrf.mxu1 }
0x3398   :  { %11736 = vmatmul.mubr.msk.f32.gmra.mxu0 %vm298_vm3, %v8263_v17 }
0x3399   :  { %v11720_v21 = vpop.f32.mrf.mxu1  ;;  %11773 = vmatprep.mubr.msk.f32.mxu0 %vm12349_vm2, %v12348_v46 }
0x339b   :  { %v8488_v0 = vpop.f32.mrf.mxu1 }
0x339c   :  { %v8512_v29 = vmul.f32 0.4472136, %v8488_v0 }
0x339d   :  { %v11750_v10 = vpop.f32.mrf.mxu1 }
0x339e   :  { %v8517_v20 = vadd.f32 %v15144_v12, %v8512_v29 }
0x339f   :  { %v8493_v49 = vpop.f32.mrf.mxu1 }
0x33a0   :  { %v8513_v55 = vmul.f32 0.4472136, %v8493_v49  ;;  %v8522_v19 = vsel %vm419_vm4, %v8517_v20, -inf }
0x33a1   :  { %8523 = vmax.xlane.f32.xlu1 %v8522_v19  ;;  %v11753_v5 = vpop.f32.mrf.mxu1 }
0x33a2   :  { %v8518_v16 = vadd.f32 %v15154_v25, %v8513_v55 }
0x33a3   :  { %v8498_v62 = vpop.f32.mrf.mxu1 }
0x33a4   :  { %v8514_v45 = vmul.f32 0.4472136, %v8498_v62  ;;  %v8525_v15 = vsel %vm419_vm4, %v8518_v16, -inf }
0x33a5   :  { %8526 = vmax.xlane.f32.xlu0 %v8525_v15  ;;  %v11756_v22 = vpop.f32.mrf.mxu1 }
0x33a6   :  { %v8519_v24 = vadd.f32 %v15164_v54, %v8514_v45  ;;  %v7929_v54 = vadd.f32 %v15418_v35, %v15428_v41  ;;  %v7944_v35 = vadd.f32 %v15424_v50, %v15434_v42 }
0x33a7   :  { %v8503_v3 = vpop.f32.mrf.mxu1 }
0x33a8   :  { %v8515_v40 = vmul.f32 0.4472136, %v8503_v3  ;;  %v8528_v12 = vsel %vm419_vm4, %v8519_v24, -inf }
0x33a9   :  { %8529 = vmax.xlane.f32.xlu0 %v8528_v12  ;;  %v11759_v51 = vpop.f32.mrf.mxu1 }
0x33aa   :  { %v8520_v18 = vadd.f32 %v15171_v11, %v8515_v40  ;;  %v7949_v40 = vadd.f32 %v15426_v23, %v15436_v30  ;;  %v9883_v23 = vld [vmem:[%s15839_s6 + $0x78] sm:$0x1f] }
0x33ab   :  { %v8508_v60 = vpop.f32.mrf.mxu1  ;;  %11789 = vmatpush3.msk.msra.mxu1 %vm928_vm5, %v9883_v23 }
0x33ac   :  { %v8516_v14 = vmul.f32 0.4472136, %v8508_v60  ;;  %v8531_v25 = vsel %vm419_vm4, %v8520_v18, -inf  ;;  %11826 = vmatprep.subr.mxu1 %v12348_v46 }
0x33ad   :  { %8532 = vmax.xlane.f32.xlu0 %v8531_v25  ;;  %v11762_v59 = vpop.f32.mrf.mxu1 }
0x33ae   :  { %v8521_v8 = vadd.f32 %v15178_v2, %v8516_v14 }
0x33b0   :  { %v8534_v58 = vsel %vm419_vm4, %v8521_v8, -inf }
0x33b1   :  { %8535 = vmax.xlane.f32.xlu1 %v8534_v58 }
0x33c2   :  { %8585 = vrot.lane.b32.xlu1 %v15047_v53, %s15892_s21 }
0x33ee   :  { %v8353_v28 = vpop.f32.mrf.mxu0 }
0x33ef   :  { %v15550_v34 = vadd.f32 %v8353_v28, %v7929_v54 }
0x33f0   :  { %v11725_v11 = vpop.f32.mrf.mxu0 }
0x33f2   :  { %v8358_v7 = vpop.f32.mrf.mxu0 }
0x33f3   :  { %v15554_v31 = vadd.f32 %v8358_v7, %v7934_v63 }
0x33f4   :  { %v11728_v2 = vpop.f32.mrf.mxu0 }
0x3423   :  { %v8363_v56 = vpop.f32.mrf.mxu0 }
0x3424   :  { %v15558_v47 = vadd.f32 %v8363_v56, %v7939_v26 }
0x3425   :  { %v11731_v53 = vpop.f32.mrf.mxu0 }
0x3427   :  { %v8368_v41 = vpop.f32.mrf.mxu0 }
0x3428   :  { %v15562_v44 = vadd.f32 %v8368_v41, %v7944_v35 }
0x3429   :  { %v11734_v57 = vpop.f32.mrf.mxu0 }
0x342a   :  { %v8524_v32 = vpop.xlane.xlu1 %8523 }
0x342b   :  { %v8537_v37 = vsub.f32 %v8517_v20, %v8524_v32 }
0x342d   :  { %v8542_v52 = vmul.f32 1.442695, %v8537_v37 }
0x342e   :  { %v8527_v39 = vpop.xlane.xlu0 %8526 }
0x342f   :  { %12268 = vpow2.f32 %v8542_v52  ;;  %v8538_v33 = vsub.f32 %v8518_v16, %v8527_v39 }
0x3431   :  { %v8544_v17 = vmul.f32 1.442695, %v8538_v33 }
0x3432   :  { %v8530_v21 = vpop.xlane.xlu0 %8529 }
0x3433   :  { %12270 = vpow2.f32 %v8544_v17  ;;  %v8539_v6 = vsub.f32 %v8519_v24, %v8530_v21 }
0x3435   :  { %v8546_v9 = vmul.f32 1.442695, %v8539_v6 }
0x3436   :  { %v8533_v0 = vpop.xlane.xlu0 %8532 }
0x3437   :  { %12272 = vpow2.f32 %v8546_v9  ;;  %v8540_v29 = vsub.f32 %v8520_v18, %v8533_v0  ;;  %v9891_v9 = vld [vmem:[%s15840_s7 + $0x3] ss:$0 sm:$0xff] }
0x3439   :  { %v8548_v10 = vmul.f32 1.442695, %v8540_v29 }
0x343a   :  { %v8536_v50 = vpop.xlane.xlu1 %8535 }
0x343b   :  { %12274 = vpow2.f32 %v8548_v10  ;;  %v8541_v42 = vsub.f32 %v8521_v8, %v8536_v50 }
0x343c   :  { %v12269_v49 = vpop.eup %12268 }
0x343d   :  { %v8550_v55 = vmul.f32 1.442695, %v8541_v42  ;;  %v8552_v20 = vsel %vm419_vm4, %v12269_v49, 0.0 }
0x343e   :  { %8553 = vadd.xlane.f32.xlu0 %v8552_v20  ;;  %v8586_v19 = vpop.permute.xlu1 %8585 }
0x343f   :  { %12276 = vpow2.f32 %v8550_v55  ;;  %11764 = vmatpush3.msra.mxu0 %v8586_v19 }
0x3440   :  { %v12271_v5 = vpop.eup %12270  ;;  %11765 = vmatprep.subr.mxu0 %v12348_v46 }
0x3441   :  { %v8555_v16 = vsel %vm419_vm4, %v12271_v5, 0.0 }
0x3442   :  { %8556 = vadd.xlane.f32.xlu1 %v8555_v16 }
0x3444   :  { %v12273_v62 = vpop.eup %12272 }
0x3445   :  { %v8558_v45 = vsel %vm419_vm4, %v12273_v62, 0.0 }
0x3446   :  { %8559 = vadd.xlane.f32.xlu0 %v8558_v45 }
0x3448   :  { %v12275_v15 = vpop.eup %12274 }
0x3449   :  { %v8561_v22 = vsel %vm419_vm4, %v12275_v15, 0.0 }
0x344a   :  { %8562 = vadd.xlane.f32.xlu1 %v8561_v22 }
0x344c   :  { %v12277_v24 = vpop.eup %12276 }
0x344d   :  { %v8564_v3 = vsel %vm419_vm4, %v12277_v24, 0.0 }
0x344e   :  { %8565 = vadd.xlane.f32.xlu0 %v8564_v3 }
0x3458   :  { %v8373_v12 = vpop.f32.mrf.mxu0 }
0x3459   :  { %v15572_v51 = vadd.f32 %v8373_v12, %v7949_v40 }
0x345a   :  { %v11737_v18 = vpop.f32.mrf.mxu0 }
0x345b   :  { %8581 = vrot.lane.b32.xlu1 %v15041_v61, %s15892_s21 }
0x345f   :  { %8579 = vrot.lane.b32.xlu1 %v15039_v38, %s15892_s21 }
0x3463   :  { %8577 = vrot.lane.b32.xlu1 %v15037_v48, %s15892_s21 }
0x3464   :  { %8583 = vrot.lane.b32.xlu0 %v15043_v4, %s15892_s21 }
0x34c7   :  { %v8554_v30 = vpop.xlane.xlu0 %8553 }
0x34c8   :  { %12278 = vrcp.f32 %v8554_v30 }
0x34cb   :  { %v8557_v60 = vpop.xlane.xlu1 %8556 }
0x34cc   :  { %12280 = vrcp.f32 %v8557_v60 }
0x34cf   :  { %v8560_v61 = vpop.xlane.xlu0 %8559 }
0x34d0   :  { %12282 = vrcp.f32 %v8560_v61 }
0x34d3   :  { %v8563_v14 = vpop.xlane.xlu1 %8562 }
0x34d4   :  { %12284 = vrcp.f32 %v8563_v14 }
0x34d5   :  { %v12279_v4 = vpop.eup %12278 }
0x34d6   :  { %v8572_v8 = vmul.f32 %v12279_v4, %v12269_v49 }
0x34d7   :  { %v8582_v38 = vpop.permute.xlu1 %8581  ;;  %v8566_v25 = vpop.xlane.xlu0 %8565 }
0x34d8   :  { %12286 = vrcp.f32 %v8566_v25 }
0x34d9   :  { %v12281_v54 = vpop.eup %12280 }
0x34da   :  { %v8573_v28 = vmul.f32 %v12281_v54, %v12271_v5 }
0x34db   :  { %v8580_v48 = vpop.permute.xlu1 %8579  ;;  %v8584_v59 = vpop.permute.xlu0 %8583 }
0x34dc   :  { %11766 = vmatpush3.msra.mxu0 %v8584_v59 }
0x34dd   :  { %11767 = vmatprep.subr.mxu0 %v12348_v46  ;;  %v12283_v11 = vpop.eup %12282 }
0x34de   :  { %11768 = vmatpush3.msra.mxu0 %v8582_v38  ;;  %v8574_v63 = vmul.f32 %v12283_v11, %v12273_v62 }
0x34df   :  { %11769 = vmatprep.subr.mxu0 %v12348_v46  ;;  %v8578_v58 = vpop.permute.xlu1 %8577 }
0x34e0   :  { %11770 = vmatpush3.msra.mxu0 %v8580_v48 }
0x34e1   :  { %11771 = vmatprep.subr.mxu0 %v12348_v46  ;;  %v12285_v7 = vpop.eup %12284 }
0x34e2   :  { %11772 = vmatpush3.msra.mxu0 %v8578_v58  ;;  %v8575_v2 = vmul.f32 %v12285_v7, %v12275_v15 }
0x34e3   :  { %11774 = vmatmul.mubr.msk.f32.vlgmr.msra.gmra.mxu0 %vm419_vm4, %v8572_v8  ;;  %11805 = vmatprep.subr.mxu0 %v12348_v46 }
0x34e4   :  { %11776 = vmatprep.mubr.msk.f32.mxu0 %vm12349_vm2, %v12348_v46 }
0x34e5   :  { %v12287_v26 = vpop.eup %12286 }
0x34e6   :  { %v8576_v56 = vmul.f32 %v12287_v26, %v12277_v24 }
0x34e7   :  { %11777 = vmatmul.mubr.msk.f32.gmra.mxu0 %vm419_vm4, %v8573_v28 }
0x34e8   :  { %11779 = vmatprep.mubr.msk.f32.mxu0 %vm12349_vm2, %v12348_v46 }
0x34eb   :  { %11780 = vmatmul.mubr.msk.f32.gmra.mxu0 %vm419_vm4, %v8574_v63 }
0x34ec   :  { %11782 = vmatprep.mubr.msk.f32.mxu0 %vm12349_vm2, %v12348_v46 }
0x34ef   :  { %11783 = vmatmul.mubr.msk.f32.gmra.mxu0 %vm419_vm4, %v8575_v2 }
0x34f0   :  { %11785 = vmatprep.mubr.msk.f32.mxu0 %vm12349_vm2, %v12348_v46 }
0x34f3   :  { %11786 = vmatmul.mubr.msk.f32.gmra.mxu0 %vm419_vm4, %v8576_v56 }
0x34f4   :  { %11811 = vmatprep.mubr.msk.f32.mxu0 %vm12349_vm2, %v12348_v46 }
0x35a3   :  { %v8673_v53 = vpop.f32.mrf.mxu0 }
0x35a4   :  { %11791 = vmatmul.mubr.msk.f32.vlgmr.msra.gmra.mxu1 %vm298_vm3, %v8673_v53 }
0x35a5   :  { %v11775_v35 = vpop.f32.mrf.mxu0  ;;  %11793 = vmatprep.mubr.msk.f32.mxu1 %vm12349_vm2, %v12348_v46 }
0x35a7   :  { %v8678_v41 = vpop.f32.mrf.mxu0 }
0x35a8   :  { %11794 = vmatmul.mubr.msk.f32.gmra.mxu1 %vm298_vm3, %v8678_v41 }
0x35a9   :  { %v11778_v57 = vpop.f32.mrf.mxu0  ;;  %11796 = vmatprep.mubr.msk.f32.mxu1 %vm12349_vm2, %v12348_v46 }
0x35aa   :  { %v9898_v57 = vld [vmem:[%s15843_s10 + $0x58] sm:$0xf] }
0x35ab   :  { %v8683_v32 = vpop.f32.mrf.mxu0  ;;  %11806 = vmatpush3.msk.msra.mxu0 %vm189_vm1, %v9898_v57 }
0x35ac   :  { %11797 = vmatmul.mubr.msk.f32.gmra.mxu1 %vm298_vm3, %v8683_v32  ;;  %11807 = vmatprep.subr.mxu0 %v12348_v46  ;;  %v9897_v32 = vld [vmem:[%s15843_s10 + $0x50] sm:$0xff] }
0x35ad   :  { %v11781_v37 = vpop.f32.mrf.mxu0  ;;  %11799 = vmatprep.mubr.msk.f32.mxu1 %vm12349_vm2, %v12348_v46  ;;  %11808 = vmatpush3.msra.mxu0 %v9897_v32 }
0x35ae   :  { %11809 = vmatprep.subr.mxu0 %v12348_v46  ;;  %v9896_v37 = vld [vmem:[%s15843_s10 + $0x48] sm:$0xff] }
0x35af   :  { %v8688_v52 = vpop.f32.mrf.mxu0  ;;  %11810 = vmatpush3.msra.mxu0 %v9896_v37 }
0x35b0   :  { %11800 = vmatmul.mubr.msk.f32.gmra.mxu1 %vm298_vm3, %v8688_v52  ;;  %11861 = vmatprep.subr.mxu0 %v12348_v46  ;;  %v9916_v52 = vld [vmem:[%s15845_s12 + $0x138] sm:$0xff] }
0x35b1   :  { %v11784_v39 = vpop.f32.mrf.mxu0  ;;  %11802 = vmatprep.mubr.msk.f32.mxu1 %vm12349_vm2, %v12348_v46  ;;  %11827 = vmatpush3.msra.mxu1 %v9916_v52 }
0x35b2   :  { %v9915_v39 = vld [vmem:[%s15845_s12 + $0x130] sm:$0xff]  ;;  %11828 = vmatprep.subr.mxu1 %v12348_v46 }
0x35b3   :  { %v8693_v33 = vpop.f32.mrf.mxu0  ;;  %11829 = vmatpush3.msra.mxu1 %v9915_v39 }
0x35b4   :  { %11803 = vmatmul.mubr.msk.f32.gmra.mxu1 %vm298_vm3, %v8693_v33  ;;  %v9914_v33 = vld [vmem:[%s15845_s12 + $0x128] sm:$0xff]  ;;  %11830 = vmatprep.subr.mxu1 %v12348_v46 }
0x35b5   :  { %v11787_v17 = vpop.f32.mrf.mxu0  ;;  %11846 = vmatprep.mubr.msk.f32.mxu1 %vm12349_vm2, %v12348_v46  ;;  %11831 = vmatpush3.msra.mxu1 %v9914_v33 }
0x35b6   :  { %v9913_v17 = vld [vmem:[%s15845_s12 + $0x120] sm:$0xff]  ;;  %11832 = vmatprep.subr.mxu1 %v12348_v46 }
0x35b7   :  { %11833 = vmatpush3.msra.mxu1 %v9913_v17 }
0x35b8   :  { %11834 = vmatprep.subr.mxu1 %v12348_v46 }
0x3664   :  { %v8783_v21 = vpop.f32.mrf.mxu1 }
0x3665   :  { %v8807_v6 = vadd.f32 %v8783_v21, %v15550_v34  ;;  %v9912_v21 = vld [vmem:[%s15845_s12 + $0x118] sm:$0xff] }
0x3666   :  { %v11792_v0 = vpop.f32.mrf.mxu1  ;;  %11835 = vmatpush3.msra.mxu1 %v9912_v21 }
0x3667   :  { %v8812_v29 = vadd.f32 %v8807_v6, %v14969_v36  ;;  %v9911_v6 = vld [vmem:[%s15845_s12 + $0x110] sm:$0xff]  ;;  %11836 = vmatprep.subr.mxu1 %v12348_v46 }
0x3668   :  { %v8788_v10 = vpop.f32.mrf.mxu1  ;;  %11837 = vmatpush3.msra.mxu1 %v9911_v6 }
0x3669   :  { %v15626_v50 = vadd.f32 %v9891_v9, %v8812_v29  ;;  %v8808_v42 = vadd.f32 %v8788_v10, %v15554_v31  ;;  %11838 = vmatprep.subr.mxu1 %v12348_v46 }
0x366a   :  { %v11795_v49 = vpop.f32.mrf.mxu1 }
0x366b   :  { %v8813_v55 = vadd.f32 %v8808_v42, %v14974_v13  ;;  %v8834_v20 = vsel %vm82_vm0, %v15626_v50, 0.0 }
0x366c   :  { %8835 = vadd.xlane.f32.xlu0 %v8834_v20  ;;  %v8793_v34 = vpop.f32.mrf.mxu1 }
0x366d   :  { %v15632_v19 = vadd.f32 %v9891_v9, %v8813_v55  ;;  %v8809_v5 = vadd.f32 %v8793_v34, %v15558_v47 }
0x366e   :  { %v11798_v16 = vpop.f32.mrf.mxu1 }
0x366f   :  { %v8814_v36 = vadd.f32 %v8809_v5, %v14979_v27  ;;  %v8837_v62 = vsel %vm82_vm0, %v15632_v19, 0.0 }
0x3670   :  { %8838 = vadd.xlane.f32.xlu1 %v8837_v62  ;;  %v8798_v31 = vpop.f32.mrf.mxu1 }
0x3671   :  { %v15638_v45 = vadd.f32 %v9891_v9, %v8814_v36  ;;  %v8810_v13 = vadd.f32 %v8798_v31, %v15562_v44 }
0x3672   :  { %v11801_v15 = vpop.f32.mrf.mxu1 }
0x3673   :  { %v8815_v22 = vadd.f32 %v8810_v13, %v14984_v43  ;;  %v8840_v24 = vsel %vm82_vm0, %v15638_v45, 0.0 }
0x3674   :  { %8841 = vadd.xlane.f32.xlu0 %v8840_v24  ;;  %v8803_v47 = vpop.f32.mrf.mxu1 }
0x3675   :  { %v15644_v3 = vadd.f32 %v9891_v9, %v8815_v22  ;;  %v8811_v27 = vadd.f32 %v8803_v47, %v15572_v51  ;;  %v9894_v22 = vld [vmem:[%s15841_s8 + $0x3] ss:$0 sm:$0xff] }
0x3676   :  { %v11804_v40 = vpop.f32.mrf.mxu1 }
0x3677   :  { %v8816_v12 = vadd.f32 %v8811_v27, %v14989_v1  ;;  %v8843_v18 = vsel %vm82_vm0, %v15644_v3, 0.0  ;;  %v9895_v27 = vld [vmem:[%s15842_s9 + $0x3] ss:$0 sm:$0xff] }
0x3678   :  { %8844 = vadd.xlane.f32.xlu0 %v8843_v18 }
0x3679   :  { %v15650_v44 = vadd.f32 %v9891_v9, %v8816_v12  ;;  %v9910_v9 = vld [vmem:[%s15845_s12 + $0x108] sm:$0xff] }
0x367a   :  { %11839 = vmatpush3.msra.mxu1 %v9910_v9 }
0x367b   :  { %v8846_v43 = vsel %vm82_vm0, %v15650_v44, 0.0  ;;  %11840 = vmatprep.subr.mxu1 %v12348_v46 }
0x367c   :  { %8847 = vadd.xlane.f32.xlu0 %v8846_v43 }
0x36f5   :  { %v8836_v23 = vpop.xlane.xlu0 %8835 }
0x36f6   :  { %v8849_v30 = vmul.f32 0.05, %v8836_v23 }
0x36f8   :  { %v15655_v60 = vsub.f32 %v15626_v50, %v8849_v30 }
0x36f9   :  { %v8839_v61 = vpop.xlane.xlu1 %8838 }
0x36fa   :  { %v8850_v51 = vmul.f32 0.05, %v8839_v61  ;;  %v8859_v1 = vmul.f32 %v15655_v60, %v15655_v60 }
0x36fc   :  { %v15660_v14 = vsub.f32 %v15632_v19, %v8850_v51  ;;  %v8864_v38 = vsel %vm82_vm0, %v8859_v1, 0.0 }
0x36fd   :  { %8865 = vadd.xlane.f32.xlu1 %v8864_v38  ;;  %v8842_v25 = vpop.xlane.xlu0 %8841 }
0x36fe   :  { %v8851_v48 = vmul.f32 0.05, %v8842_v25  ;;  %v8860_v59 = vmul.f32 %v15660_v14, %v15660_v14 }
0x3700   :  { %v15666_v4 = vsub.f32 %v15638_v45, %v8851_v48  ;;  %v8867_v8 = vsel %vm82_vm0, %v8860_v59, 0.0 }
0x3701   :  { %v8845_v58 = vpop.xlane.xlu0 %8844  ;;  %8868 = vadd.xlane.f32.xlu0 %v8867_v8 }
0x3702   :  { %v8852_v54 = vmul.f32 0.05, %v8845_v58  ;;  %v8861_v28 = vmul.f32 %v15666_v4, %v15666_v4 }
0x3704   :  { %v15672_v11 = vsub.f32 %v15644_v3, %v8852_v54  ;;  %v8870_v63 = vsel %vm82_vm0, %v8861_v28, 0.0  ;;  %v9909_v54 = vld [vmem:[%s15845_s12 + $0x100] sm:$0xff]  ;;  %v9908_v28 = vld [vmem:[%s15845_s12 + $0xf8] sm:$0xff] }
0x3705   :  { %8871 = vadd.xlane.f32.xlu1 %v8870_v63  ;;  %v8848_v7 = vpop.xlane.xlu0 %8847  ;;  %11841 = vmatpush3.msra.mxu1 %v9909_v54  ;;  %v9900_v63 = vld [vmem:[%s15844_s11 + $0x3] ss:$0 sm:$0xff] }
0x3706   :  { %v8853_v2 = vmul.f32 0.05, %v8848_v7  ;;  %v8862_v26 = vmul.f32 %v15672_v11, %v15672_v11  ;;  %11842 = vmatprep.subr.mxu1 %v12348_v46 }
0x3707   :  { %11843 = vmatpush3.msra.mxu1 %v9908_v28 }
0x3708   :  { %v15678_v56 = vsub.f32 %v15650_v44, %v8853_v2  ;;  %v8873_v53 = vsel %vm82_vm0, %v8862_v26, 0.0  ;;  %11844 = vmatprep.subr.mxu1 %v12348_v46 }
0x3709   :  { %8874 = vadd.xlane.f32.xlu0 %v8873_v53 }
0x370a   :  { %v8863_v35 = vmul.f32 %v15678_v56, %v15678_v56 }
0x370c   :  { %v8876_v41 = vsel %vm82_vm0, %v8863_v35, 0.0 }
0x370d   :  { %8877 = vadd.xlane.f32.xlu1 %v8876_v41 }
0x3786   :  { %v8866_v0 = vpop.xlane.xlu1 %8865 }
0x3787   :  { %v8879_v29 = vmul.f32 0.05, %v8866_v0 }
0x3789   :  { %v8884_v10 = vadd.f32 1e-05, %v8879_v29 }
0x378a   :  { %v8869_v42 = vpop.xlane.xlu0 %8868 }
0x378b   :  { %12288 = vrsqrt.f32 %v8884_v10  ;;  %v8880_v49 = vmul.f32 0.05, %v8869_v42 }
0x378d   :  { %v8885_v55 = vadd.f32 1e-05, %v8880_v49  ;;  %v9923_v49 = vld [vmem:[%s15888_s20 + $0x3] ss:$0 sm:$0xff] }
0x378e   :  { %v8872_v20 = vpop.xlane.xlu1 %8871 }
0x378f   :  { %12290 = vrsqrt.f32 %v8885_v55  ;;  %v8881_v34 = vmul.f32 0.05, %v8872_v20 }
0x3791   :  { %v8886_v5 = vadd.f32 1e-05, %v8881_v34 }
0x3792   :  { %v8875_v16 = vpop.xlane.xlu0 %8874 }
0x3793   :  { %12292 = vrsqrt.f32 %v8886_v5  ;;  %v8882_v36 = vmul.f32 0.05, %v8875_v16 }
0x3795   :  { %v8887_v62 = vadd.f32 1e-05, %v8882_v36 }
0x3796   :  { %v8878_v31 = vpop.xlane.xlu1 %8877 }
0x3797   :  { %12294 = vrsqrt.f32 %v8887_v62  ;;  %v8883_v13 = vmul.f32 0.05, %v8878_v31 }
0x3798   :  { %v12289_v15 = vpop.eup %12288 }
0x3799   :  { %v8894_v24 = vmul.f32 %v12289_v15, %v15655_v60  ;;  %v8888_v47 = vadd.f32 1e-05, %v8883_v13 }
0x379b   :  { %v8905_v40 = vmul.f32 %v9894_v22, %v8894_v24  ;;  %12296 = vrsqrt.f32 %v8888_v47 }
0x379c   :  { %v12291_v12 = vpop.eup %12290 }
0x379d   :  { %v8916_v18 = vadd.f32 %v9895_v27, %v8905_v40  ;;  %v8895_v43 = vmul.f32 %v12291_v12, %v15660_v14 }
0x379f   :  { %11812 = vmatmul.mubr.msk.f32.vlgmr.msra.gmra.mxu0 %vm82_vm0, %v8916_v18  ;;  %v8906_v23 = vmul.f32 %v9894_v22, %v8895_v43 }
0x37a0   :  { %v12293_v30 = vpop.eup %12292  ;;  %11814 = vmatprep.mubr.msk.f32.mxu0 %vm12349_vm2, %v12348_v46 }
0x37a1   :  { %v8896_v60 = vmul.f32 %v12293_v30, %v15666_v4  ;;  %v8917_v61 = vadd.f32 %v9895_v27, %v8906_v23 }
0x37a3   :  { %11815 = vmatmul.mubr.msk.f32.gmra.mxu0 %vm82_vm0, %v8917_v61  ;;  %v8907_v51 = vmul.f32 %v9894_v22, %v8896_v60 }
0x37a4   :  { %v12295_v1 = vpop.eup %12294  ;;  %11817 = vmatprep.mubr.msk.f32.mxu0 %vm12349_vm2, %v12348_v46 }
0x37a5   :  { %v8897_v38 = vmul.f32 %v12295_v1, %v15672_v11  ;;  %v8918_v14 = vadd.f32 %v9895_v27, %v8907_v51  ;;  %v9907_v11 = vld [vmem:[%s15845_s12 + $0xf0] sm:$0xff] }
0x37a6   :  { %11845 = vmatpush3.msra.mxu1 %v9907_v11 }
0x37a7   :  { %11818 = vmatmul.mubr.msk.f32.gmra.mxu0 %vm82_vm0, %v8918_v14  ;;  %v8908_v25 = vmul.f32 %v9894_v22, %v8897_v38 }
0x37a8   :  { %v12297_v48 = vpop.eup %12296  ;;  %11820 = vmatprep.mubr.msk.f32.mxu0 %vm12349_vm2, %v12348_v46 }
0x37a9   :  { %v8898_v59 = vmul.f32 %v12297_v48, %v15678_v56  ;;  %v8919_v4 = vadd.f32 %v9895_v27, %v8908_v25 }
0x37ab   :  { %11821 = vmatmul.mubr.msk.f32.gmra.mxu0 %vm82_vm0, %v8919_v4  ;;  %v8909_v8 = vmul.f32 %v9894_v22, %v8898_v59 }
0x37ac   :  { %11823 = vmatprep.mubr.msk.f32.mxu0 %vm12349_vm2, %v12348_v46 }
0x37ad   :  { %v8920_v58 = vadd.f32 %v9895_v27, %v8909_v8 }
0x37af   :  { %11824 = vmatmul.mubr.msk.f32.gmra.mxu0 %vm82_vm0, %v8920_v58 }
0x37b0   :  { %11867 = vmatprep.mubr.msk.f32.mxu0 %vm12349_vm2, %v12348_v46 }
0x385f   :  { %v9017_v7 = vpop.f32.mrf.mxu0 }
0x3860   :  { %v9018_v2 = vadd.f32 %v9900_v63, %v9017_v7 }
0x3861   :  { %v11813_v26 = vpop.f32.mrf.mxu0 }
0x3862   :  { %v9041_v56 = vmax.f32 %v9018_v2, 0.0 }
0x3863   :  { %v9022_v53 = vpop.f32.mrf.mxu0 }
0x3864   :  { %v9023_v35 = vadd.f32 %v9900_v63, %v9022_v53  ;;  %11847 = vmatmul.mubr.msk.f32.vlgmr.msra.gmra.mxu1 %vm2229_vm6, %v9041_v56 }
0x3865   :  { %v11816_v41 = vpop.f32.mrf.mxu0  ;;  %11849 = vmatprep.mubr.msk.f32.mxu1 %vm12349_vm2, %v12348_v46 }
0x3866   :  { %v9042_v57 = vmax.f32 %v9023_v35, 0.0 }
0x3867   :  { %v9027_v32 = vpop.f32.mrf.mxu0 }
0x3868   :  { %v9028_v37 = vadd.f32 %v9900_v63, %v9027_v32  ;;  %11850 = vmatmul.mubr.msk.f32.gmra.mxu1 %vm2229_vm6, %v9042_v57  ;;  %v9271_v32 = vld [vmem:[%s15849_s16 + $0x10] sm:$0xf] }
0x3869   :  { %v11819_v52 = vpop.f32.mrf.mxu0  ;;  %11852 = vmatprep.mubr.msk.f32.mxu1 %vm12349_vm2, %v12348_v46  ;;  %11862 = vmatpush3.msk.msra.mxu0 %vm189_vm1, %v9271_v32 }
0x386a   :  { %v9043_v39 = vmax.f32 %v9028_v37, 0.0  ;;  %11863 = vmatprep.subr.mxu0 %v12348_v46  ;;  %v9270_v37 = vld [vmem:[%s15849_s16 + $0x8] sm:$0xff]  ;;  %v9269_v52 = vld [vmem:[%s15849_s16] sm:$0xff] }
0x386b   :  { %v9032_v33 = vpop.f32.mrf.mxu0  ;;  %11864 = vmatpush3.msra.mxu0 %v9270_v37 }
0x386c   :  { %v9033_v17 = vadd.f32 %v9900_v63, %v9032_v33  ;;  %11853 = vmatmul.mubr.msk.f32.gmra.mxu1 %vm2229_vm6, %v9043_v39  ;;  %11865 = vmatprep.subr.mxu0 %v12348_v46 }
0x386d   :  { %v11822_v21 = vpop.f32.mrf.mxu0  ;;  %11855 = vmatprep.mubr.msk.f32.mxu1 %vm12349_vm2, %v12348_v46  ;;  %11866 = vmatpush3.msra.mxu0 %v9269_v52 }
0x386e   :  { %v9044_v6 = vmax.f32 %v9033_v17, 0.0 }
0x386f   :  { %v9037_v9 = vpop.f32.mrf.mxu0 }
0x3870   :  { %v9038_v0 = vadd.f32 %v9900_v63, %v9037_v9  ;;  %11856 = vmatmul.mubr.msk.f32.gmra.mxu1 %vm2229_vm6, %v9044_v6 }
0x3871   :  { %v11825_v29 = vpop.f32.mrf.mxu0  ;;  %11858 = vmatprep.mubr.msk.f32.mxu1 %vm12349_vm2, %v12348_v46 }
0x3872   :  { %v9045_v10 = vmax.f32 %v9038_v0, 0.0 }
0x3874   :  { %11859 = vmatmul.mubr.msk.f32.gmra.mxu1 %vm2229_vm6, %v9045_v10 }
0x3924   :  { %v9138_v42 = vpop.f32.mrf.mxu1 }
0x3925   :  { %v9162_v55 = vadd.f32 %v9138_v42, %v15626_v50 }
0x3926   :  { %v11848_v20 = vpop.f32.mrf.mxu1 }
0x3927   :  { %v9175_v34 = vadd.f32 %v9923_v49, %v9162_v55 }
0x3928   :  { %v9143_v5 = vpop.f32.mrf.mxu1 }
0x3929   :  { %v9163_v16 = vadd.f32 %v9143_v5, %v15632_v19  ;;  %v9182_v36 = vsel %vm82_vm0, %v9175_v34, 0.0 }
0x392a   :  { %9183 = vadd.xlane.f32.xlu0 %v9182_v36  ;;  %v11851_v62 = vpop.f32.mrf.mxu1 }
0x392b   :  { %v9176_v31 = vadd.f32 %v9923_v49, %v9163_v16  ;;  %v9924_v16 = vld [vmem:[%s15847_s14] ss:$0 sm:$0xff] }
0x392c   :  { %v9148_v13 = vpop.f32.mrf.mxu1 }
0x392d   :  { %v9164_v15 = vadd.f32 %v9148_v13, %v15638_v45  ;;  %v9185_v22 = vsel %vm82_vm0, %v9176_v31, 0.0 }
0x392e   :  { %9186 = vadd.xlane.f32.xlu1 %v9185_v22  ;;  %v11854_v24 = vpop.f32.mrf.mxu1 }
0x392f   :  { %v9177_v47 = vadd.f32 %v9923_v49, %v9164_v15 }
0x3930   :  { %v9153_v27 = vpop.f32.mrf.mxu1 }
0x3931   :  { %v9165_v50 = vadd.f32 %v9153_v27, %v15644_v3  ;;  %v9188_v40 = vsel %vm82_vm0, %v9177_v47, 0.0 }
0x3932   :  { %9189 = vadd.xlane.f32.xlu0 %v9188_v40  ;;  %v11857_v19 = vpop.f32.mrf.mxu1 }
0x3933   :  { %v9178_v12 = vadd.f32 %v9923_v49, %v9165_v50 }
0x3934   :  { %v9158_v18 = vpop.f32.mrf.mxu1 }
0x3935   :  { %v9166_v43 = vadd.f32 %v9158_v18, %v15650_v44  ;;  %v9191_v23 = vsel %vm82_vm0, %v9178_v12, 0.0 }
0x3936   :  { %9192 = vadd.xlane.f32.xlu1 %v9191_v23  ;;  %v11860_v45 = vpop.f32.mrf.mxu1 }
0x3937   :  { %v9179_v30 = vadd.f32 %v9923_v49, %v9166_v43 }
0x3939   :  { %v9194_v60 = vsel %vm82_vm0, %v9179_v30, 0.0 }
0x393a   :  { %9195 = vadd.xlane.f32.xlu0 %v9194_v60 }
0x39b3   :  { %v9184_v61 = vpop.xlane.xlu0 %9183 }
0x39b4   :  { %v9197_v51 = vmul.f32 0.05, %v9184_v61 }
0x39b6   :  { %v9202_v1 = vsub.f32 %v9175_v34, %v9197_v51 }
0x39b7   :  { %v9187_v3 = vpop.xlane.xlu1 %9186 }
0x39b8   :  { %v9198_v38 = vmul.f32 0.05, %v9187_v3  ;;  %v9207_v14 = vmul.f32 %v9202_v1, %v9202_v1 }
0x39ba   :  { %v9203_v25 = vsub.f32 %v9176_v31, %v9198_v38  ;;  %v9212_v48 = vsel %vm82_vm0, %v9207_v14, 0.0  ;;  %v9925_v31 = vld [vmem:[%s15900_s13] ss:$0 sm:$0xff] }
0x39bb   :  { %v9190_v59 = vpop.xlane.xlu0 %9189  ;;  %9213 = vadd.xlane.f32.xlu1 %v9212_v48 }
0x39bc   :  { %v9199_v44 = vmul.f32 0.05, %v9190_v59  ;;  %v9208_v4 = vmul.f32 %v9203_v25, %v9203_v25 }
0x39be   :  { %v9204_v8 = vsub.f32 %v9177_v47, %v9199_v44  ;;  %v9215_v58 = vsel %vm82_vm0, %v9208_v4, 0.0 }
0x39bf   :  { %v9193_v54 = vpop.xlane.xlu1 %9192  ;;  %9216 = vadd.xlane.f32.xlu0 %v9215_v58 }
0x39c0   :  { %v9200_v28 = vmul.f32 0.05, %v9193_v54  ;;  %v9209_v11 = vmul.f32 %v9204_v8, %v9204_v8 }
0x39c2   :  { %v9205_v63 = vsub.f32 %v9178_v12, %v9200_v28  ;;  %v9218_v7 = vsel %vm82_vm0, %v9209_v11, 0.0 }
0x39c3   :  { %9219 = vadd.xlane.f32.xlu1 %v9218_v7  ;;  %v9196_v2 = vpop.xlane.xlu0 %9195 }
0x39c4   :  { %v9201_v26 = vmul.f32 0.05, %v9196_v2  ;;  %v9210_v56 = vmul.f32 %v9205_v63, %v9205_v63 }
0x39c6   :  { %v9206_v53 = vsub.f32 %v9179_v30, %v9201_v26  ;;  %v9221_v35 = vsel %vm82_vm0, %v9210_v56, 0.0 }
0x39c7   :  { %9222 = vadd.xlane.f32.xlu0 %v9221_v35 }
0x39c8   :  { %v9211_v41 = vmul.f32 %v9206_v53, %v9206_v53 }
0x39ca   :  { %v9224_v57 = vsel %vm82_vm0, %v9211_v41, 0.0 }
0x39cb   :  { %9225 = vadd.xlane.f32.xlu1 %v9224_v57 }
0x3a44   :  { %v9214_v39 = vpop.xlane.xlu1 %9213 }
0x3a45   :  { %v9227_v33 = vmul.f32 0.05, %v9214_v39 }
0x3a47   :  { %v9232_v17 = vadd.f32 1e-05, %v9227_v33 }
0x3a48   :  { %v9217_v21 = vpop.xlane.xlu0 %9216 }
0x3a49   :  { %12298 = vrsqrt.f32 %v9232_v17  ;;  %v9228_v6 = vmul.f32 0.05, %v9217_v21 }
0x3a4b   :  { %v9233_v9 = vadd.f32 1e-05, %v9228_v6 }
0x3a4c   :  { %v9220_v0 = vpop.xlane.xlu1 %9219 }
0x3a4d   :  { %12300 = vrsqrt.f32 %v9233_v9  ;;  %v9229_v29 = vmul.f32 0.05, %v9220_v0 }
0x3a4f   :  { %v9234_v10 = vadd.f32 1e-05, %v9229_v29 }
0x3a50   :  { %v9223_v42 = vpop.xlane.xlu0 %9222 }
0x3a51   :  { %12302 = vrsqrt.f32 %v9234_v10  ;;  %v9230_v49 = vmul.f32 0.05, %v9223_v42 }
0x3a53   :  { %v9235_v55 = vadd.f32 1e-05, %v9230_v49 }
0x3a54   :  { %v9226_v20 = vpop.xlane.xlu1 %9225 }
0x3a55   :  { %12304 = vrsqrt.f32 %v9235_v55  ;;  %v9231_v34 = vmul.f32 0.05, %v9226_v20 }
0x3a56   :  { %v12299_v5 = vpop.eup %12298 }
0x3a57   :  { %v9242_v36 = vmul.f32 %v12299_v5, %v9202_v1  ;;  %v9236_v62 = vadd.f32 1e-05, %v9231_v34  ;;  %v9926_v1 = vld [vmem:[%s15901_s1] ss:$0 sm:$0xff] }
0x3a59   :  { %v9253_v13 = vmul.f32 %v9924_v16, %v9242_v36  ;;  %12306 = vrsqrt.f32 %v9236_v62 }
0x3a5a   :  { %v12301_v15 = vpop.eup %12300 }
0x3a5b   :  { %v9264_v22 = vadd.f32 %v9925_v31, %v9253_v13  ;;  %v9243_v24 = vmul.f32 %v12301_v15, %v9203_v25 }
0x3a5d   :  { %11868 = vmatmul.mubr.msk.f32.vlgmr.msra.gmra.mxu0 %vm82_vm0, %v9264_v22  ;;  %v9254_v47 = vmul.f32 %v9924_v16, %v9243_v24 }
0x3a5e   :  { %v12303_v27 = vpop.eup %12302  ;;  %11870 = vmatprep.mubr.msk.f32.mxu0 %vm12349_vm2, %v12348_v46 }
0x3a5f   :  { %v9244_v50 = vmul.f32 %v12303_v27, %v9204_v8  ;;  %v9265_v40 = vadd.f32 %v9925_v31, %v9254_v47 }
0x3a61   :  { %11871 = vmatmul.mubr.msk.f32.gmra.mxu0 %vm82_vm0, %v9265_v40  ;;  %v9255_v19 = vmul.f32 %v9924_v16, %v9244_v50 }
0x3a62   :  { %v12305_v12 = vpop.eup %12304  ;;  %11873 = vmatprep.mubr.msk.f32.mxu0 %vm12349_vm2, %v12348_v46 }
0x3a63   :  { %v9245_v18 = vmul.f32 %v12305_v12, %v9205_v63  ;;  %v9266_v43 = vadd.f32 %v9925_v31, %v9255_v19 }
0x3a65   :  { %11874 = vmatmul.mubr.msk.f32.gmra.mxu0 %vm82_vm0, %v9266_v43  ;;  %v9256_v23 = vmul.f32 %v9924_v16, %v9245_v18 }
0x3a66   :  { %v12307_v45 = vpop.eup %12306  ;;  %11876 = vmatprep.mubr.msk.f32.mxu0 %vm12349_vm2, %v12348_v46 }
0x3a67   :  { %v9246_v30 = vmul.f32 %v12307_v45, %v9206_v53  ;;  %v9267_v60 = vadd.f32 %v9925_v31, %v9256_v23 }
0x3a69   :  { %11877 = vmatmul.mubr.msk.f32.gmra.mxu0 %vm82_vm0, %v9267_v60  ;;  %v9257_v61 = vmul.f32 %v9924_v16, %v9246_v30 }
0x3a6a   :  { %11879 = vmatprep.mubr.msk.f32.mxu0 %vm12349_vm2, %v12348_v46 }
0x3a6b   :  { %v9268_v51 = vadd.f32 %v9925_v31, %v9257_v61 }
0x3a6d   :  { %11880 = vmatmul.mubr.msk.f32.gmra.mxu0 %vm82_vm0, %v9268_v51 }
0x3b1d   :  { %v9363_v3 = vpop.f32.mrf.mxu0 }
0x3b1e   :  { %v9364_v38 = vadd.f32 %v9926_v1, %v9363_v3 }
0x3b1f   :  { %v11869_v14 = vpop.f32.mrf.mxu0 }
0x3b20   :  { %9387 = vst [vmem:[#allocation2] sm:$0xff] %v9364_v38 }
0x3b21   :  { %v9368_v25 = vpop.f32.mrf.mxu0 }
0x3b22   :  { %v9369_v48 = vadd.f32 %v9926_v1, %v9368_v25 }
0x3b23   :  { %v11872_v59 = vpop.f32.mrf.mxu0 }
0x3b24   :  { %9388 = vst [vmem:[#allocation2 + $0x8] sm:$0xff] %v9369_v48 }
0x3b25   :  { %v9373_v44 = vpop.f32.mrf.mxu0 }
0x3b26   :  { %v9374_v4 = vadd.f32 %v9926_v1, %v9373_v44 }
0x3b27   :  { %v11875_v8 = vpop.f32.mrf.mxu0 }
0x3b28   :  { %9389 = vst [vmem:[#allocation2 + $0x10] sm:$0xff] %v9374_v4 }
0x3b29   :  { %v9378_v46 = vpop.f32.mrf.mxu0 }
0x3b2a   :  { %v9379_v58 = vadd.f32 %v9926_v1, %v9378_v46 }
0x3b2b   :  { %v11878_v54 = vpop.f32.mrf.mxu0 }
0x3b2c   :  { %9390 = vst [vmem:[#allocation2 + $0x18] sm:$0xff] %v9379_v58 }
0x3b2d   :  { %v9383_v28 = vpop.f32.mrf.mxu0 }
0x3b2e   :  { %v9384_v11 = vadd.f32 %v9926_v1, %v9383_v28 }
0x3b2f   :  { %v11881_v63 = vpop.f32.mrf.mxu0 }
0x3b30   :  { %9391 = vst [vmem:[#allocation2 + $0x20] sm:$0xff] %v9384_v11 }
0x3b31   :  { %12337 = shalt.err (!%p12334_p4)
}
0x3b32   :  { %s12362_s23 = smov 128   ;;  %s12363_s24 = smov 8  }
0x3b33   :  { %s15902_s8 = sld [smem:[#allocation11_spill]] }
0x3b39   :  { %9403 = dma.vmem_to_hbm [thread:$0]  %s9398_s25, 640, %s15902_s8, [#allocation3], %s12362_s23, %s12362_s23, %s12363_s24  }
0x3b3a   :  { %12346 = dma.done.wait [#allocation3], 640  }
0x3b3b   :  { %12347 = vsyncadd [#allocation3], 4294966656 }
0x3b3c   :  { %9407 = vsyncpa [#allocation3], 1 }

</bundles_post_ra>
